<compile_context>
chip_gen: v7x
topology: tpu7x:2x2x1
jax: 0.10.0
libtpu: 0.0.40
codegen_flags: <defaults>
</compile_context>

<pallas_src>
import jax
import jax.numpy as jnp
from jax.experimental import pallas as pl
from jax.experimental.pallas import tpu as pltpu

EPS = 1e-5
CPAD = 128  # channels padded to one full lane width


def basic_block_kernel(xpad_ref, w1_ref, w2_ref,
                       g1_ref, b1_ref, g2_ref, b2_ref,
                       out_ref, mid_ref):
    # xpad_ref : (N, H+2, W+2, CPAD)  spatially + channel zero-padded input
    # w1_ref   : (9*CPAD, CPAD)       conv1 im2col weights (tap-major, then cin)
    # w2_ref   : (9*CPAD, CPAD)       conv2 im2col weights
    # g*/b*    : (1, CPAD)            BN affine params (zero in padded channels)
    # out_ref  : (N*H*W, CPAD)        lane-dense output slab
    # mid_ref  : (N, H+2, W+2, CPAD)  VMEM scratch: padded conv1 output
    N, HP, WP, C = xpad_ref.shape
    H, W = HP - 2, WP - 2
    M = N * H * W

    def conv3x3(src_ref, w_ref):
        # 9 shifted tap slabs, concatenated along lanes (each piece is exactly
        # 128 lanes -> aligned concat), then ONE MXU matmul over the batch.
        taps = [src_ref[:, dy:dy + H, dx:dx + W, :].reshape(M, C)
                for dy in range(3) for dx in range(3)]
        patches = jnp.concatenate(taps, axis=-1)              # (M, 9*C)
        return jnp.dot(patches, w_ref[...],
                       preferred_element_type=jnp.float32)    # (M, C)

    def batchnorm(o, g_ref, b_ref):
        # training-mode batch stats (biased variance); data is already in
        # vregs/VMEM values, so no extra HBM traffic.
        mean = jnp.mean(o, axis=0, keepdims=True)
        var = jnp.mean(jnp.square(o - mean), axis=0, keepdims=True)
        return (o - mean) * jax.lax.rsqrt(var + EPS) * g_ref[...] + b_ref[...]

    # ---- conv1 -> bn1 -> relu -------------------------------------------
    o1 = conv3x3(xpad_ref, w1_ref)
    o1 = jnp.maximum(batchnorm(o1, g1_ref, b1_ref), 0.0)

    # ---- re-pad the intermediate (lane-dense scratch) for conv2 ----------
    mid_ref[...] = jnp.zeros(mid_ref.shape, mid_ref.dtype)
    o1_4d = o1.reshape(N, H, W, C)
    for n in range(N):
        mid_ref[n, 1:H + 1, 1:W + 1, :] = o1_4d[n]

    # ---- conv2 -> bn2 -> residual add -> relu ----------------------------
    o2 = batchnorm(conv3x3(mid_ref, w2_ref), g2_ref, b2_ref)
    identity = xpad_ref[:, 1:H + 1, 1:W + 1, :].reshape(M, C)  # == x (padded)
    out_ref[...] = jnp.maximum(o2 + identity, 0.0)


@jax.jit
def basic_block(x_nhwc, w1_hwio, w2_hwio, g1, b1, g2, b2):
    """x_nhwc: (N,H,W,Cin) f32; w*_hwio: (3,3,Cin,C); g*/b*: (C,)."""
    N, H, W, Cin = x_nhwc.shape
    C = w1_hwio.shape[-1]
    M = N * H * W

    # Spatial zero-pad (conv SAME) + channel zero-pad to the lane width.
    xp = jnp.pad(x_nhwc, ((0, 0), (1, 1), (1, 1), (0, CPAD - Cin)))

    def pad_w(w, ci, co):
        wp = jnp.zeros((3, 3, CPAD, CPAD), jnp.float32)
        wp = wp.at[:, :, :ci, :co].set(w)
        return wp.reshape(9 * CPAD, CPAD)       # im2col layout: (tap, cin) x cout

    w1p = pad_w(w1_hwio, Cin, C)
    w2p = pad_w(w2_hwio, C, C)

    def pad_vec(v):
        return jnp.zeros((1, CPAD), jnp.float32).at[0, :C].set(v)

    g1p, b1p, g2p, b2p = pad_vec(g1), pad_vec(b1), pad_vec(g2), pad_vec(b2)

    out = pl.pallas_call(
        basic_block_kernel,
        out_shape=jax.ShapeDtypeStruct((M, CPAD), jnp.float32),
        grid=(1,),
        in_specs=[
            pl.BlockSpec((N, H + 2, W + 2, CPAD), lambda i: (0, 0, 0, 0)),
            pl.BlockSpec((9 * CPAD, CPAD), lambda i: (0, 0)),
            pl.BlockSpec((9 * CPAD, CPAD), lambda i: (0, 0)),
            pl.BlockSpec((1, CPAD), lambda i: (0, 0)),
            pl.BlockSpec((1, CPAD), lambda i: (0, 0)),
            pl.BlockSpec((1, CPAD), lambda i: (0, 0)),
            pl.BlockSpec((1, CPAD), lambda i: (0, 0)),
        ],
        out_specs=pl.BlockSpec((M, CPAD), lambda i: (0, 0)),
        scratch_shapes=[pltpu.VMEM((N, H + 2, W + 2, CPAD), jnp.float32)],
        compiler_params=pltpu.CompilerParams(
            dimension_semantics=("arbitrary",),
            vmem_limit_bytes=48 * 1024 * 1024,
        ),
    )(xp, w1p, w2p, g1p, b1p, g2p, b2p)

    # Contiguous reshape back to NHWC and drop padded channels.
    return out.reshape(N, H, W, CPAD)[..., :C]


def reference(x_nhwc, w1_hwio, w2_hwio, g1, b1, g2, b2):
    def conv(x, w):
        return jax.lax.conv_general_dilated(
            x, w, window_strides=(1, 1), padding="SAME",
            dimension_numbers=("NHWC", "HWIO", "NHWC"))

    def bn(x, gamma, beta):
        m = jnp.mean(x, axis=(0, 1, 2), keepdims=True)
        v = jnp.mean((x - m) ** 2, axis=(0, 1, 2), keepdims=True)
        return (x - m) * jax.lax.rsqrt(v + EPS) * gamma + beta

    o = jax.nn.relu(bn(conv(x_nhwc, w1_hwio), g1, b1))
    o = bn(conv(o, w2_hwio), g2, b2)
    return jax.nn.relu(o + x_nhwc)


if __name__ == "__main__":
    # Small shapes: batch=2, in_channel=out_channel=8, spatial 16x16.
    N, C, H, W = 2, 8, 16, 16
    key = jax.random.PRNGKey(0)
    kx, kw1, kw2 = jax.random.split(key, 3)

    # PyTorch-convention NCHW input, converted to NHWC for the kernel.
    x_nchw = jax.random.normal(kx, (N, C, H, W), jnp.float32)
    x_nhwc = jnp.transpose(x_nchw, (0, 2, 3, 1))

    # Deterministic synthetic conv weights (HWIO); BN gamma=1 / beta=0.
    w1_hwio = jax.random.normal(kw1, (3, 3, C, C), jnp.float32) * 0.1
    w2_hwio = jax.random.normal(kw2, (3, 3, C, C), jnp.float32) * 0.1
    gamma1 = jnp.ones((C,), jnp.float32)
    beta1 = jnp.zeros((C,), jnp.float32)
    gamma2 = jnp.ones((C,), jnp.float32)
    beta2 = jnp.zeros((C,), jnp.float32)

    out = basic_block(x_nhwc, w1_hwio, w2_hwio, gamma1, beta1, gamma2, beta2)
    out = jax.block_until_ready(out)

    ref = reference(x_nhwc, w1_hwio, w2_hwio, gamma1, beta1, gamma2, beta2)
    assert out.shape == (N, H, W, C)
    assert jnp.allclose(out, ref, atol=1e-3, rtol=1e-3), (
        float(jnp.max(jnp.abs(out - ref))))

    print("KERNEL_OK")
</pallas_src>

<mosaic_0001>
module attributes {stable_mosaic.version = 11 : i64} {
  func.func @basic_block_kernel(%arg0: i32, %arg1: memref<2x18x18x128xf32, #tpu.memory_space<vmem>>, %arg2: memref<1152x128xf32, #tpu.memory_space<vmem>>, %arg3: memref<1152x128xf32, #tpu.memory_space<vmem>>, %arg4: memref<1x128xf32, #tpu.memory_space<vmem>>, %arg5: memref<1x128xf32, #tpu.memory_space<vmem>>, %arg6: memref<1x128xf32, #tpu.memory_space<vmem>>, %arg7: memref<1x128xf32, #tpu.memory_space<vmem>>, %arg8: memref<512x128xf32, #tpu.memory_space<vmem>>, %arg9: memref<2x18x18x128xf32, #tpu.memory_space<vmem>>) attributes {dimension_semantics = [#tpu.dimension_semantics<arbitrary>], iteration_bounds = array<i64: 1>, scalar_prefetch = 0 : i64, scratch_operands = 1 : i64, tpu.core_type = #tpu.core_type<tc>, window_params = [{pipeline_mode = #tpu.pipeline_mode<synchronous>, transform_indices = @transform_0, window_bounds = array<i64: 2, 18, 18, 128>}, {pipeline_mode = #tpu.pipeline_mode<synchronous>, transform_indices = @transform_1, window_bounds = array<i64: 1152, 128>}, {pipeline_mode = #tpu.pipeline_mode<synchronous>, transform_indices = @transform_2, window_bounds = array<i64: 1152, 128>}, {pipeline_mode = #tpu.pipeline_mode<synchronous>, transform_indices = @transform_3, window_bounds = array<i64: 1, 128>}, {pipeline_mode = #tpu.pipeline_mode<synchronous>, transform_indices = @transform_4, window_bounds = array<i64: 1, 128>}, {pipeline_mode = #tpu.pipeline_mode<synchronous>, transform_indices = @transform_5, window_bounds = array<i64: 1, 128>}, {pipeline_mode = #tpu.pipeline_mode<synchronous>, transform_indices = @transform_6, window_bounds = array<i64: 1, 128>}, {pipeline_mode = #tpu.pipeline_mode<synchronous>, transform_indices = @transform_7, window_bounds = array<i64: 512, 128>}]} {
    %c0 = arith.constant 0 : index
    %c0_0 = arith.constant 0 : index
    %c0_1 = arith.constant 0 : index
    %c0_2 = arith.constant 0 : index
    %0 = vector.load %arg1[%c0, %c0_0, %c0_1, %c0_2] : memref<2x18x18x128xf32, #tpu.memory_space<vmem>>, vector<2x16x16x128xf32>
    %1 = vector.shape_cast %0 : vector<2x16x16x128xf32> to vector<512x128xf32>
    %c0_3 = arith.constant 0 : index
    %c0_4 = arith.constant 0 : index
    %c1 = arith.constant 1 : index
    %c0_5 = arith.constant 0 : index
    %2 = vector.load %arg1[%c0_3, %c0_4, %c1, %c0_5] : memref<2x18x18x128xf32, #tpu.memory_space<vmem>>, vector<2x16x16x128xf32>
    %3 = vector.shape_cast %2 : vector<2x16x16x128xf32> to vector<512x128xf32>
    %c0_6 = arith.constant 0 : index
    %c0_7 = arith.constant 0 : index
    %c2 = arith.constant 2 : index
    %c0_8 = arith.constant 0 : index
    %4 = vector.load %arg1[%c0_6, %c0_7, %c2, %c0_8] : memref<2x18x18x128xf32, #tpu.memory_space<vmem>>, vector<2x16x16x128xf32>
    %5 = vector.shape_cast %4 : vector<2x16x16x128xf32> to vector<512x128xf32>
    %c0_9 = arith.constant 0 : index
    %c1_10 = arith.constant 1 : index
    %c0_11 = arith.constant 0 : index
    %c0_12 = arith.constant 0 : index
    %6 = vector.load %arg1[%c0_9, %c1_10, %c0_11, %c0_12] : memref<2x18x18x128xf32, #tpu.memory_space<vmem>>, vector<2x16x16x128xf32>
    %7 = vector.shape_cast %6 : vector<2x16x16x128xf32> to vector<512x128xf32>
    %c0_13 = arith.constant 0 : index
    %c1_14 = arith.constant 1 : index
    %c1_15 = arith.constant 1 : index
    %c0_16 = arith.constant 0 : index
    %8 = vector.load %arg1[%c0_13, %c1_14, %c1_15, %c0_16] : memref<2x18x18x128xf32, #tpu.memory_space<vmem>>, vector<2x16x16x128xf32>
    %9 = vector.shape_cast %8 : vector<2x16x16x128xf32> to vector<512x128xf32>
    %c0_17 = arith.constant 0 : index
    %c1_18 = arith.constant 1 : index
    %c2_19 = arith.constant 2 : index
    %c0_20 = arith.constant 0 : index
    %10 = vector.load %arg1[%c0_17, %c1_18, %c2_19, %c0_20] : memref<2x18x18x128xf32, #tpu.memory_space<vmem>>, vector<2x16x16x128xf32>
    %11 = vector.shape_cast %10 : vector<2x16x16x128xf32> to vector<512x128xf32>
    %c0_21 = arith.constant 0 : index
    %c2_22 = arith.constant 2 : index
    %c0_23 = arith.constant 0 : index
    %c0_24 = arith.constant 0 : index
    %12 = vector.load %arg1[%c0_21, %c2_22, %c0_23, %c0_24] : memref<2x18x18x128xf32, #tpu.memory_space<vmem>>, vector<2x16x16x128xf32>
    %13 = vector.shape_cast %12 : vector<2x16x16x128xf32> to vector<512x128xf32>
    %c0_25 = arith.constant 0 : index
    %c2_26 = arith.constant 2 : index
    %c1_27 = arith.constant 1 : index
    %c0_28 = arith.constant 0 : index
    %14 = vector.load %arg1[%c0_25, %c2_26, %c1_27, %c0_28] : memref<2x18x18x128xf32, #tpu.memory_space<vmem>>, vector<2x16x16x128xf32>
    %15 = vector.shape_cast %14 : vector<2x16x16x128xf32> to vector<512x128xf32>
    %c0_29 = arith.constant 0 : index
    %c2_30 = arith.constant 2 : index
    %c2_31 = arith.constant 2 : index
    %c0_32 = arith.constant 0 : index
    %16 = vector.load %arg1[%c0_29, %c2_30, %c2_31, %c0_32] : memref<2x18x18x128xf32, #tpu.memory_space<vmem>>, vector<2x16x16x128xf32>
    %17 = vector.shape_cast %16 : vector<2x16x16x128xf32> to vector<512x128xf32>
    %18 = tpu.concatenate %1, %3, %5, %7, %9, %11, %13, %15, %17 in 1 : vector<512x128xf32>, vector<512x128xf32>, vector<512x128xf32>, vector<512x128xf32>, vector<512x128xf32>, vector<512x128xf32>, vector<512x128xf32>, vector<512x128xf32>, vector<512x128xf32> -> vector<512x1152xf32>
    %c0_33 = arith.constant 0 : index
    %c0_34 = arith.constant 0 : index
    %19 = vector.load %arg2[%c0_33, %c0_34] : memref<1152x128xf32, #tpu.memory_space<vmem>>, vector<1152x128xf32>
    %cst = arith.constant dense<0.000000e+00> : vector<512x128xf32>
    %20 = tpu.matmul %18, %19, %cst {dimension_numbers = #tpu.dot_dimension_numbers<[1], [0], [0], [1], [0, 0, 1, 1], [], []>} : vector<512x1152xf32>, vector<1152x128xf32>, vector<512x128xf32> -> vector<512x128xf32>
    %cst_35 = arith.constant dense<0.000000e+00> : vector<128xf32>
    %21 = vector.multi_reduction <add>, %20, %cst_35 [0] : vector<512x128xf32> to vector<128xf32>
    %22 = vector.shape_cast %21 : vector<128xf32> to vector<1x128xf32>
    %cst_36 = arith.constant 5.120000e+02 : f32
    %23 = vector.broadcast %cst_36 : f32 to vector<1x128xf32>
    %24 = arith.divf %22, %23 : vector<1x128xf32>
    %25 = vector.broadcast %24 : vector<1x128xf32> to vector<512x128xf32>
    %26 = arith.subf %20, %25 : vector<512x128xf32>
    %27 = arith.mulf %26, %26 : vector<512x128xf32>
    %cst_37 = arith.constant dense<0.000000e+00> : vector<128xf32>
    %28 = vector.multi_reduction <add>, %27, %cst_37 [0] : vector<512x128xf32> to vector<128xf32>
    %29 = vector.shape_cast %28 : vector<128xf32> to vector<1x128xf32>
    %cst_38 = arith.constant 5.120000e+02 : f32
    %30 = vector.broadcast %cst_38 : f32 to vector<1x128xf32>
    %31 = arith.divf %29, %30 : vector<1x128xf32>
    %32 = vector.broadcast %24 : vector<1x128xf32> to vector<512x128xf32>
    %33 = arith.subf %20, %32 : vector<512x128xf32>
    %cst_39 = arith.constant 9.99999974E-6 : f32
    %34 = vector.broadcast %cst_39 : f32 to vector<1x128xf32>
    %35 = arith.addf %31, %34 : vector<1x128xf32>
    %36 = math.rsqrt %35 : vector<1x128xf32>
    %37 = vector.broadcast %36 : vector<1x128xf32> to vector<512x128xf32>
    %38 = arith.mulf %33, %37 : vector<512x128xf32>
    %c0_40 = arith.constant 0 : index
    %c0_41 = arith.constant 0 : index
    %39 = vector.load %arg4[%c0_40, %c0_41] : memref<1x128xf32, #tpu.memory_space<vmem>>, vector<1x128xf32>
    %40 = vector.broadcast %39 : vector<1x128xf32> to vector<512x128xf32>
    %41 = arith.mulf %38, %40 : vector<512x128xf32>
    %c0_42 = arith.constant 0 : index
    %c0_43 = arith.constant 0 : index
    %42 = vector.load %arg5[%c0_42, %c0_43] : memref<1x128xf32, #tpu.memory_space<vmem>>, vector<1x128xf32>
    %43 = vector.broadcast %42 : vector<1x128xf32> to vector<512x128xf32>
    %44 = arith.addf %41, %43 : vector<512x128xf32>
    %cst_44 = arith.constant 0.000000e+00 : f32
    %45 = vector.broadcast %cst_44 : f32 to vector<512x128xf32>
    %46 = arith.maximumf %44, %45 : vector<512x128xf32>
    %cst_45 = arith.constant 0.000000e+00 : f32
    %47 = vector.broadcast %cst_45 : f32 to vector<2x18x18x128xf32>
    %c0_46 = arith.constant 0 : index
    %c0_47 = arith.constant 0 : index
    %c0_48 = arith.constant 0 : index
    %c0_49 = arith.constant 0 : index
    %48 = vector.load %arg9[%c0_46, %c0_47, %c0_48, %c0_49] : memref<2x18x18x128xf32, #tpu.memory_space<vmem>>, vector<2x18x18x128xf32>
    tpu.vector_store %arg9[%c0_46, %c0_47, %c0_48, %c0_49], %47 {strides = array<i32>} : memref<2x18x18x128xf32, #tpu.memory_space<vmem>>, vector<2x18x18x128xf32>,
    %49 = vector.shape_cast %46 : vector<512x128xf32> to vector<2x16x16x128xf32>
    %50 = vector.extract_strided_slice %49 {offsets = [0, 0, 0, 0], sizes = [1, 16, 16, 128], strides = [1, 1, 1, 1]} : vector<2x16x16x128xf32> to vector<1x16x16x128xf32>
    %51 = vector.shape_cast %50 : vector<1x16x16x128xf32> to vector<16x16x128xf32>
    %c0_50 = arith.constant 0 : index
    %c1_51 = arith.constant 1 : index
    %c1_52 = arith.constant 1 : index
    %c0_53 = arith.constant 0 : index
    %52 = vector.load %arg9[%c0_50, %c1_51, %c1_52, %c0_53] : memref<2x18x18x128xf32, #tpu.memory_space<vmem>>, vector<1x16x16x128xf32>
    %53 = vector.shape_cast %52 : vector<1x16x16x128xf32> to vector<16x16x128xf32>
    %54 = vector.shape_cast %51 : vector<16x16x128xf32> to vector<1x16x16x128xf32>
    tpu.vector_store %arg9[%c0_50, %c1_51, %c1_52, %c0_53], %54 {strides = array<i32>} : memref<2x18x18x128xf32, #tpu.memory_space<vmem>>, vector<1x16x16x128xf32>,
    %55 = vector.extract_strided_slice %49 {offsets = [1, 0, 0, 0], sizes = [1, 16, 16, 128], strides = [1, 1, 1, 1]} : vector<2x16x16x128xf32> to vector<1x16x16x128xf32>
    %56 = vector.shape_cast %55 : vector<1x16x16x128xf32> to vector<16x16x128xf32>
    %c1_54 = arith.constant 1 : index
    %c1_55 = arith.constant 1 : index
    %c1_56 = arith.constant 1 : index
    %c0_57 = arith.constant 0 : index
    %57 = vector.load %arg9[%c1_54, %c1_55, %c1_56, %c0_57] : memref<2x18x18x128xf32, #tpu.memory_space<vmem>>, vector<1x16x16x128xf32>
    %58 = vector.shape_cast %57 : vector<1x16x16x128xf32> to vector<16x16x128xf32>
    %59 = vector.shape_cast %56 : vector<16x16x128xf32> to vector<1x16x16x128xf32>
    tpu.vector_store %arg9[%c1_54, %c1_55, %c1_56, %c0_57], %59 {strides = array<i32>} : memref<2x18x18x128xf32, #tpu.memory_space<vmem>>, vector<1x16x16x128xf32>,
    %c0_58 = arith.constant 0 : index
    %c0_59 = arith.constant 0 : index
    %c0_60 = arith.constant 0 : index
    %c0_61 = arith.constant 0 : index
    %60 = vector.load %arg9[%c0_58, %c0_59, %c0_60, %c0_61] : memref<2x18x18x128xf32, #tpu.memory_space<vmem>>, vector<2x16x16x128xf32>
    %61 = vector.shape_cast %60 : vector<2x16x16x128xf32> to vector<512x128xf32>
    %c0_62 = arith.constant 0 : index
    %c0_63 = arith.constant 0 : index
    %c1_64 = arith.constant 1 : index
    %c0_65 = arith.constant 0 : index
    %62 = vector.load %arg9[%c0_62, %c0_63, %c1_64, %c0_65] : memref<2x18x18x128xf32, #tpu.memory_space<vmem>>, vector<2x16x16x128xf32>
    %63 = vector.shape_cast %62 : vector<2x16x16x128xf32> to vector<512x128xf32>
    %c0_66 = arith.constant 0 : index
    %c0_67 = arith.constant 0 : index
    %c2_68 = arith.constant 2 : index
    %c0_69 = arith.constant 0 : index
    %64 = vector.load %arg9[%c0_66, %c0_67, %c2_68, %c0_69] : memref<2x18x18x128xf32, #tpu.memory_space<vmem>>, vector<2x16x16x128xf32>
    %65 = vector.shape_cast %64 : vector<2x16x16x128xf32> to vector<512x128xf32>
    %c0_70 = arith.constant 0 : index
    %c1_71 = arith.constant 1 : index
    %c0_72 = arith.constant 0 : index
    %c0_73 = arith.constant 0 : index
    %66 = vector.load %arg9[%c0_70, %c1_71, %c0_72, %c0_73] : memref<2x18x18x128xf32, #tpu.memory_space<vmem>>, vector<2x16x16x128xf32>
    %67 = vector.shape_cast %66 : vector<2x16x16x128xf32> to vector<512x128xf32>
    %c0_74 = arith.constant 0 : index
    %c1_75 = arith.constant 1 : index
    %c1_76 = arith.constant 1 : index
    %c0_77 = arith.constant 0 : index
    %68 = vector.load %arg9[%c0_74, %c1_75, %c1_76, %c0_77] : memref<2x18x18x128xf32, #tpu.memory_space<vmem>>, vector<2x16x16x128xf32>
    %69 = vector.shape_cast %68 : vector<2x16x16x128xf32> to vector<512x128xf32>
    %c0_78 = arith.constant 0 : index
    %c1_79 = arith.constant 1 : index
    %c2_80 = arith.constant 2 : index
    %c0_81 = arith.constant 0 : index
    %70 = vector.load %arg9[%c0_78, %c1_79, %c2_80, %c0_81] : memref<2x18x18x128xf32, #tpu.memory_space<vmem>>, vector<2x16x16x128xf32>
    %71 = vector.shape_cast %70 : vector<2x16x16x128xf32> to vector<512x128xf32>
    %c0_82 = arith.constant 0 : index
    %c2_83 = arith.constant 2 : index
    %c0_84 = arith.constant 0 : index
    %c0_85 = arith.constant 0 : index
    %72 = vector.load %arg9[%c0_82, %c2_83, %c0_84, %c0_85] : memref<2x18x18x128xf32, #tpu.memory_space<vmem>>, vector<2x16x16x128xf32>
    %73 = vector.shape_cast %72 : vector<2x16x16x128xf32> to vector<512x128xf32>
    %c0_86 = arith.constant 0 : index
    %c2_87 = arith.constant 2 : index
    %c1_88 = arith.constant 1 : index
    %c0_89 = arith.constant 0 : index
    %74 = vector.load %arg9[%c0_86, %c2_87, %c1_88, %c0_89] : memref<2x18x18x128xf32, #tpu.memory_space<vmem>>, vector<2x16x16x128xf32>
    %75 = vector.shape_cast %74 : vector<2x16x16x128xf32> to vector<512x128xf32>
    %c0_90 = arith.constant 0 : index
    %c2_91 = arith.constant 2 : index
    %c2_92 = arith.constant 2 : index
    %c0_93 = arith.constant 0 : index
    %76 = vector.load %arg9[%c0_90, %c2_91, %c2_92, %c0_93] : memref<2x18x18x128xf32, #tpu.memory_space<vmem>>, vector<2x16x16x128xf32>
    %77 = vector.shape_cast %76 : vector<2x16x16x128xf32> to vector<512x128xf32>
    %78 = tpu.concatenate %61, %63, %65, %67, %69, %71, %73, %75, %77 in 1 : vector<512x128xf32>, vector<512x128xf32>, vector<512x128xf32>, vector<512x128xf32>, vector<512x128xf32>, vector<512x128xf32>, vector<512x128xf32>, vector<512x128xf32>, vector<512x128xf32> -> vector<512x1152xf32>
    %c0_94 = arith.constant 0 : index
    %c0_95 = arith.constant 0 : index
    %79 = vector.load %arg3[%c0_94, %c0_95] : memref<1152x128xf32, #tpu.memory_space<vmem>>, vector<1152x128xf32>
    %cst_96 = arith.constant dense<0.000000e+00> : vector<512x128xf32>
    %80 = tpu.matmul %78, %79, %cst_96 {dimension_numbers = #tpu.dot_dimension_numbers<[1], [0], [0], [1], [0, 0, 1, 1], [], []>} : vector<512x1152xf32>, vector<1152x128xf32>, vector<512x128xf32> -> vector<512x128xf32>
    %cst_97 = arith.constant dense<0.000000e+00> : vector<128xf32>
    %81 = vector.multi_reduction <add>, %80, %cst_97 [0] : vector<512x128xf32> to vector<128xf32>
    %82 = vector.shape_cast %81 : vector<128xf32> to vector<1x128xf32>
    %cst_98 = arith.constant 5.120000e+02 : f32
    %83 = vector.broadcast %cst_98 : f32 to vector<1x128xf32>
    %84 = arith.divf %82, %83 : vector<1x128xf32>
    %85 = vector.broadcast %84 : vector<1x128xf32> to vector<512x128xf32>
    %86 = arith.subf %80, %85 : vector<512x128xf32>
    %87 = arith.mulf %86, %86 : vector<512x128xf32>
    %cst_99 = arith.constant dense<0.000000e+00> : vector<128xf32>
    %88 = vector.multi_reduction <add>, %87, %cst_99 [0] : vector<512x128xf32> to vector<128xf32>
    %89 = vector.shape_cast %88 : vector<128xf32> to vector<1x128xf32>
    %cst_100 = arith.constant 5.120000e+02 : f32
    %90 = vector.broadcast %cst_100 : f32 to vector<1x128xf32>
    %91 = arith.divf %89, %90 : vector<1x128xf32>
    %92 = vector.broadcast %84 : vector<1x128xf32> to vector<512x128xf32>
    %93 = arith.subf %80, %92 : vector<512x128xf32>
    %cst_101 = arith.constant 9.99999974E-6 : f32
    %94 = vector.broadcast %cst_101 : f32 to vector<1x128xf32>
    %95 = arith.addf %91, %94 : vector<1x128xf32>
    %96 = math.rsqrt %95 : vector<1x128xf32>
    %97 = vector.broadcast %96 : vector<1x128xf32> to vector<512x128xf32>
    %98 = arith.mulf %93, %97 : vector<512x128xf32>
    %c0_102 = arith.constant 0 : index
    %c0_103 = arith.constant 0 : index
    %99 = vector.load %arg6[%c0_102, %c0_103] : memref<1x128xf32, #tpu.memory_space<vmem>>, vector<1x128xf32>
    %100 = vector.broadcast %99 : vector<1x128xf32> to vector<512x128xf32>
    %101 = arith.mulf %98, %100 : vector<512x128xf32>
    %c0_104 = arith.constant 0 : index
    %c0_105 = arith.constant 0 : index
    %102 = vector.load %arg7[%c0_104, %c0_105] : memref<1x128xf32, #tpu.memory_space<vmem>>, vector<1x128xf32>
    %103 = vector.broadcast %102 : vector<1x128xf32> to vector<512x128xf32>
    %104 = arith.addf %101, %103 : vector<512x128xf32>
    %c0_106 = arith.constant 0 : index
    %c1_107 = arith.constant 1 : index
    %c1_108 = arith.constant 1 : index
    %c0_109 = arith.constant 0 : index
    %105 = vector.load %arg1[%c0_106, %c1_107, %c1_108, %c0_109] : memref<2x18x18x128xf32, #tpu.memory_space<vmem>>, vector<2x16x16x128xf32>
    %106 = vector.shape_cast %105 : vector<2x16x16x128xf32> to vector<512x128xf32>
    %107 = arith.addf %104, %106 : vector<512x128xf32>
    %cst_110 = arith.constant 0.000000e+00 : f32
    %108 = vector.broadcast %cst_110 : f32 to vector<512x128xf32>
    %109 = arith.maximumf %107, %108 : vector<512x128xf32>
    %c0_111 = arith.constant 0 : index
    %c0_112 = arith.constant 0 : index
    %110 = vector.load %arg8[%c0_111, %c0_112] : memref<512x128xf32, #tpu.memory_space<vmem>>, vector<512x128xf32>
    tpu.vector_store %arg8[%c0_111, %c0_112], %109 {strides = array<i32>} : memref<512x128xf32, #tpu.memory_space<vmem>>, vector<512x128xf32>,
    return
  }
  func.func @transform_0(%arg0: i32) -> (i32, i32, i32, i32) {
    %c0_i32 = arith.constant 0 : i32
    %c0_i32_0 = arith.constant 0 : i32
    %c0_i32_1 = arith.constant 0 : i32
    %c0_i32_2 = arith.constant 0 : i32
    %c0_i32_3 = arith.constant 0 : i32
    return %c0_i32, %c0_i32_0, %c0_i32_1, %c0_i32_2 : i32, i32, i32, i32
  }
  func.func @transform_1(%arg0: i32) -> (i32, i32) {
    %c0_i32 = arith.constant 0 : i32
    %c0_i32_0 = arith.constant 0 : i32
    %c0_i32_1 = arith.constant 0 : i32
    return %c0_i32, %c0_i32_0 : i32, i32
  }
  func.func @transform_2(%arg0: i32) -> (i32, i32) {
    %c0_i32 = arith.constant 0 : i32
    %c0_i32_0 = arith.constant 0 : i32
    %c0_i32_1 = arith.constant 0 : i32
    return %c0_i32, %c0_i32_0 : i32, i32
  }
  func.func @transform_3(%arg0: i32) -> (i32, i32) {
    %c0_i32 = arith.constant 0 : i32
    %c0_i32_0 = arith.constant 0 : i32
    %c0_i32_1 = arith.constant 0 : i32
    return %c0_i32, %c0_i32_0 : i32, i32
  }
  func.func @transform_4(%arg0: i32) -> (i32, i32) {
    %c0_i32 = arith.constant 0 : i32
    %c0_i32_0 = arith.constant 0 : i32
    %c0_i32_1 = arith.constant 0 : i32
    return %c0_i32, %c0_i32_0 : i32, i32
  }
  func.func @transform_5(%arg0: i32) -> (i32, i32) {
    %c0_i32 = arith.constant 0 : i32
    %c0_i32_0 = arith.constant 0 : i32
    %c0_i32_1 = arith.constant 0 : i32
    return %c0_i32, %c0_i32_0 : i32, i32
  }
  func.func @transform_6(%arg0: i32) -> (i32, i32) {
    %c0_i32 = arith.constant 0 : i32
    %c0_i32_0 = arith.constant 0 : i32
    %c0_i32_1 = arith.constant 0 : i32
    return %c0_i32, %c0_i32_0 : i32, i32
  }
  func.func @transform_7(%arg0: i32) -> (i32, i32) {
    %c0_i32 = arith.constant 0 : i32
    %c0_i32_0 = arith.constant 0 : i32
    %c0_i32_1 = arith.constant 0 : i32
    return %c0_i32, %c0_i32_0 : i32, i32
  }
}

</mosaic_0001>

<bundles_post_ra>
// kernel: basic_block.1
= control target key start
LH: loop header
LB: loop body
LE: loop exit
PB: predicated region body
PF: predicated region fallthrough
CT: control target
= control target key end

     0   :  { %v16599_v0 = vmov 0.0|0.0   ;;  %s16591_s1 = inlined_call_operand.vmem [shape: f32[1152,128], index: 1, kind: input, shape index: {}]   ;;  %s16592_s0 = inlined_call_operand.vmem [shape: f32[2,18,18,128], index: 0, kind: input, shape index: {}]   ;;  %s16593_s2 = inlined_call_operand.vmem [shape: f32[1152,128], index: 2, kind: input, shape index: {}]   ;;  %s16594_s3 = inlined_call_operand.vmem [shape: f32[1,128], index: 3, kind: input, shape index: {}]   ;;  %s16595_s4 = inlined_call_operand.vmem [shape: f32[1,128], index: 4, kind: input, shape index: {}]   ;;  %s16596_s5 = inlined_call_operand.vmem [shape: f32[1,128], index: 5, kind: input, shape index: {}]   ;;  %s16597_s6 = inlined_call_operand.vmem [shape: f32[1,128], index: 6, kind: input, shape index: {}]   ;;  %s16598_s7 = inlined_call_operand.vmem [shape: f32[512,128], index: 7, kind: output, shape index: {}]  }
   0x1   :  { %7638 = vmatprep.subr.bf16.mxu0 %v16599_v0  ;;  %v604_v1 = vld [vmem:[%s16591_s1] sm:$0xff]  ;;  %v605_v2 = vld [vmem:[%s16591_s1 + $0x8] sm:$0xff]  ;;  %v606_v3 = vld [vmem:[%s16591_s1 + $0x10] sm:$0xff] }
   0x2   :  { %v7639_v4 = vpack.c.bf16 %v605_v2, %v604_v1  ;;  %v607_v5 = vld [vmem:[%s16591_s1 + $0x18] sm:$0xff]  ;;  %v608_v7 = vld [vmem:[%s16591_s1 + $0x20] sm:$0xff]  ;;  %v609_v8 = vld [vmem:[%s16591_s1 + $0x28] sm:$0xff] }
   0x3   :  { %v7642_v6 = vpack.c.bf16 %v607_v5, %v606_v3  ;;  %v7645_v9 = vpack.c.bf16 %v609_v8, %v608_v7  ;;  %v610_v10 = vld [vmem:[%s16591_s1 + $0x30] sm:$0xff]  ;;  %v611_v11 = vld [vmem:[%s16591_s1 + $0x38] sm:$0xff]  ;;  %v90_v12 = vld [vmem:[%s16592_s0 + $0x1] sm:$0xff] }
   0x4   :  { %7640 = vmatpush1.bf16.msra.mxu0 %v7639_v4  ;;  %v7648_v13 = vpack.c.bf16 %v611_v11, %v610_v10  ;;  %812 = vmatprep.mubr.f32.mxu0 %v90_v12  ;;  %v612_v14 = vld [vmem:[%s16591_s1 + $0x40] sm:$0xff]  ;;  %v613_v15 = vld [vmem:[%s16591_s1 + $0x48] sm:$0xff]  ;;  %v614_v17 = vld [vmem:[%s16591_s1 + $0x50] sm:$0xff] }
   0x5   :  { %7641 = vmatprep.subr.bf16.mxu0 %v16599_v0  ;;  %v7651_v16 = vpack.c.bf16 %v613_v15, %v612_v14  ;;  %v615_v18 = vld [vmem:[%s16591_s1 + $0x58] sm:$0xff]  ;;  %v616_v20 = vld [vmem:[%s16591_s1 + $0x60] sm:$0xff]  ;;  %v617_v21 = vld [vmem:[%s16591_s1 + $0x68] sm:$0xff] }
   0x6   :  { %v7654_v19 = vpack.c.bf16 %v615_v18, %v614_v17  ;;  %v7657_v22 = vpack.c.bf16 %v617_v21, %v616_v20  ;;  %v618_v23 = vld [vmem:[%s16591_s1 + $0x70] sm:$0xff]  ;;  %v619_v24 = vld [vmem:[%s16591_s1 + $0x78] sm:$0xff]  ;;  %v620_v26 = vld [vmem:[%s16591_s1 + $0x80] sm:$0xff] }
   0x7   :  { %v7660_v25 = vpack.c.bf16 %v619_v24, %v618_v23  ;;  %v621_v27 = vld [vmem:[%s16591_s1 + $0x88] sm:$0xff]  ;;  %v622_v29 = vld [vmem:[%s16591_s1 + $0x90] sm:$0xff]  ;;  %v623_v30 = vld [vmem:[%s16591_s1 + $0x98] sm:$0xff] }
   0x8   :  { %7643 = vmatpush1.bf16.msra.mxu0 %v7642_v6  ;;  %v7663_v28 = vpack.c.bf16 %v621_v27, %v620_v26  ;;  %v7666_v31 = vpack.c.bf16 %v623_v30, %v622_v29  ;;  %v624_v32 = vld [vmem:[%s16591_s1 + $0xa0] sm:$0xff]  ;;  %v625_v33 = vld [vmem:[%s16591_s1 + $0xa8] sm:$0xff]  ;;  %v626_v35 = vld [vmem:[%s16591_s1 + $0xb0] sm:$0xff] }
   0x9   :  { %7644 = vmatprep.subr.bf16.mxu0 %v16599_v0  ;;  %v7669_v34 = vpack.c.bf16 %v625_v33, %v624_v32  ;;  %v627_v36 = vld [vmem:[%s16591_s1 + $0xb8] sm:$0xff]  ;;  %v628_v38 = vld [vmem:[%s16591_s1 + $0xc0] sm:$0xff]  ;;  %v629_v39 = vld [vmem:[%s16591_s1 + $0xc8] sm:$0xff] }
   0xa   :  { %v7672_v37 = vpack.c.bf16 %v627_v36, %v626_v35  ;;  %v7675_v40 = vpack.c.bf16 %v629_v39, %v628_v38  ;;  %v630_v41 = vld [vmem:[%s16591_s1 + $0xd0] sm:$0xff]  ;;  %v631_v42 = vld [vmem:[%s16591_s1 + $0xd8] sm:$0xff]  ;;  %v632_v44 = vld [vmem:[%s16591_s1 + $0xe0] sm:$0xff] }
   0xb   :  { %v7678_v43 = vpack.c.bf16 %v631_v42, %v630_v41  ;;  %v633_v45 = vld [vmem:[%s16591_s1 + $0xe8] sm:$0xff]  ;;  %v634_v47 = vld [vmem:[%s16591_s1 + $0xf0] sm:$0xff]  ;;  %v635_v48 = vld [vmem:[%s16591_s1 + $0xf8] sm:$0xff] }
   0xc   :  { %7646 = vmatpush1.bf16.msra.mxu0 %v7645_v9  ;;  %v7681_v46 = vpack.c.bf16 %v633_v45, %v632_v44  ;;  %v7684_v49 = vpack.c.bf16 %v635_v48, %v634_v47  ;;  %v636_v50 = vld [vmem:[%s16591_s1 + $0x100] sm:$0xff]  ;;  %v637_v51 = vld [vmem:[%s16591_s1 + $0x108] sm:$0xff]  ;;  %v638_v55 = vld [vmem:[%s16591_s1 + $0x110] sm:$0xff] }
   0xd   :  { %7647 = vmatprep.subr.bf16.mxu0 %v16599_v0  ;;  %v26_v52 = vld [vmem:[%s16592_s0] sm:$0xff]  ;;  %v7687_v53 = vpack.c.bf16 %v637_v51, %v636_v50  ;;  %v91_v54 = vld [vmem:[%s16592_s0 + $0x9] sm:$0xff]  ;;  %v639_v56 = vld [vmem:[%s16591_s1 + $0x118] sm:$0xff] }
   0xe   :  { %v27_v57 = vld [vmem:[%s16592_s0 + $0x8] sm:$0xff]  ;;  %v7690_v58 = vpack.c.bf16 %v639_v56, %v638_v55  ;;  %v92_v59 = vld [vmem:[%s16592_s0 + $0x19] sm:$0xff]  ;;  %v642_v2 = vld [vmem:[%s16591_s1 + $0x130] sm:$0xff] }
   0xf   :  { %v640_v60 = vld [vmem:[%s16591_s1 + $0x120] sm:$0xff]  ;;  %v641_v61 = vld [vmem:[%s16591_s1 + $0x128] sm:$0xff]  ;;  %v9071_v62 = vld [vmem:[%s16592_s0 + $0x18] sm:$0xff] }
  0x10   :  { %7649 = vmatpush1.bf16.msra.mxu0 %v7648_v13  ;;  %v7693_v63 = vpack.c.bf16 %v641_v61, %v640_v60  ;;  %v93_v1 = vld [vmem:[%s16592_s0 + $0x21] sm:$0xff]  ;;  %v643_v3 = vld [vmem:[%s16591_s1 + $0x138] sm:$0xff]  ;;  %v9103_v9 = vld [vmem:[%s16592_s0 + $0x30] sm:$0xff] }
  0x11   :  { %7650 = vmatprep.subr.bf16.mxu0 %v16599_v0  ;;  %v9087_v4 = vld [vmem:[%s16592_s0 + $0x20] sm:$0xff]  ;;  %v7696_v5 = vpack.c.bf16 %v643_v3, %v642_v2  ;;  %v94_v6 = vld [vmem:[%s16592_s0 + $0x31] sm:$0xff]  ;;  %v645_v8 = vld [vmem:[%s16591_s1 + $0x148] sm:$0xff] }
  0x12   :  { %v644_v7 = vld [vmem:[%s16591_s1 + $0x140] sm:$0xff]  ;;  %v646_v12 = vld [vmem:[%s16591_s1 + $0x150] sm:$0xff]  ;;  %v647_v13 = vld [vmem:[%s16591_s1 + $0x158] sm:$0xff] }
  0x13   :  { %v7699_v10 = vpack.c.bf16 %v645_v8, %v644_v7  ;;  %v95_v11 = vld [vmem:[%s16592_s0 + $0x39] sm:$0xff]  ;;  %v7702_v15 = vpack.c.bf16 %v647_v13, %v646_v12  ;;  %v649_v18 = vld [vmem:[%s16591_s1 + $0x168] sm:$0xff]  ;;  %v97_v21 = vld [vmem:[%s16592_s0 + $0x51] sm:$0xff] }
  0x14   :  { %7652 = vmatpush1.bf16.msra.mxu0 %v7651_v16  ;;  %v9119_v14 = vld [vmem:[%s16592_s0 + $0x38] sm:$0xff]  ;;  %v96_v16 = vld [vmem:[%s16592_s0 + $0x49] sm:$0xff]  ;;  %v648_v17 = vld [vmem:[%s16591_s1 + $0x160] sm:$0xff] }
  0x15   :  { %7653 = vmatprep.subr.bf16.mxu0 %v16599_v0  ;;  %v7705_v20 = vpack.c.bf16 %v649_v18, %v648_v17  ;;  %v651_v23 = vld [vmem:[%s16591_s1 + $0x178] sm:$0xff]  ;;  %v9151_v24 = vld [vmem:[%s16592_s0 + $0x50] sm:$0xff]  ;;  %v98_v26 = vld [vmem:[%s16592_s0 + $0x61] sm:$0xff] }
  0x16   :  { %v652_v27 = vld [vmem:[%s16591_s1 + $0x180] sm:$0xff]  ;;  %v654_v32 = vld [vmem:[%s16591_s1 + $0x190] sm:$0xff]  ;;  %v655_v33 = vld [vmem:[%s16591_s1 + $0x198] sm:$0xff] }
  0x17   :  { %v9167_v29 = vld [vmem:[%s16592_s0 + $0x60] sm:$0xff]  ;;  %v7714_v35 = vpack.c.bf16 %v655_v33, %v654_v32  ;;  %v657_v38 = vld [vmem:[%s16591_s1 + $0x1a8] sm:$0xff]  ;;  %v9199_v39 = vld [vmem:[%s16592_s0 + $0x78] sm:$0xff] }
  0x18   :  { %7655 = vmatpush1.bf16.msra.mxu0 %v7654_v19  ;;  %v9135_v19 = vld [vmem:[%s16592_s0 + $0x48] sm:$0xff]  ;;  %v100_v36 = vld [vmem:[%s16592_s0 + $0x79] sm:$0xff]  ;;  %v9219_v44 = vld [vmem:[%s16592_s0 + $0x90] sm:$0xff] }
  0x19   :  { %7656 = vmatprep.subr.bf16.mxu0 %v16599_v0  ;;  %v101_v41 = vld [vmem:[%s16592_s0 + $0x81] sm:$0xff]  ;;  %v103_v45 = vld [vmem:[%s16592_s0 + $0x99] sm:$0xff]  ;;  %v104_v50 = vld [vmem:[%s16592_s0 + $0xa9] sm:$0xff] }
  0x1a   :  { %v9209_v42 = vld [vmem:[%s16592_s0 + $0x80] sm:$0xff]  ;;  %v659_v47 = vld [vmem:[%s16591_s1 + $0x1b8] sm:$0xff]  ;;  %v9244_v51 = vld [vmem:[%s16592_s0 + $0xa8] sm:$0xff] }
  0x1b   :  { %v9234_v48 = vld [vmem:[%s16592_s0 + $0x98] sm:$0xff]  ;;  %v9262_v55 = vld [vmem:[%s16592_s0 + $0xc0] sm:$0xff]  ;;  %v107_v56 = vld [vmem:[%s16592_s0 + $0xc9] sm:$0xff] }
  0x1c   :  { %7658 = vmatpush1.bf16.msra.mxu0 %v7657_v22  ;;  %v650_v22 = vld [vmem:[%s16591_s1 + $0x170] sm:$0xff]  ;;  %v108_v61 = vld [vmem:[%s16592_s0 + $0xd9] sm:$0xff]  ;;  %v9330_v13 = vld [vmem:[%s16592_s0 + $0x108] sm:$0xff] }
  0x1d   :  { %7659 = vmatprep.subr.bf16.mxu0 %v16599_v0  ;;  %v9296_v2 = vld [vmem:[%s16592_s0 + $0xe0] sm:$0xff]  ;;  %v110_v3 = vld [vmem:[%s16592_s0 + $0xf1] sm:$0xff]  ;;  %v112_v12 = vld [vmem:[%s16592_s0 + $0x109] sm:$0xff] }
  0x1e   :  { %v662_v7 = vld [vmem:[%s16591_s1 + $0x1d0] sm:$0xff]  ;;  %v663_v8 = vld [vmem:[%s16591_s1 + $0x1d8] sm:$0xff]  ;;  %v114_v17 = vld [vmem:[%s16592_s0 + $0x121] sm:$0xff] }
  0x1f   :  { %v9348_v18 = vld [vmem:[%s16592_s0 + $0x120] sm:$0xff]  ;;  %v9391_v32 = vld [vmem:[%s16592_s0 + $0x150] sm:$0xff] }
  0x20   :  { %7661 = vmatpush1.bf16.msra.mxu0 %v7660_v25  ;;  %v7708_v25 = vpack.c.bf16 %v651_v23, %v650_v22  ;;  %v665_v22 = vld [vmem:[%s16591_s1 + $0x1e8] sm:$0xff]  ;;  %v119_v33 = vld [vmem:[%s16592_s0 + $0x159] sm:$0xff] }
  0x21   :  { %7662 = vmatprep.subr.bf16.mxu0 %v16599_v0  ;;  %v9363_v23 = vld [vmem:[%s16592_s0 + $0x128] sm:$0xff] }
  0x24   :  { %7664 = vmatpush1.bf16.msra.mxu0 %v7663_v28  ;;  %v653_v28 = vld [vmem:[%s16591_s1 + $0x188] sm:$0xff] }
  0x25   :  { %7665 = vmatprep.subr.bf16.mxu0 %v16599_v0  ;;  %v7711_v30 = vpack.c.bf16 %v653_v28, %v652_v27  ;;  %v9373_v27 = vld [vmem:[%s16592_s0 + $0x138] sm:$0xff]  ;;  %v117_v28 = vld [vmem:[%s16592_s0 + $0x141] sm:$0xff] }
  0x28   :  { %7667 = vmatpush1.bf16.msra.mxu0 %v7666_v31  ;;  %v99_v31 = vld [vmem:[%s16592_s0 + $0x69] sm:$0xff] }
  0x29   :  { %7668 = vmatprep.subr.bf16.mxu0 %v16599_v0 }
  0x2c   :  { %7670 = vmatpush1.bf16.msra.mxu0 %v7669_v34  ;;  %v9183_v34 = vld [vmem:[%s16592_s0 + $0x68] sm:$0xff] }
  0x2d   :  { %7671 = vmatprep.subr.bf16.mxu0 %v16599_v0 }
  0x30   :  { %7673 = vmatpush1.bf16.msra.mxu0 %v7672_v37  ;;  %v656_v37 = vld [vmem:[%s16591_s1 + $0x1a0] sm:$0xff] }
  0x31   :  { %7674 = vmatprep.subr.bf16.mxu0 %v16599_v0 }
  0x34   :  { %7676 = vmatpush1.bf16.msra.mxu0 %v7675_v40  ;;  %v7717_v40 = vpack.c.bf16 %v657_v38, %v656_v37  ;;  %v9406_v37 = vld [vmem:[%s16592_s0 + $0x158] sm:$0xff] }
  0x35   :  { %7677 = vmatprep.subr.bf16.mxu0 %v16599_v0 }
  0x38   :  { %7679 = vmatpush1.bf16.msra.mxu0 %v7678_v43  ;;  %v102_v43 = vld [vmem:[%s16592_s0 + $0x91] sm:$0xff] }
  0x39   :  { %7680 = vmatprep.subr.bf16.mxu0 %v16599_v0 }
  0x3c   :  { %7682 = vmatpush1.bf16.msra.mxu0 %v7681_v46  ;;  %v658_v46 = vld [vmem:[%s16591_s1 + $0x1b0] sm:$0xff] }
  0x3d   :  { %7683 = vmatprep.subr.bf16.mxu0 %v16599_v0 }
  0x40   :  { %7685 = vmatpush1.bf16.msra.mxu0 %v7684_v49  ;;  %v7720_v49 = vpack.c.bf16 %v659_v47, %v658_v46  ;;  %v122_v46 = vld [vmem:[%s16592_s0 + $0x1b1] sm:$0xff] }
  0x41   :  { %7686 = vmatprep.subr.bf16.mxu0 %v16599_v0  ;;  %v58_v47 = vld [vmem:[%s16592_s0 + $0x1b0] sm:$0xff] }
  0x43   :  { %813 = vmatmul.mubr.f32.vlgmr.msra.gmra.mrb[0].mxu0 %v26_v52  ;;  %v105_v52 = vld [vmem:[%s16592_s0 + $0xb1] sm:$0xff] }
  0x44   :  { %7688 = vmatpush1.bf16.msra.mxu0 %v7687_v53  ;;  %817 = vmatprep.mubr.f32.mxu0 %v91_v54  ;;  %v9253_v53 = vld [vmem:[%s16592_s0 + $0xb0] sm:$0xff]  ;;  %v106_v54 = vld [vmem:[%s16592_s0 + $0xc1] sm:$0xff] }
  0x45   :  { %7689 = vmatprep.subr.bf16.mxu0 %v16599_v0 }
  0x47   :  { %818 = vmatmul.mubr.f32.gmra.mrb[2].mxu0 %v27_v57  ;;  %v660_v57 = vld [vmem:[%s16591_s1 + $0x1c0] sm:$0xff] }
  0x48   :  { %822 = vmatprep.mubr.f32.mxu0 %v92_v59  ;;  %7691 = vmatpush1.bf16.msra.mxu0 %v7690_v58  ;;  %v661_v58 = vld [vmem:[%s16591_s1 + $0x1c8] sm:$0xff] }
  0x49   :  { %7692 = vmatprep.subr.bf16.mxu0 %v16599_v0  ;;  %v9277_v59 = vld [vmem:[%s16592_s0 + $0xc8] sm:$0xff]  ;;  %v7723_v60 = vpack.c.bf16 %v661_v58, %v660_v57  ;;  %v9455_v57 = vld [vmem:[%s16592_s0 + $0x1d0] sm:$0xff] }
  0x4a   :  { %v126_v58 = vld [vmem:[%s16592_s0 + $0x1e1] sm:$0xff] }
  0x4b   :  { %823 = vmatmul.mubr.f32.gmra.mrb[4].mxu0 %v9071_v62 }
  0x4c   :  { %827 = vmatprep.mubr.f32.mxu0 %v93_v1  ;;  %7694 = vmatpush1.bf16.msra.mxu0 %v7693_v63  ;;  %v9287_v63 = vld [vmem:[%s16592_s0 + $0xd8] sm:$0xff]  ;;  %v109_v1 = vld [vmem:[%s16592_s0 + $0xe1] sm:$0xff] }
  0x4d   :  { %7695 = vmatprep.subr.bf16.mxu0 %v16599_v0 }
  0x4f   :  { %828 = vmatmul.mubr.f32.gmra.mrb[6].mxu0 %v9087_v4 }
  0x50   :  { %832 = vmatprep.mubr.f32.mxu0 %v94_v6  ;;  %7697 = vmatpush1.bf16.msra.mxu0 %v7696_v5  ;;  %v9305_v5 = vld [vmem:[%s16592_s0 + $0xf0] sm:$0xff]  ;;  %v111_v6 = vld [vmem:[%s16592_s0 + $0xf9] sm:$0xff] }
  0x51   :  { %7698 = vmatprep.subr.bf16.mxu0 %v16599_v0 }
  0x53   :  { %833 = vmatmul.mubr.f32.gmra.mrb[8].mxu0 %v9103_v9 }
  0x54   :  { %837 = vmatprep.mubr.f32.mxu0 %v95_v11  ;;  %7700 = vmatpush1.bf16.msra.mxu0 %v7699_v10  ;;  %v9320_v10 = vld [vmem:[%s16592_s0 + $0xf8] sm:$0xff]  ;;  %v7726_v11 = vpack.c.bf16 %v663_v8, %v662_v7  ;;  %v129_v7 = vld [vmem:[%s16592_s0 + $0x201] sm:$0xff] }
  0x55   :  { %7701 = vmatprep.subr.bf16.mxu0 %v16599_v0  ;;  %v9491_v8 = vld [vmem:[%s16592_s0 + $0x200] sm:$0xff] }
  0x57   :  { %838 = vmatmul.mubr.f32.gmra.mrb[10].mxu0 %v9119_v14 }
  0x58   :  { %842 = vmatprep.mubr.f32.mxu0 %v96_v16  ;;  %7703 = vmatpush1.bf16.msra.mxu0 %v7702_v15  ;;  %v113_v15 = vld [vmem:[%s16592_s0 + $0x111] sm:$0xff] }
  0x59   :  { %7704 = vmatprep.subr.bf16.mxu0 %v16599_v0  ;;  %v9339_v16 = vld [vmem:[%s16592_s0 + $0x110] sm:$0xff] }
  0x5b   :  { %843 = vmatmul.mubr.f32.gmra.mrb[12].mxu0 %v9135_v19 }
  0x5c   :  { %847 = vmatprep.mubr.f32.mxu0 %v97_v21  ;;  %7706 = vmatpush1.bf16.msra.mxu0 %v7705_v20  ;;  %v115_v20 = vld [vmem:[%s16592_s0 + $0x129] sm:$0xff]  ;;  %v664_v21 = vld [vmem:[%s16591_s1 + $0x1e0] sm:$0xff] }
  0x5d   :  { %7707 = vmatprep.subr.bf16.mxu0 %v16599_v0 }
  0x5f   :  { %848 = vmatmul.mubr.f32.gmra.mrb[14].mxu0 %v9151_v24 }
  0x60   :  { %852 = vmatprep.mubr.f32.mxu0 %v98_v26  ;;  %7709 = vmatpush1.bf16.msra.mxu0 %v7708_v25  ;;  %v7729_v25 = vpack.c.bf16 %v665_v22, %v664_v21  ;;  %v116_v26 = vld [vmem:[%s16592_s0 + $0x139] sm:$0xff]  ;;  %v9518_v21 = vld [vmem:[%s16592_s0 + $0x228] sm:$0xff]  ;;  %v133_v22 = vld [vmem:[%s16592_s0 + $0x231] sm:$0xff] }
  0x61   :  { %7710 = vmatprep.subr.bf16.mxu0 %v16599_v0 }
  0x63   :  { %853 = vmatmul.mubr.f32.gmra.mrb[16].mxu0 %v9167_v29 }
  0x64   :  { %857 = vmatprep.mubr.f32.mxu0 %v99_v31  ;;  %7712 = vmatpush1.bf16.msra.mxu0 %v7711_v30  ;;  %v9382_v30 = vld [vmem:[%s16592_s0 + $0x140] sm:$0xff]  ;;  %v118_v31 = vld [vmem:[%s16592_s0 + $0x151] sm:$0xff] }
  0x65   :  { %7713 = vmatprep.subr.bf16.mxu0 %v16599_v0 }
  0x67   :  { %858 = vmatmul.mubr.f32.gmra.mrb[18].mxu0 %v9183_v34 }
  0x68   :  { %862 = vmatprep.mubr.f32.mxu0 %v100_v36  ;;  %7715 = vmatpush1.bf16.msra.mxu0 %v7714_v35  ;;  %v666_v35 = vld [vmem:[%s16591_s1 + $0x1f0] sm:$0xff]  ;;  %v667_v36 = vld [vmem:[%s16591_s1 + $0x1f8] sm:$0xff] }
  0x69   :  { %7716 = vmatprep.subr.bf16.mxu0 %v16599_v0  ;;  %v7732_v38 = vpack.c.bf16 %v667_v36, %v666_v35  ;;  %v136_v35 = vld [vmem:[%s16592_s0 + $0x259] sm:$0xff] }
  0x6a   :  { %v9554_v36 = vld [vmem:[%s16592_s0 + $0x258] sm:$0xff] }
  0x6b   :  { %863 = vmatmul.mubr.f32.gmra.mrb[20].mxu0 %v9199_v39 }
  0x6c   :  { %867 = vmatprep.mubr.f32.mxu0 %v101_v41  ;;  %7718 = vmatpush1.bf16.msra.mxu0 %v7717_v40  ;;  %v120_v40 = vld [vmem:[%s16592_s0 + $0x169] sm:$0xff] }
  0x6d   :  { %7719 = vmatprep.subr.bf16.mxu0 %v16599_v0  ;;  %v9416_v41 = vld [vmem:[%s16592_s0 + $0x168] sm:$0xff] }
  0x6f   :  { %868 = vmatmul.mubr.f32.gmra.mrb[22].mxu0 %v9209_v42 }
  0x70   :  { %872 = vmatprep.mubr.f32.mxu0 %v102_v43  ;;  %7721 = vmatpush1.bf16.msra.mxu0 %v7720_v49  ;;  %v121_v43 = vld [vmem:[%s16592_s0 + $0x171] sm:$0xff]  ;;  %v123_v49 = vld [vmem:[%s16592_s0 + $0x1b9] sm:$0xff] }
  0x71   :  { %7722 = vmatprep.subr.bf16.mxu0 %v16599_v0 }
  0x73   :  { %873 = vmatmul.mubr.f32.gmra.mrb[24].mxu0 %v9219_v44 }
  0x74   :  { %877 = vmatprep.mubr.f32.mxu0 %v103_v45  ;;  %7724 = vmatpush1.bf16.msra.mxu0 %v7723_v60  ;;  %v9425_v45 = vld [vmem:[%s16592_s0 + $0x170] sm:$0xff]  ;;  %v9464_v60 = vld [vmem:[%s16592_s0 + $0x1e0] sm:$0xff] }
  0x75   :  { %7725 = vmatprep.subr.bf16.mxu0 %v16599_v0 }
  0x77   :  { %878 = vmatmul.mubr.f32.gmra.mrb[26].mxu0 %v9234_v48 }
  0x78   :  { %882 = vmatprep.mubr.f32.mxu0 %v104_v50  ;;  %7727 = vmatpush1.bf16.msra.mxu0 %v7726_v11  ;;  %v59_v50 = vld [vmem:[%s16592_s0 + $0x1b8] sm:$0xff] }
  0x79   :  { %7728 = vmatprep.subr.bf16.mxu0 %v16599_v0  ;;  %v130_v11 = vld [vmem:[%s16592_s0 + $0x211] sm:$0xff] }
  0x7b   :  { %883 = vmatmul.mubr.f32.gmra.mrb[28].mxu0 %v9244_v51 }
  0x7c   :  { %887 = vmatprep.mubr.f32.mxu0 %v105_v52  ;;  %7730 = vmatpush1.bf16.msra.mxu0 %v7729_v25  ;;  %v124_v52 = vld [vmem:[%s16592_s0 + $0x1c9] sm:$0xff] }
  0x7d   :  { %7731 = vmatprep.subr.bf16.mxu0 %v16599_v0  ;;  %v9527_v25 = vld [vmem:[%s16592_s0 + $0x230] sm:$0xff] }
  0x7f   :  { %888 = vmatmul.mubr.f32.gmra.mrb[30].mxu0 %v9253_v53 }
  0x80   :  { %892 = vmatprep.mubr.f32.mxu0 %v106_v54  ;;  %7733 = vmatpush1.bf16.msra.mxu0 %v7732_v38  ;;  %v9446_v54 = vld [vmem:[%s16592_s0 + $0x1c8] sm:$0xff] }
  0x81   :  { %7734 = vmatprep.subr.bf16.mxu0 %v16599_v0  ;;  %v137_v38 = vld [vmem:[%s16592_s0 + $0x261] sm:$0xff] }
  0x83   :  { %893 = vmatmul.mubr.f32.gmra.mrb[32].mxu0 %v9262_v55 }
  0x84   :  { %897 = vmatprep.mubr.f32.mxu0 %v107_v56  ;;  %v125_v56 = vld [vmem:[%s16592_s0 + $0x1d1] sm:$0xff] }
  0x87   :  { %898 = vmatmul.mubr.f32.gmra.mrb[34].mxu0 %v9277_v59 }
  0x88   :  { %902 = vmatprep.mubr.f32.mxu0 %v108_v61  ;;  %v127_v61 = vld [vmem:[%s16592_s0 + $0x1e9] sm:$0xff] }
  0x8b   :  { %903 = vmatmul.mubr.f32.gmra.mrb[36].mxu0 %v9287_v63 }
  0x8c   :  { %907 = vmatprep.mubr.f32.mxu0 %v109_v1  ;;  %v9473_v1 = vld [vmem:[%s16592_s0 + $0x1e8] sm:$0xff] }
  0x8f   :  { %908 = vmatmul.mubr.f32.gmra.mrb[38].mxu0 %v9296_v2 }
  0x90   :  { %912 = vmatprep.mubr.f32.mxu0 %v110_v3  ;;  %v128_v3 = vld [vmem:[%s16592_s0 + $0x1f9] sm:$0xff] }
  0x93   :  { %913 = vmatmul.mubr.f32.gmra.mrb[40].mxu0 %v9305_v5 }
  0x94   :  { %917 = vmatprep.mubr.f32.mxu0 %v111_v6  ;;  %v9482_v6 = vld [vmem:[%s16592_s0 + $0x1f8] sm:$0xff] }
  0x97   :  { %918 = vmatmul.mubr.f32.gmra.mrb[42].mxu0 %v9320_v10 }
  0x98   :  { %922 = vmatprep.mubr.f32.mxu0 %v112_v12  ;;  %v9500_v12 = vld [vmem:[%s16592_s0 + $0x210] sm:$0xff] }
  0x9b   :  { %923 = vmatmul.mubr.f32.gmra.mrb[44].mxu0 %v9330_v13 }
  0x9c   :  { %927 = vmatprep.mubr.f32.mxu0 %v113_v15  ;;  %v131_v15 = vld [vmem:[%s16592_s0 + $0x219] sm:$0xff] }
  0x9f   :  { %928 = vmatmul.mubr.f32.gmra.mrb[46].mxu0 %v9339_v16 }
  0xa0   :  { %932 = vmatprep.mubr.f32.mxu0 %v114_v17  ;;  %v9509_v17 = vld [vmem:[%s16592_s0 + $0x218] sm:$0xff] }
  0xa3   :  { %933 = vmatmul.mubr.f32.gmra.mrb[48].mxu0 %v9348_v18 }
  0xa4   :  { %937 = vmatprep.mubr.f32.mxu0 %v115_v20  ;;  %v132_v20 = vld [vmem:[%s16592_s0 + $0x229] sm:$0xff] }
  0xa7   :  { %938 = vmatmul.mubr.f32.gmra.mrb[50].mxu0 %v9363_v23 }
  0xa8   :  { %942 = vmatprep.mubr.f32.mxu0 %v116_v26  ;;  %v134_v26 = vld [vmem:[%s16592_s0 + $0x241] sm:$0xff] }
  0xab   :  { %943 = vmatmul.mubr.f32.gmra.mrb[52].mxu0 %v9373_v27 }
  0xac   :  { %947 = vmatprep.mubr.f32.mxu0 %v117_v28  ;;  %v9536_v28 = vld [vmem:[%s16592_s0 + $0x240] sm:$0xff] }
  0xaf   :  { %948 = vmatmul.mubr.f32.gmra.mrb[54].mxu0 %v9382_v30 }
  0xb0   :  { %952 = vmatprep.mubr.f32.mxu0 %v118_v31  ;;  %v135_v31 = vld [vmem:[%s16592_s0 + $0x249] sm:$0xff] }
  0xb3   :  { %953 = vmatmul.mubr.f32.gmra.mrb[56].mxu0 %v9391_v32 }
  0xb4   :  { %957 = vmatprep.mubr.f32.mxu0 %v119_v33  ;;  %v9545_v33 = vld [vmem:[%s16592_s0 + $0x248] sm:$0xff] }
  0xb7   :  { %958 = vmatmul.mubr.f32.gmra.mrb[58].mxu0 %v9406_v37 }
  0xb8   :  { %962 = vmatprep.mubr.f32.mxu0 %v120_v40  ;;  %v9563_v40 = vld [vmem:[%s16592_s0 + $0x260] sm:$0xff] }
  0xbb   :  { %963 = vmatmul.mubr.f32.gmra.mrb[60].mxu0 %v9416_v41 }
  0xbc   :  { %967 = vmatprep.mubr.f32.mxu0 %v121_v43  ;;  %v138_v43 = vld [vmem:[%s16592_s0 + $0x271] sm:$0xff] }
  0xbf   :  { %968 = vmatmul.mubr.f32.gmra.mrb[62].mxu0 %v9425_v45 }
  0xc0   :  { %972 = vmatprep.mubr.f32.mxu0 %v122_v46  ;;  %v9572_v46 = vld [vmem:[%s16592_s0 + $0x270] sm:$0xff] }
  0xc3   :  { %973 = vmatmul.mubr.f32.gmra.mrb[64].mxu0 %v58_v47  ;;  %v139_v47 = vld [vmem:[%s16592_s0 + $0x279] sm:$0xff] }
  0xc4   :  { %977 = vmatprep.mubr.f32.mxu0 %v123_v49  ;;  %v9581_v49 = vld [vmem:[%s16592_s0 + $0x278] sm:$0xff] }
  0xc7   :  { %978 = vmatmul.mubr.f32.gmra.mrb[66].mxu0 %v59_v50  ;;  %v140_v50 = vld [vmem:[%s16592_s0 + $0x289] sm:$0xff] }
  0xc8   :  { %982 = vmatprep.mubr.f32.mxu0 %v124_v52  ;;  %v9590_v52 = vld [vmem:[%s16592_s0 + $0x288] sm:$0xff] }
  0xcb   :  { %983 = vmatmul.mubr.f32.gmra.mrb[68].mxu0 %v9446_v54 }
  0xcc   :  { %987 = vmatprep.mubr.f32.mxu0 %v125_v56  ;;  %v141_v56 = vld [vmem:[%s16592_s0 + $0x291] sm:$0xff] }
  0xcf   :  { %988 = vmatmul.mubr.f32.gmra.mrb[70].mxu0 %v9455_v57 }
  0xd0   :  { %992 = vmatprep.mubr.f32.mxu0 %v126_v58  ;;  %v9599_v58 = vld [vmem:[%s16592_s0 + $0x290] sm:$0xff] }
  0xd3   :  { %993 = vmatmul.mubr.f32.gmra.mrb[72].mxu0 %v9464_v60 }
  0xd4   :  { %997 = vmatprep.mubr.f32.mxu0 %v127_v61  ;;  %v142_v61 = vld [vmem:[%s16592_s0 + $0x2a1] sm:$0xff] }
  0xd7   :  { %998 = vmatmul.mubr.f32.gmra.mrb[74].mxu0 %v9473_v1 }
  0xd8   :  { %1002 = vmatprep.mubr.f32.mxu0 %v128_v3  ;;  %v9608_v3 = vld [vmem:[%s16592_s0 + $0x2a0] sm:$0xff] }
  0xdb   :  { %1003 = vmatmul.mubr.f32.gmra.mrb[76].mxu0 %v9482_v6 }
  0xdc   :  { %1007 = vmatprep.mubr.f32.mxu0 %v129_v7  ;;  %v143_v7 = vld [vmem:[%s16592_s0 + $0x2a9] sm:$0xff] }
  0xdf   :  { %1008 = vmatmul.mubr.f32.gmra.mrb[78].mxu0 %v9491_v8 }
  0xe0   :  { %1012 = vmatprep.mubr.f32.mxu0 %v130_v11  ;;  %v9617_v11 = vld [vmem:[%s16592_s0 + $0x2a8] sm:$0xff] }
  0xe3   :  { %1013 = vmatmul.mubr.f32.gmra.mrb[80].mxu0 %v9500_v12 }
  0xe4   :  { %1017 = vmatprep.mubr.f32.mxu0 %v131_v15  ;;  %v144_v15 = vld [vmem:[%s16592_s0 + $0x2b9] sm:$0xff] }
  0xe7   :  { %1018 = vmatmul.mubr.f32.gmra.mrb[82].mxu0 %v9509_v17 }
  0xe8   :  { %1022 = vmatprep.mubr.f32.mxu0 %v132_v20  ;;  %v9626_v20 = vld [vmem:[%s16592_s0 + $0x2b8] sm:$0xff] }
  0xeb   :  { %1023 = vmatmul.mubr.f32.gmra.mrb[84].mxu0 %v9518_v21 }
  0xec   :  { %1027 = vmatprep.mubr.f32.mxu0 %v133_v22  ;;  %v145_v22 = vld [vmem:[%s16592_s0 + $0x2c1] sm:$0xff] }
  0xef   :  { %1028 = vmatmul.mubr.f32.gmra.mrb[86].mxu0 %v9527_v25 }
  0xf0   :  { %1032 = vmatprep.mubr.f32.mxu0 %v134_v26  ;;  %v9635_v26 = vld [vmem:[%s16592_s0 + $0x2c0] sm:$0xff] }
  0xf3   :  { %1033 = vmatmul.mubr.f32.gmra.mrb[88].mxu0 %v9536_v28 }
  0xf4   :  { %1037 = vmatprep.mubr.f32.mxu0 %v135_v31  ;;  %v146_v31 = vld [vmem:[%s16592_s0 + $0x2d1] sm:$0xff] }
  0xf7   :  { %1038 = vmatmul.mubr.f32.gmra.mrb[90].mxu0 %v9545_v33 }
  0xf8   :  { %1042 = vmatprep.mubr.f32.mxu0 %v136_v35  ;;  %v9644_v35 = vld [vmem:[%s16592_s0 + $0x2d0] sm:$0xff] }
  0xfb   :  { %1043 = vmatmul.mubr.f32.gmra.mrb[92].mxu0 %v9554_v36 }
  0xfc   :  { %1047 = vmatprep.mubr.f32.mxu0 %v137_v38  ;;  %v147_v38 = vld [vmem:[%s16592_s0 + $0x2d9] sm:$0xff] }
  0xff   :  { %1048 = vmatmul.mubr.f32.gmra.mrb[94].mxu0 %v9563_v40 }
 0x100   :  { %1052 = vmatprep.mubr.f32.mxu0 %v138_v43  ;;  %v9653_v43 = vld [vmem:[%s16592_s0 + $0x2d8] sm:$0xff] }
 0x103   :  { %1053 = vmatmul.mubr.f32.gmra.mrb[96].mxu0 %v9572_v46 }
 0x104   :  { %1057 = vmatprep.mubr.f32.mxu0 %v139_v47  ;;  %v148_v47 = vld [vmem:[%s16592_s0 + $0x2e9] sm:$0xff] }
 0x107   :  { %1058 = vmatmul.mubr.f32.gmra.mrb[98].mxu0 %v9581_v49 }
 0x108   :  { %1062 = vmatprep.mubr.f32.mxu0 %v140_v50  ;;  %v9662_v50 = vld [vmem:[%s16592_s0 + $0x2e8] sm:$0xff] }
 0x10b   :  { %1063 = vmatmul.mubr.f32.gmra.mrb[100].mxu0 %v9590_v52 }
 0x10c   :  { %1067 = vmatprep.mubr.f32.mxu0 %v141_v56  ;;  %v149_v56 = vld [vmem:[%s16592_s0 + $0x2f1] sm:$0xff] }
 0x10f   :  { %1068 = vmatmul.mubr.f32.gmra.mrb[102].mxu0 %v9599_v58 }
 0x110   :  { %1072 = vmatprep.mubr.f32.mxu0 %v142_v61  ;;  %v9671_v61 = vld [vmem:[%s16592_s0 + $0x2f0] sm:$0xff] }
 0x113   :  { %1073 = vmatmul.mubr.f32.gmra.mrb[104].mxu0 %v9608_v3 }
 0x114   :  { %1077 = vmatprep.mubr.f32.mxu0 %v143_v7  ;;  %v150_v7 = vld [vmem:[%s16592_s0 + $0x301] sm:$0xff] }
 0x117   :  { %1078 = vmatmul.mubr.f32.gmra.mrb[106].mxu0 %v9617_v11 }
 0x118   :  { %1082 = vmatprep.mubr.f32.mxu0 %v144_v15  ;;  %v9680_v15 = vld [vmem:[%s16592_s0 + $0x300] sm:$0xff] }
 0x119   :  { %16750 = vst [vmem:[#allocation3_spill] sm:$0xff] %v9680_v15 }
 0x11b   :  { %1083 = vmatmul.mubr.f32.gmra.mrb[108].mxu0 %v9626_v20 }
 0x11c   :  { %1087 = vmatprep.mubr.f32.mxu0 %v145_v22  ;;  %v151_v22 = vld [vmem:[%s16592_s0 + $0x309] sm:$0xff] }
 0x11f   :  { %1088 = vmatmul.mubr.f32.gmra.mrb[110].mxu0 %v9635_v26 }
 0x120   :  { %1092 = vmatprep.mubr.f32.mxu0 %v146_v31  ;;  %v9689_v31 = vld [vmem:[%s16592_s0 + $0x308] sm:$0xff] }
 0x121   :  { %16751 = vst [vmem:[#allocation4_spill] sm:$0xff] %v9689_v31 }
 0x123   :  { %1093 = vmatmul.mubr.f32.gmra.mrb[112].mxu0 %v9644_v35 }
 0x124   :  { %1097 = vmatprep.mubr.f32.mxu0 %v147_v38  ;;  %v152_v38 = vld [vmem:[%s16592_s0 + $0x319] sm:$0xff] }
 0x127   :  { %1098 = vmatmul.mubr.f32.gmra.mrb[114].mxu0 %v9653_v43 }
 0x128   :  { %1102 = vmatprep.mubr.f32.mxu0 %v148_v47  ;;  %v9698_v47 = vld [vmem:[%s16592_s0 + $0x318] sm:$0xff] }
 0x129   :  { %16752 = vst [vmem:[#allocation5_spill] sm:$0xff] %v9698_v47 }
 0x12b   :  { %1103 = vmatmul.mubr.f32.gmra.mrb[116].mxu0 %v9662_v50 }
 0x12c   :  { %1107 = vmatprep.mubr.f32.mxu0 %v149_v56  ;;  %v153_v56 = vld [vmem:[%s16592_s0 + $0x321] sm:$0xff] }
 0x12f   :  { %1108 = vmatmul.mubr.f32.gmra.mrb[118].mxu0 %v9671_v61 }
 0x130   :  { %1112 = vmatprep.mubr.f32.mxu0 %v150_v7  ;;  %v9707_v7 = vld [vmem:[%s16592_s0 + $0x320] sm:$0xff] }
 0x131   :  { %16753 = vst [vmem:[#allocation6_spill] sm:$0xff] %v9707_v7 }
 0x133   :  { %1113 = vmatmul.mubr.f32.gmra.mrb[120].mxu0 %v9680_v15  ;;  %v16754_v15 = vmov 0.0|0.0  }
 0x134   :  { %1117 = vmatprep.mubr.f32.mxu0 %v151_v22  ;;  %v668_v22 = vld [vmem:[%s16591_s1 + $0x200] sm:$0xff] }
 0x137   :  { %1118 = vmatmul.mubr.f32.gmra.mrb[122].mxu0 %v9689_v31  ;;  %v671_v31 = vld [vmem:[%s16591_s1 + $0x218] sm:$0xff] }
 0x138   :  { %1122 = vmatprep.mubr.f32.mxu0 %v152_v38  ;;  %v669_v38 = vld [vmem:[%s16591_s1 + $0x208] sm:$0xff] }
 0x139   :  { %v7735_v0 = vpack.c.bf16 %v669_v38, %v668_v22  ;;  %v672_v22 = vld [vmem:[%s16591_s1 + $0x220] sm:$0xff]  ;;  %v673_v38 = vld [vmem:[%s16591_s1 + $0x228] sm:$0xff] }
 0x13b   :  { %1123 = vmatmul.mubr.f32.gmra.mrb[124].mxu0 %v9698_v47  ;;  %v670_v47 = vld [vmem:[%s16591_s1 + $0x210] sm:$0xff] }
 0x13c   :  { %1127 = vmatprep.mubr.f32.mxu0 %v153_v56  ;;  %v154_v56 = vld [vmem:[%s16592_s0 + $0x2] sm:$0xff] }
 0x13f   :  { %1128 = vmatmul.mubr.f32.gmra.mrb[126].mxu0 %v9707_v7  ;;  %v7738_v7 = vpack.c.bf16 %v671_v31, %v670_v47  ;;  %v674_v31 = vld [vmem:[%s16591_s1 + $0x230] sm:$0xff]  ;;  %v675_v47 = vld [vmem:[%s16591_s1 + $0x238] sm:$0xff] }
 0x140   :  { %1197 = vmatprep.mubr.f32.mxu0 %v9071_v62  ;;  %v155_v62 = vld [vmem:[%s16592_s0 + $0xa] sm:$0xff] }
 0x143   :  { %1198 = vmatmul.mubr.f32.vlgmr.msra.gmra.mrb[0].mxu0 %v154_v56  ;;  %v676_v56 = vld [vmem:[%s16591_s1 + $0x240] sm:$0xff] }
 0x144   :  { %7736 = vmatpush1.bf16.msra.mxu0 %v7735_v0  ;;  %1202 = vmatprep.mubr.f32.mxu0 %v9087_v4  ;;  %v9741_v0 = vld [vmem:[%s16592_s0 + $0x1a] sm:$0xff]  ;;  %v7741_v4 = vpack.c.bf16 %v673_v38, %v672_v22  ;;  %v678_v38 = vld [vmem:[%s16591_s1 + $0x250] sm:$0xff] }
 0x145   :  { %7737 = vmatprep.subr.bf16.mxu0 %v16754_v15 }
 0x147   :  { %1203 = vmatmul.mubr.f32.gmra.mrb[2].mxu0 %v155_v62  ;;  %v677_v62 = vld [vmem:[%s16591_s1 + $0x248] sm:$0xff] }
 0x148   :  { %1207 = vmatprep.mubr.f32.mxu0 %v9103_v9  ;;  %7739 = vmatpush1.bf16.msra.mxu0 %v7738_v7  ;;  %v9755_v9 = vld [vmem:[%s16592_s0 + $0x22] sm:$0xff]  ;;  %v7744_v7 = vpack.c.bf16 %v675_v47, %v674_v31  ;;  %v7747_v22 = vpack.c.bf16 %v677_v62, %v676_v56  ;;  %v682_v62 = vld [vmem:[%s16591_s1 + $0x270] sm:$0xff] }
 0x149   :  { %7740 = vmatprep.subr.bf16.mxu0 %v16754_v15  ;;  %v680_v47 = vld [vmem:[%s16591_s1 + $0x260] sm:$0xff] }
 0x14b   :  { %1208 = vmatmul.mubr.f32.gmra.mrb[4].mxu0 %v9741_v0 }
 0x14c   :  { %1212 = vmatprep.mubr.f32.mxu0 %v9119_v14  ;;  %7742 = vmatpush1.bf16.msra.mxu0 %v7741_v4  ;;  %v9769_v14 = vld [vmem:[%s16592_s0 + $0x32] sm:$0xff] }
 0x14d   :  { %7743 = vmatprep.subr.bf16.mxu0 %v16754_v15  ;;  %v679_v4 = vld [vmem:[%s16591_s1 + $0x258] sm:$0xff] }
 0x14e   :  { %v7750_v31 = vpack.c.bf16 %v679_v4, %v678_v38  ;;  %v684_v4 = vld [vmem:[%s16591_s1 + $0x280] sm:$0xff] }
 0x14f   :  { %1213 = vmatmul.mubr.f32.gmra.mrb[6].mxu0 %v9755_v9 }
 0x150   :  { %1217 = vmatprep.mubr.f32.mxu0 %v9135_v19  ;;  %7745 = vmatpush1.bf16.msra.mxu0 %v7744_v7  ;;  %v9783_v19 = vld [vmem:[%s16592_s0 + $0x3a] sm:$0xff]  ;;  %v681_v7 = vld [vmem:[%s16591_s1 + $0x268] sm:$0xff] }
 0x151   :  { %7746 = vmatprep.subr.bf16.mxu0 %v16754_v15  ;;  %v7753_v56 = vpack.c.bf16 %v681_v7, %v680_v47  ;;  %v686_v7 = vld [vmem:[%s16591_s1 + $0x290] sm:$0xff] }
 0x153   :  { %1218 = vmatmul.mubr.f32.gmra.mrb[8].mxu0 %v9769_v14 }
 0x154   :  { %1222 = vmatprep.mubr.f32.mxu0 %v9151_v24  ;;  %7748 = vmatpush1.bf16.msra.mxu0 %v7747_v22  ;;  %v9797_v24 = vld [vmem:[%s16592_s0 + $0x4a] sm:$0xff]  ;;  %v683_v22 = vld [vmem:[%s16591_s1 + $0x278] sm:$0xff] }
 0x155   :  { %7749 = vmatprep.subr.bf16.mxu0 %v16754_v15  ;;  %v7756_v38 = vpack.c.bf16 %v683_v22, %v682_v62  ;;  %v688_v22 = vld [vmem:[%s16591_s1 + $0x2a0] sm:$0xff] }
 0x157   :  { %1223 = vmatmul.mubr.f32.gmra.mrb[10].mxu0 %v9783_v19 }
 0x158   :  { %1227 = vmatprep.mubr.f32.mxu0 %v9167_v29  ;;  %7751 = vmatpush1.bf16.msra.mxu0 %v7750_v31  ;;  %v9811_v29 = vld [vmem:[%s16592_s0 + $0x52] sm:$0xff]  ;;  %v685_v31 = vld [vmem:[%s16591_s1 + $0x288] sm:$0xff] }
 0x159   :  { %7752 = vmatprep.subr.bf16.mxu0 %v16754_v15  ;;  %v7759_v47 = vpack.c.bf16 %v685_v31, %v684_v4  ;;  %v9861_v31 = vld [vmem:[%s16592_s0 + $0x82] sm:$0xff] }
 0x15b   :  { %1228 = vmatmul.mubr.f32.gmra.mrb[12].mxu0 %v9797_v24 }
 0x15c   :  { %1232 = vmatprep.mubr.f32.mxu0 %v9183_v34  ;;  %7754 = vmatpush1.bf16.msra.mxu0 %v7753_v56  ;;  %v9825_v34 = vld [vmem:[%s16592_s0 + $0x62] sm:$0xff]  ;;  %v687_v56 = vld [vmem:[%s16591_s1 + $0x298] sm:$0xff] }
 0x15d   :  { %7755 = vmatprep.subr.bf16.mxu0 %v16754_v15  ;;  %v7762_v62 = vpack.c.bf16 %v687_v56, %v686_v7  ;;  %v9890_v56 = vld [vmem:[%s16592_s0 + $0xaa] sm:$0xff] }
 0x15f   :  { %1233 = vmatmul.mubr.f32.gmra.mrb[14].mxu0 %v9811_v29 }
 0x160   :  { %1237 = vmatprep.mubr.f32.mxu0 %v9199_v39  ;;  %7757 = vmatpush1.bf16.msra.mxu0 %v7756_v38  ;;  %v9839_v39 = vld [vmem:[%s16592_s0 + $0x6a] sm:$0xff] }
 0x161   :  { %7758 = vmatprep.subr.bf16.mxu0 %v16754_v15  ;;  %v689_v38 = vld [vmem:[%s16591_s1 + $0x2a8] sm:$0xff] }
 0x162   :  { %v7765_v4 = vpack.c.bf16 %v689_v38, %v688_v22  ;;  %v9925_v38 = vld [vmem:[%s16592_s0 + $0xda] sm:$0xff] }
 0x163   :  { %1238 = vmatmul.mubr.f32.gmra.mrb[16].mxu0 %v9825_v34 }
 0x164   :  { %1242 = vmatprep.mubr.f32.mxu0 %v9209_v42  ;;  %7760 = vmatpush1.bf16.msra.mxu0 %v7759_v47  ;;  %v9853_v42 = vld [vmem:[%s16592_s0 + $0x7a] sm:$0xff] }
 0x165   :  { %7761 = vmatprep.subr.bf16.mxu0 %v16754_v15  ;;  %v691_v47 = vld [vmem:[%s16591_s1 + $0x2b8] sm:$0xff] }
 0x167   :  { %1243 = vmatmul.mubr.f32.gmra.mrb[18].mxu0 %v9839_v39 }
 0x168   :  { %1247 = vmatprep.mubr.f32.mxu0 %v9219_v44  ;;  %7763 = vmatpush1.bf16.msra.mxu0 %v7762_v62  ;;  %v9869_v44 = vld [vmem:[%s16592_s0 + $0x92] sm:$0xff]  ;;  %v693_v62 = vld [vmem:[%s16591_s1 + $0x2c8] sm:$0xff] }
 0x169   :  { %7764 = vmatprep.subr.bf16.mxu0 %v16754_v15 }
 0x16b   :  { %1248 = vmatmul.mubr.f32.gmra.mrb[20].mxu0 %v9853_v42 }
 0x16c   :  { %1252 = vmatprep.mubr.f32.mxu0 %v9234_v48  ;;  %7766 = vmatpush1.bf16.msra.mxu0 %v7765_v4  ;;  %v690_v48 = vld [vmem:[%s16591_s1 + $0x2b0] sm:$0xff]  ;;  %v695_v4 = vld [vmem:[%s16591_s1 + $0x2d8] sm:$0xff] }
 0x16d   :  { %7767 = vmatprep.subr.bf16.mxu0 %v16754_v15  ;;  %v7768_v7 = vpack.c.bf16 %v691_v47, %v690_v48  ;;  %v9960_v47 = vld [vmem:[%s16592_s0 + $0x10a] sm:$0xff] }
 0x16f   :  { %1253 = vmatmul.mubr.f32.gmra.mrb[22].mxu0 %v9861_v31 }
 0x170   :  { %1257 = vmatprep.mubr.f32.mxu0 %v9244_v51  ;;  %v9882_v51 = vld [vmem:[%s16592_s0 + $0x9a] sm:$0xff]  ;;  %7769 = vmatpush1.bf16.msra.mxu0 %v7768_v7  ;;  %v697_v7 = vld [vmem:[%s16591_s1 + $0x2e8] sm:$0xff] }
 0x171   :  { %7770 = vmatprep.subr.bf16.mxu0 %v16754_v15 }
 0x173   :  { %1258 = vmatmul.mubr.f32.gmra.mrb[24].mxu0 %v9869_v44 }
 0x174   :  { %1262 = vmatprep.mubr.f32.mxu0 %v9253_v53  ;;  %v9897_v53 = vld [vmem:[%s16592_s0 + $0xb2] sm:$0xff] }
 0x177   :  { %1263 = vmatmul.mubr.f32.gmra.mrb[26].mxu0 %v9882_v51 }
 0x178   :  { %1267 = vmatprep.mubr.f32.mxu0 %v9262_v55  ;;  %v9904_v55 = vld [vmem:[%s16592_s0 + $0xc2] sm:$0xff] }
 0x17b   :  { %1268 = vmatmul.mubr.f32.gmra.mrb[28].mxu0 %v9890_v56 }
 0x17c   :  { %1272 = vmatprep.mubr.f32.mxu0 %v9277_v59  ;;  %v692_v59 = vld [vmem:[%s16591_s1 + $0x2c0] sm:$0xff] }
 0x17d   :  { %v7771_v22 = vpack.c.bf16 %v693_v62, %v692_v59  ;;  %v9995_v62 = vld [vmem:[%s16592_s0 + $0x13a] sm:$0xff] }
 0x17f   :  { %1273 = vmatmul.mubr.f32.gmra.mrb[30].mxu0 %v9897_v53 }
 0x180   :  { %1277 = vmatprep.mubr.f32.mxu0 %v9287_v63  ;;  %v9917_v63 = vld [vmem:[%s16592_s0 + $0xca] sm:$0xff]  ;;  %7772 = vmatpush1.bf16.msra.mxu0 %v7771_v22  ;;  %v699_v22 = vld [vmem:[%s16591_s1 + $0x2f8] sm:$0xff] }
 0x181   :  { %7773 = vmatprep.subr.bf16.mxu0 %v16754_v15 }
 0x183   :  { %1278 = vmatmul.mubr.f32.gmra.mrb[32].mxu0 %v9904_v55 }
 0x184   :  { %1282 = vmatprep.mubr.f32.mxu0 %v9296_v2  ;;  %v9932_v2 = vld [vmem:[%s16592_s0 + $0xe2] sm:$0xff] }
 0x187   :  { %1283 = vmatmul.mubr.f32.gmra.mrb[34].mxu0 %v9917_v63 }
 0x188   :  { %1287 = vmatprep.mubr.f32.mxu0 %v9305_v5  ;;  %v9939_v5 = vld [vmem:[%s16592_s0 + $0xf2] sm:$0xff] }
 0x18b   :  { %1288 = vmatmul.mubr.f32.gmra.mrb[36].mxu0 %v9925_v38 }
 0x18c   :  { %1292 = vmatprep.mubr.f32.mxu0 %v9320_v10  ;;  %v694_v10 = vld [vmem:[%s16591_s1 + $0x2d0] sm:$0xff] }
 0x18d   :  { %v7774_v48 = vpack.c.bf16 %v695_v4, %v694_v10  ;;  %v6800_v4 = vld [vmem:[%s16592_s0 + $0x180] sm:$0xff] }
 0x18f   :  { %1293 = vmatmul.mubr.f32.gmra.mrb[38].mxu0 %v9932_v2 }
 0x190   :  { %1297 = vmatprep.mubr.f32.mxu0 %v9330_v13  ;;  %v9952_v13 = vld [vmem:[%s16592_s0 + $0xfa] sm:$0xff]  ;;  %7775 = vmatpush1.bf16.msra.mxu0 %v7774_v48  ;;  %v6801_v48 = vld [vmem:[%s16592_s0 + $0x188] sm:$0xff] }
 0x191   :  { %7776 = vmatprep.subr.bf16.mxu0 %v16754_v15 }
 0x193   :  { %1298 = vmatmul.mubr.f32.gmra.mrb[40].mxu0 %v9939_v5 }
 0x194   :  { %1302 = vmatprep.mubr.f32.mxu0 %v9339_v16  ;;  %v9967_v16 = vld [vmem:[%s16592_s0 + $0x112] sm:$0xff] }
 0x197   :  { %1303 = vmatmul.mubr.f32.gmra.mrb[42].mxu0 %v9952_v13 }
 0x198   :  { %1307 = vmatprep.mubr.f32.mxu0 %v9348_v18  ;;  %v9974_v18 = vld [vmem:[%s16592_s0 + $0x122] sm:$0xff] }
 0x19b   :  { %1308 = vmatmul.mubr.f32.gmra.mrb[44].mxu0 %v9960_v47 }
 0x19c   :  { %1312 = vmatprep.mubr.f32.mxu0 %v9363_v23  ;;  %v696_v23 = vld [vmem:[%s16591_s1 + $0x2e0] sm:$0xff] }
 0x19d   :  { %v7777_v59 = vpack.c.bf16 %v697_v7, %v696_v23  ;;  %v10041_v23 = vld [vmem:[%s16592_s0 + $0x172] sm:$0xff] }
 0x19e   :  { %v186_v7 = vld [vmem:[%s16592_s0 + $0x1b2] sm:$0xff] }
 0x19f   :  { %1313 = vmatmul.mubr.f32.gmra.mrb[46].mxu0 %v9967_v16 }
 0x1a0   :  { %1317 = vmatprep.mubr.f32.mxu0 %v9373_v27  ;;  %v9987_v27 = vld [vmem:[%s16592_s0 + $0x12a] sm:$0xff]  ;;  %7778 = vmatpush1.bf16.msra.mxu0 %v7777_v59  ;;  %v187_v59 = vld [vmem:[%s16592_s0 + $0x1ba] sm:$0xff] }
 0x1a1   :  { %7779 = vmatprep.subr.bf16.mxu0 %v16754_v15 }
 0x1a3   :  { %1318 = vmatmul.mubr.f32.gmra.mrb[48].mxu0 %v9974_v18 }
 0x1a4   :  { %1322 = vmatprep.mubr.f32.mxu0 %v9382_v30  ;;  %v10002_v30 = vld [vmem:[%s16592_s0 + $0x142] sm:$0xff] }
 0x1a7   :  { %1323 = vmatmul.mubr.f32.gmra.mrb[50].mxu0 %v9987_v27 }
 0x1a8   :  { %1327 = vmatprep.mubr.f32.mxu0 %v9391_v32  ;;  %v10009_v32 = vld [vmem:[%s16592_s0 + $0x152] sm:$0xff] }
 0x1ab   :  { %1328 = vmatmul.mubr.f32.gmra.mrb[52].mxu0 %v9995_v62 }
 0x1ac   :  { %1332 = vmatprep.mubr.f32.mxu0 %v9406_v37  ;;  %v698_v37 = vld [vmem:[%s16591_s1 + $0x2f0] sm:$0xff] }
 0x1ad   :  { %v7780_v10 = vpack.c.bf16 %v699_v22, %v698_v37  ;;  %v10056_v37 = vld [vmem:[%s16592_s0 + $0x1ca] sm:$0xff] }
 0x1ae   :  { %v16756_v22 = vld [vmem:[#allocation4_spill] sm:$0xff] }
 0x1af   :  { %1333 = vmatmul.mubr.f32.gmra.mrb[54].mxu0 %v10002_v30 }
 0x1b0   :  { %1337 = vmatprep.mubr.f32.mxu0 %v9416_v41  ;;  %v10022_v41 = vld [vmem:[%s16592_s0 + $0x15a] sm:$0xff]  ;;  %7781 = vmatpush1.bf16.msra.mxu0 %v7780_v10  ;;  %v16757_v10 = vld [vmem:[#allocation5_spill] sm:$0xff] }
 0x1b1   :  { %7782 = vmatprep.subr.bf16.mxu0 %v16754_v15 }
 0x1b3   :  { %1338 = vmatmul.mubr.f32.gmra.mrb[56].mxu0 %v10009_v32 }
 0x1b4   :  { %1342 = vmatprep.mubr.f32.mxu0 %v9425_v45  ;;  %v10032_v45 = vld [vmem:[%s16592_s0 + $0x16a] sm:$0xff] }
 0x1b7   :  { %1343 = vmatmul.mubr.f32.gmra.mrb[58].mxu0 %v10022_v41 }
 0x1b8   :  { %1347 = vmatprep.mubr.f32.mxu0 %v6800_v4  ;;  %v10238_v4 = vld [vmem:[%s16592_s0 + $0x302] sm:$0xff] }
 0x1bb   :  { %1348 = vmatmul.mubr.f32.gmra.mrb[60].mxu0 %v10032_v45 }
 0x1bc   :  { %1352 = vmatprep.mubr.f32.mxu0 %v6801_v48  ;;  %v16759_v48 = vld [vmem:[#allocation6_spill] sm:$0xff] }
 0x1bf   :  { %1353 = vmatmul.mubr.f32.gmra.mrb[62].mxu0 %v10041_v23 }
 0x1c0   :  { %1357 = vmatprep.mubr.f32.mxu0 %v9446_v54  ;;  %v10063_v54 = vld [vmem:[%s16592_s0 + $0x1d2] sm:$0xff] }
 0x1c3   :  { %1358 = vmatmul.mubr.f32.gmra.mrb[64].mxu0 %v186_v7  ;;  %v10245_v7 = vld [vmem:[%s16592_s0 + $0x30a] sm:$0xff] }
 0x1c4   :  { %1362 = vmatprep.mubr.f32.mxu0 %v9455_v57  ;;  %v10070_v57 = vld [vmem:[%s16592_s0 + $0x1e2] sm:$0xff]  ;;  %16760 = vst [vmem:[#allocation4_spill] sm:$0xff] %v10245_v7 }
 0x1c7   :  { %1363 = vmatmul.mubr.f32.gmra.mrb[66].mxu0 %v187_v59  ;;  %v6832_v59 = vld [vmem:[%s16592_s0 + $0x330] sm:$0xff] }
 0x1c8   :  { %1367 = vmatprep.mubr.f32.mxu0 %v9464_v60  ;;  %v10077_v60 = vld [vmem:[%s16592_s0 + $0x1ea] sm:$0xff] }
 0x1cb   :  { %1368 = vmatmul.mubr.f32.gmra.mrb[68].mxu0 %v10056_v37 }
 0x1cc   :  { %1372 = vmatprep.mubr.f32.mxu0 %v9473_v1  ;;  %v10084_v1 = vld [vmem:[%s16592_s0 + $0x1fa] sm:$0xff] }
 0x1cf   :  { %1373 = vmatmul.mubr.f32.gmra.mrb[70].mxu0 %v10063_v54 }
 0x1d0   :  { %1377 = vmatprep.mubr.f32.mxu0 %v9482_v6  ;;  %v10091_v6 = vld [vmem:[%s16592_s0 + $0x202] sm:$0xff] }
 0x1d3   :  { %1378 = vmatmul.mubr.f32.gmra.mrb[72].mxu0 %v10070_v57 }
 0x1d4   :  { %1382 = vmatprep.mubr.f32.mxu0 %v9491_v8  ;;  %v10098_v8 = vld [vmem:[%s16592_s0 + $0x212] sm:$0xff] }
 0x1d7   :  { %1383 = vmatmul.mubr.f32.gmra.mrb[74].mxu0 %v10077_v60 }
 0x1d8   :  { %1387 = vmatprep.mubr.f32.mxu0 %v9500_v12  ;;  %v10105_v12 = vld [vmem:[%s16592_s0 + $0x21a] sm:$0xff] }
 0x1db   :  { %1388 = vmatmul.mubr.f32.gmra.mrb[76].mxu0 %v10084_v1 }
 0x1dc   :  { %1392 = vmatprep.mubr.f32.mxu0 %v9509_v17  ;;  %v10112_v17 = vld [vmem:[%s16592_s0 + $0x22a] sm:$0xff] }
 0x1df   :  { %1393 = vmatmul.mubr.f32.gmra.mrb[78].mxu0 %v10091_v6 }
 0x1e0   :  { %1397 = vmatprep.mubr.f32.mxu0 %v9518_v21  ;;  %v10119_v21 = vld [vmem:[%s16592_s0 + $0x232] sm:$0xff] }
 0x1e3   :  { %1398 = vmatmul.mubr.f32.gmra.mrb[80].mxu0 %v10098_v8 }
 0x1e4   :  { %1402 = vmatprep.mubr.f32.mxu0 %v9527_v25  ;;  %v10126_v25 = vld [vmem:[%s16592_s0 + $0x242] sm:$0xff] }
 0x1e7   :  { %1403 = vmatmul.mubr.f32.gmra.mrb[82].mxu0 %v10105_v12 }
 0x1e8   :  { %1407 = vmatprep.mubr.f32.mxu0 %v9536_v28  ;;  %v10133_v28 = vld [vmem:[%s16592_s0 + $0x24a] sm:$0xff] }
 0x1eb   :  { %1408 = vmatmul.mubr.f32.gmra.mrb[84].mxu0 %v10112_v17 }
 0x1ec   :  { %1412 = vmatprep.mubr.f32.mxu0 %v9545_v33  ;;  %v10140_v33 = vld [vmem:[%s16592_s0 + $0x25a] sm:$0xff] }
 0x1ef   :  { %1413 = vmatmul.mubr.f32.gmra.mrb[86].mxu0 %v10119_v21 }
 0x1f0   :  { %1417 = vmatprep.mubr.f32.mxu0 %v9554_v36  ;;  %v10147_v36 = vld [vmem:[%s16592_s0 + $0x262] sm:$0xff] }
 0x1f3   :  { %1418 = vmatmul.mubr.f32.gmra.mrb[88].mxu0 %v10126_v25 }
 0x1f4   :  { %1422 = vmatprep.mubr.f32.mxu0 %v9563_v40  ;;  %v10154_v40 = vld [vmem:[%s16592_s0 + $0x272] sm:$0xff] }
 0x1f7   :  { %1423 = vmatmul.mubr.f32.gmra.mrb[90].mxu0 %v10133_v28 }
 0x1f8   :  { %1427 = vmatprep.mubr.f32.mxu0 %v9572_v46  ;;  %v10161_v46 = vld [vmem:[%s16592_s0 + $0x27a] sm:$0xff] }
 0x1fb   :  { %1428 = vmatmul.mubr.f32.gmra.mrb[92].mxu0 %v10140_v33 }
 0x1fc   :  { %1432 = vmatprep.mubr.f32.mxu0 %v9581_v49  ;;  %v10168_v49 = vld [vmem:[%s16592_s0 + $0x28a] sm:$0xff] }
 0x1ff   :  { %1433 = vmatmul.mubr.f32.gmra.mrb[94].mxu0 %v10147_v36 }
 0x200   :  { %1437 = vmatprep.mubr.f32.mxu0 %v9590_v52  ;;  %v10175_v52 = vld [vmem:[%s16592_s0 + $0x292] sm:$0xff] }
 0x203   :  { %1438 = vmatmul.mubr.f32.gmra.mrb[96].mxu0 %v10154_v40 }
 0x204   :  { %1442 = vmatprep.mubr.f32.mxu0 %v9599_v58  ;;  %v10182_v58 = vld [vmem:[%s16592_s0 + $0x2a2] sm:$0xff] }
 0x207   :  { %1443 = vmatmul.mubr.f32.gmra.mrb[98].mxu0 %v10161_v46 }
 0x208   :  { %1447 = vmatprep.mubr.f32.mxu0 %v9608_v3  ;;  %v10189_v3 = vld [vmem:[%s16592_s0 + $0x2aa] sm:$0xff] }
 0x20b   :  { %1448 = vmatmul.mubr.f32.gmra.mrb[100].mxu0 %v10168_v49 }
 0x20c   :  { %1452 = vmatprep.mubr.f32.mxu0 %v9617_v11  ;;  %v10196_v11 = vld [vmem:[%s16592_s0 + $0x2ba] sm:$0xff] }
 0x20f   :  { %1453 = vmatmul.mubr.f32.gmra.mrb[102].mxu0 %v10175_v52 }
 0x210   :  { %1457 = vmatprep.mubr.f32.mxu0 %v9626_v20  ;;  %v10203_v20 = vld [vmem:[%s16592_s0 + $0x2c2] sm:$0xff] }
 0x213   :  { %1458 = vmatmul.mubr.f32.gmra.mrb[104].mxu0 %v10182_v58 }
 0x214   :  { %1462 = vmatprep.mubr.f32.mxu0 %v9635_v26  ;;  %v10210_v26 = vld [vmem:[%s16592_s0 + $0x2d2] sm:$0xff] }
 0x217   :  { %1463 = vmatmul.mubr.f32.gmra.mrb[106].mxu0 %v10189_v3 }
 0x218   :  { %1467 = vmatprep.mubr.f32.mxu0 %v9644_v35  ;;  %v10217_v35 = vld [vmem:[%s16592_s0 + $0x2da] sm:$0xff] }
 0x21b   :  { %1468 = vmatmul.mubr.f32.gmra.mrb[108].mxu0 %v10196_v11 }
 0x21c   :  { %1472 = vmatprep.mubr.f32.mxu0 %v9653_v43  ;;  %v16755_v43 = vld [vmem:[#allocation3_spill] sm:$0xff] }
 0x21d   :  { %16758 = vst [vmem:[#allocation3_spill] sm:$0xff] %v10238_v4 }
 0x21f   :  { %1473 = vmatmul.mubr.f32.gmra.mrb[110].mxu0 %v10203_v20 }
 0x220   :  { %1477 = vmatprep.mubr.f32.mxu0 %v9662_v50  ;;  %v10224_v50 = vld [vmem:[%s16592_s0 + $0x2ea] sm:$0xff] }
 0x223   :  { %1478 = vmatmul.mubr.f32.gmra.mrb[112].mxu0 %v10210_v26 }
 0x224   :  { %1482 = vmatprep.mubr.f32.mxu0 %v9671_v61  ;;  %v10231_v61 = vld [vmem:[%s16592_s0 + $0x2f2] sm:$0xff] }
 0x227   :  { %1483 = vmatmul.mubr.f32.gmra.mrb[114].mxu0 %v10217_v35 }
 0x228   :  { %1487 = vmatprep.mubr.f32.mxu0 %v16755_v43  ;;  %v10254_v43 = vld [vmem:[%s16592_s0 + $0x31a] sm:$0xff] }
 0x229   :  { %16761 = vst [vmem:[#allocation5_spill] sm:$0xff] %v10254_v43 }
 0x22b   :  { %1488 = vmatmul.mubr.f32.gmra.mrb[116].mxu0 %v10224_v50 }
 0x22c   :  { %1492 = vmatprep.mubr.f32.mxu0 %v16756_v22  ;;  %v6833_v22 = vld [vmem:[%s16592_s0 + $0x338] sm:$0xff] }
 0x22f   :  { %1493 = vmatmul.mubr.f32.gmra.mrb[118].mxu0 %v10231_v61 }
 0x230   :  { %1497 = vmatprep.mubr.f32.mxu0 %v16757_v10  ;;  %v10263_v10 = vld [vmem:[%s16592_s0 + $0x322] sm:$0xff] }
 0x231   :  { %16762 = vst [vmem:[#allocation6_spill] sm:$0xff] %v10263_v10 }
 0x233   :  { %1498 = vmatmul.mubr.f32.gmra.mrb[120].mxu0 %v10238_v4  ;;  %v703_v4 = vld [vmem:[%s16591_s1 + $0x318] sm:$0xff] }
 0x234   :  { %1502 = vmatprep.mubr.f32.mxu0 %v16759_v48  ;;  %v700_v48 = vld [vmem:[%s16591_s1 + $0x300] sm:$0xff] }
 0x237   :  { %1503 = vmatmul.mubr.f32.gmra.mrb[122].mxu0 %v10245_v7  ;;  %v702_v7 = vld [vmem:[%s16591_s1 + $0x310] sm:$0xff] }
 0x238   :  { %1507 = vmatprep.mubr.f32.mxu0 %v6832_v59  ;;  %v701_v59 = vld [vmem:[%s16591_s1 + $0x308] sm:$0xff] }
 0x23b   :  { %1508 = vmatmul.mubr.f32.gmra.mrb[124].mxu0 %v10254_v43  ;;  %v7783_v43 = vpack.c.bf16 %v701_v59, %v700_v48  ;;  %v704_v48 = vld [vmem:[%s16591_s1 + $0x320] sm:$0xff]  ;;  %v705_v59 = vld [vmem:[%s16591_s1 + $0x328] sm:$0xff] }
 0x23c   :  { %1512 = vmatprep.mubr.f32.mxu0 %v6833_v22  ;;  %v6834_v22 = vld [vmem:[%s16592_s0 + $0x19] sm:$0xff] }
 0x23f   :  { %1513 = vmatmul.mubr.f32.gmra.mrb[126].mxu0 %v10263_v10  ;;  %v7786_v10 = vpack.c.bf16 %v703_v4, %v702_v7  ;;  %v7789_v4 = vpack.c.bf16 %v705_v59, %v704_v48  ;;  %v706_v7 = vld [vmem:[%s16591_s1 + $0x330] sm:$0xff] }
 0x240   :  { %1582 = vmatprep.mubr.f32.mxu0 %v9741_v0  ;;  %v6835_v0 = vld [vmem:[%s16592_s0 + $0x21] sm:$0xff]  ;;  %v710_v59 = vld [vmem:[%s16591_s1 + $0x350] sm:$0xff] }
 0x243   :  { %1583 = vmatmul.mubr.f32.vlgmr.msra.gmra.mrb[0].mxu0 %v6834_v22  ;;  %v708_v22 = vld [vmem:[%s16591_s1 + $0x340] sm:$0xff] }
 0x244   :  { %7784 = vmatpush1.bf16.msra.mxu0 %v7783_v43  ;;  %1587 = vmatprep.mubr.f32.mxu0 %v9755_v9  ;;  %v10297_v9 = vld [vmem:[%s16592_s0 + $0x31] sm:$0xff] }
 0x245   :  { %7785 = vmatprep.subr.bf16.mxu0 %v16754_v15  ;;  %v707_v43 = vld [vmem:[%s16591_s1 + $0x338] sm:$0xff] }
 0x247   :  { %1588 = vmatmul.mubr.f32.gmra.mrb[2].mxu0 %v6835_v0  ;;  %v709_v0 = vld [vmem:[%s16591_s1 + $0x348] sm:$0xff] }
 0x248   :  { %1592 = vmatprep.mubr.f32.mxu0 %v9769_v14  ;;  %7787 = vmatpush1.bf16.msra.mxu0 %v7786_v10  ;;  %v10311_v14 = vld [vmem:[%s16592_s0 + $0x39] sm:$0xff]  ;;  %v7792_v10 = vpack.c.bf16 %v707_v43, %v706_v7  ;;  %v7795_v48 = vpack.c.bf16 %v709_v0, %v708_v22  ;;  %v714_v0 = vld [vmem:[%s16591_s1 + $0x370] sm:$0xff] }
 0x249   :  { %7788 = vmatprep.subr.bf16.mxu0 %v16754_v15  ;;  %v712_v43 = vld [vmem:[%s16591_s1 + $0x360] sm:$0xff] }
 0x24b   :  { %1593 = vmatmul.mubr.f32.gmra.mrb[4].mxu0 %v10297_v9 }
 0x24c   :  { %1597 = vmatprep.mubr.f32.mxu0 %v9783_v19  ;;  %7790 = vmatpush1.bf16.msra.mxu0 %v7789_v4  ;;  %v10325_v19 = vld [vmem:[%s16592_s0 + $0x49] sm:$0xff]  ;;  %v711_v4 = vld [vmem:[%s16591_s1 + $0x358] sm:$0xff] }
 0x24d   :  { %7791 = vmatprep.subr.bf16.mxu0 %v16754_v15  ;;  %v7798_v7 = vpack.c.bf16 %v711_v4, %v710_v59  ;;  %v716_v4 = vld [vmem:[%s16591_s1 + $0x380] sm:$0xff] }
 0x24f   :  { %1598 = vmatmul.mubr.f32.gmra.mrb[6].mxu0 %v10311_v14 }
 0x250   :  { %1602 = vmatprep.mubr.f32.mxu0 %v9797_v24  ;;  %7793 = vmatpush1.bf16.msra.mxu0 %v7792_v10  ;;  %v10339_v24 = vld [vmem:[%s16592_s0 + $0x51] sm:$0xff]  ;;  %v713_v10 = vld [vmem:[%s16591_s1 + $0x368] sm:$0xff] }
 0x251   :  { %7794 = vmatprep.subr.bf16.mxu0 %v16754_v15  ;;  %v7801_v22 = vpack.c.bf16 %v713_v10, %v712_v43  ;;  %v718_v10 = vld [vmem:[%s16591_s1 + $0x390] sm:$0xff] }
 0x253   :  { %1603 = vmatmul.mubr.f32.gmra.mrb[8].mxu0 %v10325_v19 }
 0x254   :  { %1607 = vmatprep.mubr.f32.mxu0 %v9811_v29  ;;  %7796 = vmatpush1.bf16.msra.mxu0 %v7795_v48  ;;  %v10353_v29 = vld [vmem:[%s16592_s0 + $0x61] sm:$0xff]  ;;  %v715_v48 = vld [vmem:[%s16591_s1 + $0x378] sm:$0xff] }
 0x255   :  { %7797 = vmatprep.subr.bf16.mxu0 %v16754_v15  ;;  %v7804_v59 = vpack.c.bf16 %v715_v48, %v714_v0  ;;  %v720_v48 = vld [vmem:[%s16591_s1 + $0x3a0] sm:$0xff] }
 0x257   :  { %1608 = vmatmul.mubr.f32.gmra.mrb[10].mxu0 %v10339_v24 }
 0x258   :  { %1612 = vmatprep.mubr.f32.mxu0 %v9825_v34  ;;  %7799 = vmatpush1.bf16.msra.mxu0 %v7798_v7  ;;  %v10367_v34 = vld [vmem:[%s16592_s0 + $0x69] sm:$0xff] }
 0x259   :  { %7800 = vmatprep.subr.bf16.mxu0 %v16754_v15  ;;  %v717_v7 = vld [vmem:[%s16591_s1 + $0x388] sm:$0xff] }
 0x25a   :  { %v7807_v43 = vpack.c.bf16 %v717_v7, %v716_v4  ;;  %v10417_v7 = vld [vmem:[%s16592_s0 + $0x99] sm:$0xff] }
 0x25b   :  { %1613 = vmatmul.mubr.f32.gmra.mrb[12].mxu0 %v10353_v29 }
 0x25c   :  { %1617 = vmatprep.mubr.f32.mxu0 %v9839_v39  ;;  %7802 = vmatpush1.bf16.msra.mxu0 %v7801_v22  ;;  %v10381_v39 = vld [vmem:[%s16592_s0 + $0x79] sm:$0xff] }
 0x25d   :  { %7803 = vmatprep.subr.bf16.mxu0 %v16754_v15  ;;  %v719_v22 = vld [vmem:[%s16591_s1 + $0x398] sm:$0xff] }
 0x25e   :  { %v7810_v0 = vpack.c.bf16 %v719_v22, %v718_v10  ;;  %v10446_v22 = vld [vmem:[%s16592_s0 + $0xc1] sm:$0xff] }
 0x25f   :  { %1618 = vmatmul.mubr.f32.gmra.mrb[14].mxu0 %v10367_v34 }
 0x260   :  { %1622 = vmatprep.mubr.f32.mxu0 %v9853_v42  ;;  %7805 = vmatpush1.bf16.msra.mxu0 %v7804_v59  ;;  %v10395_v42 = vld [vmem:[%s16592_s0 + $0x81] sm:$0xff] }
 0x261   :  { %7806 = vmatprep.subr.bf16.mxu0 %v16754_v15  ;;  %v721_v59 = vld [vmem:[%s16591_s1 + $0x3a8] sm:$0xff] }
 0x262   :  { %v7813_v4 = vpack.c.bf16 %v721_v59, %v720_v48  ;;  %v10481_v59 = vld [vmem:[%s16592_s0 + $0xf1] sm:$0xff] }
 0x263   :  { %1623 = vmatmul.mubr.f32.gmra.mrb[16].mxu0 %v10381_v39 }
 0x264   :  { %1627 = vmatprep.mubr.f32.mxu0 %v9861_v31  ;;  %7808 = vmatpush1.bf16.msra.mxu0 %v7807_v43  ;;  %v10409_v31 = vld [vmem:[%s16592_s0 + $0x91] sm:$0xff] }
 0x265   :  { %7809 = vmatprep.subr.bf16.mxu0 %v16754_v15  ;;  %v723_v43 = vld [vmem:[%s16591_s1 + $0x3b8] sm:$0xff] }
 0x267   :  { %1628 = vmatmul.mubr.f32.gmra.mrb[18].mxu0 %v10395_v42 }
 0x268   :  { %1632 = vmatprep.mubr.f32.mxu0 %v9869_v44  ;;  %7811 = vmatpush1.bf16.msra.mxu0 %v7810_v0  ;;  %v10425_v44 = vld [vmem:[%s16592_s0 + $0xa9] sm:$0xff] }
 0x269   :  { %7812 = vmatprep.subr.bf16.mxu0 %v16754_v15  ;;  %v725_v0 = vld [vmem:[%s16591_s1 + $0x3c8] sm:$0xff] }
 0x26b   :  { %1633 = vmatmul.mubr.f32.gmra.mrb[20].mxu0 %v10409_v31 }
 0x26c   :  { %1637 = vmatprep.mubr.f32.mxu0 %v9882_v51  ;;  %7814 = vmatpush1.bf16.msra.mxu0 %v7813_v4  ;;  %v722_v51 = vld [vmem:[%s16591_s1 + $0x3b0] sm:$0xff]  ;;  %v727_v4 = vld [vmem:[%s16591_s1 + $0x3d8] sm:$0xff] }
 0x26d   :  { %7815 = vmatprep.subr.bf16.mxu0 %v16754_v15  ;;  %v7816_v10 = vpack.c.bf16 %v723_v43, %v722_v51  ;;  %v10516_v43 = vld [vmem:[%s16592_s0 + $0x121] sm:$0xff] }
 0x26f   :  { %1638 = vmatmul.mubr.f32.gmra.mrb[22].mxu0 %v10417_v7 }
 0x270   :  { %1642 = vmatprep.mubr.f32.mxu0 %v9890_v56  ;;  %v10438_v56 = vld [vmem:[%s16592_s0 + $0xb1] sm:$0xff]  ;;  %7817 = vmatpush1.bf16.msra.mxu0 %v7816_v10  ;;  %v733_v10 = vld [vmem:[%s16591_s1 + $0x408] sm:$0xff] }
 0x271   :  { %7818 = vmatprep.subr.bf16.mxu0 %v16754_v15 }
 0x273   :  { %1643 = vmatmul.mubr.f32.gmra.mrb[24].mxu0 %v10425_v44 }
 0x274   :  { %1647 = vmatprep.mubr.f32.mxu0 %v9897_v53  ;;  %v10453_v53 = vld [vmem:[%s16592_s0 + $0xc9] sm:$0xff] }
 0x277   :  { %1648 = vmatmul.mubr.f32.gmra.mrb[26].mxu0 %v10438_v56 }
 0x278   :  { %1652 = vmatprep.mubr.f32.mxu0 %v9904_v55  ;;  %v10460_v55 = vld [vmem:[%s16592_s0 + $0xd9] sm:$0xff] }
 0x27b   :  { %1653 = vmatmul.mubr.f32.gmra.mrb[28].mxu0 %v10446_v22 }
 0x27c   :  { %1657 = vmatprep.mubr.f32.mxu0 %v9917_v63  ;;  %v724_v63 = vld [vmem:[%s16591_s1 + $0x3c0] sm:$0xff] }
 0x27d   :  { %v7819_v48 = vpack.c.bf16 %v725_v0, %v724_v63  ;;  %v728_v0 = vld [vmem:[%s16591_s1 + $0x3e0] sm:$0xff] }
 0x27f   :  { %1658 = vmatmul.mubr.f32.gmra.mrb[30].mxu0 %v10453_v53 }
 0x280   :  { %1662 = vmatprep.mubr.f32.mxu0 %v9925_v38  ;;  %v10473_v38 = vld [vmem:[%s16592_s0 + $0xe1] sm:$0xff]  ;;  %7820 = vmatpush1.bf16.msra.mxu0 %v7819_v48 }
 0x281   :  { %7821 = vmatprep.subr.bf16.mxu0 %v16754_v15  ;;  %v729_v48 = vld [vmem:[%s16591_s1 + $0x3e8] sm:$0xff] }
 0x283   :  { %1663 = vmatmul.mubr.f32.gmra.mrb[32].mxu0 %v10460_v55 }
 0x284   :  { %1667 = vmatprep.mubr.f32.mxu0 %v9932_v2  ;;  %v10488_v2 = vld [vmem:[%s16592_s0 + $0xf9] sm:$0xff] }
 0x287   :  { %1668 = vmatmul.mubr.f32.gmra.mrb[34].mxu0 %v10473_v38 }
 0x288   :  { %1672 = vmatprep.mubr.f32.mxu0 %v9939_v5  ;;  %v10495_v5 = vld [vmem:[%s16592_s0 + $0x109] sm:$0xff] }
 0x28b   :  { %1673 = vmatmul.mubr.f32.gmra.mrb[36].mxu0 %v10481_v59 }
 0x28c   :  { %1677 = vmatprep.mubr.f32.mxu0 %v9952_v13  ;;  %v726_v13 = vld [vmem:[%s16591_s1 + $0x3d0] sm:$0xff] }
 0x28d   :  { %v7822_v51 = vpack.c.bf16 %v727_v4, %v726_v13  ;;  %v10552_v13 = vld [vmem:[%s16592_s0 + $0x141] sm:$0xff]  ;;  %v7825_v4 = vpack.c.bf16 %v729_v48, %v728_v0  ;;  %v738_v48 = vld [vmem:[%s16591_s1 + $0x430] sm:$0xff] }
 0x28f   :  { %1678 = vmatmul.mubr.f32.gmra.mrb[38].mxu0 %v10488_v2 }
 0x290   :  { %1682 = vmatprep.mubr.f32.mxu0 %v9960_v47  ;;  %v10508_v47 = vld [vmem:[%s16592_s0 + $0x111] sm:$0xff]  ;;  %7823 = vmatpush1.bf16.msra.mxu0 %v7822_v51 }
 0x291   :  { %7824 = vmatprep.subr.bf16.mxu0 %v16754_v15  ;;  %v735_v51 = vld [vmem:[%s16591_s1 + $0x418] sm:$0xff] }
 0x293   :  { %1683 = vmatmul.mubr.f32.gmra.mrb[40].mxu0 %v10495_v5 }
 0x294   :  { %1687 = vmatprep.mubr.f32.mxu0 %v9967_v16  ;;  %v10523_v16 = vld [vmem:[%s16592_s0 + $0x129] sm:$0xff]  ;;  %7826 = vmatpush1.bf16.msra.mxu0 %v7825_v4 }
 0x295   :  { %7827 = vmatprep.subr.bf16.mxu0 %v16754_v15 }
 0x297   :  { %1688 = vmatmul.mubr.f32.gmra.mrb[42].mxu0 %v10508_v47 }
 0x298   :  { %1692 = vmatprep.mubr.f32.mxu0 %v9974_v18  ;;  %v732_v18 = vld [vmem:[%s16591_s1 + $0x400] sm:$0xff] }
 0x299   :  { %v7830_v63 = vpack.c.bf16 %v733_v10, %v732_v18  ;;  %v736_v10 = vld [vmem:[%s16591_s1 + $0x420] sm:$0xff] }
 0x29b   :  { %1693 = vmatmul.mubr.f32.gmra.mrb[44].mxu0 %v10516_v43  ;;  %7831 = vmatprep.subr.bf16.mxu1 %v7830_v63 }
 0x29c   :  { %1697 = vmatprep.mubr.f32.mxu0 %v9987_v27  ;;  %v10536_v27 = vld [vmem:[%s16592_s0 + $0x139] sm:$0xff]  ;;  %7833 = vmatpush3.bf16.msra.mxu1 %v7830_v63  ;;  %v10568_v63 = vld [vmem:[%s16592_s0 + $0x151] sm:$0xff] }
 0x29f   :  { %1698 = vmatmul.mubr.f32.gmra.mrb[46].mxu0 %v10523_v16 }
 0x2a0   :  { %1702 = vmatprep.mubr.f32.mxu0 %v9995_v62  ;;  %v734_v62 = vld [vmem:[%s16591_s1 + $0x410] sm:$0xff] }
 0x2a1   :  { %v7834_v18 = vpack.c.bf16 %v735_v51, %v734_v62  ;;  %v10582_v62 = vld [vmem:[%s16592_s0 + $0x159] sm:$0xff] }
 0x2a2   :  { %v740_v51 = vld [vmem:[%s16591_s1 + $0x440] sm:$0xff] }
 0x2a3   :  { %1703 = vmatmul.mubr.f32.gmra.mrb[48].mxu0 %v10536_v27  ;;  %7835 = vmatprep.subr.bf16.mxu1 %v7834_v18 }
 0x2a4   :  { %1707 = vmatprep.mubr.f32.mxu0 %v10002_v30  ;;  %v737_v30 = vld [vmem:[%s16591_s1 + $0x428] sm:$0xff]  ;;  %7837 = vmatpush3.bf16.msra.mxu1 %v7834_v18 }
 0x2a5   :  { %v7838_v0 = vpack.c.bf16 %v737_v30, %v736_v10  ;;  %v741_v18 = vld [vmem:[%s16591_s1 + $0x448] sm:$0xff]  ;;  %v730_v30 = vld [vmem:[%s16591_s1 + $0x3f0] sm:$0xff] }
 0x2a6   :  { %v7846_v10 = vpack.c.bf16 %v741_v18, %v740_v51  ;;  %v10619_v51 = vld [vmem:[%s16592_s0 + $0x182] sm:$0xff] }
 0x2a7   :  { %1708 = vmatmul.mubr.f32.gmra.mrb[50].mxu0 %v10552_v13  ;;  %7839 = vmatprep.subr.bf16.mxu1 %v7838_v0 }
 0x2a8   :  { %1712 = vmatprep.mubr.f32.mxu0 %v10009_v32  ;;  %v739_v32 = vld [vmem:[%s16591_s1 + $0x438] sm:$0xff]  ;;  %7841 = vmatpush3.bf16.msra.mxu1 %v7838_v0 }
 0x2a9   :  { %v7842_v4 = vpack.c.bf16 %v739_v32, %v738_v48  ;;  %v731_v0 = vld [vmem:[%s16591_s1 + $0x3f8] sm:$0xff] }
 0x2aa   :  { %v10611_v48 = vld [vmem:[%s16592_s0 + $0x171] sm:$0xff]  ;;  %v7828_v32 = vpack.c.bf16 %v731_v0, %v730_v30  ;;  %v10632_v30 = vld [vmem:[%s16592_s0 + $0x181] sm:$0xff] }
 0x2ab   :  { %1713 = vmatmul.mubr.f32.gmra.mrb[52].mxu0 %v10568_v63  ;;  %7843 = vmatprep.subr.bf16.mxu1 %v7842_v4  ;;  %16763 = vst [vmem:[#allocation7_spill] sm:$0xff] %v10611_v48  ;;  %16764 = vst [vmem:[#allocation8_spill] sm:$0xff] %v10632_v30 }
 0x2ac   :  { %1717 = vmatprep.mubr.f32.mxu0 %v10022_v41  ;;  %v10595_v41 = vld [vmem:[%s16592_s0 + $0x169] sm:$0xff]  ;;  %7845 = vmatpush3.bf16.msra.mxu1 %v7842_v4  ;;  %v743_v4 = vld [vmem:[%s16591_s1 + $0x458] sm:$0xff] }
 0x2ad   :  { %7847 = vmatprep.subr.bf16.mxu1 %v7846_v10  ;;  %7829 = vmatpush1.bf16.msra.mxu0 %v7828_v32  ;;  %v746_v32 = vld [vmem:[%s16591_s1 + $0x470] sm:$0xff] }
 0x2af   :  { %1718 = vmatmul.mubr.f32.gmra.mrb[54].mxu0 %v10582_v62 }
 0x2b0   :  { %1722 = vmatprep.mubr.f32.mxu0 %v10032_v45  ;;  %v742_v45 = vld [vmem:[%s16591_s1 + $0x450] sm:$0xff]  ;;  %7849 = vmatpush3.bf16.msra.mxu1 %v7846_v10  ;;  %v745_v10 = vld [vmem:[%s16591_s1 + $0x468] sm:$0xff] }
 0x2b1   :  { %v7850_v18 = vpack.c.bf16 %v743_v4, %v742_v45  ;;  %v10637_v45 = vld [vmem:[%s16592_s0 + $0x18a] sm:$0xff]  ;;  %v747_v4 = vld [vmem:[%s16591_s1 + $0x478] sm:$0xff] }
 0x2b3   :  { %1723 = vmatmul.mubr.f32.gmra.mrb[56].mxu0 %v10595_v41  ;;  %7851 = vmatprep.subr.bf16.mxu1 %v7850_v18 }
 0x2b4   :  { %1727 = vmatprep.mubr.f32.mxu0 %v10041_v23  ;;  %v744_v23 = vld [vmem:[%s16591_s1 + $0x460] sm:$0xff]  ;;  %7853 = vmatpush3.bf16.msra.mxu1 %v7850_v18  ;;  %v10650_v18 = vld [vmem:[%s16592_s0 + $0x189] sm:$0xff] }
 0x2b5   :  { %v7854_v0 = vpack.c.bf16 %v745_v10, %v744_v23  ;;  %v7858_v23 = vpack.c.bf16 %v747_v4, %v746_v32  ;;  %v7090_v10 = vld [vmem:[%s16592_s0 + $0x32] sm:$0xff]  ;;  %v10675_v32 = vld [vmem:[%s16592_s0 + $0x1e1] sm:$0xff] }
 0x2b6   :  { %7414 = vmatprep.mubr.f32.mxu1 %v7090_v10  ;;  %v10705_v4 = vld [vmem:[%s16592_s0 + $0x201] sm:$0xff]  ;;  %v10725_v10 = vld [vmem:[%s16592_s0 + $0x219] sm:$0xff] }
 0x2b7   :  { %1728 = vmatmul.mubr.f32.gmra.mrb[58].mxu0 %v10611_v48  ;;  %7855 = vmatprep.subr.bf16.mxu1 %v7854_v0  ;;  %v7091_v48 = vld [vmem:[%s16592_s0 + $0x3a] sm:$0xff] }
 0x2b8   :  { %1732 = vmatprep.mubr.f32.mxu0 %v10619_v51  ;;  %7857 = vmatpush3.bf16.msra.mxu1 %v7854_v0  ;;  %v7092_v0 = vld [vmem:[%s16592_s0 + $0x4a] sm:$0xff] }
 0x2b9   :  { %7859 = vmatprep.subr.bf16.mxu1 %v7858_v23 }
 0x2bb   :  { %1733 = vmatmul.mubr.f32.gmra.mrb[60].mxu0 %v10632_v30  ;;  %v6866_v30 = vld [vmem:[%s16592_s0 + $0x1c9] sm:$0xff] }
 0x2bc   :  { %1737 = vmatprep.mubr.f32.mxu0 %v10637_v45  ;;  %7861 = vmatpush3.bf16.msra.mxu1 %v7858_v23  ;;  %v10715_v23 = vld [vmem:[%s16592_s0 + $0x211] sm:$0xff] }
 0x2bd   :  { %7862 = vmatprep.subr.bf16.mxu1 %v16754_v15 }
 0x2bf   :  { %1738 = vmatmul.mubr.f32.gmra.mrb[62].mxu0 %v10650_v18  ;;  %7415 = vmatmul.mubr.f32.vlgmr.msra.gmra.mrb[0].mxu1 %v7091_v48  ;;  %v10685_v48 = vld [vmem:[%s16592_s0 + $0x1e9] sm:$0xff] }
 0x2c0   :  { %1742 = vmatprep.mubr.f32.mxu0 %v10056_v37  ;;  %v6867_v37 = vld [vmem:[%s16592_s0 + $0x1d1] sm:$0xff]  ;;  %7417 = vmatprep.mubr.f32.mxu1 %v7092_v0 }
 0x2c1   :  { %v10745_v0 = vld [vmem:[%s16592_s0 + $0x231] sm:$0xff] }
 0x2c3   :  { %1743 = vmatmul.mubr.f32.gmra.mrb[64].mxu0 %v6866_v30  ;;  %v10695_v30 = vld [vmem:[%s16592_s0 + $0x1f9] sm:$0xff] }
 0x2c4   :  { %1747 = vmatprep.mubr.f32.mxu0 %v10063_v54  ;;  %v7093_v54 = vld [vmem:[%s16592_s0 + $0x52] sm:$0xff] }
 0x2c5   :  { %7418 = vmatmul.mubr.f32.gmra.mrb[2].mxu1 %v7093_v54  ;;  %v10755_v54 = vld [vmem:[%s16592_s0 + $0x241] sm:$0xff] }
 0x2c7   :  { %1748 = vmatmul.mubr.f32.gmra.mrb[66].mxu0 %v6867_v37  ;;  %v10735_v37 = vld [vmem:[%s16592_s0 + $0x229] sm:$0xff] }
 0x2c8   :  { %1752 = vmatprep.mubr.f32.mxu0 %v10070_v57  ;;  %v7094_v57 = vld [vmem:[%s16592_s0 + $0x62] sm:$0xff] }
 0x2c9   :  { %7420 = vmatprep.mubr.f32.mxu1 %v7094_v57  ;;  %v10765_v57 = vld [vmem:[%s16592_s0 + $0x249] sm:$0xff] }
 0x2cb   :  { %1753 = vmatmul.mubr.f32.gmra.mrb[68].mxu0 %v10675_v32 }
 0x2cc   :  { %1757 = vmatprep.mubr.f32.mxu0 %v10077_v60  ;;  %v7095_v60 = vld [vmem:[%s16592_s0 + $0x6a] sm:$0xff] }
 0x2cd   :  { %7421 = vmatmul.mubr.f32.gmra.mrb[4].mxu1 %v7095_v60  ;;  %v10775_v60 = vld [vmem:[%s16592_s0 + $0x259] sm:$0xff] }
 0x2cf   :  { %1758 = vmatmul.mubr.f32.gmra.mrb[70].mxu0 %v10685_v48 }
 0x2d0   :  { %1762 = vmatprep.mubr.f32.mxu0 %v10084_v1  ;;  %v7096_v1 = vld [vmem:[%s16592_s0 + $0x7a] sm:$0xff] }
 0x2d1   :  { %7423 = vmatprep.mubr.f32.mxu1 %v7096_v1  ;;  %v10785_v1 = vld [vmem:[%s16592_s0 + $0x261] sm:$0xff] }
 0x2d3   :  { %1763 = vmatmul.mubr.f32.gmra.mrb[72].mxu0 %v10695_v30 }
 0x2d4   :  { %1767 = vmatprep.mubr.f32.mxu0 %v10091_v6  ;;  %v7097_v6 = vld [vmem:[%s16592_s0 + $0x82] sm:$0xff] }
 0x2d5   :  { %7424 = vmatmul.mubr.f32.gmra.mrb[6].mxu1 %v7097_v6  ;;  %v10795_v6 = vld [vmem:[%s16592_s0 + $0x271] sm:$0xff] }
 0x2d7   :  { %1768 = vmatmul.mubr.f32.gmra.mrb[74].mxu0 %v10705_v4 }
 0x2d8   :  { %1772 = vmatprep.mubr.f32.mxu0 %v10098_v8  ;;  %v7098_v8 = vld [vmem:[%s16592_s0 + $0x92] sm:$0xff] }
 0x2d9   :  { %7426 = vmatprep.mubr.f32.mxu1 %v7098_v8  ;;  %v10805_v8 = vld [vmem:[%s16592_s0 + $0x279] sm:$0xff] }
 0x2db   :  { %1773 = vmatmul.mubr.f32.gmra.mrb[76].mxu0 %v10715_v23 }
 0x2dc   :  { %1777 = vmatprep.mubr.f32.mxu0 %v10105_v12  ;;  %v7099_v12 = vld [vmem:[%s16592_s0 + $0x9a] sm:$0xff] }
 0x2dd   :  { %7427 = vmatmul.mubr.f32.gmra.mrb[8].mxu1 %v7099_v12  ;;  %v10815_v12 = vld [vmem:[%s16592_s0 + $0x289] sm:$0xff] }
 0x2df   :  { %1778 = vmatmul.mubr.f32.gmra.mrb[78].mxu0 %v10725_v10 }
 0x2e0   :  { %1782 = vmatprep.mubr.f32.mxu0 %v10112_v17  ;;  %v7100_v17 = vld [vmem:[%s16592_s0 + $0xaa] sm:$0xff] }
 0x2e1   :  { %7429 = vmatprep.mubr.f32.mxu1 %v7100_v17  ;;  %v10825_v17 = vld [vmem:[%s16592_s0 + $0x291] sm:$0xff] }
 0x2e3   :  { %1783 = vmatmul.mubr.f32.gmra.mrb[80].mxu0 %v10735_v37 }
 0x2e4   :  { %1787 = vmatprep.mubr.f32.mxu0 %v10119_v21  ;;  %v7101_v21 = vld [vmem:[%s16592_s0 + $0xb2] sm:$0xff] }
 0x2e5   :  { %7430 = vmatmul.mubr.f32.gmra.mrb[10].mxu1 %v7101_v21  ;;  %v10835_v21 = vld [vmem:[%s16592_s0 + $0x2a1] sm:$0xff] }
 0x2e7   :  { %1788 = vmatmul.mubr.f32.gmra.mrb[82].mxu0 %v10745_v0 }
 0x2e8   :  { %1792 = vmatprep.mubr.f32.mxu0 %v10126_v25  ;;  %v7102_v25 = vld [vmem:[%s16592_s0 + $0xc2] sm:$0xff] }
 0x2e9   :  { %7432 = vmatprep.mubr.f32.mxu1 %v7102_v25  ;;  %v10845_v25 = vld [vmem:[%s16592_s0 + $0x2a9] sm:$0xff] }
 0x2eb   :  { %1793 = vmatmul.mubr.f32.gmra.mrb[84].mxu0 %v10755_v54 }
 0x2ec   :  { %1797 = vmatprep.mubr.f32.mxu0 %v10133_v28  ;;  %v7103_v28 = vld [vmem:[%s16592_s0 + $0xca] sm:$0xff] }
 0x2ed   :  { %7433 = vmatmul.mubr.f32.gmra.mrb[12].mxu1 %v7103_v28  ;;  %v10855_v28 = vld [vmem:[%s16592_s0 + $0x2b9] sm:$0xff] }
 0x2ef   :  { %1798 = vmatmul.mubr.f32.gmra.mrb[86].mxu0 %v10765_v57 }
 0x2f0   :  { %1802 = vmatprep.mubr.f32.mxu0 %v10140_v33  ;;  %v7104_v33 = vld [vmem:[%s16592_s0 + $0xda] sm:$0xff] }
 0x2f1   :  { %7435 = vmatprep.mubr.f32.mxu1 %v7104_v33  ;;  %v10865_v33 = vld [vmem:[%s16592_s0 + $0x2c1] sm:$0xff] }
 0x2f3   :  { %1803 = vmatmul.mubr.f32.gmra.mrb[88].mxu0 %v10775_v60 }
 0x2f4   :  { %1807 = vmatprep.mubr.f32.mxu0 %v10147_v36  ;;  %v7105_v36 = vld [vmem:[%s16592_s0 + $0xe2] sm:$0xff] }
 0x2f5   :  { %7436 = vmatmul.mubr.f32.gmra.mrb[14].mxu1 %v7105_v36  ;;  %v10875_v36 = vld [vmem:[%s16592_s0 + $0x2d1] sm:$0xff] }
 0x2f7   :  { %1808 = vmatmul.mubr.f32.gmra.mrb[90].mxu0 %v10785_v1 }
 0x2f8   :  { %1812 = vmatprep.mubr.f32.mxu0 %v10154_v40  ;;  %v7106_v40 = vld [vmem:[%s16592_s0 + $0xf2] sm:$0xff] }
 0x2f9   :  { %7438 = vmatprep.mubr.f32.mxu1 %v7106_v40  ;;  %v10885_v40 = vld [vmem:[%s16592_s0 + $0x2d9] sm:$0xff] }
 0x2fb   :  { %1813 = vmatmul.mubr.f32.gmra.mrb[92].mxu0 %v10795_v6 }
 0x2fc   :  { %1817 = vmatprep.mubr.f32.mxu0 %v10161_v46  ;;  %v7107_v46 = vld [vmem:[%s16592_s0 + $0xfa] sm:$0xff] }
 0x2fd   :  { %7439 = vmatmul.mubr.f32.gmra.mrb[16].mxu1 %v7107_v46  ;;  %v6890_v46 = vld [vmem:[%s16592_s0 + $0x2e9] sm:$0xff] }
 0x2ff   :  { %1818 = vmatmul.mubr.f32.gmra.mrb[94].mxu0 %v10805_v8 }
 0x300   :  { %1822 = vmatprep.mubr.f32.mxu0 %v10168_v49  ;;  %v7108_v49 = vld [vmem:[%s16592_s0 + $0x10a] sm:$0xff] }
 0x301   :  { %7441 = vmatprep.mubr.f32.mxu1 %v7108_v49  ;;  %v6891_v49 = vld [vmem:[%s16592_s0 + $0x2f1] sm:$0xff] }
 0x303   :  { %1823 = vmatmul.mubr.f32.gmra.mrb[96].mxu0 %v10815_v12 }
 0x304   :  { %1827 = vmatprep.mubr.f32.mxu0 %v10175_v52  ;;  %v7109_v52 = vld [vmem:[%s16592_s0 + $0x112] sm:$0xff] }
 0x305   :  { %7442 = vmatmul.mubr.f32.gmra.mrb[18].mxu1 %v7109_v52  ;;  %v16765_v52 = vld [vmem:[#allocation3_spill] sm:$0xff] }
 0x307   :  { %1828 = vmatmul.mubr.f32.gmra.mrb[98].mxu0 %v10825_v17 }
 0x308   :  { %1832 = vmatprep.mubr.f32.mxu0 %v10182_v58  ;;  %v7110_v58 = vld [vmem:[%s16592_s0 + $0x122] sm:$0xff] }
 0x309   :  { %7444 = vmatprep.mubr.f32.mxu1 %v7110_v58  ;;  %v6892_v58 = vld [vmem:[%s16592_s0 + $0x301] sm:$0xff] }
 0x30b   :  { %1833 = vmatmul.mubr.f32.gmra.mrb[100].mxu0 %v10835_v21 }
 0x30c   :  { %1837 = vmatprep.mubr.f32.mxu0 %v10189_v3  ;;  %v7111_v3 = vld [vmem:[%s16592_s0 + $0x12a] sm:$0xff] }
 0x30d   :  { %7445 = vmatmul.mubr.f32.gmra.mrb[20].mxu1 %v7111_v3  ;;  %v16766_v3 = vld [vmem:[#allocation4_spill] sm:$0xff] }
 0x30f   :  { %1838 = vmatmul.mubr.f32.gmra.mrb[102].mxu0 %v10845_v25 }
 0x310   :  { %1842 = vmatprep.mubr.f32.mxu0 %v10196_v11  ;;  %v7112_v11 = vld [vmem:[%s16592_s0 + $0x13a] sm:$0xff] }
 0x311   :  { %7447 = vmatprep.mubr.f32.mxu1 %v7112_v11  ;;  %v6893_v11 = vld [vmem:[%s16592_s0 + $0x309] sm:$0xff] }
 0x313   :  { %1843 = vmatmul.mubr.f32.gmra.mrb[104].mxu0 %v10855_v28 }
 0x314   :  { %1847 = vmatprep.mubr.f32.mxu0 %v10203_v20  ;;  %v7113_v20 = vld [vmem:[%s16592_s0 + $0x142] sm:$0xff] }
 0x315   :  { %7448 = vmatmul.mubr.f32.gmra.mrb[22].mxu1 %v7113_v20  ;;  %v16767_v20 = vld [vmem:[#allocation5_spill] sm:$0xff] }
 0x317   :  { %1848 = vmatmul.mubr.f32.gmra.mrb[106].mxu0 %v10865_v33 }
 0x318   :  { %1852 = vmatprep.mubr.f32.mxu0 %v10210_v26  ;;  %v7114_v26 = vld [vmem:[%s16592_s0 + $0x152] sm:$0xff] }
 0x319   :  { %7450 = vmatprep.mubr.f32.mxu1 %v7114_v26  ;;  %v6894_v26 = vld [vmem:[%s16592_s0 + $0x319] sm:$0xff] }
 0x31b   :  { %1853 = vmatmul.mubr.f32.gmra.mrb[108].mxu0 %v10875_v36 }
 0x31c   :  { %1857 = vmatprep.mubr.f32.mxu0 %v10217_v35  ;;  %v7115_v35 = vld [vmem:[%s16592_s0 + $0x15a] sm:$0xff] }
 0x31d   :  { %7451 = vmatmul.mubr.f32.gmra.mrb[24].mxu1 %v7115_v35  ;;  %v6960_v35 = vld [vmem:[%s16592_s0 + $0x332] sm:$0xff] }
 0x31f   :  { %1858 = vmatmul.mubr.f32.gmra.mrb[110].mxu0 %v10885_v40 }
 0x320   :  { %1862 = vmatprep.mubr.f32.mxu0 %v10224_v50  ;;  %v7116_v50 = vld [vmem:[%s16592_s0 + $0x16a] sm:$0xff] }
 0x321   :  { %7453 = vmatprep.mubr.f32.mxu1 %v7116_v50  ;;  %v7121_v50 = vld [vmem:[%s16592_s0 + $0x1a2] sm:$0xff] }
 0x323   :  { %1863 = vmatmul.mubr.f32.gmra.mrb[112].mxu0 %v6890_v46  ;;  %v16768_v46 = vld [vmem:[#allocation6_spill] sm:$0xff] }
 0x324   :  { %1867 = vmatprep.mubr.f32.mxu0 %v10231_v61  ;;  %v7117_v61 = vld [vmem:[%s16592_s0 + $0x172] sm:$0xff] }
 0x325   :  { %7454 = vmatmul.mubr.f32.gmra.mrb[26].mxu1 %v7117_v61  ;;  %v7122_v61 = vld [vmem:[%s16592_s0 + $0x1e2] sm:$0xff] }
 0x326   :  { %7456 = vmatprep.mubr.f32.mxu1 %v10619_v51  ;;  %v6895_v51 = vld [vmem:[%s16592_s0 + $0x321] sm:$0xff] }
 0x327   :  { %1868 = vmatmul.mubr.f32.gmra.mrb[114].mxu0 %v6891_v49  ;;  %v6896_v49 = vld [vmem:[%s16592_s0 + $0x331] sm:$0xff] }
 0x328   :  { %1872 = vmatprep.mubr.f32.mxu0 %v16765_v52  ;;  %v6961_v52 = vld [vmem:[%s16592_s0 + $0x33a] sm:$0xff] }
 0x329   :  { %7457 = vmatmul.mubr.f32.gmra.mrb[28].mxu1 %v10637_v45  ;;  %v7120_v45 = vld [vmem:[%s16592_s0 + $0x19a] sm:$0xff] }
 0x32a   :  { %7459 = vmatprep.mubr.f32.mxu1 %v7120_v45  ;;  %v6968_v45 = vld [vmem:[%s16592_s0 + $0x78] sm:$0xff] }
 0x32b   :  { %1873 = vmatmul.mubr.f32.gmra.mrb[116].mxu0 %v6892_v58  ;;  %v6897_v58 = vld [vmem:[%s16592_s0 + $0x339] sm:$0xff] }
 0x32c   :  { %1877 = vmatprep.mubr.f32.mxu0 %v16766_v3  ;;  %v6962_v3 = vld [vmem:[%s16592_s0 + $0x30] sm:$0xff] }
 0x32d   :  { %7460 = vmatmul.mubr.f32.gmra.mrb[30].mxu1 %v7121_v50  ;;  %v6970_v50 = vld [vmem:[%s16592_s0 + $0x90] sm:$0xff] }
 0x32e   :  { %7462 = vmatprep.mubr.f32.mxu1 %v7122_v61  ;;  %v6973_v61 = vld [vmem:[%s16592_s0 + $0xb0] sm:$0xff] }
 0x32f   :  { %1878 = vmatmul.mubr.f32.gmra.mrb[118].mxu0 %v6893_v11  ;;  %v7123_v11 = vld [vmem:[%s16592_s0 + $0x1ea] sm:$0xff] }
 0x330   :  { %1882 = vmatprep.mubr.f32.mxu0 %v16767_v20  ;;  %v6963_v20 = vld [vmem:[%s16592_s0 + $0x38] sm:$0xff] }
 0x331   :  { %7463 = vmatmul.mubr.f32.gmra.mrb[32].mxu1 %v7123_v11  ;;  %v6975_v11 = vld [vmem:[%s16592_s0 + $0xc8] sm:$0xff] }
 0x333   :  { %1883 = vmatmul.mubr.f32.gmra.mrb[120].mxu0 %v6894_v26  ;;  %v6964_v26 = vld [vmem:[%s16592_s0 + $0x48] sm:$0xff] }
 0x334   :  { %1887 = vmatprep.mubr.f32.mxu0 %v16768_v46  ;;  %v6965_v46 = vld [vmem:[%s16592_s0 + $0x50] sm:$0xff] }
 0x337   :  { %1888 = vmatmul.mubr.f32.gmra.mrb[122].mxu0 %v6895_v51  ;;  %v6966_v51 = vld [vmem:[%s16592_s0 + $0x60] sm:$0xff] }
 0x338   :  { %1892 = vmatprep.mubr.f32.mxu0 %v6960_v35  ;;  %v6967_v35 = vld [vmem:[%s16592_s0 + $0x68] sm:$0xff] }
 0x33b   :  { %1893 = vmatmul.mubr.f32.gmra.mrb[124].mxu0 %v6896_v49  ;;  %v6969_v49 = vld [vmem:[%s16592_s0 + $0x80] sm:$0xff] }
 0x33c   :  { %1897 = vmatprep.mubr.f32.mxu0 %v6961_v52  ;;  %v6971_v52 = vld [vmem:[%s16592_s0 + $0x98] sm:$0xff] }
 0x33f   :  { %1898 = vmatmul.mubr.f32.gmra.mrb[126].mxu0 %v6897_v58  ;;  %v6972_v58 = vld [vmem:[%s16592_s0 + $0xa8] sm:$0xff] }
 0x340   :  { %1967 = vmatprep.mubr.f32.mxu0 %v10297_v9  ;;  %v7124_v9 = vld [vmem:[%s16592_s0 + $0x1fa] sm:$0xff] }
 0x341   :  { %7465 = vmatprep.mubr.f32.mxu1 %v7124_v9  ;;  %v6977_v9 = vld [vmem:[%s16592_s0 + $0xe0] sm:$0xff] }
 0x343   :  { %1968 = vmatmul.mubr.f32.vlgmr.msra.gmra.mrb[0].mxu0 %v6962_v3  ;;  %v6974_v3 = vld [vmem:[%s16592_s0 + $0xc0] sm:$0xff] }
 0x344   :  { %1972 = vmatprep.mubr.f32.mxu0 %v10311_v14  ;;  %v7125_v14 = vld [vmem:[%s16592_s0 + $0x202] sm:$0xff] }
 0x345   :  { %7466 = vmatmul.mubr.f32.gmra.mrb[34].mxu1 %v7125_v14  ;;  %v6979_v14 = vld [vmem:[%s16592_s0 + $0xf8] sm:$0xff] }
 0x347   :  { %1973 = vmatmul.mubr.f32.gmra.mrb[2].mxu0 %v6963_v20  ;;  %v6976_v20 = vld [vmem:[%s16592_s0 + $0xd8] sm:$0xff] }
 0x348   :  { %1977 = vmatprep.mubr.f32.mxu0 %v10325_v19  ;;  %v7126_v19 = vld [vmem:[%s16592_s0 + $0x212] sm:$0xff] }
 0x349   :  { %7468 = vmatprep.mubr.f32.mxu1 %v7126_v19  ;;  %v6981_v19 = vld [vmem:[%s16592_s0 + $0x110] sm:$0xff] }
 0x34b   :  { %1978 = vmatmul.mubr.f32.gmra.mrb[4].mxu0 %v6964_v26  ;;  %v6978_v26 = vld [vmem:[%s16592_s0 + $0xf0] sm:$0xff] }
 0x34c   :  { %1982 = vmatprep.mubr.f32.mxu0 %v10339_v24  ;;  %v7127_v24 = vld [vmem:[%s16592_s0 + $0x21a] sm:$0xff] }
 0x34d   :  { %7469 = vmatmul.mubr.f32.gmra.mrb[36].mxu1 %v7127_v24  ;;  %v6983_v24 = vld [vmem:[%s16592_s0 + $0x128] sm:$0xff] }
 0x34f   :  { %1983 = vmatmul.mubr.f32.gmra.mrb[6].mxu0 %v6965_v46  ;;  %v6980_v46 = vld [vmem:[%s16592_s0 + $0x108] sm:$0xff] }
 0x350   :  { %1987 = vmatprep.mubr.f32.mxu0 %v10353_v29  ;;  %v7128_v29 = vld [vmem:[%s16592_s0 + $0x22a] sm:$0xff] }
 0x351   :  { %7471 = vmatprep.mubr.f32.mxu1 %v7128_v29  ;;  %v11106_v29 = vld [vmem:[%s16592_s0 + $0x138] sm:$0xff] }
 0x353   :  { %1988 = vmatmul.mubr.f32.gmra.mrb[8].mxu0 %v6966_v51  ;;  %v6982_v51 = vld [vmem:[%s16592_s0 + $0x120] sm:$0xff] }
 0x354   :  { %1992 = vmatprep.mubr.f32.mxu0 %v10367_v34  ;;  %v7129_v34 = vld [vmem:[%s16592_s0 + $0x232] sm:$0xff] }
 0x355   :  { %7472 = vmatmul.mubr.f32.gmra.mrb[38].mxu1 %v7129_v34  ;;  %v6985_v34 = vld [vmem:[%s16592_s0 + $0x140] sm:$0xff] }
 0x357   :  { %1993 = vmatmul.mubr.f32.gmra.mrb[10].mxu0 %v6967_v35 }
 0x358   :  { %1997 = vmatprep.mubr.f32.mxu0 %v10381_v39  ;;  %v7130_v39 = vld [vmem:[%s16592_s0 + $0x242] sm:$0xff] }
 0x359   :  { %7474 = vmatprep.mubr.f32.mxu1 %v7130_v39 }
 0x35b   :  { %1998 = vmatmul.mubr.f32.gmra.mrb[12].mxu0 %v6968_v45  ;;  %v8880_v45 = vmov 0.0  }
 0x35c   :  { %2002 = vmatprep.mubr.f32.mxu0 %v10395_v42  ;;  %v7131_v42 = vld [vmem:[%s16592_s0 + $0x24a] sm:$0xff]  ;;  %3217 = vst [vmem:[#allocation2 + $0x18] sm:$0xff] %v8880_v45  ;;  %3218 = vst [vmem:[#allocation2 + $0x20] sm:$0xff] %v8880_v45 }
 0x35d   :  { %7475 = vmatmul.mubr.f32.gmra.mrb[40].mxu1 %v7131_v42  ;;  %3214 = vst [vmem:[#allocation2] sm:$0xff] %v8880_v45  ;;  %3215 = vst [vmem:[#allocation2 + $0x8] sm:$0xff] %v8880_v45  ;;  %v7146_v42 = vld [vmem:[%s16592_s0 + $0x302] sm:$0xff] }
 0x35e   :  { %3216 = vst [vmem:[#allocation2 + $0x10] sm:$0x3] %v8880_v45  ;;  %3219 = vst [vmem:[#allocation2 + $0x28] sm:$0x3] %v8880_v45 }
 0x35f   :  { %2003 = vmatmul.mubr.f32.gmra.mrb[14].mxu0 %v6969_v49  ;;  %3220 = vst [vmem:[#allocation2 + $0x30] sm:$0xff] %v8880_v45  ;;  %3221 = vst [vmem:[#allocation2 + $0x38] sm:$0xff] %v8880_v45 }
 0x360   :  { %2007 = vmatprep.mubr.f32.mxu0 %v10409_v31  ;;  %v7132_v31 = vld [vmem:[%s16592_s0 + $0x25a] sm:$0xff]  ;;  %3222 = vst [vmem:[#allocation2 + $0x40] sm:$0x3] %v8880_v45  ;;  %3223 = vst [vmem:[#allocation2 + $0x48] sm:$0xff] %v8880_v45 }
 0x361   :  { %7477 = vmatprep.mubr.f32.mxu1 %v7132_v31  ;;  %3224 = vst [vmem:[#allocation2 + $0x50] sm:$0xff] %v8880_v45  ;;  %3225 = vst [vmem:[#allocation2 + $0x58] sm:$0x3] %v8880_v45 }
 0x362   :  { %3226 = vst [vmem:[#allocation2 + $0x60] sm:$0xff] %v8880_v45  ;;  %3227 = vst [vmem:[#allocation2 + $0x68] sm:$0xff] %v8880_v45 }
 0x363   :  { %2008 = vmatmul.mubr.f32.gmra.mrb[16].mxu0 %v6970_v50  ;;  %3228 = vst [vmem:[#allocation2 + $0x70] sm:$0x3] %v8880_v45  ;;  %3229 = vst [vmem:[#allocation2 + $0x78] sm:$0xff] %v8880_v45  ;;  %v6986_v50 = vld [vmem:[%s16592_s0 + $0x150] sm:$0xff] }
 0x364   :  { %2012 = vmatprep.mubr.f32.mxu0 %v10417_v7  ;;  %v7133_v7 = vld [vmem:[%s16592_s0 + $0x262] sm:$0xff]  ;;  %3230 = vst [vmem:[#allocation2 + $0x80] sm:$0xff] %v8880_v45  ;;  %3231 = vst [vmem:[#allocation2 + $0x88] sm:$0x3] %v8880_v45 }
 0x365   :  { %7478 = vmatmul.mubr.f32.gmra.mrb[42].mxu1 %v7133_v7  ;;  %3232 = vst [vmem:[#allocation2 + $0x90] sm:$0xff] %v8880_v45  ;;  %3233 = vst [vmem:[#allocation2 + $0x98] sm:$0xff] %v8880_v45  ;;  %v7148_v7 = vld [vmem:[%s16592_s0 + $0x31a] sm:$0xff] }
 0x366   :  { %3234 = vst [vmem:[#allocation2 + $0xa0] sm:$0x3] %v8880_v45  ;;  %3235 = vst [vmem:[#allocation2 + $0xa8] sm:$0xff] %v8880_v45 }
 0x367   :  { %2013 = vmatmul.mubr.f32.gmra.mrb[18].mxu0 %v6971_v52  ;;  %3236 = vst [vmem:[#allocation2 + $0xb0] sm:$0xff] %v8880_v45  ;;  %3237 = vst [vmem:[#allocation2 + $0xb8] sm:$0x3] %v8880_v45 }
 0x368   :  { %2017 = vmatprep.mubr.f32.mxu0 %v10425_v44  ;;  %v7134_v44 = vld [vmem:[%s16592_s0 + $0x272] sm:$0xff]  ;;  %3238 = vst [vmem:[#allocation2 + $0xc0] sm:$0xff] %v8880_v45  ;;  %3239 = vst [vmem:[#allocation2 + $0xc8] sm:$0xff] %v8880_v45 }
 0x369   :  { %7480 = vmatprep.mubr.f32.mxu1 %v7134_v44  ;;  %3240 = vst [vmem:[#allocation2 + $0xd0] sm:$0x3] %v8880_v45  ;;  %3241 = vst [vmem:[#allocation2 + $0xd8] sm:$0xff] %v8880_v45 }
 0x36a   :  { %3242 = vst [vmem:[#allocation2 + $0xe0] sm:$0xff] %v8880_v45  ;;  %3243 = vst [vmem:[#allocation2 + $0xe8] sm:$0x3] %v8880_v45 }
 0x36b   :  { %2018 = vmatmul.mubr.f32.gmra.mrb[20].mxu0 %v6972_v58  ;;  %3244 = vst [vmem:[#allocation2 + $0xf0] sm:$0xff] %v8880_v45  ;;  %3245 = vst [vmem:[#allocation2 + $0xf8] sm:$0xff] %v8880_v45  ;;  %v6988_v58 = vld [vmem:[%s16592_s0 + $0x168] sm:$0xff] }
 0x36c   :  { %2022 = vmatprep.mubr.f32.mxu0 %v10438_v56  ;;  %v7135_v56 = vld [vmem:[%s16592_s0 + $0x27a] sm:$0xff]  ;;  %3246 = vst [vmem:[#allocation2 + $0x100] sm:$0x3] %v8880_v45  ;;  %3247 = vst [vmem:[#allocation2 + $0x108] sm:$0xff] %v8880_v45 }
 0x36d   :  { %7481 = vmatmul.mubr.f32.gmra.mrb[44].mxu1 %v7135_v56  ;;  %3248 = vst [vmem:[#allocation2 + $0x110] sm:$0xff] %v8880_v45  ;;  %3249 = vst [vmem:[#allocation2 + $0x118] sm:$0x3] %v8880_v45  ;;  %v16770_v56 = vld [vmem:[#allocation8_spill] sm:$0xff] }
 0x36e   :  { %3250 = vst [vmem:[#allocation2 + $0x120] sm:$0xff] %v8880_v45  ;;  %3251 = vst [vmem:[#allocation2 + $0x128] sm:$0xff] %v8880_v45 }
 0x36f   :  { %2023 = vmatmul.mubr.f32.gmra.mrb[22].mxu0 %v6973_v61  ;;  %3252 = vst [vmem:[#allocation2 + $0x130] sm:$0x3] %v8880_v45  ;;  %3253 = vst [vmem:[#allocation2 + $0x138] sm:$0xff] %v8880_v45  ;;  %v16769_v61 = vld [vmem:[#allocation7_spill] sm:$0xff] }
 0x370   :  { %2027 = vmatprep.mubr.f32.mxu0 %v10446_v22  ;;  %v7136_v22 = vld [vmem:[%s16592_s0 + $0x28a] sm:$0xff]  ;;  %3254 = vst [vmem:[#allocation2 + $0x140] sm:$0xff] %v8880_v45  ;;  %3255 = vst [vmem:[#allocation2 + $0x148] sm:$0x3] %v8880_v45 }
 0x371   :  { %7483 = vmatprep.mubr.f32.mxu1 %v7136_v22  ;;  %3256 = vst [vmem:[#allocation2 + $0x150] sm:$0xff] %v8880_v45  ;;  %3257 = vst [vmem:[#allocation2 + $0x158] sm:$0xff] %v8880_v45  ;;  %v7150_v22 = vld [vmem:[%s16592_s0 + $0x332] sm:$0xff] }
 0x372   :  { %3258 = vst [vmem:[#allocation2 + $0x160] sm:$0x3] %v8880_v45  ;;  %3259 = vst [vmem:[#allocation2 + $0x168] sm:$0xff] %v8880_v45 }
 0x373   :  { %2028 = vmatmul.mubr.f32.gmra.mrb[24].mxu0 %v6974_v3  ;;  %3260 = vst [vmem:[#allocation2 + $0x170] sm:$0xff] %v8880_v45  ;;  %3261 = vst [vmem:[#allocation2 + $0x178] sm:$0x3] %v8880_v45 }
 0x374   :  { %2032 = vmatprep.mubr.f32.mxu0 %v10453_v53  ;;  %v7137_v53 = vld [vmem:[%s16592_s0 + $0x292] sm:$0xff]  ;;  %3262 = vst [vmem:[#allocation2 + $0x180] sm:$0xff] %v8880_v45  ;;  %3263 = vst [vmem:[#allocation2 + $0x188] sm:$0xff] %v8880_v45 }
 0x375   :  { %7484 = vmatmul.mubr.f32.gmra.mrb[46].mxu1 %v7137_v53  ;;  %3264 = vst [vmem:[#allocation2 + $0x190] sm:$0x3] %v8880_v45  ;;  %3265 = vst [vmem:[#allocation2 + $0x198] sm:$0xff] %v8880_v45  ;;  %v6991_v53 = vld [vmem:[%s16592_s0 + $0x188] sm:$0xff] }
 0x376   :  { %3266 = vst [vmem:[#allocation2 + $0x1a0] sm:$0xff] %v8880_v45  ;;  %3267 = vst [vmem:[#allocation2 + $0x1a8] sm:$0x3] %v8880_v45 }
 0x377   :  { %2033 = vmatmul.mubr.f32.gmra.mrb[26].mxu0 %v6975_v11  ;;  %3268 = vst [vmem:[#allocation2 + $0x1b0] sm:$0xff] %v8880_v45  ;;  %3269 = vst [vmem:[#allocation2 + $0x1b8] sm:$0xff] %v8880_v45  ;;  %v6990_v11 = vld [vmem:[%s16592_s0 + $0x180] sm:$0xff] }
 0x378   :  { %2037 = vmatprep.mubr.f32.mxu0 %v10460_v55  ;;  %v7138_v55 = vld [vmem:[%s16592_s0 + $0x2a2] sm:$0xff]  ;;  %3270 = vst [vmem:[#allocation2 + $0x1c0] sm:$0x3] %v8880_v45  ;;  %3271 = vst [vmem:[#allocation2 + $0x1c8] sm:$0xff] %v8880_v45 }
 0x379   :  { %7486 = vmatprep.mubr.f32.mxu1 %v7138_v55  ;;  %3272 = vst [vmem:[#allocation2 + $0x1d0] sm:$0xff] %v8880_v45  ;;  %3273 = vst [vmem:[#allocation2 + $0x1d8] sm:$0x3] %v8880_v45 }
 0x37a   :  { %3274 = vst [vmem:[#allocation2 + $0x1e0] sm:$0xff] %v8880_v45  ;;  %3275 = vst [vmem:[#allocation2 + $0x1e8] sm:$0xff] %v8880_v45 }
 0x37b   :  { %2038 = vmatmul.mubr.f32.gmra.mrb[28].mxu0 %v6976_v20  ;;  %3276 = vst [vmem:[#allocation2 + $0x1f0] sm:$0x3] %v8880_v45  ;;  %3277 = vst [vmem:[#allocation2 + $0x1f8] sm:$0xff] %v8880_v45  ;;  %v7151_v20 = vld [vmem:[%s16592_s0 + $0x33a] sm:$0xff] }
 0x37c   :  { %2042 = vmatprep.mubr.f32.mxu0 %v10473_v38  ;;  %v7139_v38 = vld [vmem:[%s16592_s0 + $0x2aa] sm:$0xff]  ;;  %3278 = vst [vmem:[#allocation2 + $0x200] sm:$0xff] %v8880_v45  ;;  %3279 = vst [vmem:[#allocation2 + $0x208] sm:$0x3] %v8880_v45 }
 0x37d   :  { %7487 = vmatmul.mubr.f32.gmra.mrb[48].mxu1 %v7139_v38  ;;  %3280 = vst [vmem:[#allocation2 + $0x210] sm:$0xff] %v8880_v45  ;;  %3281 = vst [vmem:[#allocation2 + $0x218] sm:$0xff] %v8880_v45  ;;  %v6992_v38 = vld [vmem:[%s16592_s0 + $0x198] sm:$0xff] }
 0x37e   :  { %3282 = vst [vmem:[#allocation2 + $0x220] sm:$0x3] %v8880_v45  ;;  %3283 = vst [vmem:[#allocation2 + $0x228] sm:$0xff] %v8880_v45 }
 0x37f   :  { %2043 = vmatmul.mubr.f32.gmra.mrb[30].mxu0 %v6977_v9  ;;  %3284 = vst [vmem:[#allocation2 + $0x230] sm:$0xff] %v8880_v45  ;;  %3285 = vst [vmem:[#allocation2 + $0x238] sm:$0x3] %v8880_v45  ;;  %v7056_v9 = vld [vmem:[%s16592_s0 + $0x199] sm:$0xff] }
 0x380   :  { %2047 = vmatprep.mubr.f32.mxu0 %v10481_v59  ;;  %v7140_v59 = vld [vmem:[%s16592_s0 + $0x2ba] sm:$0xff]  ;;  %3286 = vst [vmem:[#allocation2 + $0x240] sm:$0xff] %v8880_v45  ;;  %3287 = vst [vmem:[#allocation2 + $0x248] sm:$0xff] %v8880_v45 }
 0x381   :  { %7489 = vmatprep.mubr.f32.mxu1 %v7140_v59  ;;  %3288 = vst [vmem:[#allocation2 + $0x250] sm:$0x3] %v8880_v45  ;;  %3289 = vst [vmem:[#allocation2 + $0x258] sm:$0xff] %v8880_v45  ;;  %v7153_v59 = vld [vmem:[%s16592_s0 + $0x352] sm:$0xff] }
 0x382   :  { %3290 = vst [vmem:[#allocation2 + $0x260] sm:$0xff] %v8880_v45  ;;  %3291 = vst [vmem:[#allocation2 + $0x268] sm:$0x3] %v8880_v45 }
 0x383   :  { %2048 = vmatmul.mubr.f32.gmra.mrb[32].mxu0 %v6978_v26  ;;  %3292 = vst [vmem:[#allocation2 + $0x270] sm:$0xff] %v8880_v45  ;;  %3293 = vst [vmem:[#allocation2 + $0x278] sm:$0xff] %v8880_v45 }
 0x384   :  { %2052 = vmatprep.mubr.f32.mxu0 %v10488_v2  ;;  %v7141_v2 = vld [vmem:[%s16592_s0 + $0x2c2] sm:$0xff]  ;;  %3294 = vst [vmem:[#allocation2 + $0x280] sm:$0x3] %v8880_v45  ;;  %3295 = vst [vmem:[#allocation2 + $0x288] sm:$0xff] %v8880_v45 }
 0x385   :  { %7490 = vmatmul.mubr.f32.gmra.mrb[50].mxu1 %v7141_v2  ;;  %3296 = vst [vmem:[#allocation2 + $0x290] sm:$0xff] %v8880_v45  ;;  %3297 = vst [vmem:[#allocation2 + $0x298] sm:$0x3] %v8880_v45 }
 0x386   :  { %3298 = vst [vmem:[#allocation2 + $0x2a0] sm:$0xff] %v8880_v45  ;;  %3299 = vst [vmem:[#allocation2 + $0x2a8] sm:$0xff] %v8880_v45 }
 0x387   :  { %2053 = vmatmul.mubr.f32.gmra.mrb[34].mxu0 %v6979_v14  ;;  %3300 = vst [vmem:[#allocation2 + $0x2b0] sm:$0x3] %v8880_v45  ;;  %3301 = vst [vmem:[#allocation2 + $0x2b8] sm:$0xff] %v8880_v45  ;;  %v7057_v14 = vld [vmem:[%s16592_s0 + $0x1a1] sm:$0xff] }
 0x388   :  { %2057 = vmatprep.mubr.f32.mxu0 %v10495_v5  ;;  %v7142_v5 = vld [vmem:[%s16592_s0 + $0x2d2] sm:$0xff]  ;;  %3302 = vst [vmem:[#allocation2 + $0x2c0] sm:$0xff] %v8880_v45  ;;  %3303 = vst [vmem:[#allocation2 + $0x2c8] sm:$0x3] %v8880_v45 }
 0x389   :  { %7492 = vmatprep.mubr.f32.mxu1 %v7142_v5  ;;  %3304 = vst [vmem:[#allocation2 + $0x2d0] sm:$0xff] %v8880_v45  ;;  %3305 = vst [vmem:[#allocation2 + $0x2d8] sm:$0xff] %v8880_v45  ;;  %v6994_v5 = vld [vmem:[%s16592_s0 + $0x1e0] sm:$0xff] }
 0x38a   :  { %3306 = vst [vmem:[#allocation2 + $0x2e0] sm:$0x3] %v8880_v45  ;;  %3307 = vst [vmem:[#allocation2 + $0x2e8] sm:$0xff] %v8880_v45 }
 0x38b   :  { %2058 = vmatmul.mubr.f32.gmra.mrb[36].mxu0 %v6980_v46  ;;  %3308 = vst [vmem:[#allocation2 + $0x2f0] sm:$0xff] %v8880_v45  ;;  %3309 = vst [vmem:[#allocation2 + $0x2f8] sm:$0x3] %v8880_v45  ;;  %v6993_v46 = vld [vmem:[%s16592_s0 + $0x1a0] sm:$0xff] }
 0x38c   :  { %2062 = vmatprep.mubr.f32.mxu0 %v10508_v47  ;;  %v7143_v47 = vld [vmem:[%s16592_s0 + $0x2da] sm:$0xff]  ;;  %3310 = vst [vmem:[#allocation2 + $0x300] sm:$0xff] %v8880_v45  ;;  %3311 = vst [vmem:[#allocation2 + $0x308] sm:$0xff] %v8880_v45 }
 0x38d   :  { %7493 = vmatmul.mubr.f32.gmra.mrb[52].mxu1 %v7143_v47  ;;  %3312 = vst [vmem:[#allocation2 + $0x310] sm:$0x3] %v8880_v45  ;;  %3313 = vst [vmem:[#allocation2 + $0x318] sm:$0xff] %v8880_v45 }
 0x38e   :  { %3314 = vst [vmem:[#allocation2 + $0x320] sm:$0xff] %v8880_v45  ;;  %3315 = vst [vmem:[#allocation2 + $0x328] sm:$0x3] %v8880_v45 }
 0x38f   :  { %2063 = vmatmul.mubr.f32.gmra.mrb[38].mxu0 %v6981_v19  ;;  %3316 = vst [vmem:[#allocation2 + $0x330] sm:$0xff] %v8880_v45  ;;  %3317 = vst [vmem:[#allocation2 + $0x338] sm:$0xff] %v8880_v45 }
 0x390   :  { %2067 = vmatprep.mubr.f32.mxu0 %v10516_v43  ;;  %3318 = vst [vmem:[#allocation2 + $0x340] sm:$0x3] %v8880_v45  ;;  %3319 = vst [vmem:[#allocation2 + $0x348] sm:$0xff] %v8880_v45 }
 0x391   :  { %3320 = vst [vmem:[#allocation2 + $0x350] sm:$0xff] %v8880_v45  ;;  %3321 = vst [vmem:[#allocation2 + $0x358] sm:$0x3] %v8880_v45 }
 0x392   :  { %v11098_v35 = vpop.f32.mrb[0].mxu1 }
 0x393   :  { %2068 = vmatmul.mubr.f32.gmra.mrb[40].mxu0 %v6982_v51  ;;  %v11100_v43 = vpop.f32.mrb[1].mxu1  ;;  %v6995_v51 = vld [vmem:[%s16592_s0 + $0x1e8] sm:$0xff] }
 0x394   :  { %2072 = vmatprep.mubr.f32.mxu0 %v10523_v16  ;;  %v7144_v16 = vld [vmem:[%s16592_s0 + $0x2ea] sm:$0xff] }
 0x395   :  { %7495 = vmatprep.mubr.f32.mxu1 %v7144_v16 }
 0x397   :  { %2073 = vmatmul.mubr.f32.gmra.mrb[42].mxu0 %v6983_v24 }
 0x398   :  { %2077 = vmatprep.mubr.f32.mxu0 %v10536_v27  ;;  %v7145_v27 = vld [vmem:[%s16592_s0 + $0x2f2] sm:$0xff]  ;;  %v11227_v49 = vpop.f32.mrb[2].mxu1 }
 0x399   :  { %7496 = vmatmul.mubr.f32.gmra.mrb[54].mxu1 %v7145_v27  ;;  %v11229_v39 = vpop.f32.mrb[3].mxu1 }
 0x39a   :  { %7498 = vmatprep.mubr.f32.mxu1 %v7146_v42 }
 0x39b   :  { %2078 = vmatmul.mubr.f32.gmra.mrb[44].mxu0 %v11106_v29 }
 0x39c   :  { %2082 = vmatprep.mubr.f32.mxu0 %v10552_v13  ;;  %v7147_v13 = vld [vmem:[%s16592_s0 + $0x30a] sm:$0xff] }
 0x39d   :  { %7499 = vmatmul.mubr.f32.gmra.mrb[56].mxu1 %v7147_v13 }
 0x39e   :  { %7501 = vmatprep.mubr.f32.mxu1 %v7148_v7 }
 0x39f   :  { %2083 = vmatmul.mubr.f32.gmra.mrb[46].mxu0 %v6985_v34 }
 0x3a0   :  { %2087 = vmatprep.mubr.f32.mxu0 %v10568_v63  ;;  %v6987_v63 = vld [vmem:[%s16592_s0 + $0x158] sm:$0xff]  ;;  %v11245_v52 = vpop.f32.mrb[4].mxu1 }
 0x3a1   :  { %v11247_v31 = vpop.f32.mrb[5].mxu1 }
 0x3a3   :  { %2088 = vmatmul.mubr.f32.gmra.mrb[48].mxu0 %v6986_v50 }
 0x3a4   :  { %2092 = vmatprep.mubr.f32.mxu0 %v10582_v62  ;;  %v7149_v62 = vld [vmem:[%s16592_s0 + $0x322] sm:$0xff] }
 0x3a5   :  { %7502 = vmatmul.mubr.f32.gmra.mrb[58].mxu1 %v7149_v62 }
 0x3a6   :  { %7504 = vmatprep.mubr.f32.mxu1 %v7150_v22 }
 0x3a7   :  { %2093 = vmatmul.mubr.f32.gmra.mrb[50].mxu0 %v6987_v63 }
 0x3a8   :  { %2097 = vmatprep.mubr.f32.mxu0 %v10595_v41  ;;  %v6989_v41 = vld [vmem:[%s16592_s0 + $0x170] sm:$0xff]  ;;  %v11263_v44 = vpop.f32.mrb[6].mxu1 }
 0x3a9   :  { %v11265_v3 = vpop.f32.mrb[7].mxu1  ;;  %7505 = vmatmul.mubr.f32.gmra.mrb[60].mxu1 %v7151_v20 }
 0x3ab   :  { %2098 = vmatmul.mubr.f32.gmra.mrb[52].mxu0 %v6988_v58 }
 0x3ac   :  { %2102 = vmatprep.mubr.f32.mxu0 %v16769_v61 }
 0x3af   :  { %2103 = vmatmul.mubr.f32.gmra.mrb[54].mxu0 %v6989_v41 }
 0x3b0   :  { %2107 = vmatprep.mubr.f32.mxu0 %v16770_v56  ;;  %v11284_v55 = vpop.f32.mrb[8].mxu1 }
 0x3b1   :  { %v11286_v26 = vpop.f32.mrb[9].mxu1 }
 0x3b3   :  { %2108 = vmatmul.mubr.f32.gmra.mrb[56].mxu0 %v6990_v11 }
 0x3b4   :  { %2112 = vmatprep.mubr.f32.mxu0 %v10650_v18  ;;  %v7152_v18 = vld [vmem:[%s16592_s0 + $0x34a] sm:$0xff] }
 0x3b5   :  { %7507 = vmatprep.mubr.f32.mxu1 %v7152_v18 }
 0x3b6   :  { %7508 = vmatmul.mubr.f32.gmra.mrb[62].mxu1 %v7153_v59  ;;  %v7081_v59 = vld [vmem:[%s16592_s0 + $0x2f1] sm:$0xff] }
 0x3b7   :  { %2113 = vmatmul.mubr.f32.gmra.mrb[58].mxu0 %v6991_v53  ;;  %v7080_v53 = vld [vmem:[%s16592_s0 + $0x2e9] sm:$0xff] }
 0x3b8   :  { %2117 = vmatprep.mubr.f32.mxu0 %v7056_v9  ;;  %v11303_v2 = vpop.f32.mrb[10].mxu1 }
 0x3b9   :  { %v11305_v19 = vpop.f32.mrb[11].mxu1 }
 0x3bb   :  { %2118 = vmatmul.mubr.f32.gmra.mrb[60].mxu0 %v6992_v38 }
 0x3bc   :  { %2122 = vmatprep.mubr.f32.mxu0 %v7057_v14 }
 0x3bf   :  { %2123 = vmatmul.mubr.f32.gmra.mrb[62].mxu0 %v6993_v46 }
 0x3c0   :  { %2127 = vmatprep.mubr.f32.mxu0 %v10675_v32  ;;  %v11315_v47 = vpop.f32.mrb[12].mxu1  ;;  %v6996_v32 = vld [vmem:[%s16592_s0 + $0x1f8] sm:$0xff] }
 0x3c1   :  { %v11317_v24 = vpop.f32.mrb[13].mxu1 }
 0x3c3   :  { %2128 = vmatmul.mubr.f32.gmra.mrb[64].mxu0 %v6994_v5 }
 0x3c4   :  { %2132 = vmatprep.mubr.f32.mxu0 %v10685_v48  ;;  %v6997_v48 = vld [vmem:[%s16592_s0 + $0x200] sm:$0xff] }
 0x3c7   :  { %2133 = vmatmul.mubr.f32.gmra.mrb[66].mxu0 %v6995_v51 }
 0x3c8   :  { %2137 = vmatprep.mubr.f32.mxu0 %v10695_v30  ;;  %v11327_v29 = vpop.f32.mrb[14].mxu1  ;;  %v6998_v30 = vld [vmem:[%s16592_s0 + $0x210] sm:$0xff] }
 0x3c9   :  { %v11329_v45 = vpop.f32.mrb[15].mxu1 }
 0x3cb   :  { %2138 = vmatmul.mubr.f32.gmra.mrb[68].mxu0 %v6996_v32  ;;  %v7082_v32 = vld [vmem:[%s16592_s0 + $0x301] sm:$0xff] }
 0x3cc   :  { %2142 = vmatprep.mubr.f32.mxu0 %v10705_v4  ;;  %v6999_v4 = vld [vmem:[%s16592_s0 + $0x218] sm:$0xff] }
 0x3cf   :  { %2143 = vmatmul.mubr.f32.gmra.mrb[70].mxu0 %v6997_v48 }
 0x3d0   :  { %2147 = vmatprep.mubr.f32.mxu0 %v10715_v23  ;;  %v11339_v16 = vpop.f32.mrb[16].mxu1  ;;  %v7000_v23 = vld [vmem:[%s16592_s0 + $0x228] sm:$0xff] }
 0x3d1   :  { %v11341_v27 = vpop.f32.mrb[17].mxu1 }
 0x3d3   :  { %2148 = vmatmul.mubr.f32.gmra.mrb[72].mxu0 %v6998_v30 }
 0x3d4   :  { %2152 = vmatprep.mubr.f32.mxu0 %v10725_v10  ;;  %v7001_v10 = vld [vmem:[%s16592_s0 + $0x230] sm:$0xff] }
 0x3d7   :  { %2153 = vmatmul.mubr.f32.gmra.mrb[74].mxu0 %v6999_v4 }
 0x3d8   :  { %2157 = vmatprep.mubr.f32.mxu0 %v10735_v37  ;;  %v11351_v34 = vpop.f32.mrb[18].mxu1  ;;  %v7002_v37 = vld [vmem:[%s16592_s0 + $0x240] sm:$0xff] }
 0x3d9   :  { %v11353_v50 = vpop.f32.mrb[19].mxu1 }
 0x3db   :  { %2158 = vmatmul.mubr.f32.gmra.mrb[76].mxu0 %v7000_v23 }
 0x3dc   :  { %2162 = vmatprep.mubr.f32.mxu0 %v10745_v0  ;;  %v7003_v0 = vld [vmem:[%s16592_s0 + $0x248] sm:$0xff] }
 0x3df   :  { %2163 = vmatmul.mubr.f32.gmra.mrb[78].mxu0 %v7001_v10  ;;  %v7018_v10 = vld [vmem:[%s16592_s0 + $0x300] sm:$0xff] }
 0x3e0   :  { %2167 = vmatprep.mubr.f32.mxu0 %v10755_v54  ;;  %v11363_v42 = vpop.f32.mrb[20].mxu1  ;;  %v7004_v54 = vld [vmem:[%s16592_s0 + $0x258] sm:$0xff] }
 0x3e1   :  { %v11365_v13 = vpop.f32.mrb[21].mxu1 }
 0x3e3   :  { %2168 = vmatmul.mubr.f32.gmra.mrb[80].mxu0 %v7002_v37  ;;  %v7083_v37 = vld [vmem:[%s16592_s0 + $0x309] sm:$0xff] }
 0x3e4   :  { %2172 = vmatprep.mubr.f32.mxu0 %v10765_v57  ;;  %v7005_v57 = vld [vmem:[%s16592_s0 + $0x260] sm:$0xff] }
 0x3e7   :  { %2173 = vmatmul.mubr.f32.gmra.mrb[82].mxu0 %v7003_v0 }
 0x3e8   :  { %2177 = vmatprep.mubr.f32.mxu0 %v10775_v60  ;;  %v11375_v63 = vpop.f32.mrb[22].mxu1  ;;  %v7006_v60 = vld [vmem:[%s16592_s0 + $0x270] sm:$0xff] }
 0x3e9   :  { %v11377_v58 = vpop.f32.mrb[23].mxu1 }
 0x3eb   :  { %2178 = vmatmul.mubr.f32.gmra.mrb[84].mxu0 %v7004_v54 }
 0x3ec   :  { %2182 = vmatprep.mubr.f32.mxu0 %v10785_v1  ;;  %v7007_v1 = vld [vmem:[%s16592_s0 + $0x278] sm:$0xff] }
 0x3ef   :  { %2183 = vmatmul.mubr.f32.gmra.mrb[86].mxu0 %v7005_v57 }
 0x3f0   :  { %2187 = vmatprep.mubr.f32.mxu0 %v10795_v6  ;;  %v11387_v7 = vpop.f32.mrb[24].mxu1  ;;  %v7008_v6 = vld [vmem:[%s16592_s0 + $0x288] sm:$0xff] }
 0x3f1   :  { %v11389_v62 = vpop.f32.mrb[25].mxu1 }
 0x3f3   :  { %2188 = vmatmul.mubr.f32.gmra.mrb[88].mxu0 %v7006_v60  ;;  %v7084_v60 = vld [vmem:[%s16592_s0 + $0x319] sm:$0xff] }
 0x3f4   :  { %2192 = vmatprep.mubr.f32.mxu0 %v10805_v8  ;;  %v7009_v8 = vld [vmem:[%s16592_s0 + $0x290] sm:$0xff] }
 0x3f7   :  { %2193 = vmatmul.mubr.f32.gmra.mrb[90].mxu0 %v7007_v1 }
 0x3f8   :  { %2197 = vmatprep.mubr.f32.mxu0 %v10815_v12  ;;  %v11399_v61 = vpop.f32.mrb[26].mxu1  ;;  %v7010_v12 = vld [vmem:[%s16592_s0 + $0x2a0] sm:$0xff] }
 0x3f9   :  { %v11401_v41 = vpop.f32.mrb[27].mxu1 }
 0x3fb   :  { %2198 = vmatmul.mubr.f32.gmra.mrb[92].mxu0 %v7008_v6 }
 0x3fc   :  { %2202 = vmatprep.mubr.f32.mxu0 %v10825_v17  ;;  %v7011_v17 = vld [vmem:[%s16592_s0 + $0x2a8] sm:$0xff]  ;;  %v11411_v56 = vpop.f32.mrb[28].mxu1 }
 0x3fd   :  { %v11413_v11 = vpop.f32.mrb[29].mxu1 }
 0x3ff   :  { %2203 = vmatmul.mubr.f32.gmra.mrb[94].mxu0 %v7009_v8 }
 0x400   :  { %2207 = vmatprep.mubr.f32.mxu0 %v10835_v21  ;;  %v7012_v21 = vld [vmem:[%s16592_s0 + $0x2b8] sm:$0xff]  ;;  %v11423_v22 = vpop.f32.mrb[30].mxu1 }
 0x401   :  { %v11425_v20 = vpop.f32.mrb[31].mxu1 }
 0x403   :  { %2208 = vmatmul.mubr.f32.gmra.mrb[96].mxu0 %v7010_v12 }
 0x404   :  { %2212 = vmatprep.mubr.f32.mxu0 %v10845_v25  ;;  %v7013_v25 = vld [vmem:[%s16592_s0 + $0x2c0] sm:$0xff]  ;;  %v11438_v9 = vpop.f32.mrb[32].mxu1 }
 0x405   :  { %v11440_v18 = vpop.f32.mrb[33].mxu1 }
 0x407   :  { %2213 = vmatmul.mubr.f32.gmra.mrb[98].mxu0 %v7011_v17  ;;  %v7020_v17 = vld [vmem:[%s16592_s0 + $0x318] sm:$0xff] }
 0x408   :  { %2217 = vmatprep.mubr.f32.mxu0 %v10855_v28  ;;  %v7014_v28 = vld [vmem:[%s16592_s0 + $0x2d0] sm:$0xff] }
 0x40b   :  { %2218 = vmatmul.mubr.f32.gmra.mrb[100].mxu0 %v7012_v21  ;;  %v7085_v21 = vld [vmem:[%s16592_s0 + $0x321] sm:$0xff] }
 0x40c   :  { %2222 = vmatprep.mubr.f32.mxu0 %v10865_v33  ;;  %v7015_v33 = vld [vmem:[%s16592_s0 + $0x2d8] sm:$0xff] }
 0x40f   :  { %2223 = vmatmul.mubr.f32.gmra.mrb[102].mxu0 %v7013_v25 }
 0x410   :  { %2227 = vmatprep.mubr.f32.mxu0 %v10875_v36 }
 0x413   :  { %2228 = vmatmul.mubr.f32.gmra.mrb[104].mxu0 %v7014_v28 }
 0x414   :  { %2232 = vmatprep.mubr.f32.mxu0 %v10885_v40  ;;  %v7016_v40 = vld [vmem:[%s16592_s0 + $0x2e8] sm:$0xff] }
 0x416   :  { %v1969_v38 = vpop.f32.mrb[0].mxu0 }
 0x417   :  { %v11443_v36 = vadd.f32 %v11100_v43, %v1969_v38  ;;  %v1971_v14 = vpop.f32.mrb[1].mxu0  ;;  %2233 = vmatmul.mubr.f32.gmra.mrb[106].mxu0 %v7015_v33  ;;  %v7017_v43 = vld [vmem:[%s16592_s0 + $0x2f0] sm:$0xff] }
 0x418   :  { %2237 = vmatprep.mubr.f32.mxu0 %v7080_v53  ;;  %v11460_v48 = vpop.f32.mrb[34].mxu1  ;;  %v7086_v53 = vld [vmem:[%s16592_s0 + $0x331] sm:$0xff] }
 0x419   :  { %16771 = vst [vmem:[#allocation3_spill] sm:$0xff] %v11443_v36  ;;  %v11462_v4 = vpop.f32.mrb[35].mxu1 }
 0x41a   :  { %v1974_v46 = vpop.f32.mrb[2].mxu0 }
 0x41b   :  { %v11452_v5 = vadd.f32 %v11098_v35, %v1974_v46  ;;  %v1976_v51 = vpop.f32.mrb[3].mxu0  ;;  %2238 = vmatmul.mubr.f32.gmra.mrb[108].mxu0 %v7016_v40  ;;  %v7022_v46 = vld [vmem:[%s16592_s0 + $0x330] sm:$0xff] }
 0x41c   :  { %2242 = vmatprep.mubr.f32.mxu0 %v7081_v59  ;;  %v7087_v51 = vld [vmem:[%s16592_s0 + $0x339] sm:$0xff] }
 0x41d   :  { %16772 = vst [vmem:[#allocation4_spill] sm:$0xff] %v11452_v5 }
 0x41e   :  { %v1979_v30 = vpop.f32.mrb[4].mxu0 }
 0x41f   :  { %v11465_v23 = vadd.f32 %v11229_v39, %v1979_v30  ;;  %v1981_v35 = vpop.f32.mrb[5].mxu0  ;;  %2243 = vmatmul.mubr.f32.gmra.mrb[110].mxu0 %v7017_v43  ;;  %v7019_v39 = vld [vmem:[%s16592_s0 + $0x308] sm:$0xff] }
 0x420   :  { %2247 = vmatprep.mubr.f32.mxu0 %v7082_v32  ;;  %v11482_v1 = vpop.f32.mrb[36].mxu1  ;;  %v7088_v35 = vld [vmem:[%s16592_s0 + $0x349] sm:$0xff] }
 0x421   :  { %16773 = vst [vmem:[#allocation5_spill] sm:$0xff] %v11465_v23  ;;  %v11484_v8 = vpop.f32.mrb[37].mxu1 }
 0x422   :  { %v1984_v0 = vpop.f32.mrb[6].mxu0 }
 0x423   :  { %v11474_v54 = vadd.f32 %v11227_v49, %v1984_v0  ;;  %v1986_v57 = vpop.f32.mrb[7].mxu0  ;;  %2248 = vmatmul.mubr.f32.gmra.mrb[112].mxu0 %v7018_v10 }
 0x424   :  { %2252 = vmatprep.mubr.f32.mxu0 %v7083_v37 }
 0x426   :  { %v1989_v6 = vpop.f32.mrb[8].mxu0 }
 0x427   :  { %v11487_v12 = vadd.f32 %v11247_v31, %v1989_v6  ;;  %v1991_v49 = vpop.f32.mrb[9].mxu0  ;;  %2253 = vmatmul.mubr.f32.gmra.mrb[114].mxu0 %v7019_v39  ;;  %v7021_v31 = vld [vmem:[%s16592_s0 + $0x320] sm:$0xff]  ;;  %v7024_v39 = vld [vmem:[%s16592_s0 + $0x348] sm:$0xff] }
 0x428   :  { %2257 = vmatprep.mubr.f32.mxu0 %v7084_v60  ;;  %v11504_v38 = vpop.f32.mrb[38].mxu1  ;;  %v7089_v60 = vld [vmem:[%s16592_s0 + $0x351] sm:$0xff] }
 0x429   :  { %v11506_v40 = vpop.f32.mrb[39].mxu1 }
 0x42a   :  { %v1994_v25 = vpop.f32.mrb[10].mxu0 }
 0x42b   :  { %v11496_v28 = vadd.f32 %v11245_v52, %v1994_v25  ;;  %v1996_v33 = vpop.f32.mrb[11].mxu0  ;;  %2258 = vmatmul.mubr.f32.gmra.mrb[116].mxu0 %v7020_v17 }
 0x42c   :  { %2262 = vmatprep.mubr.f32.mxu0 %v7085_v21 }
 0x42e   :  { %v1999_v14 = vpop.f32.mrb[12].mxu0 }
 0x42f   :  { %v11509_v59 = vadd.f32 %v11265_v3, %v1999_v14  ;;  %v2001_v52 = vpop.f32.mrb[13].mxu0  ;;  %2263 = vmatmul.mubr.f32.gmra.mrb[118].mxu0 %v7021_v31  ;;  %v7023_v3 = vld [vmem:[%s16592_s0 + $0x338] sm:$0xff] }
 0x430   :  { %2267 = vmatprep.mubr.f32.mxu0 %v7086_v53  ;;  %v11526_v10 = vpop.f32.mrb[40].mxu1 }
 0x431   :  { %v11528_v0 = vpop.f32.mrb[41].mxu1 }
 0x432   :  { %v2004_v43 = vpop.f32.mrb[14].mxu0 }
 0x433   :  { %v11518_v32 = vadd.f32 %v11263_v44, %v2004_v43  ;;  %v2006_v30 = vpop.f32.mrb[15].mxu0  ;;  %2268 = vmatmul.mubr.f32.gmra.mrb[120].mxu0 %v7022_v46 }
 0x434   :  { %2272 = vmatprep.mubr.f32.mxu0 %v7087_v51 }
 0x436   :  { %v2009_v37 = vpop.f32.mrb[16].mxu0 }
 0x437   :  { %v11531_v57 = vadd.f32 %v11286_v26, %v2009_v37  ;;  %v2011_v44 = vpop.f32.mrb[17].mxu0  ;;  %2273 = vmatmul.mubr.f32.gmra.mrb[122].mxu0 %v7023_v3  ;;  %v7025_v26 = vld [vmem:[%s16592_s0 + $0x350] sm:$0xff] }
 0x438   :  { %2277 = vmatprep.mubr.f32.mxu0 %v7088_v35  ;;  %v11545_v21 = vpop.f32.mrb[42].mxu1 }
 0x439   :  { %v11547_v33 = vpop.f32.mrb[43].mxu1 }
 0x43a   :  { %v2014_v6 = vpop.f32.mrb[18].mxu0 }
 0x43b   :  { %v11540_v49 = vadd.f32 %v11284_v55, %v2014_v6  ;;  %v2016_v17 = vpop.f32.mrb[19].mxu0  ;;  %2278 = vmatmul.mubr.f32.gmra.mrb[124].mxu0 %v7024_v39 }
 0x43c   :  { %2282 = vmatprep.mubr.f32.mxu0 %v7089_v60 }
 0x43e   :  { %v2019_v25 = vpop.f32.mrb[20].mxu0 }
 0x43f   :  { %v11550_v31 = vadd.f32 %v11305_v19, %v2019_v25  ;;  %v2021_v53 = vpop.f32.mrb[21].mxu0  ;;  %2283 = vmatmul.mubr.f32.gmra.mrb[126].mxu0 %v7025_v26 }
 0x440   :  { %v11555_v46 = vpop.f32.mrb[44].mxu1 }
 0x441   :  { %v11557_v43 = vpop.f32.mrb[45].mxu1 }
 0x442   :  { %v2024_v14 = vpop.f32.mrb[22].mxu0 }
 0x443   :  { %v11553_v55 = vadd.f32 %v11303_v2, %v2024_v14  ;;  %v2026_v52 = vpop.f32.mrb[23].mxu0 }
 0x446   :  { %v2029_v51 = vpop.f32.mrb[24].mxu0 }
 0x447   :  { %v11560_v30 = vadd.f32 %v11317_v24, %v2029_v51  ;;  %v2031_v3 = vpop.f32.mrb[25].mxu0 }
 0x448   :  { %v11565_v44 = vpop.f32.mrb[46].mxu1 }
 0x449   :  { %v11567_v2 = vpop.f32.mrb[47].mxu1 }
 0x44a   :  { %v2034_v35 = vpop.f32.mrb[26].mxu0 }
 0x44b   :  { %v11563_v19 = vadd.f32 %v11315_v47, %v2034_v35  ;;  %v2036_v37 = vpop.f32.mrb[27].mxu0 }
 0x44e   :  { %v2039_v39 = vpop.f32.mrb[28].mxu0 }
 0x44f   :  { %v11570_v60 = vadd.f32 %v11329_v45, %v2039_v39  ;;  %v2041_v6 = vpop.f32.mrb[29].mxu0 }
 0x450   :  { %v11575_v25 = vpop.f32.mrb[48].mxu1 }
 0x451   :  { %v11577_v47 = vpop.f32.mrb[49].mxu1 }
 0x452   :  { %v2044_v17 = vpop.f32.mrb[30].mxu0 }
 0x453   :  { %v11573_v26 = vadd.f32 %v11327_v29, %v2044_v17  ;;  %v2046_v24 = vpop.f32.mrb[31].mxu0 }
 0x456   :  { %v2049_v53 = vpop.f32.mrb[32].mxu0 }
 0x457   :  { %v11580_v14 = vadd.f32 %v11341_v27, %v2049_v53  ;;  %v2051_v52 = vpop.f32.mrb[33].mxu0 }
 0x458   :  { %v11585_v35 = vpop.f32.mrb[50].mxu1 }
 0x459   :  { %16774 = vst [vmem:[#allocation6_spill] sm:$0xff] %v11585_v35  ;;  %v11587_v29 = vpop.f32.mrb[51].mxu1 }
 0x45a   :  { %v2054_v51 = vpop.f32.mrb[34].mxu0 }
 0x45b   :  { %v11583_v3 = vadd.f32 %v11339_v16, %v2054_v51  ;;  %v2056_v45 = vpop.f32.mrb[35].mxu0 }
 0x45e   :  { %v2059_v37 = vpop.f32.mrb[36].mxu0 }
 0x45f   :  { %v11590_v39 = vadd.f32 %v11353_v50, %v2059_v37  ;;  %v2061_v6 = vpop.f32.mrb[37].mxu0 }
 0x460   :  { %v11595_v53 = vpop.f32.mrb[52].mxu1 }
 0x461   :  { %16775 = vst [vmem:[#allocation7_spill] sm:$0xff] %v11595_v53  ;;  %v11597_v16 = vpop.f32.mrb[53].mxu1 }
 0x462   :  { %v2064_v17 = vpop.f32.mrb[38].mxu0  ;;  %16776 = vst [vmem:[#allocation8_spill] sm:$0xff] %v11597_v16 }
 0x463   :  { %v11593_v24 = vadd.f32 %v11351_v34, %v2064_v17  ;;  %v2066_v27 = vpop.f32.mrb[39].mxu0 }
 0x466   :  { %v2069_v52 = vpop.f32.mrb[40].mxu0 }
 0x467   :  { %v11600_v51 = vadd.f32 %v11365_v13, %v2069_v52  ;;  %v2071_v45 = vpop.f32.mrb[41].mxu0 }
 0x46a   :  { %v2074_v15 = vpop.f32.mrb[42].mxu0 }
 0x46b   :  { %v11603_v35 = vadd.f32 %v11363_v42, %v2074_v15  ;;  %v2076_v50 = vpop.f32.mrb[43].mxu0 }
 0x46c   :  { %v11605_v37 = vpop.f32.mrb[54].mxu1 }
 0x46d   :  { %16777 = vst [vmem:[#allocation9_spill] sm:$0xff] %v11605_v37  ;;  %v11607_v34 = vpop.f32.mrb[55].mxu1 }
 0x46e   :  { %v2079_v6 = vpop.f32.mrb[44].mxu0  ;;  %16778 = vst [vmem:[#allocation10_spill] sm:$0xff] %v11607_v34 }
 0x46f   :  { %v11610_v17 = vadd.f32 %v11377_v58, %v2079_v6  ;;  %v2081_v27 = vpop.f32.mrb[45].mxu0 }
 0x470   :  { %v11615_v52 = vpop.f32.mrb[56].mxu1 }
 0x471   :  { %16779 = vst [vmem:[#allocation11_spill] sm:$0xff] %v11615_v52  ;;  %v11617_v15 = vpop.f32.mrb[57].mxu1 }
 0x472   :  { %v2084_v53 = vpop.f32.mrb[46].mxu0  ;;  %16780 = vst [vmem:[#allocation12_spill] sm:$0xff] %v11617_v15 }
 0x473   :  { %v11613_v16 = vadd.f32 %v11375_v63, %v2084_v53  ;;  %v2086_v13 = vpop.f32.mrb[47].mxu0 }
 0x476   :  { %v2089_v45 = vpop.f32.mrb[48].mxu0 }
 0x477   :  { %v11620_v42 = vadd.f32 %v11389_v62, %v2089_v45  ;;  %v2091_v50 = vpop.f32.mrb[49].mxu0 }
 0x478   :  { %v11625_v6 = vpop.f32.mrb[58].mxu1 }
 0x479   :  { %16781 = vst [vmem:[#allocation13_spill] sm:$0xff] %v11625_v6  ;;  %v11627_v63 = vpop.f32.mrb[59].mxu1 }
 0x47a   :  { %v2094_v37 = vpop.f32.mrb[50].mxu0 }
 0x47b   :  { %v11623_v34 = vadd.f32 %v11387_v7, %v2094_v37  ;;  %v2096_v58 = vpop.f32.mrb[51].mxu0 }
 0x47c   :  { %v11635_v45 = vpop.f32.mrb[60].mxu1 }
 0x47d   :  { %16782 = vst [vmem:[#allocation14_spill] sm:$0xff] %v11635_v45  ;;  %v11637_v7 = vpop.f32.mrb[61].mxu1 }
 0x47e   :  { %v2099_v27 = vpop.f32.mrb[52].mxu0  ;;  %16783 = vst [vmem:[#allocation15_spill] sm:$0xff] %v11637_v7 }
 0x47f   :  { %v11630_v53 = vadd.f32 %v11401_v41, %v2099_v27  ;;  %v2101_v13 = vpop.f32.mrb[53].mxu0  ;;  %v2673_v41 = vadd.f32 %v11452_v5, %v11443_v36 }
 0x482   :  { %v2104_v52 = vpop.f32.mrb[54].mxu0 }
 0x483   :  { %v11633_v15 = vadd.f32 %v11399_v61, %v2104_v52  ;;  %v2106_v62 = vpop.f32.mrb[55].mxu0  ;;  %v2674_v61 = vadd.f32 %v2673_v41, %v11465_v23 }
 0x485   :  { %v2675_v7 = vadd.f32 %v2674_v61, %v11474_v54 }
 0x486   :  { %v2109_v50 = vpop.f32.mrb[56].mxu0 }
 0x487   :  { %v11640_v37 = vadd.f32 %v11413_v11, %v2109_v50  ;;  %v2111_v58 = vpop.f32.mrb[57].mxu0 }
 0x488   :  { %v2676_v58 = vadd.f32 %v2675_v7, %v11487_v12 }
 0x489   :  { %v11648_v52 = vpop.f32.mrb[62].mxu1 }
 0x48a   :  { %v2114_v6 = vpop.f32.mrb[58].mxu0  ;;  %v11650_v45 = vpop.f32.mrb[63].mxu1 }
 0x48b   :  { %v11645_v27 = vadd.f32 %v11411_v56, %v2114_v6  ;;  %v2116_v13 = vpop.f32.mrb[59].mxu0  ;;  %v2677_v56 = vadd.f32 %v2676_v58, %v11496_v28 }
 0x48d   :  { %v2678_v13 = vadd.f32 %v2677_v56, %v11509_v59 }
 0x48e   :  { %v2119_v62 = vpop.f32.mrb[60].mxu0 }
 0x48f   :  { %v11654_v11 = vadd.f32 %v11425_v20, %v2119_v62  ;;  %v2121_v50 = vpop.f32.mrb[61].mxu0  ;;  %v2679_v36 = vadd.f32 %v2678_v13, %v11518_v32 }
 0x491   :  { %v2680_v62 = vadd.f32 %v2679_v36, %v11531_v57 }
 0x492   :  { %v2124_v5 = vpop.f32.mrb[62].mxu0 }
 0x493   :  { %v11659_v6 = vadd.f32 %v11423_v22, %v2124_v5  ;;  %v2126_v41 = vpop.f32.mrb[63].mxu0  ;;  %v2681_v7 = vadd.f32 %v2680_v62, %v11540_v49 }
 0x495   :  { %v2682_v5 = vadd.f32 %v2681_v7, %v11550_v31 }
 0x496   :  { %v2129_v23 = vpop.f32.mrb[64].mxu0 }
 0x497   :  { %v11664_v61 = vadd.f32 %v11440_v18, %v2129_v23  ;;  %v2131_v20 = vpop.f32.mrb[65].mxu0  ;;  %v2683_v56 = vadd.f32 %v2682_v5, %v11553_v55 }
 0x499   :  { %v2684_v23 = vadd.f32 %v2683_v56, %v11560_v30 }
 0x49a   :  { %v2134_v50 = vpop.f32.mrb[66].mxu0 }
 0x49b   :  { %v11669_v58 = vadd.f32 %v11438_v9, %v2134_v50  ;;  %v2136_v22 = vpop.f32.mrb[67].mxu0  ;;  %v2685_v36 = vadd.f32 %v2684_v23, %v11563_v19 }
 0x49d   :  { %v2686_v50 = vadd.f32 %v2685_v36, %v11570_v60 }
 0x49e   :  { %v2139_v41 = vpop.f32.mrb[68].mxu0 }
 0x49f   :  { %v11674_v13 = vadd.f32 %v11462_v4, %v2139_v41  ;;  %v2141_v18 = vpop.f32.mrb[69].mxu0  ;;  %v2687_v7 = vadd.f32 %v2686_v50, %v11573_v26 }
 0x4a1   :  { %v2688_v41 = vadd.f32 %v2687_v7, %v11580_v14 }
 0x4a2   :  { %v2144_v20 = vpop.f32.mrb[70].mxu0 }
 0x4a3   :  { %v11679_v62 = vadd.f32 %v11460_v48, %v2144_v20  ;;  %v2146_v9 = vpop.f32.mrb[71].mxu0  ;;  %v2689_v56 = vadd.f32 %v2688_v41, %v11583_v3 }
 0x4a5   :  { %v2690_v20 = vadd.f32 %v2689_v56, %v11590_v39 }
 0x4a6   :  { %v2149_v22 = vpop.f32.mrb[72].mxu0 }
 0x4a7   :  { %v11684_v5 = vadd.f32 %v11484_v8, %v2149_v22  ;;  %v2151_v4 = vpop.f32.mrb[73].mxu0  ;;  %v2691_v36 = vadd.f32 %v2690_v20, %v11593_v24 }
 0x4a9   :  { %v2692_v22 = vadd.f32 %v2691_v36, %v11600_v51 }
 0x4aa   :  { %v2154_v18 = vpop.f32.mrb[74].mxu0 }
 0x4ab   :  { %v11689_v23 = vadd.f32 %v11482_v1, %v2154_v18  ;;  %v2156_v48 = vpop.f32.mrb[75].mxu0  ;;  %v2693_v7 = vadd.f32 %v2692_v22, %v11603_v35 }
 0x4ad   :  { %v2694_v18 = vadd.f32 %v2693_v7, %v11610_v17 }
 0x4ae   :  { %v2159_v9 = vpop.f32.mrb[76].mxu0 }
 0x4af   :  { %v11694_v50 = vadd.f32 %v11506_v40, %v2159_v9  ;;  %v2161_v8 = vpop.f32.mrb[77].mxu0  ;;  %v2695_v56 = vadd.f32 %v2694_v18, %v11613_v16 }
 0x4b1   :  { %16784 = vst [vmem:[#allocation16_spill] sm:$0xff] %v11694_v50  ;;  %v2696_v9 = vadd.f32 %v2695_v56, %v11620_v42 }
 0x4b2   :  { %v2164_v4 = vpop.f32.mrb[78].mxu0 }
 0x4b3   :  { %v11699_v41 = vadd.f32 %v11504_v38, %v2164_v4  ;;  %v2166_v1 = vpop.f32.mrb[79].mxu0  ;;  %v2697_v36 = vadd.f32 %v2696_v9, %v11623_v34 }
 0x4b5   :  { %16785 = vst [vmem:[#allocation17_spill] sm:$0xff] %v11699_v41  ;;  %v2698_v4 = vadd.f32 %v2697_v36, %v11630_v53 }
 0x4b6   :  { %v2169_v48 = vpop.f32.mrb[80].mxu0 }
 0x4b7   :  { %v11704_v20 = vadd.f32 %v11528_v0, %v2169_v48  ;;  %v2171_v40 = vpop.f32.mrb[81].mxu0  ;;  %v2699_v7 = vadd.f32 %v2698_v4, %v11633_v15 }
 0x4b9   :  { %16786 = vst [vmem:[#allocation18_spill] sm:$0xff] %v11704_v20  ;;  %v2700_v48 = vadd.f32 %v2699_v7, %v11640_v37 }
 0x4ba   :  { %v2174_v8 = vpop.f32.mrb[82].mxu0 }
 0x4bb   :  { %v11709_v22 = vadd.f32 %v11526_v10, %v2174_v8  ;;  %v2176_v38 = vpop.f32.mrb[83].mxu0  ;;  %v2701_v56 = vadd.f32 %v2700_v48, %v11645_v27 }
 0x4bd   :  { %16787 = vst [vmem:[#allocation19_spill] sm:$0xff] %v11709_v22  ;;  %v2702_v8 = vadd.f32 %v2701_v56, %v11654_v11 }
 0x4be   :  { %v2179_v1 = vpop.f32.mrb[84].mxu0 }
 0x4bf   :  { %v11714_v18 = vadd.f32 %v11547_v33, %v2179_v1  ;;  %v2181_v0 = vpop.f32.mrb[85].mxu0  ;;  %v2703_v36 = vadd.f32 %v2702_v8, %v11659_v6 }
 0x4c1   :  { %16788 = vst [vmem:[#allocation20_spill] sm:$0xff] %v11714_v18  ;;  %v2704_v1 = vadd.f32 %v2703_v36, %v11664_v61 }
 0x4c2   :  { %v2184_v40 = vpop.f32.mrb[86].mxu0 }
 0x4c3   :  { %v11719_v9 = vadd.f32 %v11545_v21, %v2184_v40  ;;  %v2186_v10 = vpop.f32.mrb[87].mxu0  ;;  %v2705_v7 = vadd.f32 %v2704_v1, %v11669_v58 }
 0x4c5   :  { %16789 = vst [vmem:[#allocation21_spill] sm:$0xff] %v11719_v9  ;;  %v2706_v40 = vadd.f32 %v2705_v7, %v11674_v13 }
 0x4c6   :  { %v2189_v38 = vpop.f32.mrb[88].mxu0 }
 0x4c7   :  { %v11724_v4 = vadd.f32 %v11557_v43, %v2189_v38  ;;  %v2191_v33 = vpop.f32.mrb[89].mxu0  ;;  %v2707_v56 = vadd.f32 %v2706_v40, %v11679_v62 }
 0x4c9   :  { %16790 = vst [vmem:[#allocation22_spill] sm:$0xff] %v11724_v4  ;;  %v2708_v38 = vadd.f32 %v2707_v56, %v11684_v5 }
 0x4ca   :  { %v2194_v0 = vpop.f32.mrb[90].mxu0 }
 0x4cb   :  { %v11729_v48 = vadd.f32 %v11555_v46, %v2194_v0  ;;  %v2196_v21 = vpop.f32.mrb[91].mxu0  ;;  %v2709_v36 = vadd.f32 %v2708_v38, %v11689_v23 }
 0x4cd   :  { %16791 = vst [vmem:[#allocation23_spill] sm:$0xff] %v11729_v48  ;;  %v2710_v0 = vadd.f32 %v2709_v36, %v11694_v50 }
 0x4ce   :  { %v2199_v10 = vpop.f32.mrb[92].mxu0 }
 0x4cf   :  { %v11734_v8 = vadd.f32 %v11567_v2, %v2199_v10  ;;  %v2201_v43 = vpop.f32.mrb[93].mxu0  ;;  %v2711_v7 = vadd.f32 %v2710_v0, %v11699_v41 }
 0x4d1   :  { %16792 = vst [vmem:[#allocation24_spill] sm:$0xff] %v11734_v8  ;;  %v2712_v10 = vadd.f32 %v2711_v7, %v11704_v20  ;;  %v16797_v20 = vld [vmem:[#allocation6_spill] sm:$0xff] }
 0x4d2   :  { %v2204_v33 = vpop.f32.mrb[94].mxu0 }
 0x4d3   :  { %v11739_v1 = vadd.f32 %v11565_v44, %v2204_v33  ;;  %v2206_v46 = vpop.f32.mrb[95].mxu0  ;;  %v2713_v56 = vadd.f32 %v2712_v10, %v11709_v22  ;;  %v16810_v22 = vld [vmem:[#allocation14_spill] sm:$0xff] }
 0x4d5   :  { %16793 = vst [vmem:[#allocation25_spill] sm:$0xff] %v11739_v1  ;;  %v2714_v33 = vadd.f32 %v2713_v56, %v11714_v18  ;;  %v16799_v18 = vld [vmem:[#allocation8_spill] sm:$0xff] }
 0x4d6   :  { %v2209_v21 = vpop.f32.mrb[96].mxu0 }
 0x4d7   :  { %v11744_v40 = vadd.f32 %v11577_v47, %v2209_v21  ;;  %v2211_v2 = vpop.f32.mrb[97].mxu0  ;;  %v2715_v36 = vadd.f32 %v2714_v33, %v11719_v9  ;;  %v16809_v9 = vld [vmem:[#allocation15_spill] sm:$0xff] }
 0x4d9   :  { %16794 = vst [vmem:[#allocation26_spill] sm:$0xff] %v11744_v40  ;;  %v2716_v21 = vadd.f32 %v2715_v36, %v11724_v4  ;;  %v16801_v4 = vld [vmem:[#allocation7_spill] sm:$0xff] }
 0x4da   :  { %v2214_v43 = vpop.f32.mrb[98].mxu0 }
 0x4db   :  { %v11749_v38 = vadd.f32 %v11575_v25, %v2214_v43  ;;  %v2216_v44 = vpop.f32.mrb[99].mxu0  ;;  %v2717_v7 = vadd.f32 %v2716_v21, %v11729_v48 }
 0x4dd   :  { %16795 = vst [vmem:[#allocation27_spill] sm:$0xff] %v11749_v38  ;;  %v2718_v43 = vadd.f32 %v2717_v7, %v11734_v8  ;;  %v16803_v8 = vld [vmem:[#allocation10_spill] sm:$0xff] }
 0x4de   :  { %v2219_v46 = vpop.f32.mrb[100].mxu0 }
 0x4df   :  { %v11754_v0 = vadd.f32 %v11587_v29, %v2219_v46  ;;  %v2221_v47 = vpop.f32.mrb[101].mxu0  ;;  %v2719_v56 = vadd.f32 %v2718_v43, %v11739_v1 }
 0x4e1   :  { %16796 = vst [vmem:[#allocation28_spill] sm:$0xff] %v11754_v0  ;;  %v2720_v46 = vadd.f32 %v2719_v56, %v11744_v40  ;;  %v16805_v40 = vld [vmem:[#allocation9_spill] sm:$0xff] }
 0x4e2   :  { %v2224_v2 = vpop.f32.mrb[102].mxu0 }
 0x4e3   :  { %v11759_v10 = vadd.f32 %v16797_v20, %v2224_v2  ;;  %v2226_v25 = vpop.f32.mrb[103].mxu0  ;;  %v2721_v36 = vadd.f32 %v2720_v46, %v11749_v38 }
 0x4e5   :  { %16798 = vst [vmem:[#allocation6_spill] sm:$0xff] %v11759_v10  ;;  %v2722_v2 = vadd.f32 %v2721_v36, %v11754_v0  ;;  %v16806_v36 = vld [vmem:[#allocation12_spill] sm:$0xff] }
 0x4e6   :  { %v2229_v44 = vpop.f32.mrb[104].mxu0 }
 0x4e7   :  { %v11764_v33 = vadd.f32 %v16799_v18, %v2229_v44  ;;  %v2231_v29 = vpop.f32.mrb[105].mxu0  ;;  %v2723_v7 = vadd.f32 %v2722_v2, %v11759_v10 }
 0x4e9   :  { %16800 = vst [vmem:[#allocation8_spill] sm:$0xff] %v11764_v33  ;;  %v2724_v44 = vadd.f32 %v2723_v7, %v11764_v33 }
 0x4ea   :  { %v2234_v47 = vpop.f32.mrb[106].mxu0 }
 0x4eb   :  { %v11769_v21 = vadd.f32 %v16801_v4, %v2234_v47  ;;  %v2236_v20 = vpop.f32.mrb[107].mxu0 }
 0x4ed   :  { %16802 = vst [vmem:[#allocation7_spill] sm:$0xff] %v11769_v21  ;;  %v2725_v56 = vadd.f32 %v2724_v44, %v11769_v21 }
 0x4ee   :  { %v2239_v25 = vpop.f32.mrb[108].mxu0 }
 0x4ef   :  { %v11774_v43 = vadd.f32 %v16803_v8, %v2239_v25  ;;  %v2241_v18 = vpop.f32.mrb[109].mxu0  ;;  %v16807_v8 = vld [vmem:[#allocation11_spill] sm:$0xff] }
 0x4f1   :  { %16804 = vst [vmem:[#allocation10_spill] sm:$0xff] %v11774_v43  ;;  %v2726_v4 = vadd.f32 %v2725_v56, %v11774_v43 }
 0x4f2   :  { %v2244_v29 = vpop.f32.mrb[110].mxu0 }
 0x4f3   :  { %v2630_v46 = vadd.f32 %v16805_v40, %v2244_v29  ;;  %v2246_v38 = vpop.f32.mrb[111].mxu0 }
 0x4f4   :  { %v16808_v38 = vld [vmem:[#allocation13_spill] sm:$0xff] }
 0x4f5   :  { %v2727_v20 = vadd.f32 %v2726_v4, %v2630_v46 }
 0x4f6   :  { %v2249_v47 = vpop.f32.mrb[112].mxu0 }
 0x4f7   :  { %v2635_v0 = vadd.f32 %v16806_v36, %v2249_v47  ;;  %v2251_v1 = vpop.f32.mrb[113].mxu0 }
 0x4f9   :  { %v2728_v2 = vadd.f32 %v2727_v20, %v2635_v0 }
 0x4fa   :  { %v2254_v10 = vpop.f32.mrb[114].mxu0 }
 0x4fb   :  { %v2640_v25 = vadd.f32 %v16807_v8, %v2254_v10  ;;  %v2256_v18 = vpop.f32.mrb[115].mxu0 }
 0x4fd   :  { %v2729_v48 = vadd.f32 %v2728_v2, %v2640_v25 }
 0x4fe   :  { %v2259_v7 = vpop.f32.mrb[116].mxu0 }
 0x4ff   :  { %v2645_v33 = vadd.f32 %v11627_v63, %v2259_v7  ;;  %v2261_v44 = vpop.f32.mrb[117].mxu0 }
 0x501   :  { %v2730_v21 = vadd.f32 %v2729_v48, %v2645_v33 }
 0x502   :  { %v2264_v40 = vpop.f32.mrb[118].mxu0 }
 0x503   :  { %v2650_v29 = vadd.f32 %v16808_v38, %v2264_v40  ;;  %v2266_v56 = vpop.f32.mrb[119].mxu0 }
 0x505   :  { %v2731_v43 = vadd.f32 %v2730_v21, %v2650_v29 }
 0x506   :  { %v2269_v4 = vpop.f32.mrb[120].mxu0 }
 0x507   :  { %v2655_v47 = vadd.f32 %v16809_v9, %v2269_v4  ;;  %v2271_v1 = vpop.f32.mrb[121].mxu0 }
 0x509   :  { %v2732_v20 = vadd.f32 %v2731_v43, %v2655_v47 }
 0x50a   :  { %v2274_v36 = vpop.f32.mrb[122].mxu0 }
 0x50b   :  { %v2660_v10 = vadd.f32 %v16810_v22, %v2274_v36  ;;  %v2276_v8 = vpop.f32.mrb[123].mxu0 }
 0x50d   :  { %v2733_v2 = vadd.f32 %v2732_v20, %v2660_v10 }
 0x50e   :  { %v2279_v18 = vpop.f32.mrb[124].mxu0 }
 0x50f   :  { %v2665_v63 = vadd.f32 %v11650_v45, %v2279_v18  ;;  %v2281_v7 = vpop.f32.mrb[125].mxu0 }
 0x511   :  { %v2734_v48 = vadd.f32 %v2733_v2, %v2665_v63 }
 0x512   :  { %v2284_v44 = vpop.f32.mrb[126].mxu0 }
 0x513   :  { %v2670_v40 = vadd.f32 %v11648_v52, %v2284_v44  ;;  %v2286_v38 = vpop.f32.mrb[127].mxu0 }
 0x515   :  { %v2735_v21 = vadd.f32 %v2734_v48, %v2670_v40 }
 0x517   :  { %v2736_v56 = vrot.slane %v2735_v21, 4 }
 0x519   :  { %v2737_v41 = vadd.f32 %v2736_v56, %v2735_v21 }
 0x51b   :  { %v2738_v9 = vrot.slane %v2737_v41, 2 }
 0x51d   :  { %v2739_v4 = vadd.f32 %v2738_v9, %v2737_v41 }
 0x51f   :  { %v2740_v43 = vrot.slane %v2739_v4, 1 }
 0x521   :  { %v2741_v1 = vadd.f32 %v2740_v43, %v2739_v4 }
 0x523   :  { %v11788_v50 = vmul.f32 0.001953125, %v2741_v1 }
 0x525   :  { %v11791_v22 = vsub.f32 %v2630_v46, %v11788_v50  ;;  %v11794_v45 = vsub.f32 %v2635_v0, %v11788_v50  ;;  %v11797_v20 = vsub.f32 %v2640_v25, %v11788_v50  ;;  %v11800_v52 = vsub.f32 %v2645_v33, %v11788_v50  ;;  %v16813_v25 = vld [vmem:[#allocation3_spill] sm:$0xff]  ;;  %v16814_v33 = vld [vmem:[#allocation4_spill] sm:$0xff] }
 0x526   :  { %v11803_v36 = vsub.f32 %v2650_v29, %v11788_v50  ;;  %v11806_v41 = vsub.f32 %v2655_v47, %v11788_v50  ;;  %v11809_v8 = vsub.f32 %v2660_v10, %v11788_v50  ;;  %v11812_v46 = vsub.f32 %v2665_v63, %v11788_v50  ;;  %v16815_v47 = vld [vmem:[#allocation5_spill] sm:$0xff] }
 0x527   :  { %16811 = vst [vmem:[#allocation9_spill] sm:$0xff] %v11794_v45  ;;  %16812 = vst [vmem:[#allocation12_spill] sm:$0xff] %v11797_v20  ;;  %v11815_v0 = vsub.f32 %v2670_v40, %v11788_v50  ;;  %v11819_v2 = vsub.f32 %v16813_v25, %v11788_v50  ;;  %v11823_v29 = vsub.f32 %v16814_v33, %v11788_v50 }
 0x528   :  { %v11827_v18 = vsub.f32 %v16815_v47, %v11788_v50  ;;  %v11835_v7 = vsub.f32 %v11474_v54, %v11788_v50  ;;  %v11839_v48 = vsub.f32 %v11487_v12, %v11788_v50  ;;  %v11845_v38 = vsub.f32 %v11496_v28, %v11788_v50 }
 0x529   :  { %v2808_v10 = vmul.f32 %v11819_v2, %v11819_v2  ;;  %v2809_v63 = vmul.f32 %v11823_v29, %v11823_v29  ;;  %v11851_v54 = vsub.f32 %v11509_v59, %v11788_v50  ;;  %v11857_v4 = vsub.f32 %v11518_v32, %v11788_v50 }
 0x52a   :  { %v2810_v44 = vmul.f32 %v11827_v18, %v11827_v18  ;;  %v2811_v21 = vmul.f32 %v11835_v7, %v11835_v7  ;;  %v2812_v12 = vmul.f32 %v11839_v48, %v11839_v48  ;;  %v2813_v28 = vmul.f32 %v11845_v38, %v11845_v38 }
 0x52b   :  { %v2872_v40 = vadd.f32 %v2809_v63, %v2808_v10  ;;  %v11863_v1 = vsub.f32 %v11531_v57, %v11788_v50  ;;  %v2814_v59 = vmul.f32 %v11851_v54, %v11851_v54  ;;  %v11869_v33 = vsub.f32 %v11540_v49, %v11788_v50 }
 0x52c   :  { %v2815_v32 = vmul.f32 %v11857_v4, %v11857_v4  ;;  %v11875_v10 = vsub.f32 %v11550_v31, %v11788_v50 }
 0x52d   :  { %v2873_v56 = vadd.f32 %v2872_v40, %v2810_v44  ;;  %v2816_v57 = vmul.f32 %v11863_v1, %v11863_v1  ;;  %v11881_v44 = vsub.f32 %v11553_v55, %v11788_v50  ;;  %v2817_v49 = vmul.f32 %v11869_v33, %v11869_v33 }
 0x52e   :  { %v2818_v31 = vmul.f32 %v11875_v10, %v11875_v10 }
 0x52f   :  { %v2874_v9 = vadd.f32 %v2873_v56, %v2811_v21  ;;  %v11887_v21 = vsub.f32 %v11560_v30, %v11788_v50  ;;  %v2819_v55 = vmul.f32 %v11881_v44, %v11881_v44  ;;  %v3966_v30 = vld [vmem:[%s16593_s2 + $0x8] sm:$0xff] }
 0x531   :  { %v2875_v43 = vadd.f32 %v2874_v9, %v2812_v12  ;;  %v11893_v12 = vsub.f32 %v11563_v19, %v11788_v50  ;;  %v2820_v19 = vmul.f32 %v11887_v21, %v11887_v21 }
 0x533   :  { %v2876_v25 = vadd.f32 %v2875_v43, %v2813_v28  ;;  %v3965_v28 = vld [vmem:[%s16593_s2] sm:$0xff]  ;;  %v11905_v43 = vsub.f32 %v11570_v60, %v11788_v50  ;;  %v3967_v60 = vld [vmem:[%s16593_s2 + $0x10] sm:$0xff] }
 0x535   :  { %v2877_v47 = vadd.f32 %v2876_v25, %v2814_v59  ;;  %v7863_v25 = vpack.c.bf16 %v3966_v30, %v3965_v28  ;;  %v3970_v30 = vld [vmem:[%s16593_s2 + $0x28] sm:$0xff] }
 0x537   :  { %v2878_v63 = vadd.f32 %v2877_v47, %v2815_v32  ;;  %v11911_v32 = vsub.f32 %v11573_v26, %v11788_v50  ;;  %v2821_v47 = vmul.f32 %v11893_v12, %v11893_v12  ;;  %7864 = vmatpush1.bf16.msra.mxu1 %v7863_v25  ;;  %v2822_v26 = vmul.f32 %v11905_v43, %v11905_v43 }
 0x539   :  { %v2879_v40 = vadd.f32 %v2878_v63, %v2816_v57  ;;  %v16816_v63 = vmov 0.0|0.0  }
 0x53a   :  { %7865 = vmatprep.subr.bf16.mxu1 %v16816_v63 }
 0x53b   :  { %v2880_v56 = vadd.f32 %v2879_v40, %v2817_v49  ;;  %v3968_v49 = vld [vmem:[%s16593_s2 + $0x18] sm:$0xff]  ;;  %v11924_v40 = vsub.f32 %v11580_v14, %v11788_v50  ;;  %v3969_v14 = vld [vmem:[%s16593_s2 + $0x20] sm:$0xff] }
 0x53c   :  { %v7869_v25 = vpack.c.bf16 %v3970_v30, %v3969_v14  ;;  %v3974_v30 = vld [vmem:[%s16593_s2 + $0x48] sm:$0xff] }
 0x53d   :  { %v2881_v9 = vadd.f32 %v2880_v56, %v2818_v31  ;;  %v7866_v56 = vpack.c.bf16 %v3968_v49, %v3967_v60  ;;  %v3972_v49 = vld [vmem:[%s16593_s2 + $0x38] sm:$0xff] }
 0x53f   :  { %v2882_v59 = vadd.f32 %v2881_v9, %v2819_v55  ;;  %v11930_v55 = vsub.f32 %v11583_v3, %v11788_v50  ;;  %v2823_v9 = vmul.f32 %v11911_v32, %v11911_v32  ;;  %7867 = vmatpush1.bf16.msra.mxu1 %v7866_v56  ;;  %v2824_v3 = vmul.f32 %v11924_v40, %v11924_v40 }
 0x540   :  { %7868 = vmatprep.subr.bf16.mxu1 %v16816_v63 }
 0x541   :  { %v2883_v57 = vadd.f32 %v2882_v59, %v2820_v19  ;;  %v11943_v19 = vsub.f32 %v11590_v39, %v11788_v50  ;;  %v3971_v39 = vld [vmem:[%s16593_s2 + $0x30] sm:$0xff] }
 0x542   :  { %v7872_v56 = vpack.c.bf16 %v3972_v49, %v3971_v39  ;;  %v3976_v49 = vld [vmem:[%s16593_s2 + $0x58] sm:$0xff] }
 0x543   :  { %v2884_v31 = vadd.f32 %v2883_v57, %v2821_v47  ;;  %v11949_v47 = vsub.f32 %v11593_v24, %v11788_v50  ;;  %v2825_v57 = vmul.f32 %v11930_v55, %v11930_v55  ;;  %7870 = vmatpush1.bf16.msra.mxu1 %v7869_v25  ;;  %v2826_v24 = vmul.f32 %v11943_v19, %v11943_v19 }
 0x544   :  { %7871 = vmatprep.subr.bf16.mxu1 %v16816_v63 }
 0x545   :  { %v2885_v28 = vadd.f32 %v2884_v31, %v2822_v26  ;;  %v11962_v26 = vsub.f32 %v11600_v51, %v11788_v50  ;;  %v3973_v51 = vld [vmem:[%s16593_s2 + $0x40] sm:$0xff] }
 0x546   :  { %v7875_v25 = vpack.c.bf16 %v3974_v30, %v3973_v51  ;;  %v3978_v30 = vld [vmem:[%s16593_s2 + $0x68] sm:$0xff] }
 0x547   :  { %v2886_v59 = vadd.f32 %v2885_v28, %v2823_v9  ;;  %v11968_v9 = vsub.f32 %v11603_v35, %v11788_v50  ;;  %v2827_v28 = vmul.f32 %v11949_v47, %v11949_v47  ;;  %7873 = vmatpush1.bf16.msra.mxu1 %v7872_v56  ;;  %v2828_v35 = vmul.f32 %v11962_v26, %v11962_v26 }
 0x548   :  { %7874 = vmatprep.subr.bf16.mxu1 %v16816_v63 }
 0x549   :  { %v2887_v60 = vadd.f32 %v2886_v59, %v2824_v3  ;;  %v11981_v3 = vsub.f32 %v11610_v17, %v11788_v50  ;;  %v3975_v17 = vld [vmem:[%s16593_s2 + $0x50] sm:$0xff] }
 0x54a   :  { %v7878_v56 = vpack.c.bf16 %v3976_v49, %v3975_v17  ;;  %v3980_v49 = vld [vmem:[%s16593_s2 + $0x78] sm:$0xff] }
 0x54b   :  { %v2888_v31 = vadd.f32 %v2887_v60, %v2825_v57  ;;  %v11987_v57 = vsub.f32 %v11613_v16, %v11788_v50  ;;  %v2829_v60 = vmul.f32 %v11968_v9, %v11968_v9  ;;  %7876 = vmatpush1.bf16.msra.mxu1 %v7875_v25  ;;  %v2830_v16 = vmul.f32 %v11981_v3, %v11981_v3 }
 0x54c   :  { %7877 = vmatprep.subr.bf16.mxu1 %v16816_v63 }
 0x54d   :  { %v2889_v14 = vadd.f32 %v2888_v31, %v2826_v24  ;;  %v12000_v24 = vsub.f32 %v11620_v42, %v11788_v50  ;;  %v3977_v42 = vld [vmem:[%s16593_s2 + $0x60] sm:$0xff] }
 0x54e   :  { %v7881_v25 = vpack.c.bf16 %v3978_v30, %v3977_v42  ;;  %v3982_v30 = vld [vmem:[%s16593_s2 + $0x88] sm:$0xff] }
 0x54f   :  { %v2890_v59 = vadd.f32 %v2889_v14, %v2827_v28  ;;  %v12006_v28 = vsub.f32 %v11623_v34, %v11788_v50  ;;  %v2831_v14 = vmul.f32 %v11987_v57, %v11987_v57  ;;  %7879 = vmatpush1.bf16.msra.mxu1 %v7878_v56  ;;  %v2832_v34 = vmul.f32 %v12000_v24, %v12000_v24 }
 0x550   :  { %7880 = vmatprep.subr.bf16.mxu1 %v16816_v63 }
 0x551   :  { %v2891_v39 = vadd.f32 %v2890_v59, %v2828_v35  ;;  %v12019_v35 = vsub.f32 %v11630_v53, %v11788_v50  ;;  %v3979_v53 = vld [vmem:[%s16593_s2 + $0x70] sm:$0xff] }
 0x552   :  { %v7884_v56 = vpack.c.bf16 %v3980_v49, %v3979_v53  ;;  %v3984_v49 = vld [vmem:[%s16593_s2 + $0x98] sm:$0xff] }
 0x553   :  { %v2892_v31 = vadd.f32 %v2891_v39, %v2829_v60  ;;  %v12025_v60 = vsub.f32 %v11633_v15, %v11788_v50  ;;  %v2833_v39 = vmul.f32 %v12006_v28, %v12006_v28  ;;  %7882 = vmatpush1.bf16.msra.mxu1 %v7881_v25  ;;  %v2834_v15 = vmul.f32 %v12019_v35, %v12019_v35 }
 0x554   :  { %7883 = vmatprep.subr.bf16.mxu1 %v16816_v63 }
 0x555   :  { %v2893_v51 = vadd.f32 %v2892_v31, %v2830_v16  ;;  %v12038_v16 = vsub.f32 %v11640_v37, %v11788_v50  ;;  %v3981_v37 = vld [vmem:[%s16593_s2 + $0x80] sm:$0xff] }
 0x556   :  { %v7887_v25 = vpack.c.bf16 %v3982_v30, %v3981_v37  ;;  %v3986_v30 = vld [vmem:[%s16593_s2 + $0xa8] sm:$0xff] }
 0x557   :  { %v2894_v59 = vadd.f32 %v2893_v51, %v2831_v14  ;;  %v12044_v14 = vsub.f32 %v11645_v27, %v11788_v50  ;;  %v2835_v51 = vmul.f32 %v12025_v60, %v12025_v60  ;;  %7885 = vmatpush1.bf16.msra.mxu1 %v7884_v56  ;;  %v2836_v27 = vmul.f32 %v12038_v16, %v12038_v16 }
 0x558   :  { %7886 = vmatprep.subr.bf16.mxu1 %v16816_v63 }
 0x559   :  { %v2895_v17 = vadd.f32 %v2894_v59, %v2832_v34  ;;  %v12057_v34 = vsub.f32 %v11654_v11, %v11788_v50  ;;  %v3983_v11 = vld [vmem:[%s16593_s2 + $0x90] sm:$0xff] }
 0x55a   :  { %v7890_v56 = vpack.c.bf16 %v3984_v49, %v3983_v11  ;;  %v3988_v49 = vld [vmem:[%s16593_s2 + $0xb8] sm:$0xff] }
 0x55b   :  { %v2896_v31 = vadd.f32 %v2895_v17, %v2833_v39  ;;  %v12063_v39 = vsub.f32 %v11659_v6, %v11788_v50  ;;  %v2837_v17 = vmul.f32 %v12044_v14, %v12044_v14  ;;  %7888 = vmatpush1.bf16.msra.mxu1 %v7887_v25  ;;  %v2838_v6 = vmul.f32 %v12057_v34, %v12057_v34 }
 0x55c   :  { %7889 = vmatprep.subr.bf16.mxu1 %v16816_v63 }
 0x55d   :  { %v2897_v42 = vadd.f32 %v2896_v31, %v2834_v15  ;;  %v12076_v15 = vsub.f32 %v11664_v61, %v11788_v50  ;;  %v3985_v61 = vld [vmem:[%s16593_s2 + $0xa0] sm:$0xff] }
 0x55e   :  { %v7893_v25 = vpack.c.bf16 %v3986_v30, %v3985_v61  ;;  %v12128_v30 = vsub.f32 %v11689_v23, %v11788_v50  ;;  %v16820_v23 = vld [vmem:[#allocation16_spill] sm:$0xff] }
 0x55f   :  { %v2898_v59 = vadd.f32 %v2897_v42, %v2835_v51  ;;  %v12082_v51 = vsub.f32 %v11669_v58, %v11788_v50  ;;  %v2839_v42 = vmul.f32 %v12063_v39, %v12063_v39  ;;  %7891 = vmatpush1.bf16.msra.mxu1 %v7890_v56  ;;  %v2840_v58 = vmul.f32 %v12076_v15, %v12076_v15 }
 0x560   :  { %7892 = vmatprep.subr.bf16.mxu1 %v16816_v63  ;;  %16819 = vst [vmem:[#allocation15_spill] sm:$0xff] %v12128_v30 }
 0x561   :  { %v2899_v53 = vadd.f32 %v2898_v59, %v2836_v27  ;;  %v12095_v27 = vsub.f32 %v11674_v13, %v11788_v50  ;;  %v3987_v13 = vld [vmem:[%s16593_s2 + $0xb0] sm:$0xff] }
 0x562   :  { %v7896_v56 = vpack.c.bf16 %v3988_v49, %v3987_v13 }
 0x563   :  { %v2900_v31 = vadd.f32 %v2899_v53, %v2837_v17  ;;  %v12101_v17 = vsub.f32 %v11679_v62, %v11788_v50  ;;  %v2841_v53 = vmul.f32 %v12082_v51, %v12082_v51  ;;  %7894 = vmatpush1.bf16.msra.mxu1 %v7893_v25  ;;  %v2842_v62 = vmul.f32 %v12095_v27, %v12095_v27  ;;  %v3990_v25 = vld [vmem:[%s16593_s2 + $0xc8] sm:$0xff] }
 0x564   :  { %7895 = vmatprep.subr.bf16.mxu1 %v16816_v63 }
 0x565   :  { %v2901_v37 = vadd.f32 %v2900_v31, %v2838_v6  ;;  %v12114_v6 = vsub.f32 %v11684_v5, %v11788_v50  ;;  %v2843_v5 = vmul.f32 %v12101_v17, %v12101_v17 }
 0x567   :  { %v2902_v59 = vadd.f32 %v2901_v37, %v2839_v42  ;;  %16817 = vst [vmem:[#allocation11_spill] sm:$0xff] %v12114_v6  ;;  %v4093_v42 = vld [vmem:[%s16593_s2 + $0x400] sm:$0xff]  ;;  %v4094_v37 = vld [vmem:[%s16593_s2 + $0x408] sm:$0xff]  ;;  %7897 = vmatpush1.bf16.msra.mxu1 %v7896_v56 }
 0x568   :  { %v12124_v61 = vpack.c.bf16 %v4094_v37, %v4093_v42  ;;  %7898 = vmatprep.subr.bf16.mxu1 %v16816_v63  ;;  %v16823_v42 = vld [vmem:[#allocation17_spill] sm:$0xff] }
 0x569   :  { %v2903_v11 = vadd.f32 %v2902_v59, %v2840_v58  ;;  %v3989_v59 = vld [vmem:[%s16593_s2 + $0xc0] sm:$0xff]  ;;  %v12157_v37 = vsub.f32 %v16823_v42, %v11788_v50  ;;  %v4098_v42 = vld [vmem:[%s16593_s2 + $0x428] sm:$0xff] }
 0x56a   :  { %16818 = vst [vmem:[#allocation13_spill] sm:$0xff] %v12124_v61  ;;  %8055 = vmatprep.subr.bf16.mxu0 %v12124_v61  ;;  %v7899_v49 = vpack.c.bf16 %v3990_v25, %v3989_v59  ;;  %v3991_v59 = vld [vmem:[%s16593_s2 + $0xd0] sm:$0xff]  ;;  %v3992_v25 = vld [vmem:[%s16593_s2 + $0xd8] sm:$0xff] }
 0x56b   :  { %v2904_v31 = vadd.f32 %v2903_v11, %v2841_v53  ;;  %v12142_v53 = vsub.f32 %v16820_v23, %v11788_v50  ;;  %v2844_v11 = vmul.f32 %v12114_v6, %v12114_v6  ;;  %8057 = vmatpush3.bf16.msra.mxu0 %v12124_v61  ;;  %16824 = vst [vmem:[#allocation4_spill] sm:$0xff] %v12157_v37  ;;  %v16825_v23 = vld [vmem:[#allocation18_spill] sm:$0xff] }
 0x56c   :  { %7900 = vmatpush1.bf16.msra.mxu1 %v7899_v49  ;;  %v7902_v49 = vpack.c.bf16 %v3992_v25, %v3991_v59  ;;  %v3993_v59 = vld [vmem:[%s16593_s2 + $0xe0] sm:$0xff]  ;;  %v3994_v25 = vld [vmem:[%s16593_s2 + $0xe8] sm:$0xff] }
 0x56d   :  { %v2905_v58 = vadd.f32 %v2904_v31, %v2842_v62  ;;  %16821 = vst [vmem:[#allocation14_spill] sm:$0xff] %v12142_v53  ;;  %v4095_v62 = vld [vmem:[%s16593_s2 + $0x410] sm:$0xff]  ;;  %v4096_v31 = vld [vmem:[%s16593_s2 + $0x418] sm:$0xff]  ;;  %7901 = vmatprep.subr.bf16.mxu1 %v16816_v63 }
 0x56e   :  { %v12153_v56 = vpack.c.bf16 %v4096_v31, %v4095_v62  ;;  %v12171_v62 = vsub.f32 %v16825_v23, %v11788_v50  ;;  %v4097_v31 = vld [vmem:[%s16593_s2 + $0x420] sm:$0xff] }
 0x56f   :  { %v2906_v13 = vadd.f32 %v2905_v58, %v2843_v5  ;;  %v2845_v5 = vmul.f32 %v12128_v30, %v12128_v30  ;;  %v12182_v61 = vpack.c.bf16 %v4098_v42, %v4097_v31  ;;  %v16828_v23 = vld [vmem:[#allocation19_spill] sm:$0xff]  ;;  %v16830_v31 = vld [vmem:[#allocation20_spill] sm:$0xff] }
 0x570   :  { %16822 = vst [vmem:[#allocation3_spill] sm:$0xff] %v12153_v56  ;;  %8059 = vmatprep.subr.bf16.mxu0 %v12153_v56  ;;  %16826 = vst [vmem:[#allocation5_spill] sm:$0xff] %v12171_v62  ;;  %v12186_v30 = vsub.f32 %v16828_v23, %v11788_v50  ;;  %7903 = vmatpush1.bf16.msra.mxu1 %v7902_v49  ;;  %v12200_v42 = vsub.f32 %v16830_v31, %v11788_v50  ;;  %v4099_v23 = vld [vmem:[%s16593_s2 + $0x430] sm:$0xff] }
 0x571   :  { %v2907_v58 = vadd.f32 %v2906_v13, %v2844_v11  ;;  %v2846_v11 = vmul.f32 %v12142_v53, %v12142_v53  ;;  %8061 = vmatpush3.bf16.msra.mxu0 %v12153_v56  ;;  %16827 = vst [vmem:[#allocation16_spill] sm:$0xff] %v12182_v61  ;;  %7904 = vmatprep.subr.bf16.mxu1 %v16816_v63  ;;  %v4100_v56 = vld [vmem:[%s16593_s2 + $0x438] sm:$0xff]  ;;  %v16833_v31 = vld [vmem:[#allocation21_spill] sm:$0xff] }
 0x572   :  { %16829 = vst [vmem:[#allocation17_spill] sm:$0xff] %v12186_v30  ;;  %8063 = vmatprep.subr.bf16.mxu0 %v12182_v61  ;;  %16831 = vst [vmem:[#allocation18_spill] sm:$0xff] %v12200_v42  ;;  %v7905_v49 = vpack.c.bf16 %v3994_v25, %v3993_v59  ;;  %v12215_v53 = vsub.f32 %v16833_v31, %v11788_v50  ;;  %v3995_v59 = vld [vmem:[%s16593_s2 + $0xf0] sm:$0xff]  ;;  %v16835_v25 = vld [vmem:[#allocation22_spill] sm:$0xff] }
 0x573   :  { %v2908_v13 = vadd.f32 %v2907_v58, %v2845_v5  ;;  %v2847_v5 = vmul.f32 %v12157_v37, %v12157_v37  ;;  %v12211_v37 = vpack.c.bf16 %v4100_v56, %v4099_v23  ;;  %v3996_v56 = vld [vmem:[%s16593_s2 + $0xf8] sm:$0xff]  ;;  %v12229_v23 = vsub.f32 %v16835_v25, %v11788_v50  ;;  %v4102_v31 = vld [vmem:[%s16593_s2 + $0x448] sm:$0xff]  ;;  %v16838_v25 = vld [vmem:[#allocation23_spill] sm:$0xff] }
 0x574   :  { %16834 = vst [vmem:[#allocation20_spill] sm:$0xff] %v12215_v53  ;;  %7906 = vmatpush1.bf16.msra.mxu1 %v7905_v49  ;;  %v4101_v49 = vld [vmem:[%s16593_s2 + $0x440] sm:$0xff] }
 0x575   :  { %v2909_v58 = vadd.f32 %v2908_v13, %v2846_v11  ;;  %v2848_v11 = vmul.f32 %v12171_v62, %v12171_v62  ;;  %8065 = vmatpush3.bf16.msra.mxu0 %v12182_v61  ;;  %16832 = vst [vmem:[#allocation19_spill] sm:$0xff] %v12211_v37  ;;  %7907 = vmatprep.subr.bf16.mxu1 %v16816_v63  ;;  %16836 = vst [vmem:[#allocation21_spill] sm:$0xff] %v12229_v23 }
 0x576   :  { %8067 = vmatprep.subr.bf16.mxu0 %v12211_v37  ;;  %v7908_v61 = vpack.c.bf16 %v3996_v56, %v3995_v59  ;;  %v12244_v62 = vsub.f32 %v16838_v25, %v11788_v50  ;;  %v2852_v59 = vmul.f32 %v12229_v23, %v12229_v23 }
 0x577   :  { %v2910_v13 = vadd.f32 %v2909_v58, %v2847_v5  ;;  %v2849_v5 = vmul.f32 %v12186_v30, %v12186_v30  ;;  %v12240_v30 = vpack.c.bf16 %v4102_v31, %v4101_v49  ;;  %v8876_v49 = vld [vmem:[#allocation2 + $0x18] sm:$0xff] }
 0x578   :  { %16839 = vst [vmem:[#allocation23_spill] sm:$0xff] %v12244_v62  ;;  %7909 = vmatpush1.bf16.msra.mxu1 %v7908_v61  ;;  %v4104_v61 = vld [vmem:[%s16593_s2 + $0x458] sm:$0xff]  ;;  %v2853_v25 = vmul.f32 %v12244_v62, %v12244_v62 }
 0x579   :  { %v2911_v58 = vadd.f32 %v2910_v13, %v2848_v11  ;;  %v2850_v11 = vmul.f32 %v12200_v42, %v12200_v42  ;;  %8069 = vmatpush3.bf16.msra.mxu0 %v12211_v37  ;;  %16837 = vst [vmem:[#allocation22_spill] sm:$0xff] %v12240_v30  ;;  %v3452_v37 = vld [vmem:[#allocation2 + $0x1] sm:$0xff]  ;;  %7910 = vmatprep.subr.bf16.mxu1 %v16816_v63  ;;  %v16851_v62 = vld [vmem:[#allocation6_spill] sm:$0xff] }
 0x57a   :  { %8071 = vmatprep.subr.bf16.mxu0 %v12240_v30  ;;  %v16840_v42 = vld [vmem:[#allocation24_spill] sm:$0xff]  ;;  %4173 = vmatprep.mubr.f32.mxu1 %v3452_v37 }
 0x57b   :  { %v2912_v13 = vadd.f32 %v2911_v58, %v2849_v5  ;;  %v2851_v5 = vmul.f32 %v12215_v53, %v12215_v53  ;;  %v12252_v6 = vsub.f32 %v16840_v42, %v11788_v50  ;;  %4174 = vmatmul.mubr.f32.vlgmr.msra.gmra.mrb[64].mxu1 %v8876_v49  ;;  %v16843_v42 = vld [vmem:[#allocation25_spill] sm:$0xff]  ;;  %v12317_v53 = vsub.f32 %v16851_v62, %v11788_v50  ;;  %v16852_v62 = vld [vmem:[#allocation8_spill] sm:$0xff] }
 0x57c   :  { %v12267_v31 = vsub.f32 %v16843_v42, %v11788_v50 }
 0x57d   :  { %v2913_v58 = vadd.f32 %v2912_v13, %v2850_v11  ;;  %16841 = vst [vmem:[#allocation24_spill] sm:$0xff] %v12252_v6  ;;  %8073 = vmatpush3.bf16.msra.mxu0 %v12240_v30  ;;  %v4103_v11 = vld [vmem:[%s16593_s2 + $0x450] sm:$0xff]  ;;  %v16845_v30 = vld [vmem:[#allocation26_spill] sm:$0xff]  ;;  %v2854_v37 = vmul.f32 %v12252_v6, %v12252_v6  ;;  %v3998_v6 = vld [vmem:[%s16593_s2 + $0x108] sm:$0xff] }
 0x57e   :  { %v12263_v13 = vpack.c.bf16 %v4104_v61, %v4103_v11  ;;  %16844 = vst [vmem:[#allocation25_spill] sm:$0xff] %v12267_v31  ;;  %v12274_v23 = vsub.f32 %v16845_v30, %v11788_v50  ;;  %v4105_v61 = vld [vmem:[%s16593_s2 + $0x460] sm:$0xff] }
 0x57f   :  { %v2914_v56 = vadd.f32 %v2913_v58, %v2851_v5  ;;  %v3453_v58 = vld [vmem:[#allocation2 + $0x9] sm:$0xff]  ;;  %v16847_v30 = vld [vmem:[#allocation27_spill] sm:$0xff] }
 0x580   :  { %16842 = vst [vmem:[#allocation29_spill] sm:$0xff] %v12263_v13  ;;  %8075 = vmatprep.subr.bf16.mxu0 %v12263_v13  ;;  %4178 = vmatprep.mubr.f32.mxu1 %v3453_v58  ;;  %v12289_v42 = vsub.f32 %v16847_v30, %v11788_v50 }
 0x581   :  { %v2915_v5 = vadd.f32 %v2914_v56, %v2852_v59  ;;  %8077 = vmatpush3.bf16.msra.mxu0 %v12263_v13  ;;  %v4106_v59 = vld [vmem:[%s16593_s2 + $0x468] sm:$0xff]  ;;  %4179 = vmatmul.mubr.f32.gmra.mrb[66].mxu1 %v8876_v49  ;;  %v3997_v13 = vld [vmem:[%s16593_s2 + $0x100] sm:$0xff]  ;;  %v4107_v49 = vld [vmem:[%s16593_s2 + $0x470] sm:$0xff] }
 0x582   :  { %v12285_v56 = vpack.c.bf16 %v4106_v59, %v4105_v61  ;;  %16848 = vst [vmem:[#allocation27_spill] sm:$0xff] %v12289_v42  ;;  %v7911_v58 = vpack.c.bf16 %v3998_v6, %v3997_v13  ;;  %v4108_v61 = vld [vmem:[%s16593_s2 + $0x478] sm:$0xff]  ;;  %v2856_v59 = vmul.f32 %v12274_v23, %v12274_v23  ;;  %v3999_v6 = vld [vmem:[%s16593_s2 + $0x110] sm:$0xff] }
 0x583   :  { %v2916_v11 = vadd.f32 %v2915_v5, %v2853_v25  ;;  %v2855_v25 = vmul.f32 %v12267_v31, %v12267_v31  ;;  %v12313_v31 = vpack.c.bf16 %v4108_v61, %v4107_v49  ;;  %v4000_v13 = vld [vmem:[%s16593_s2 + $0x118] sm:$0xff] }
 0x584   :  { %16846 = vst [vmem:[#allocation26_spill] sm:$0xff] %v12285_v56  ;;  %8079 = vmatprep.subr.bf16.mxu0 %v12285_v56  ;;  %7912 = vmatpush1.bf16.msra.mxu1 %v7911_v58  ;;  %v7914_v49 = vpack.c.bf16 %v4000_v13, %v3999_v6  ;;  %v12331_v58 = vsub.f32 %v16852_v62, %v11788_v50  ;;  %v16854_v6 = vld [vmem:[#allocation10_spill] sm:$0xff] }
 0x585   :  { %v2917_v5 = vadd.f32 %v2916_v11, %v2854_v37  ;;  %v16849_v37 = vld [vmem:[#allocation28_spill] sm:$0xff]  ;;  %8081 = vmatpush3.bf16.msra.mxu0 %v12285_v56  ;;  %7913 = vmatprep.subr.bf16.mxu1 %v16816_v63  ;;  %v16853_v56 = vld [vmem:[#allocation7_spill] sm:$0xff]  ;;  %v12345_v13 = vsub.f32 %v16854_v6, %v11788_v50 }
 0x586   :  { %v12308_v11 = vsub.f32 %v16849_v37, %v11788_v50  ;;  %16850 = vst [vmem:[#allocation28_spill] sm:$0xff] %v12313_v31  ;;  %8083 = vmatprep.subr.bf16.mxu0 %v12313_v31 }
 0x587   :  { %v2918_v30 = vadd.f32 %v2917_v5, %v2855_v25  ;;  %v2857_v25 = vmul.f32 %v12289_v42, %v12289_v42  ;;  %v12338_v42 = vsub.f32 %v16853_v56, %v11788_v50  ;;  %v2862_v56 = vmul.f32 %v12345_v13, %v12345_v13 }
 0x588   :  { %v2858_v61 = vmul.f32 %v12308_v11, %v12308_v11  ;;  %7915 = vmatpush1.bf16.msra.mxu1 %v7914_v49  ;;  %v2864_v50 = vmul.f32 %v11794_v45, %v11794_v45 }
 0x589   :  { %v2919_v5 = vadd.f32 %v2918_v30, %v2856_v59  ;;  %8085 = vmatpush3.bf16.msra.mxu0 %v12313_v31  ;;  %v2859_v59 = vmul.f32 %v12317_v53, %v12317_v53  ;;  %7916 = vmatprep.subr.bf16.mxu1 %v16816_v63  ;;  %v2861_v49 = vmul.f32 %v12338_v42, %v12338_v42 }
 0x58b   :  { %v2920_v37 = vadd.f32 %v2919_v5, %v2857_v25  ;;  %v2860_v25 = vmul.f32 %v12331_v58, %v12331_v58 }
 0x58d   :  { %v2921_v30 = vadd.f32 %v2920_v37, %v2858_v61  ;;  %v2863_v61 = vmul.f32 %v11791_v22, %v11791_v22 }
 0x58f   :  { %v2922_v5 = vadd.f32 %v2921_v30, %v2859_v59  ;;  %v4001_v59 = vld [vmem:[%s16593_s2 + $0x120] sm:$0xff]  ;;  %v4002_v30 = vld [vmem:[%s16593_s2 + $0x128] sm:$0xff] }
 0x591   :  { %v2923_v62 = vadd.f32 %v2922_v5, %v2860_v25  ;;  %v2865_v25 = vmul.f32 %v11797_v20, %v11797_v20  ;;  %v2869_v20 = vmul.f32 %v11809_v8, %v11809_v8 }
 0x593   :  { %v2924_v31 = vadd.f32 %v2923_v62, %v2861_v49  ;;  %v7917_v49 = vpack.c.bf16 %v4002_v30, %v4001_v59  ;;  %v2871_v30 = vmul.f32 %v11815_v0, %v11815_v0 }
 0x595   :  { %v2925_v37 = vadd.f32 %v2924_v31, %v2862_v56  ;;  %v2866_v31 = vmul.f32 %v11800_v52, %v11800_v52  ;;  %7918 = vmatpush1.bf16.msra.mxu1 %v7917_v49  ;;  %v2867_v56 = vmul.f32 %v11803_v36, %v11803_v36  ;;  %v4003_v49 = vld [vmem:[%s16593_s2 + $0x130] sm:$0xff] }
 0x596   :  { %7919 = vmatprep.subr.bf16.mxu1 %v16816_v63 }
 0x597   :  { %v2926_v6 = vadd.f32 %v2925_v37, %v2863_v61  ;;  %v2868_v37 = vmul.f32 %v11806_v41, %v11806_v41 }
 0x599   :  { %v2927_v5 = vadd.f32 %v2926_v6, %v2864_v50  ;;  %v2870_v6 = vmul.f32 %v11812_v46, %v11812_v46 }
 0x59b   :  { %v2928_v62 = vadd.f32 %v2927_v5, %v2865_v25 }
 0x59d   :  { %v2929_v61 = vadd.f32 %v2928_v62, %v2866_v31  ;;  %v4004_v31 = vld [vmem:[%s16593_s2 + $0x138] sm:$0xff] }
 0x59f   :  { %v2930_v45 = vadd.f32 %v2929_v61, %v2867_v56  ;;  %v7920_v56 = vpack.c.bf16 %v4004_v31, %v4003_v49  ;;  %v12397_v31 = vld [vmem:[%s16594_s3] ss:$0 sm:$0xff] }
 0x5a1   :  { %v2931_v50 = vadd.f32 %v2930_v45, %v2868_v37  ;;  %7921 = vmatpush1.bf16.msra.mxu1 %v7920_v56 }
 0x5a2   :  { %7922 = vmatprep.subr.bf16.mxu1 %v16816_v63 }
 0x5a3   :  { %v2932_v59 = vadd.f32 %v2931_v50, %v2869_v20 }
 0x5a5   :  { %v2933_v25 = vadd.f32 %v2932_v59, %v2870_v6 }
 0x5a7   :  { %v2934_v5 = vadd.f32 %v2933_v25, %v2871_v30  ;;  %v4005_v30 = vld [vmem:[%s16593_s2 + $0x140] sm:$0xff]  ;;  %v4006_v25 = vld [vmem:[%s16593_s2 + $0x148] sm:$0xff] }
 0x5a8   :  { %v7923_v49 = vpack.c.bf16 %v4006_v25, %v4005_v30  ;;  %v16856_v30 = vld [vmem:[#allocation11_spill] sm:$0xff] }
 0x5a9   :  { %v2935_v62 = vrot.slane %v2934_v5, 4  ;;  %v16857_v25 = vld [vmem:[#allocation15_spill] sm:$0xff] }
 0x5aa   :  { %7924 = vmatpush1.bf16.msra.mxu1 %v7923_v49  ;;  %v16858_v49 = vld [vmem:[#allocation14_spill] sm:$0xff] }
 0x5ab   :  { %v2936_v45 = vadd.f32 %v2935_v62, %v2934_v5  ;;  %7925 = vmatprep.subr.bf16.mxu1 %v16816_v63  ;;  %v16866_v63 = vld [vmem:[#allocation20_spill] sm:$0xff] }
 0x5ad   :  { %v2937_v20 = vrot.slane %v2936_v45, 2 }
 0x5af   :  { %v2938_v61 = vadd.f32 %v2937_v20, %v2936_v45 }
 0x5b1   :  { %v2939_v37 = vrot.slane %v2938_v61, 1 }
 0x5b3   :  { %v2940_v50 = vadd.f32 %v2939_v37, %v2938_v61  ;;  %v12416_v61 = vld [vmem:[%s16595_s4] ss:$0 sm:$0xff] }
 0x5b4   :  { %16855 = vst [vmem:[#allocation6_spill] sm:$0xff] %v12416_v61 }
 0x5b5   :  { %v2941_v6 = vmul.f32 0.001953125, %v2940_v50 }
 0x5b7   :  { %v2942_v59 = vadd.f32 1e-05, %v2941_v6 }
 0x5b9   :  { %8872 = vrsqrt.f32 %v2942_v59 }
 0x5c3   :  { %v12392_v5 = vpop.eup %8872 }
 0x5c4   :  { %v3007_v62 = vmul.f32 %v12392_v5, %v11815_v0  ;;  %v12403_v56 = vmul.f32 %v12392_v5, %v11819_v2  ;;  %v12407_v45 = vmul.f32 %v12392_v5, %v11823_v29  ;;  %v12411_v20 = vmul.f32 %v12392_v5, %v11827_v18 }
 0x5c5   :  { %v12420_v0 = vmul.f32 %v12392_v5, %v11835_v7  ;;  %v12424_v2 = vmul.f32 %v12392_v5, %v11839_v48  ;;  %v12428_v29 = vmul.f32 %v12392_v5, %v11845_v38  ;;  %v12432_v18 = vmul.f32 %v12392_v5, %v11851_v54 }
 0x5c6   :  { %v3078_v37 = vmul.f32 %v12397_v31, %v3007_v62  ;;  %v12437_v50 = vmul.f32 %v12392_v5, %v11857_v4  ;;  %v12441_v7 = vmul.f32 %v12392_v5, %v11863_v1  ;;  %v12445_v48 = vmul.f32 %v12392_v5, %v11869_v33  ;;  %v16859_v62 = vld [vmem:[#allocation4_spill] sm:$0xff] }
 0x5c7   :  { %v12449_v38 = vmul.f32 %v12392_v5, %v11875_v10  ;;  %v12453_v54 = vmul.f32 %v12392_v5, %v11881_v44  ;;  %v12457_v4 = vmul.f32 %v12392_v5, %v11887_v21  ;;  %v12461_v1 = vmul.f32 %v12392_v5, %v11893_v12 }
 0x5c8   :  { %v3149_v6 = vadd.f32 %v12416_v61, %v3078_v37  ;;  %v12466_v33 = vmul.f32 %v12392_v5, %v11905_v43  ;;  %v12470_v10 = vmul.f32 %v12392_v5, %v11911_v32  ;;  %v12474_v44 = vmul.f32 %v12392_v5, %v11924_v40  ;;  %v16861_v37 = vld [vmem:[#allocation5_spill] sm:$0xff] }
 0x5c9   :  { %v12478_v21 = vmul.f32 %v12392_v5, %v11930_v55  ;;  %v12482_v12 = vmul.f32 %v12392_v5, %v11943_v19  ;;  %v12486_v43 = vmul.f32 %v12392_v5, %v11949_v47  ;;  %v12490_v32 = vmul.f32 %v12392_v5, %v11962_v26  ;;  %v16868_v61 = vld [vmem:[#allocation21_spill] sm:$0xff] }
 0x5ca   :  { %v3213_v59 = vmax.f32 %v3149_v6, 0.0  ;;  %v12494_v40 = vmul.f32 %v12392_v5, %v11968_v9  ;;  %v12498_v55 = vmul.f32 %v12392_v5, %v11981_v3  ;;  %v12502_v19 = vmul.f32 %v12392_v5, %v11987_v57  ;;  %v16863_v6 = vld [vmem:[#allocation17_spill] sm:$0xff] }
 0x5cb   :  { %v12506_v47 = vmul.f32 %v12392_v5, %v12000_v24  ;;  %v12510_v26 = vmul.f32 %v12392_v5, %v12006_v28  ;;  %v12514_v9 = vmul.f32 %v12392_v5, %v12019_v35  ;;  %v12518_v3 = vmul.f32 %v12392_v5, %v12025_v60 }
 0x5cc   :  { %3387 = vst [vmem:[#allocation2 + $0x339] sm:$0xff] %v3213_v59  ;;  %v12522_v57 = vmul.f32 %v12392_v5, %v12038_v16  ;;  %v12526_v24 = vmul.f32 %v12392_v5, %v12044_v14  ;;  %v12530_v28 = vmul.f32 %v12392_v5, %v12057_v34  ;;  %v12534_v35 = vmul.f32 %v12392_v5, %v12063_v39 }
 0x5cd   :  { %v12538_v60 = vmul.f32 %v12392_v5, %v12076_v15  ;;  %v12542_v16 = vmul.f32 %v12392_v5, %v12082_v51  ;;  %v12546_v14 = vmul.f32 %v12392_v5, %v12095_v27  ;;  %v12550_v34 = vmul.f32 %v12392_v5, %v12101_v17 }
 0x5ce   :  { %v12554_v39 = vmul.f32 %v12392_v5, %v16856_v30  ;;  %v12558_v15 = vmul.f32 %v12392_v5, %v16857_v25  ;;  %v12562_v51 = vmul.f32 %v12392_v5, %v16858_v49  ;;  %v12566_v27 = vmul.f32 %v12392_v5, %v16859_v62  ;;  %v16865_v30 = vld [vmem:[#allocation18_spill] sm:$0xff] }
 0x5cf   :  { %v12570_v17 = vmul.f32 %v12392_v5, %v16861_v37  ;;  %v12574_v59 = vmul.f32 %v12392_v5, %v16863_v6  ;;  %v12578_v25 = vmul.f32 %v12392_v5, %v16865_v30  ;;  %v12582_v49 = vmul.f32 %v12392_v5, %v16866_v63 }
 0x5d0   :  { %16860 = vst [vmem:[#allocation8_spill] sm:$0xff] %v12566_v27  ;;  %v12586_v62 = vmul.f32 %v12392_v5, %v16868_v61  ;;  %v16869_v27 = vld [vmem:[#allocation23_spill] sm:$0xff]  ;;  %v12602_v63 = vmul.f32 %v12392_v5, %v12274_v23  ;;  %v12622_v23 = vmul.f32 %v12392_v5, %v12338_v42  ;;  %v12642_v42 = vmul.f32 %v12392_v5, %v11800_v52 }
 0x5d1   :  { %16862 = vst [vmem:[#allocation7_spill] sm:$0xff] %v12570_v17  ;;  %16864 = vst [vmem:[#allocation10_spill] sm:$0xff] %v12574_v59  ;;  %v12590_v37 = vmul.f32 %v12392_v5, %v16869_v27  ;;  %v16870_v17 = vld [vmem:[#allocation24_spill] sm:$0xff]  ;;  %v16871_v59 = vld [vmem:[#allocation25_spill] sm:$0xff]  ;;  %v12610_v27 = vmul.f32 %v12392_v5, %v12308_v11  ;;  %v12630_v11 = vmul.f32 %v12392_v5, %v11791_v22 }
 0x5d2   :  { %16867 = vst [vmem:[#allocation11_spill] sm:$0xff] %v12582_v49  ;;  %v12594_v6 = vmul.f32 %v12392_v5, %v16870_v17  ;;  %v12598_v30 = vmul.f32 %v12392_v5, %v16871_v59  ;;  %v16872_v49 = vld [vmem:[#allocation27_spill] sm:$0xff]  ;;  %v12614_v17 = vmul.f32 %v12392_v5, %v12317_v53  ;;  %v12618_v59 = vmul.f32 %v12392_v5, %v12331_v58 }
 0x5d3   :  { %v12606_v61 = vmul.f32 %v12392_v5, %v16872_v49  ;;  %16873 = vst [vmem:[#allocation15_spill] sm:$0xff] %v12610_v27  ;;  %v12626_v49 = vmul.f32 %v12392_v5, %v12345_v13  ;;  %v16875_v27 = vld [vmem:[#allocation9_spill] sm:$0xff]  ;;  %v12646_v13 = vmul.f32 %v12392_v5, %v11803_v36  ;;  %v12650_v22 = vmul.f32 %v12392_v5, %v11806_v41 }
 0x5d4   :  { %16874 = vst [vmem:[#allocation14_spill] sm:$0xff] %v12614_v17  ;;  %v12634_v53 = vmul.f32 %v12392_v5, %v16875_v27  ;;  %v16876_v17 = vld [vmem:[#allocation12_spill] sm:$0xff]  ;;  %v12654_v27 = vmul.f32 %v12392_v5, %v11809_v8  ;;  %v12662_v52 = vmul.f32 %v12397_v31, %v12403_v56  ;;  %v12666_v36 = vmul.f32 %v12397_v31, %v12407_v45 }
 0x5d5   :  { %v12638_v58 = vmul.f32 %v12392_v5, %v16876_v17  ;;  %v12658_v17 = vmul.f32 %v12392_v5, %v11812_v46  ;;  %v12670_v41 = vmul.f32 %v12397_v31, %v12411_v20  ;;  %v12674_v8 = vmul.f32 %v12397_v31, %v12420_v0 }
 0x5d6   :  { %v12678_v46 = vmul.f32 %v12397_v31, %v12424_v2  ;;  %v12682_v5 = vmul.f32 %v12397_v31, %v12428_v29  ;;  %v12686_v56 = vmul.f32 %v12397_v31, %v12432_v18  ;;  %v12690_v45 = vmul.f32 %v12397_v31, %v12437_v50 }
 0x5d7   :  { %v12694_v20 = vmul.f32 %v12397_v31, %v12441_v7  ;;  %v12698_v0 = vmul.f32 %v12397_v31, %v12445_v48  ;;  %v12702_v2 = vmul.f32 %v12397_v31, %v12449_v38  ;;  %v12706_v29 = vmul.f32 %v12397_v31, %v12453_v54 }
 0x5d8   :  { %v12710_v18 = vmul.f32 %v12397_v31, %v12457_v4  ;;  %v12714_v50 = vmul.f32 %v12397_v31, %v12461_v1  ;;  %v12718_v7 = vmul.f32 %v12397_v31, %v12466_v33  ;;  %v12722_v48 = vmul.f32 %v12397_v31, %v12470_v10 }
 0x5d9   :  { %v12726_v38 = vmul.f32 %v12397_v31, %v12474_v44  ;;  %v12730_v54 = vmul.f32 %v12397_v31, %v12478_v21  ;;  %v12734_v4 = vmul.f32 %v12397_v31, %v12482_v12  ;;  %v12738_v1 = vmul.f32 %v12397_v31, %v12486_v43 }
 0x5da   :  { %v12742_v33 = vmul.f32 %v12397_v31, %v12490_v32  ;;  %v12746_v10 = vmul.f32 %v12397_v31, %v12494_v40  ;;  %v12750_v44 = vmul.f32 %v12397_v31, %v12498_v55  ;;  %v12754_v21 = vmul.f32 %v12397_v31, %v12502_v19 }
 0x5db   :  { %v12758_v12 = vmul.f32 %v12397_v31, %v12506_v47  ;;  %v12762_v43 = vmul.f32 %v12397_v31, %v12510_v26  ;;  %v12766_v32 = vmul.f32 %v12397_v31, %v12514_v9  ;;  %v12770_v40 = vmul.f32 %v12397_v31, %v12518_v3 }
 0x5dc   :  { %v12774_v55 = vmul.f32 %v12397_v31, %v12522_v57  ;;  %v12778_v19 = vmul.f32 %v12397_v31, %v12526_v24  ;;  %v12782_v47 = vmul.f32 %v12397_v31, %v12530_v28  ;;  %v12786_v26 = vmul.f32 %v12397_v31, %v12534_v35 }
 0x5dd   :  { %v12790_v9 = vmul.f32 %v12397_v31, %v12538_v60  ;;  %v12794_v3 = vmul.f32 %v12397_v31, %v12542_v16  ;;  %v12798_v57 = vmul.f32 %v12397_v31, %v12546_v14  ;;  %v12802_v24 = vmul.f32 %v12397_v31, %v12550_v34  ;;  %v16880_v16 = vld [vmem:[#allocation8_spill] sm:$0xff] }
 0x5de   :  { %v12806_v28 = vmul.f32 %v12397_v31, %v12554_v39  ;;  %v12810_v35 = vmul.f32 %v12397_v31, %v12558_v15  ;;  %v12814_v60 = vmul.f32 %v12397_v31, %v12562_v51  ;;  %v12818_v14 = vmul.f32 %v12397_v31, %v16880_v16 }
 0x5df   :  { %16877 = vst [vmem:[#allocation4_spill] sm:$0xff] %v12798_v57  ;;  %16878 = vst [vmem:[#allocation5_spill] sm:$0xff] %v12802_v24  ;;  %v16881_v57 = vld [vmem:[#allocation7_spill] sm:$0xff]  ;;  %v16882_v24 = vld [vmem:[#allocation10_spill] sm:$0xff]  ;;  %v12830_v15 = vmul.f32 %v12397_v31, %v12578_v25  ;;  %v12838_v16 = vmul.f32 %v12397_v31, %v12586_v62  ;;  %v12850_v25 = vmul.f32 %v12397_v31, %v12598_v30 }
 0x5e0   :  { %16879 = vst [vmem:[#allocation17_spill] sm:$0xff] %v12810_v35  ;;  %v12822_v34 = vmul.f32 %v12397_v31, %v16881_v57  ;;  %v12826_v39 = vmul.f32 %v12397_v31, %v16882_v24  ;;  %v16883_v35 = vld [vmem:[#allocation11_spill] sm:$0xff]  ;;  %v12842_v57 = vmul.f32 %v12397_v31, %v12590_v37  ;;  %v12846_v24 = vmul.f32 %v12397_v31, %v12594_v6 }
 0x5e1   :  { %v12834_v51 = vmul.f32 %v12397_v31, %v16883_v35  ;;  %16884 = vst [vmem:[#allocation18_spill] sm:$0xff] %v12838_v16  ;;  %v12854_v35 = vmul.f32 %v12397_v31, %v12602_v63  ;;  %v12858_v62 = vmul.f32 %v12397_v31, %v12606_v61  ;;  %v16886_v16 = vld [vmem:[#allocation15_spill] sm:$0xff]  ;;  %v12870_v30 = vmul.f32 %v12397_v31, %v12618_v59 }
 0x5e2   :  { %16885 = vst [vmem:[#allocation20_spill] sm:$0xff] %v12842_v57  ;;  %v12862_v37 = vmul.f32 %v12397_v31, %v16886_v16  ;;  %v16887_v57 = vld [vmem:[#allocation14_spill] sm:$0xff]  ;;  %v12874_v63 = vmul.f32 %v12397_v31, %v12622_v23  ;;  %v12878_v61 = vmul.f32 %v12397_v31, %v12626_v49  ;;  %v12882_v16 = vmul.f32 %v12397_v31, %v12630_v11 }
 0x5e3   :  { %v12866_v6 = vmul.f32 %v12397_v31, %v16887_v57  ;;  %v12886_v57 = vmul.f32 %v12397_v31, %v12634_v53  ;;  %v12890_v59 = vmul.f32 %v12397_v31, %v12638_v58  ;;  %v12894_v23 = vmul.f32 %v12397_v31, %v12642_v42 }
 0x5e4   :  { %v12898_v49 = vmul.f32 %v12397_v31, %v12646_v13  ;;  %v12902_v11 = vmul.f32 %v12397_v31, %v12650_v22  ;;  %v12906_v53 = vmul.f32 %v12397_v31, %v12654_v27  ;;  %v12910_v58 = vmul.f32 %v12397_v31, %v12658_v17 }
 0x5e5   :  { %16888 = vst [vmem:[#allocation21_spill] sm:$0xff] %v12890_v59  ;;  %v16889_v59 = vld [vmem:[#allocation6_spill] sm:$0xff] }
 0x5e6   :  { %v12914_v42 = vadd.f32 %v16889_v59, %v12662_v52  ;;  %v12918_v13 = vadd.f32 %v16889_v59, %v12666_v36  ;;  %v12922_v22 = vadd.f32 %v16889_v59, %v12670_v41  ;;  %v12926_v27 = vadd.f32 %v16889_v59, %v12674_v8 }
 0x5e7   :  { %v12930_v31 = vadd.f32 %v16889_v59, %v12678_v46  ;;  %v12934_v17 = vadd.f32 %v16889_v59, %v12682_v5  ;;  %v12938_v52 = vadd.f32 %v16889_v59, %v12686_v56  ;;  %v12942_v36 = vadd.f32 %v16889_v59, %v12690_v45 }
 0x5e8   :  { %v12946_v41 = vadd.f32 %v16889_v59, %v12694_v20  ;;  %v12950_v8 = vadd.f32 %v16889_v59, %v12698_v0  ;;  %v12954_v46 = vadd.f32 %v16889_v59, %v12702_v2  ;;  %v12958_v5 = vadd.f32 %v16889_v59, %v12706_v29 }
 0x5e9   :  { %v12962_v56 = vadd.f32 %v16889_v59, %v12710_v18  ;;  %v12966_v45 = vadd.f32 %v16889_v59, %v12714_v50  ;;  %v12970_v20 = vadd.f32 %v16889_v59, %v12718_v7  ;;  %v12974_v0 = vadd.f32 %v16889_v59, %v12722_v48 }
 0x5ea   :  { %v12978_v2 = vadd.f32 %v16889_v59, %v12726_v38  ;;  %v12982_v29 = vadd.f32 %v16889_v59, %v12730_v54  ;;  %v12986_v18 = vadd.f32 %v16889_v59, %v12734_v4  ;;  %v12990_v50 = vadd.f32 %v16889_v59, %v12738_v1 }
 0x5eb   :  { %v12994_v7 = vadd.f32 %v16889_v59, %v12742_v33  ;;  %v12998_v48 = vadd.f32 %v16889_v59, %v12746_v10  ;;  %v13002_v38 = vadd.f32 %v16889_v59, %v12750_v44  ;;  %v13006_v54 = vadd.f32 %v16889_v59, %v12754_v21 }
 0x5ec   :  { %v13010_v4 = vadd.f32 %v16889_v59, %v12758_v12  ;;  %v13014_v1 = vadd.f32 %v16889_v59, %v12762_v43  ;;  %v13018_v33 = vadd.f32 %v16889_v59, %v12766_v32  ;;  %v13022_v10 = vadd.f32 %v16889_v59, %v12770_v40 }
 0x5ed   :  { %v13026_v44 = vadd.f32 %v16889_v59, %v12774_v55  ;;  %v13030_v21 = vadd.f32 %v16889_v59, %v12778_v19  ;;  %v13034_v12 = vadd.f32 %v16889_v59, %v12782_v47  ;;  %v13038_v43 = vadd.f32 %v16889_v59, %v12786_v26  ;;  %v16892_v55 = vld [vmem:[#allocation4_spill] sm:$0xff] }
 0x5ee   :  { %v13042_v32 = vadd.f32 %v16889_v59, %v12790_v9  ;;  %v13046_v40 = vadd.f32 %v16889_v59, %v12794_v3  ;;  %v13050_v19 = vadd.f32 %v16889_v59, %v16892_v55  ;;  %v13058_v26 = vadd.f32 %v16889_v59, %v12806_v28 }
 0x5ef   :  { %16890 = vst [vmem:[#allocation23_spill] sm:$0xff] %v13030_v21  ;;  %16891 = vst [vmem:[#allocation24_spill] sm:$0xff] %v13038_v43  ;;  %v16893_v21 = vld [vmem:[#allocation5_spill] sm:$0xff]  ;;  %v13066_v3 = vadd.f32 %v16889_v59, %v12814_v60  ;;  %v13070_v55 = vadd.f32 %v16889_v59, %v12818_v14  ;;  %v13078_v28 = vadd.f32 %v16889_v59, %v12826_v39 }
 0x5f0   :  { %v13054_v47 = vadd.f32 %v16889_v59, %v16893_v21  ;;  %v16894_v43 = vld [vmem:[#allocation17_spill] sm:$0xff]  ;;  %v13074_v21 = vadd.f32 %v16889_v59, %v12822_v34  ;;  %v13086_v60 = vadd.f32 %v16889_v59, %v12834_v51  ;;  %v13098_v39 = vadd.f32 %v16889_v59, %v12846_v24 }
 0x5f1   :  { %v13062_v9 = vadd.f32 %v16889_v59, %v16894_v43  ;;  %16895 = vst [vmem:[#allocation25_spill] sm:$0xff] %v13066_v3  ;;  %16896 = vst [vmem:[#allocation27_spill] sm:$0xff] %v13070_v55  ;;  %v13082_v43 = vadd.f32 %v16889_v59, %v12830_v15  ;;  %v16899_v3 = vld [vmem:[#allocation18_spill] sm:$0xff]  ;;  %v16901_v55 = vld [vmem:[#allocation20_spill] sm:$0xff]  ;;  %v13102_v15 = vadd.f32 %v16889_v59, %v12850_v25 }
 0x5f2   :  { %16898 = vst [vmem:[#allocation12_spill] sm:$0xff] %v13086_v60  ;;  %v13090_v14 = vadd.f32 %v16889_v59, %v16899_v3  ;;  %v13094_v34 = vadd.f32 %v16889_v59, %v16901_v55  ;;  %16903 = vst [vmem:[#allocation10_spill] sm:$0xff] %v13098_v39  ;;  %v13106_v51 = vadd.f32 %v16889_v59, %v12854_v35 }
 0x5f3   :  { %16897 = vst [vmem:[#allocation9_spill] sm:$0xff] %v13082_v43  ;;  %v13110_v3 = vadd.f32 %v16889_v59, %v12858_v62  ;;  %v13114_v55 = vadd.f32 %v16889_v59, %v12862_v37  ;;  %v13118_v24 = vadd.f32 %v16889_v59, %v12866_v6  ;;  %v13122_v25 = vadd.f32 %v16889_v59, %v12870_v30 }
 0x5f4   :  { %16900 = vst [vmem:[#allocation8_spill] sm:$0xff] %v13090_v14  ;;  %16902 = vst [vmem:[#allocation7_spill] sm:$0xff] %v13094_v34  ;;  %v13126_v35 = vadd.f32 %v16889_v59, %v12874_v63  ;;  %v13130_v62 = vadd.f32 %v16889_v59, %v12878_v61  ;;  %v13134_v37 = vadd.f32 %v16889_v59, %v12882_v16 }
 0x5f5   :  { %16904 = vst [vmem:[#allocation11_spill] sm:$0xff] %v13118_v24  ;;  %v13138_v6 = vadd.f32 %v16889_v59, %v12886_v57  ;;  %v16905_v24 = vld [vmem:[#allocation21_spill] sm:$0xff]  ;;  %v13146_v63 = vadd.f32 %v16889_v59, %v12894_v23  ;;  %v13150_v61 = vadd.f32 %v16889_v59, %v12898_v49  ;;  %v13154_v16 = vadd.f32 %v16889_v59, %v12902_v11 }
 0x5f6   :  { %v13142_v30 = vadd.f32 %v16889_v59, %v16905_v24  ;;  %v13158_v57 = vadd.f32 %v16889_v59, %v12906_v53  ;;  %v13162_v24 = vadd.f32 %v16889_v59, %v12910_v58  ;;  %v16670_v23 = vmax.f32 %v12918_v13, 0.0 }
 0x5f7   :  { %16907 = vst [vmem:[#allocation14_spill] sm:$0xff] %v13146_v63  ;;  %16908 = vst [vmem:[#allocation6_spill] sm:$0xff] %v13150_v61  ;;  %v16669_v63 = vmax.f32 %v12922_v22, 0.0  ;;  %v16671_v49 = vmax.f32 %v12926_v27, 0.0  ;;  %v16673_v61 = vmax.f32 %v12930_v31, 0.0  ;;  %v16672_v11 = vmax.f32 %v12934_v17, 0.0 }
 0x5f8   :  { %16906 = vst [vmem:[#allocation15_spill] sm:$0xff] %v13142_v30  ;;  %16909 = vst [vmem:[#allocation4_spill] sm:$0xff] %v13154_v16  ;;  %v3150_v30 = vmax.f32 %v12914_v42, 0.0  ;;  %v16674_v59 = vmax.f32 %v12950_v8, 0.0  ;;  %v16675_v58 = vmax.f32 %v12954_v46, 0.0  ;;  %v16676_v42 = vmax.f32 %v12958_v5, 0.0 }
 0x5f9   :  { %16910 = vst [vmem:[#allocation5_spill] sm:$0xff] %v13158_v57  ;;  %3324 = vst [vmem:[#allocation2 + $0x21] sm:$0xff] %v16670_v23  ;;  %v16678_v23 = vmax.f32 %v12978_v2, 0.0  ;;  %v16679_v53 = vmax.f32 %v12982_v29, 0.0  ;;  %v16912_v16 = vmax.f32 %v12942_v36, 0.0  ;;  %v3180_v57 = vmax.f32 %v13034_v12, 0.0 }
 0x5fa   :  { %3323 = vst [vmem:[#allocation2 + $0x19] sm:$0xff] %v3150_v30  ;;  %3325 = vst [vmem:[#allocation2 + $0x31] sm:$0xff] %v16669_v63  ;;  %4183 = vmatprep.mubr.f32.mxu1 %v3150_v30  ;;  %v16911_v63 = vmax.f32 %v12938_v52, 0.0  ;;  %v16677_v30 = vmax.f32 %v12974_v0, 0.0  ;;  %v16940_v12 = vmax.f32 %v12918_v13, 0.0  ;;  %v16944_v13 = vmax.f32 %v13082_v43, 0.0 }
 0x5fb   :  { %3326 = vst [vmem:[#allocation2 + $0x39] sm:$0xff] %v16671_v49  ;;  %3327 = vst [vmem:[#allocation2 + $0x49] sm:$0xff] %v16673_v61  ;;  %v16913_v49 = vmax.f32 %v12946_v41, 0.0  ;;  %v16925_v61 = vld [vmem:[#allocation25_spill] sm:$0xff] }
 0x5fc   :  { %3328 = vst [vmem:[#allocation2 + $0x51] sm:$0xff] %v16672_v11  ;;  %3329 = vst [vmem:[#allocation2 + $0x61] sm:$0xff] %v16911_v63  ;;  %v16680_v63 = vmax.f32 %v12990_v50, 0.0  ;;  %v16682_v11 = vmax.f32 %v13010_v4, 0.0 }
 0x5fd   :  { %3330 = vst [vmem:[#allocation2 + $0x69] sm:$0xff] %v16912_v16  ;;  %3331 = vst [vmem:[#allocation2 + $0x79] sm:$0xff] %v16913_v49  ;;  %v16914_v16 = vmax.f32 %v12962_v56, 0.0  ;;  %v16915_v49 = vmax.f32 %v12966_v45, 0.0 }
 0x5fe   :  { %3332 = vst [vmem:[#allocation2 + $0x81] sm:$0xff] %v16674_v59  ;;  %3333 = vst [vmem:[#allocation2 + $0x91] sm:$0xff] %v16675_v58  ;;  %v16916_v59 = vmax.f32 %v12970_v20, 0.0  ;;  %v16681_v58 = vmax.f32 %v13006_v54, 0.0 }
 0x5ff   :  { %3334 = vst [vmem:[#allocation2 + $0x99] sm:$0xff] %v16676_v42  ;;  %3335 = vst [vmem:[#allocation2 + $0xa9] sm:$0xff] %v16914_v16  ;;  %v16917_v16 = vmax.f32 %v12986_v18, 0.0  ;;  %v16918_v42 = vld [vmem:[#allocation23_spill] sm:$0xff] }
 0x600   :  { %3336 = vst [vmem:[#allocation2 + $0xb1] sm:$0xff] %v16915_v49  ;;  %3337 = vst [vmem:[#allocation2 + $0xc1] sm:$0xff] %v16916_v59  ;;  %v16926_v49 = vmax.f32 %v13022_v10, 0.0  ;;  %v16956_v43 = vld [vmem:[#allocation5_spill] sm:$0xff] }
 0x601   :  { %3338 = vst [vmem:[#allocation2 + $0xc9] sm:$0xff] %v16677_v30  ;;  %3339 = vst [vmem:[#allocation2 + $0xd9] sm:$0xff] %v16678_v23  ;;  %v16919_v30 = vmax.f32 %v12994_v7, 0.0  ;;  %v16920_v23 = vmax.f32 %v12998_v48, 0.0 }
 0x602   :  { %3340 = vst [vmem:[#allocation2 + $0xe1] sm:$0xff] %v16679_v53  ;;  %3341 = vst [vmem:[#allocation2 + $0xf1] sm:$0xff] %v16917_v16  ;;  %v16921_v53 = vmax.f32 %v13002_v38, 0.0  ;;  %v16922_v16 = vld [vmem:[#allocation24_spill] sm:$0xff] }
 0x603   :  { %3342 = vst [vmem:[#allocation2 + $0xf9] sm:$0xff] %v16680_v63  ;;  %3343 = vst [vmem:[#allocation2 + $0x109] sm:$0xff] %v16919_v30  ;;  %v3181_v59 = vmax.f32 %v16922_v16, 0.0  ;;  %v16923_v30 = vmax.f32 %v13014_v1, 0.0  ;;  %v16936_v16 = vmax.f32 %v13054_v47, 0.0  ;;  %v3200_v63 = vmax.f32 %v13114_v55, 0.0 }
 0x604   :  { %3344 = vst [vmem:[#allocation2 + $0x111] sm:$0xff] %v16920_v23  ;;  %3345 = vst [vmem:[#allocation2 + $0x121] sm:$0xff] %v16921_v53  ;;  %v16924_v23 = vmax.f32 %v13018_v33, 0.0  ;;  %v13276_v53 = vld [vmem:[#allocation2 + $0x3a] sm:$0xff] }
 0x605   :  { %3346 = vst [vmem:[#allocation2 + $0x129] sm:$0xff] %v16681_v58  ;;  %3347 = vst [vmem:[#allocation2 + $0x139] sm:$0xff] %v16682_v11  ;;  %v16927_v58 = vmax.f32 %v13026_v44, 0.0  ;;  %v16928_v11 = vmax.f32 %v16918_v42, 0.0 }
 0x606   :  { %3348 = vst [vmem:[#allocation2 + $0x141] sm:$0xff] %v16923_v30  ;;  %3349 = vst [vmem:[#allocation2 + $0x151] sm:$0xff] %v16924_v23  ;;  %v13261_v30 = vld [vmem:[#allocation2 + $0x18] sm:$0xff]  ;;  %v16930_v23 = vld [vmem:[#allocation27_spill] sm:$0xff] }
 0x607   :  { %3350 = vst [vmem:[#allocation2 + $0x159] sm:$0xff] %v16926_v49  ;;  %3351 = vst [vmem:[#allocation2 + $0x169] sm:$0xff] %v16927_v58  ;;  %v16931_v49 = vmax.f32 %v13042_v32, 0.0  ;;  %v16932_v58 = vmax.f32 %v13046_v40, 0.0  ;;  %4184 = vmatmul.mubr.f32.gmra.mrb[68].mxu1 %v13261_v30 }
 0x608   :  { %3352 = vst [vmem:[#allocation2 + $0x171] sm:$0xff] %v16928_v11  ;;  %3353 = vst [vmem:[#allocation2 + $0x181] sm:$0xff] %v3180_v57  ;;  %v16933_v11 = vmax.f32 %v13050_v19, 0.0  ;;  %v13273_v57 = vld [vmem:[#allocation2 + $0x32] sm:$0xff]  ;;  %4188 = vmatprep.mubr.f32.mxu1 %v16940_v12  ;;  %v13306_v12 = vld [vmem:[#allocation2 + $0x4a] sm:$0xff] }
 0x609   :  { %16929 = vst [vmem:[#allocation17_spill] sm:$0xff] %v13261_v30  ;;  %3354 = vst [vmem:[#allocation2 + $0x189] sm:$0xff] %v3181_v59  ;;  %v16939_v30 = vmax.f32 %v16925_v61, 0.0  ;;  %7542 = vmatprep.mubr.f32.mxu0 %v13273_v57  ;;  %v3204_v59 = vmax.f32 %v13130_v62, 0.0  ;;  %v3206_v62 = vmax.f32 %v13138_v6, 0.0  ;;  %v3212_v6 = vmax.f32 %v13162_v24, 0.0 }
 0x60a   :  { %3356 = vst [vmem:[#allocation2 + $0x1c9] sm:$0xff] %v16931_v49  ;;  %3357 = vst [vmem:[#allocation2 + $0x1d1] sm:$0xff] %v16932_v58  ;;  %v16937_v58 = vmax.f32 %v13058_v26, 0.0  ;;  %v3198_v49 = vmax.f32 %v13106_v51, 0.0  ;;  %7543 = vmatmul.mubr.f32.vlgmr.msra.gmra.mrb[128].mxu0 %v13276_v53  ;;  %v4007_v51 = vld [vmem:[%s16593_s2 + $0x150] sm:$0xff]  ;;  %v4009_v24 = vld [vmem:[%s16593_s2 + $0x160] sm:$0xff] }
 0x60b   :  { %3358 = vst [vmem:[#allocation2 + $0x1e1] sm:$0xff] %v16933_v11  ;;  %16934 = vst [vmem:[#allocation18_spill] sm:$0xff] %v13273_v57  ;;  %v16938_v11 = vmax.f32 %v13062_v9, 0.0  ;;  %v16950_v57 = vmax.f32 %v13098_v39, 0.0  ;;  %7545 = vmatprep.mubr.f32.mxu0 %v13306_v12  ;;  %v16955_v39 = vld [vmem:[#allocation4_spill] sm:$0xff] }
 0x60c   :  { %16935 = vst [vmem:[#allocation20_spill] sm:$0xff] %v13276_v53  ;;  %3359 = vst [vmem:[#allocation2 + $0x1e9] sm:$0xff] %v16936_v16  ;;  %v3199_v16 = vmax.f32 %v13110_v3, 0.0  ;;  %v16946_v3 = vld [vmem:[#allocation11_spill] sm:$0xff]  ;;  %v16949_v53 = vmax.f32 %v13094_v34, 0.0 }
 0x60d   :  { %3360 = vst [vmem:[#allocation2 + $0x1f9] sm:$0xff] %v16937_v58  ;;  %3361 = vst [vmem:[#allocation2 + $0x201] sm:$0xff] %v16938_v11  ;;  %v16941_v58 = vmax.f32 %v16930_v23, 0.0  ;;  %v16942_v11 = vmax.f32 %v13074_v21, 0.0  ;;  %v3201_v55 = vmax.f32 %v16946_v3, 0.0  ;;  %v13324_v3 = vld [vmem:[#allocation2 + $0x20] sm:$0xff] }
 0x60e   :  { %3362 = vst [vmem:[#allocation2 + $0x211] sm:$0xff] %v16939_v30  ;;  %v16943_v30 = vmax.f32 %v13078_v28, 0.0  ;;  %3366 = vst [vmem:[#allocation2 + $0x241] sm:$0xff] %v16944_v13  ;;  %v16948_v13 = vmax.f32 %v13090_v14, 0.0  ;;  %v16952_v14 = vld [vmem:[#allocation14_spill] sm:$0xff]  ;;  %4189 = vmatmul.mubr.f32.gmra.mrb[70].mxu1 %v13324_v3 }
 0x60f   :  { %3363 = vst [vmem:[#allocation2 + $0x219] sm:$0xff] %v16941_v58  ;;  %3364 = vst [vmem:[#allocation2 + $0x229] sm:$0xff] %v16942_v11  ;;  %v3202_v58 = vmax.f32 %v13122_v25, 0.0  ;;  %v3203_v11 = vmax.f32 %v13126_v35, 0.0  ;;  %v4008_v25 = vld [vmem:[%s16593_s2 + $0x158] sm:$0xff]  ;;  %v3205_v35 = vmax.f32 %v13134_v37, 0.0 }
 0x610   :  { %3365 = vst [vmem:[#allocation2 + $0x231] sm:$0xff] %v16943_v30  ;;  %16945 = vst [vmem:[#allocation21_spill] sm:$0xff] %v13306_v12  ;;  %v16947_v30 = vmax.f32 %v13086_v60, 0.0  ;;  %v3208_v34 = vmax.f32 %v16952_v14, 0.0  ;;  %v3210_v60 = vmax.f32 %v16955_v39, 0.0  ;;  %v3211_v37 = vmax.f32 %v16956_v43, 0.0 }
 0x611   :  { %3368 = vst [vmem:[#allocation2 + $0x259] sm:$0xff] %v16948_v13  ;;  %3369 = vst [vmem:[#allocation2 + $0x261] sm:$0xff] %v16949_v53  ;;  %v16953_v53 = vmax.f32 %v13102_v15, 0.0  ;;  %v13340_v14 = vld [vmem:[#allocation2 + $0x52] sm:$0xff]  ;;  %v13345_v39 = vld [vmem:[#allocation2 + $0x62] sm:$0xff]  ;;  %v7926_v43 = vpack.c.bf16 %v4008_v25, %v4007_v51 }
 0x612   :  { %3367 = vst [vmem:[#allocation2 + $0x249] sm:$0xff] %v16947_v30  ;;  %3370 = vst [vmem:[#allocation2 + $0x271] sm:$0xff] %v16950_v57  ;;  %v16951_v30 = vld [vmem:[#allocation15_spill] sm:$0xff]  ;;  %v16954_v57 = vld [vmem:[#allocation6_spill] sm:$0xff]  ;;  %7546 = vmatmul.mubr.f32.gmra.mrb[130].mxu0 %v13340_v14 }
 0x613   :  { %v3207_v13 = vmax.f32 %v16951_v30, 0.0  ;;  %3371 = vst [vmem:[#allocation2 + $0x279] sm:$0xff] %v16953_v53  ;;  %3372 = vst [vmem:[#allocation2 + $0x289] sm:$0xff] %v3198_v49  ;;  %v3209_v12 = vmax.f32 %v16954_v57, 0.0  ;;  %v16957_v49 = vmax.f32 %v12922_v22, 0.0  ;;  %7548 = vmatprep.mubr.f32.mxu0 %v13345_v39  ;;  %v13354_v22 = vld [vmem:[#allocation2 + $0x30] sm:$0xff]  ;;  %7927 = vmatpush1.bf16.msra.mxu1 %v7926_v43 }
 0x614   :  { %3373 = vst [vmem:[#allocation2 + $0x291] sm:$0xff] %v3199_v16  ;;  %3374 = vst [vmem:[#allocation2 + $0x2a1] sm:$0xff] %v3200_v63  ;;  %v4010_v63 = vld [vmem:[%s16593_s2 + $0x168] sm:$0xff]  ;;  %v13362_v51 = vld [vmem:[#allocation2 + $0x7a] sm:$0xff]  ;;  %v16961_v53 = vmax.f32 %v12934_v17, 0.0  ;;  %v16962_v43 = vmax.f32 %v12938_v52, 0.0 }
 0x615   :  { %3375 = vst [vmem:[#allocation2 + $0x2a9] sm:$0xff] %v3201_v55  ;;  %3376 = vst [vmem:[#allocation2 + $0x2b9] sm:$0xff] %v3202_v58  ;;  %4193 = vmatprep.mubr.f32.mxu1 %v16957_v49  ;;  %v7929_v16 = vpack.c.bf16 %v4010_v63, %v4009_v24  ;;  %v4012_v55 = vld [vmem:[%s16593_s2 + $0x178] sm:$0xff]  ;;  %v13375_v58 = vld [vmem:[#allocation2 + $0x82] sm:$0xff] }
 0x616   :  { %3377 = vst [vmem:[#allocation2 + $0x2c1] sm:$0xff] %v3203_v11  ;;  %3378 = vst [vmem:[#allocation2 + $0x2d1] sm:$0xff] %v3204_v59  ;;  %4194 = vmatmul.mubr.f32.gmra.mrb[72].mxu1 %v13354_v22  ;;  %v16958_v59 = vmax.f32 %v12926_v27, 0.0  ;;  %v13372_v27 = vld [vmem:[#allocation2 + $0x38] sm:$0xff]  ;;  %v16960_v11 = vmax.f32 %v12930_v31, 0.0  ;;  %v4014_v30 = vld [vmem:[%s16593_s2 + $0x188] sm:$0xff] }
 0x617   :  { %3379 = vst [vmem:[#allocation2 + $0x2d9] sm:$0xff] %v3205_v35  ;;  %3380 = vst [vmem:[#allocation2 + $0x2e9] sm:$0xff] %v3206_v62  ;;  %v13380_v35 = vld [vmem:[#allocation2 + $0x92] sm:$0xff]  ;;  %v4013_v62 = vld [vmem:[%s16593_s2 + $0x180] sm:$0xff] }
 0x618   :  { %3381 = vst [vmem:[#allocation2 + $0x2f1] sm:$0xff] %v3207_v13  ;;  %3382 = vst [vmem:[#allocation2 + $0x301] sm:$0xff] %v3208_v34  ;;  %v13357_v34 = vld [vmem:[#allocation2 + $0x6a] sm:$0xff]  ;;  %4198 = vmatprep.mubr.f32.mxu1 %v16958_v59  ;;  %v13393_v13 = vld [vmem:[#allocation2 + $0x9a] sm:$0xff]  ;;  %v7935_v57 = vpack.c.bf16 %v4014_v30, %v4013_v62  ;;  %v16963_v59 = vmax.f32 %v12942_v36, 0.0 }
 0x619   :  { %3383 = vst [vmem:[#allocation2 + $0x309] sm:$0xff] %v3209_v12  ;;  %3384 = vst [vmem:[#allocation2 + $0x319] sm:$0xff] %v3210_v60  ;;  %7549 = vmatmul.mubr.f32.gmra.mrb[132].mxu0 %v13357_v34  ;;  %v16959_v60 = vmov 0.0|0.0   ;;  %v4011_v12 = vld [vmem:[%s16593_s2 + $0x170] sm:$0xff]  ;;  %v13390_v31 = vld [vmem:[#allocation2 + $0x48] sm:$0xff] }
 0x61a   :  { %3385 = vst [vmem:[#allocation2 + $0x321] sm:$0xff] %v3211_v37  ;;  %3386 = vst [vmem:[#allocation2 + $0x331] sm:$0xff] %v3212_v6  ;;  %7928 = vmatprep.subr.bf16.mxu1 %v16959_v60  ;;  %7551 = vmatprep.mubr.f32.mxu0 %v13362_v51  ;;  %v7932_v25 = vpack.c.bf16 %v4012_v55, %v4011_v12  ;;  %v3911_v37 = vld [vmem:[#allocation2 + $0xaa] sm:$0xff]  ;;  %v3912_v49 = vld [vmem:[#allocation2 + $0xb2] sm:$0xff]  ;;  %v16964_v55 = vmax.f32 %v12946_v41, 0.0 }
 0x61b   :  { %4199 = vmatmul.mubr.f32.gmra.mrb[74].mxu1 %v13372_v27  ;;  %v13399_v6 = vld [vmem:[#allocation2 + $0x50] sm:$0xff]  ;;  %v3913_v17 = vld [vmem:[#allocation2 + $0xc2] sm:$0xff]  ;;  %v4016_v36 = vld [vmem:[%s16593_s2 + $0x198] sm:$0xff] }
 0x61c   :  { %4203 = vmatprep.mubr.f32.mxu1 %v16960_v11  ;;  %7930 = vmatpush1.bf16.msra.mxu1 %v7929_v16  ;;  %v13405_v24 = vld [vmem:[#allocation2 + $0x60] sm:$0xff]  ;;  %v3914_v63 = vld [vmem:[#allocation2 + $0xca] sm:$0xff]  ;;  %v3917_v11 = vld [vmem:[#allocation2 + $0xf2] sm:$0xff] }
 0x61d   :  { %7552 = vmatmul.mubr.f32.gmra.mrb[134].mxu0 %v13375_v58  ;;  %7931 = vmatprep.subr.bf16.mxu1 %v16959_v60  ;;  %v3915_v16 = vld [vmem:[#allocation2 + $0xda] sm:$0xff]  ;;  %v13410_v12 = vld [vmem:[#allocation2 + $0x68] sm:$0xff] }
 0x61e   :  { %7554 = vmatprep.mubr.f32.mxu0 %v13380_v35  ;;  %v3916_v52 = vld [vmem:[#allocation2 + $0xe2] sm:$0xff]  ;;  %v13421_v62 = vld [vmem:[#allocation2 + $0x78] sm:$0xff] }
 0x61f   :  { %4204 = vmatmul.mubr.f32.gmra.mrb[76].mxu1 %v13390_v31  ;;  %v4017_v41 = vld [vmem:[%s16593_s2 + $0x1a0] sm:$0xff] }
 0x620   :  { %4208 = vmatprep.mubr.f32.mxu1 %v16961_v53  ;;  %7933 = vmatpush1.bf16.msra.mxu1 %v7932_v25  ;;  %v4015_v25 = vld [vmem:[%s16593_s2 + $0x190] sm:$0xff]  ;;  %v4018_v53 = vld [vmem:[%s16593_s2 + $0x1a8] sm:$0xff] }
 0x621   :  { %7555 = vmatmul.mubr.f32.gmra.mrb[136].mxu0 %v13393_v13  ;;  %7934 = vmatprep.subr.bf16.mxu1 %v16959_v60  ;;  %v7938_v30 = vpack.c.bf16 %v4016_v36, %v4015_v25  ;;  %v3923_v25 = vld [vmem:[#allocation2 + $0x13a] sm:$0xff] }
 0x622   :  { %7557 = vmatprep.mubr.f32.mxu0 %v3911_v37  ;;  %v16965_v37 = vmax.f32 %v12950_v8, 0.0  ;;  %v13439_v8 = vld [vmem:[#allocation2 + $0x90] sm:$0xff] }
 0x623   :  { %4209 = vmatmul.mubr.f32.gmra.mrb[78].mxu1 %v13399_v6 }
 0x624   :  { %4213 = vmatprep.mubr.f32.mxu1 %v16962_v43  ;;  %7936 = vmatpush1.bf16.msra.mxu1 %v7935_v57  ;;  %v3918_v57 = vld [vmem:[#allocation2 + $0xfa] sm:$0xff]  ;;  %v3919_v43 = vld [vmem:[#allocation2 + $0x10a] sm:$0xff] }
 0x625   :  { %7558 = vmatmul.mubr.f32.gmra.mrb[138].mxu0 %v3912_v49  ;;  %7937 = vmatprep.subr.bf16.mxu1 %v16959_v60  ;;  %v7941_v49 = vpack.c.bf16 %v4018_v53, %v4017_v41  ;;  %v3924_v41 = vld [vmem:[#allocation2 + $0x142] sm:$0xff]  ;;  %v3925_v53 = vld [vmem:[#allocation2 + $0x152] sm:$0xff] }
 0x626   :  { %7560 = vmatprep.mubr.f32.mxu0 %v3913_v17  ;;  %v13433_v17 = vld [vmem:[#allocation2 + $0x80] sm:$0xff] }
 0x627   :  { %4214 = vmatmul.mubr.f32.gmra.mrb[80].mxu1 %v13405_v24 }
 0x628   :  { %4218 = vmatprep.mubr.f32.mxu1 %v16963_v59  ;;  %7939 = vmatpush1.bf16.msra.mxu1 %v7938_v30  ;;  %v16966_v59 = vmax.f32 %v12954_v46, 0.0  ;;  %v4020_v46 = vld [vmem:[%s16593_s2 + $0x1b8] sm:$0xff] }
 0x629   :  { %7561 = vmatmul.mubr.f32.gmra.mrb[140].mxu0 %v3914_v63  ;;  %7940 = vmatprep.subr.bf16.mxu1 %v16959_v60  ;;  %v3920_v63 = vld [vmem:[#allocation2 + $0x112] sm:$0xff] }
 0x62a   :  { %7563 = vmatprep.mubr.f32.mxu0 %v3915_v16  ;;  %v3921_v16 = vld [vmem:[#allocation2 + $0x122] sm:$0xff]  ;;  %v13450_v30 = vld [vmem:[#allocation2 + $0x98] sm:$0xff] }
 0x62b   :  { %4219 = vmatmul.mubr.f32.gmra.mrb[82].mxu1 %v13410_v12 }
 0x62c   :  { %4223 = vmatprep.mubr.f32.mxu1 %v16964_v55  ;;  %7942 = vmatpush1.bf16.msra.mxu1 %v7941_v49  ;;  %v16967_v55 = vmax.f32 %v12958_v5, 0.0  ;;  %v16968_v5 = vmax.f32 %v12962_v56, 0.0  ;;  %v16969_v49 = vmax.f32 %v12966_v45, 0.0  ;;  %v3928_v56 = vld [vmem:[#allocation2 + $0x172] sm:$0xff]  ;;  %v3931_v45 = vld [vmem:[#allocation2 + $0x19a] sm:$0xff] }
 0x62d   :  { %7564 = vmatmul.mubr.f32.gmra.mrb[142].mxu0 %v3916_v52  ;;  %7943 = vmatprep.subr.bf16.mxu1 %v16959_v60  ;;  %v3922_v52 = vld [vmem:[#allocation2 + $0x12a] sm:$0xff] }
 0x62e   :  { %7566 = vmatprep.mubr.f32.mxu0 %v3917_v11  ;;  %v4019_v11 = vld [vmem:[%s16593_s2 + $0x1b0] sm:$0xff] }
 0x62f   :  { %4224 = vmatmul.mubr.f32.gmra.mrb[84].mxu1 %v13421_v62  ;;  %v7944_v36 = vpack.c.bf16 %v4020_v46, %v4019_v11  ;;  %v16971_v11 = vmax.f32 %v12974_v0, 0.0  ;;  %v4021_v46 = vld [vmem:[%s16593_s2 + $0x1c0] sm:$0xff] }
 0x630   :  { %4228 = vmatprep.mubr.f32.mxu1 %v16965_v37  ;;  %v3926_v37 = vld [vmem:[#allocation2 + $0x15a] sm:$0xff]  ;;  %v3933_v0 = vld [vmem:[#allocation2 + $0x1e2] sm:$0xff] }
 0x631   :  { %7567 = vmatmul.mubr.f32.gmra.mrb[144].mxu0 %v3918_v57  ;;  %7945 = vmatpush1.bf16.msra.mxu1 %v7944_v36  ;;  %v13456_v57 = vld [vmem:[#allocation2 + $0xa8] sm:$0xff] }
 0x632   :  { %7569 = vmatprep.mubr.f32.mxu0 %v3919_v43  ;;  %7946 = vmatprep.subr.bf16.mxu1 %v16959_v60  ;;  %v3927_v43 = vld [vmem:[#allocation2 + $0x16a] sm:$0xff] }
 0x633   :  { %4229 = vmatmul.mubr.f32.gmra.mrb[86].mxu1 %v13433_v17  ;;  %v13477_v36 = vld [vmem:[#allocation2 + $0xc8] sm:$0xff] }
 0x634   :  { %4233 = vmatprep.mubr.f32.mxu1 %v16966_v59  ;;  %v16970_v59 = vmax.f32 %v12970_v20, 0.0  ;;  %v4022_v20 = vld [vmem:[%s16593_s2 + $0x1c8] sm:$0xff] }
 0x635   :  { %7570 = vmatmul.mubr.f32.gmra.mrb[146].mxu0 %v3920_v63  ;;  %v13461_v63 = vld [vmem:[#allocation2 + $0xb0] sm:$0xff] }
 0x636   :  { %7572 = vmatprep.mubr.f32.mxu0 %v3921_v16  ;;  %v3929_v16 = vld [vmem:[#allocation2 + $0x182] sm:$0xff] }
 0x637   :  { %4234 = vmatmul.mubr.f32.gmra.mrb[88].mxu1 %v13439_v8 }
 0x638   :  { %4238 = vmatprep.mubr.f32.mxu1 %v16967_v55  ;;  %v3930_v55 = vld [vmem:[#allocation2 + $0x18a] sm:$0xff] }
 0x639   :  { %7573 = vmatmul.mubr.f32.gmra.mrb[148].mxu0 %v3922_v52  ;;  %v13466_v52 = vld [vmem:[#allocation2 + $0xc0] sm:$0xff] }
 0x63a   :  { %7575 = vmatprep.mubr.f32.mxu0 %v3923_v25  ;;  %v7947_v25 = vpack.c.bf16 %v4022_v20, %v4021_v46  ;;  %v3939_v46 = vld [vmem:[#allocation2 + $0x22a] sm:$0xff] }
 0x63b   :  { %4239 = vmatmul.mubr.f32.gmra.mrb[90].mxu1 %v13450_v30 }
 0x63c   :  { %4243 = vmatprep.mubr.f32.mxu1 %v16968_v5  ;;  %v16972_v5 = vmax.f32 %v12978_v2, 0.0  ;;  %7948 = vmatpush1.bf16.msra.mxu1 %v7947_v25  ;;  %v3936_v2 = vld [vmem:[#allocation2 + $0x202] sm:$0xff]  ;;  %v13504_v25 = vld [vmem:[#allocation2 + $0xf8] sm:$0xff] }
 0x63d   :  { %7576 = vmatmul.mubr.f32.gmra.mrb[150].mxu0 %v3924_v41  ;;  %v3932_v41 = vld [vmem:[#allocation2 + $0x1a2] sm:$0xff]  ;;  %7949 = vmatprep.subr.bf16.mxu1 %v16959_v60 }
 0x63e   :  { %7578 = vmatprep.mubr.f32.mxu0 %v3925_v53  ;;  %v13483_v53 = vld [vmem:[#allocation2 + $0xd8] sm:$0xff] }
 0x63f   :  { %4244 = vmatmul.mubr.f32.gmra.mrb[92].mxu1 %v13456_v57 }
 0x640   :  { %4248 = vmatprep.mubr.f32.mxu1 %v16969_v49  ;;  %v16973_v49 = vmax.f32 %v12982_v29, 0.0  ;;  %v3938_v29 = vld [vmem:[#allocation2 + $0x21a] sm:$0xff] }
 0x641   :  { %7579 = vmatmul.mubr.f32.gmra.mrb[152].mxu0 %v3926_v37  ;;  %v3934_v37 = vld [vmem:[#allocation2 + $0x1ea] sm:$0xff] }
 0x642   :  { %7581 = vmatprep.mubr.f32.mxu0 %v3927_v43  ;;  %v3935_v43 = vld [vmem:[#allocation2 + $0x1fa] sm:$0xff] }
 0x643   :  { %4249 = vmatmul.mubr.f32.gmra.mrb[94].mxu1 %v13461_v63 }
 0x644   :  { %4253 = vmatprep.mubr.f32.mxu1 %v16970_v59  ;;  %v16974_v59 = vmax.f32 %v12986_v18, 0.0  ;;  %v4024_v18 = vld [vmem:[%s16593_s2 + $0x1d8] sm:$0xff] }
 0x645   :  { %7582 = vmatmul.mubr.f32.gmra.mrb[154].mxu0 %v3928_v56  ;;  %v13488_v56 = vld [vmem:[#allocation2 + $0xe0] sm:$0xff] }
 0x646   :  { %7584 = vmatprep.mubr.f32.mxu0 %v3929_v16  ;;  %v3937_v16 = vld [vmem:[#allocation2 + $0x212] sm:$0xff] }
 0x647   :  { %4254 = vmatmul.mubr.f32.gmra.mrb[96].mxu1 %v13466_v52 }
 0x648   :  { %4258 = vmatprep.mubr.f32.mxu1 %v16971_v11  ;;  %v4023_v11 = vld [vmem:[%s16593_s2 + $0x1d0] sm:$0xff] }
 0x649   :  { %7585 = vmatmul.mubr.f32.gmra.mrb[156].mxu0 %v3930_v55  ;;  %v16975_v55 = vmax.f32 %v12990_v50, 0.0  ;;  %v7950_v20 = vpack.c.bf16 %v4024_v18, %v4023_v11  ;;  %v16976_v50 = vmax.f32 %v12994_v7, 0.0  ;;  %v3944_v7 = vld [vmem:[#allocation2 + $0x262] sm:$0xff]  ;;  %v3947_v11 = vld [vmem:[#allocation2 + $0x28a] sm:$0xff] }
 0x64a   :  { %7587 = vmatprep.mubr.f32.mxu0 %v3931_v45  ;;  %v13493_v45 = vld [vmem:[#allocation2 + $0xf0] sm:$0xff]  ;;  %v4025_v18 = vld [vmem:[%s16593_s2 + $0x1e0] sm:$0xff] }
 0x64b   :  { %4259 = vmatmul.mubr.f32.gmra.mrb[98].mxu1 %v13477_v36 }
 0x64c   :  { %4263 = vmatprep.mubr.f32.mxu1 %v16972_v5  ;;  %7951 = vmatpush1.bf16.msra.mxu1 %v7950_v20  ;;  %v3941_v5 = vld [vmem:[#allocation2 + $0x242] sm:$0xff] }
 0x64d   :  { %7588 = vmatmul.mubr.f32.gmra.mrb[158].mxu0 %v3932_v41  ;;  %v3940_v41 = vld [vmem:[#allocation2 + $0x232] sm:$0xff]  ;;  %7952 = vmatprep.subr.bf16.mxu1 %v16959_v60 }
 0x64e   :  { %7590 = vmatprep.mubr.f32.mxu0 %v3933_v0  ;;  %v13510_v0 = vld [vmem:[#allocation2 + $0x108] sm:$0xff] }
 0x64f   :  { %4264 = vmatmul.mubr.f32.gmra.mrb[100].mxu1 %v13483_v53 }
 0x650   :  { %4268 = vmatprep.mubr.f32.mxu1 %v16973_v49  ;;  %v16977_v49 = vmax.f32 %v12998_v48, 0.0  ;;  %v3946_v48 = vld [vmem:[#allocation2 + $0x27a] sm:$0xff] }
 0x651   :  { %7591 = vmatmul.mubr.f32.gmra.mrb[160].mxu0 %v3934_v37  ;;  %v3942_v37 = vld [vmem:[#allocation2 + $0x24a] sm:$0xff] }
 0x652   :  { %7593 = vmatprep.mubr.f32.mxu0 %v3935_v43  ;;  %v3943_v43 = vld [vmem:[#allocation2 + $0x25a] sm:$0xff] }
 0x653   :  { %4269 = vmatmul.mubr.f32.gmra.mrb[102].mxu1 %v13488_v56 }
 0x654   :  { %4273 = vmatprep.mubr.f32.mxu1 %v16974_v59  ;;  %v16978_v59 = vmax.f32 %v13002_v38, 0.0  ;;  %v4026_v38 = vld [vmem:[%s16593_s2 + $0x1e8] sm:$0xff] }
 0x655   :  { %7594 = vmatmul.mubr.f32.gmra.mrb[162].mxu0 %v3936_v2  ;;  %v13515_v2 = vld [vmem:[#allocation2 + $0x110] sm:$0xff]  ;;  %v7953_v20 = vpack.c.bf16 %v4026_v38, %v4025_v18  ;;  %v13558_v38 = vld [vmem:[#allocation2 + $0x158] sm:$0xff] }
 0x656   :  { %7596 = vmatprep.mubr.f32.mxu0 %v3937_v16  ;;  %v3945_v16 = vld [vmem:[#allocation2 + $0x272] sm:$0xff] }
 0x657   :  { %4274 = vmatmul.mubr.f32.gmra.mrb[104].mxu1 %v13493_v45  ;;  %v4027_v18 = vld [vmem:[%s16593_s2 + $0x1f0] sm:$0xff] }
 0x658   :  { %4278 = vmatprep.mubr.f32.mxu1 %v16975_v55  ;;  %v16979_v55 = vmax.f32 %v13006_v54, 0.0  ;;  %v16980_v54 = vmax.f32 %v13010_v4, 0.0  ;;  %7954 = vmatpush1.bf16.msra.mxu1 %v7953_v20  ;;  %v3952_v4 = vld [vmem:[#allocation2 + $0x2c2] sm:$0xff] }
 0x659   :  { %7597 = vmatmul.mubr.f32.gmra.mrb[164].mxu0 %v3938_v29  ;;  %v13520_v29 = vld [vmem:[#allocation2 + $0x120] sm:$0xff]  ;;  %7955 = vmatprep.subr.bf16.mxu1 %v16959_v60 }
 0x65a   :  { %7599 = vmatprep.mubr.f32.mxu0 %v3939_v46  ;;  %v13531_v46 = vld [vmem:[#allocation2 + $0x128] sm:$0xff] }
 0x65b   :  { %4279 = vmatmul.mubr.f32.gmra.mrb[106].mxu1 %v13504_v25 }
 0x65c   :  { %4283 = vmatprep.mubr.f32.mxu1 %v16976_v50  ;;  %v3949_v50 = vld [vmem:[#allocation2 + $0x2a2] sm:$0xff] }
 0x65d   :  { %7600 = vmatmul.mubr.f32.gmra.mrb[166].mxu0 %v3940_v41  ;;  %v3948_v41 = vld [vmem:[#allocation2 + $0x292] sm:$0xff] }
 0x65e   :  { %7602 = vmatprep.mubr.f32.mxu0 %v3941_v5  ;;  %v13537_v5 = vld [vmem:[#allocation2 + $0x138] sm:$0xff] }
 0x65f   :  { %4284 = vmatmul.mubr.f32.gmra.mrb[108].mxu1 %v13510_v0 }
 0x660   :  { %4288 = vmatprep.mubr.f32.mxu1 %v16977_v49  ;;  %v16981_v49 = vmax.f32 %v13014_v1, 0.0  ;;  %v3954_v1 = vld [vmem:[#allocation2 + $0x2da] sm:$0xff] }
 0x661   :  { %7603 = vmatmul.mubr.f32.gmra.mrb[168].mxu0 %v3942_v37  ;;  %v3950_v37 = vld [vmem:[#allocation2 + $0x2aa] sm:$0xff] }
 0x662   :  { %7605 = vmatprep.mubr.f32.mxu0 %v3943_v43  ;;  %v3951_v43 = vld [vmem:[#allocation2 + $0x2ba] sm:$0xff] }
 0x663   :  { %4289 = vmatmul.mubr.f32.gmra.mrb[110].mxu1 %v13515_v2 }
 0x664   :  { %4293 = vmatprep.mubr.f32.mxu1 %v16978_v59  ;;  %v16982_v59 = vmax.f32 %v13018_v33, 0.0  ;;  %v4028_v33 = vld [vmem:[%s16593_s2 + $0x1f8] sm:$0xff] }
 0x665   :  { %7606 = vmatmul.mubr.f32.gmra.mrb[170].mxu0 %v3944_v7  ;;  %v13542_v7 = vld [vmem:[#allocation2 + $0x140] sm:$0xff]  ;;  %v7956_v20 = vpack.c.bf16 %v4028_v33, %v4027_v18  ;;  %v13594_v18 = vld [vmem:[#allocation2 + $0x1f8] sm:$0xff] }
 0x666   :  { %7608 = vmatprep.mubr.f32.mxu0 %v3945_v16  ;;  %v3953_v16 = vld [vmem:[#allocation2 + $0x2d2] sm:$0xff]  ;;  %v13599_v33 = vld [vmem:[#allocation2 + $0x200] sm:$0xff] }
 0x667   :  { %4294 = vmatmul.mubr.f32.gmra.mrb[112].mxu1 %v13520_v29 }
 0x668   :  { %4298 = vmatprep.mubr.f32.mxu1 %v16979_v55  ;;  %v16983_v55 = vmax.f32 %v13022_v10, 0.0  ;;  %v16984_v10 = vmax.f32 %v13026_v44, 0.0  ;;  %7957 = vmatpush1.bf16.msra.mxu1 %v7956_v20  ;;  %v8877_v44 = vld [vmem:[#allocation2] sm:$0xff]  ;;  %v13604_v20 = vld [vmem:[#allocation2 + $0x210] sm:$0xff] }
 0x669   :  { %7609 = vmatmul.mubr.f32.gmra.mrb[172].mxu0 %v3946_v48  ;;  %v13547_v48 = vld [vmem:[#allocation2 + $0x150] sm:$0xff]  ;;  %7958 = vmatprep.subr.bf16.mxu1 %v16959_v60 }
 0x66a   :  { %7611 = vmatprep.mubr.f32.mxu0 %v3947_v11  ;;  %v3955_v11 = vld [vmem:[#allocation2 + $0x2ea] sm:$0xff] }
 0x66b   :  { %4299 = vmatmul.mubr.f32.gmra.mrb[114].mxu1 %v13531_v46 }
 0x66c   :  { %4303 = vmatprep.mubr.f32.mxu1 %v16980_v54  ;;  %v13564_v54 = vld [vmem:[#allocation2 + $0x168] sm:$0xff] }
 0x66d   :  { %7612 = vmatmul.mubr.f32.gmra.mrb[174].mxu0 %v3948_v41  ;;  %v3956_v41 = vld [vmem:[#allocation2 + $0x2f2] sm:$0xff] }
 0x66e   :  { %7614 = vmatprep.mubr.f32.mxu0 %v3949_v50  ;;  %v16985_v50 = vmax.f32 %v16918_v42, 0.0  ;;  %v16987_v42 = vmax.f32 %v13046_v40, 0.0  ;;  %v16990_v40 = vmax.f32 %v13058_v26, 0.0  ;;  %v16993_v26 = vmax.f32 %v16930_v23, 0.0  ;;  %v16996_v23 = vld [vmem:[#allocation9_spill] sm:$0xff] }
 0x66f   :  { %4304 = vmatmul.mubr.f32.gmra.mrb[116].mxu1 %v13537_v5 }
 0x670   :  { %4308 = vmatprep.mubr.f32.mxu1 %v16981_v49  ;;  %v13569_v49 = vld [vmem:[#allocation2 + $0x170] sm:$0xff] }
 0x671   :  { %7615 = vmatmul.mubr.f32.gmra.mrb[176].mxu0 %v3950_v37  ;;  %v3484_v37 = vld [vmem:[#allocation2 + $0x1b1] sm:$0xff] }
 0x672   :  { %7617 = vmatprep.mubr.f32.mxu0 %v3951_v43  ;;  %v3485_v43 = vld [vmem:[#allocation2 + $0x1b9] sm:$0xff] }
 0x673   :  { %4309 = vmatmul.mubr.f32.gmra.mrb[118].mxu1 %v13542_v7 }
 0x674   :  { %4313 = vmatprep.mubr.f32.mxu1 %v16982_v59  ;;  %v13574_v59 = vld [vmem:[#allocation2 + $0x1c8] sm:$0xff] }
 0x675   :  { %7618 = vmatmul.mubr.f32.gmra.mrb[178].mxu0 %v3952_v4  ;;  %v16986_v4 = vmax.f32 %v13042_v32, 0.0  ;;  %v16989_v32 = vmax.f32 %v13054_v47, 0.0  ;;  %v16992_v47 = vmax.f32 %v16925_v61, 0.0  ;;  %v16995_v61 = vmax.f32 %v13078_v28, 0.0  ;;  %v17000_v28 = vld [vmem:[#allocation8_spill] sm:$0xff] }
 0x676   :  { %7620 = vmatprep.mubr.f32.mxu0 %v3953_v16  ;;  %v13579_v16 = vld [vmem:[#allocation2 + $0x1d0] sm:$0xff] }
 0x677   :  { %4314 = vmatmul.mubr.f32.gmra.mrb[120].mxu1 %v13547_v48 }
 0x678   :  { %4318 = vmatprep.mubr.f32.mxu1 %v16983_v55  ;;  %v13584_v55 = vld [vmem:[#allocation2 + $0x1e0] sm:$0xff] }
 0x679   :  { %7621 = vmatmul.mubr.f32.gmra.mrb[180].mxu0 %v3954_v1  ;;  %v16988_v1 = vmax.f32 %v13050_v19, 0.0  ;;  %v16991_v19 = vmax.f32 %v13062_v9, 0.0  ;;  %v16994_v9 = vmax.f32 %v13074_v21, 0.0  ;;  %v16998_v21 = vld [vmem:[#allocation12_spill] sm:$0xff] }
 0x67a   :  { %7623 = vmatprep.mubr.f32.mxu0 %v3955_v11  ;;  %v13589_v11 = vld [vmem:[#allocation2 + $0x1e8] sm:$0xff] }
 0x67b   :  { %4319 = vmatmul.mubr.f32.gmra.mrb[122].mxu1 %v13558_v38 }
 0x67c   :  { %4323 = vmatprep.mubr.f32.mxu1 %v16984_v10  ;;  %v13614_v10 = vld [vmem:[#allocation2 + $0x228] sm:$0xff] }
 0x67d   :  { %7624 = vmatmul.mubr.f32.gmra.mrb[182].mxu0 %v3956_v41  ;;  %v13609_v41 = vld [vmem:[#allocation2 + $0x218] sm:$0xff] }
 0x67f   :  { %4324 = vmatmul.mubr.f32.gmra.mrb[124].mxu1 %v13564_v54 }
 0x680   :  { %4328 = vmatprep.mubr.f32.mxu1 %v16985_v50  ;;  %v13619_v50 = vld [vmem:[#allocation2 + $0x230] sm:$0xff] }
 0x683   :  { %4329 = vmatmul.mubr.f32.gmra.mrb[126].mxu1 %v13569_v49 }
 0x684   :  { %4333 = vmatprep.mubr.f32.mxu1 %v3484_v37  ;;  %v16997_v37 = vmax.f32 %v16996_v23, 0.0  ;;  %v13649_v23 = vld [vmem:[#allocation2 + $0x278] sm:$0xff] }
 0x687   :  { %4334 = vmatmul.mubr.f32.gmra.mrb[128].mxu1 %v8877_v44 }
 0x688   :  { %4338 = vmatprep.mubr.f32.mxu1 %v3485_v43  ;;  %v13624_v43 = vld [vmem:[#allocation2 + $0x240] sm:$0xff] }
 0x68b   :  { %4339 = vmatmul.mubr.f32.gmra.mrb[130].mxu1 %v8877_v44  ;;  %v16999_v44 = vmax.f32 %v16998_v21, 0.0  ;;  %v13652_v21 = vld [vmem:[#allocation2 + $0x288] sm:$0xff] }
 0x68c   :  { %4343 = vmatprep.mubr.f32.mxu1 %v16986_v4  ;;  %v13629_v4 = vld [vmem:[#allocation2 + $0x248] sm:$0xff]  ;;  %17007 = vst [vmem:[#allocation23_spill] sm:$0xff] %v13652_v21 }
 0x68f   :  { %4344 = vmatmul.mubr.f32.gmra.mrb[132].mxu1 %v13574_v59 }
 0x690   :  { %4348 = vmatprep.mubr.f32.mxu1 %v16987_v42  ;;  %v17001_v42 = vmax.f32 %v17000_v28, 0.0  ;;  %v13655_v28 = vld [vmem:[#allocation2 + $0x290] sm:$0xff] }
 0x691   :  { %17008 = vst [vmem:[#allocation24_spill] sm:$0xff] %v13655_v28 }
 0x693   :  { %4349 = vmatmul.mubr.f32.gmra.mrb[134].mxu1 %v13579_v16 }
 0x694   :  { %4353 = vmatprep.mubr.f32.mxu1 %v16988_v1  ;;  %v13634_v1 = vld [vmem:[#allocation2 + $0x258] sm:$0xff] }
 0x697   :  { %4354 = vmatmul.mubr.f32.gmra.mrb[136].mxu1 %v13584_v55 }
 0x698   :  { %4358 = vmatprep.mubr.f32.mxu1 %v16989_v32  ;;  %v17002_v32 = vld [vmem:[#allocation7_spill] sm:$0xff] }
 0x69b   :  { %4359 = vmatmul.mubr.f32.gmra.mrb[138].mxu1 %v13589_v11 }
 0x69c   :  { %4363 = vmatprep.mubr.f32.mxu1 %v16990_v40  ;;  %v17003_v40 = vmax.f32 %v17002_v32, 0.0  ;;  %v3505_v32 = vld [vmem:[#allocation2 + $0x2a9] sm:$0xff] }
 0x69f   :  { %4364 = vmatmul.mubr.f32.gmra.mrb[140].mxu1 %v13594_v18 }
 0x6a0   :  { %4368 = vmatprep.mubr.f32.mxu1 %v16991_v19  ;;  %v13639_v19 = vld [vmem:[#allocation2 + $0x260] sm:$0xff] }
 0x6a3   :  { %4369 = vmatmul.mubr.f32.gmra.mrb[142].mxu1 %v13599_v33 }
 0x6a4   :  { %4373 = vmatprep.mubr.f32.mxu1 %v16992_v47  ;;  %v17004_v47 = vld [vmem:[#allocation10_spill] sm:$0xff] }
 0x6a7   :  { %4374 = vmatmul.mubr.f32.gmra.mrb[144].mxu1 %v13604_v20 }
 0x6a8   :  { %4378 = vmatprep.mubr.f32.mxu1 %v16993_v26  ;;  %v17005_v26 = vmax.f32 %v17004_v47, 0.0  ;;  %v3506_v47 = vld [vmem:[#allocation2 + $0x2b9] sm:$0xff] }
 0x6ab   :  { %4379 = vmatmul.mubr.f32.gmra.mrb[146].mxu1 %v13609_v41 }
 0x6ac   :  { %4383 = vmatprep.mubr.f32.mxu1 %v16994_v9  ;;  %v13644_v9 = vld [vmem:[#allocation2 + $0x270] sm:$0xff] }
 0x6af   :  { %4384 = vmatmul.mubr.f32.gmra.mrb[148].mxu1 %v13614_v10 }
 0x6b0   :  { %4388 = vmatprep.mubr.f32.mxu1 %v16995_v61  ;;  %v17006_v61 = vmax.f32 %v13102_v15, 0.0  ;;  %v13658_v15 = vld [vmem:[#allocation2 + $0x2a0] sm:$0xff] }
 0x6b1   :  { %17009 = vst [vmem:[#allocation25_spill] sm:$0xff] %v13658_v15 }
 0x6b3   :  { %4389 = vmatmul.mubr.f32.gmra.mrb[150].mxu1 %v13619_v50 }
 0x6b4   :  { %4393 = vmatprep.mubr.f32.mxu1 %v16997_v37  ;;  %v3502_v37 = vld [vmem:[#allocation2 + $0x289] sm:$0xff] }
 0x6b7   :  { %4394 = vmatmul.mubr.f32.gmra.mrb[152].mxu1 %v13624_v43 }
 0x6b8   :  { %4398 = vmatprep.mubr.f32.mxu1 %v16999_v44  ;;  %v3503_v44 = vld [vmem:[#allocation2 + $0x291] sm:$0xff] }
 0x6bb   :  { %4399 = vmatmul.mubr.f32.gmra.mrb[154].mxu1 %v13629_v4 }
 0x6bc   :  { %4403 = vmatprep.mubr.f32.mxu1 %v17001_v42  ;;  %v3504_v42 = vld [vmem:[#allocation2 + $0x2a1] sm:$0xff] }
 0x6bf   :  { %4404 = vmatmul.mubr.f32.gmra.mrb[156].mxu1 %v13634_v1 }
 0x6c0   :  { %4408 = vmatprep.mubr.f32.mxu1 %v17003_v40  ;;  %v13661_v40 = vld [vmem:[#allocation2 + $0x2a8] sm:$0xff] }
 0x6c1   :  { %17010 = vst [vmem:[#allocation27_spill] sm:$0xff] %v13661_v40 }
 0x6c3   :  { %4409 = vmatmul.mubr.f32.gmra.mrb[158].mxu1 %v13639_v19 }
 0x6c4   :  { %4413 = vmatprep.mubr.f32.mxu1 %v17005_v26  ;;  %v13664_v26 = vld [vmem:[#allocation2 + $0x2b8] sm:$0xff] }
 0x6c5   :  { %17011 = vst [vmem:[#allocation11_spill] sm:$0xff] %v13664_v26 }
 0x6c7   :  { %4414 = vmatmul.mubr.f32.gmra.mrb[160].mxu1 %v13644_v9 }
 0x6c8   :  { %4418 = vmatprep.mubr.f32.mxu1 %v17006_v61  ;;  %v3507_v61 = vld [vmem:[#allocation2 + $0x2c1] sm:$0xff] }
 0x6cb   :  { %4419 = vmatmul.mubr.f32.gmra.mrb[162].mxu1 %v13649_v23 }
 0x6cc   :  { %4423 = vmatprep.mubr.f32.mxu1 %v3502_v37  ;;  %v13667_v37 = vld [vmem:[#allocation2 + $0x2c0] sm:$0xff] }
 0x6cd   :  { %17012 = vst [vmem:[#allocation15_spill] sm:$0xff] %v13667_v37 }
 0x6cf   :  { %4424 = vmatmul.mubr.f32.gmra.mrb[164].mxu1 %v13652_v21 }
 0x6d0   :  { %4428 = vmatprep.mubr.f32.mxu1 %v3503_v44  ;;  %v3508_v44 = vld [vmem:[#allocation2 + $0x2d1] sm:$0xff] }
 0x6d3   :  { %4429 = vmatmul.mubr.f32.gmra.mrb[166].mxu1 %v13655_v28 }
 0x6d4   :  { %4433 = vmatprep.mubr.f32.mxu1 %v3504_v42 }
 0x6d7   :  { %4434 = vmatmul.mubr.f32.gmra.mrb[168].mxu1 %v13658_v15  ;;  %v13674_v15 = vld [vmem:[#allocation2 + $0x2d0] sm:$0xff] }
 0x6d8   :  { %4438 = vmatprep.mubr.f32.mxu1 %v3505_v32  ;;  %17015 = vst [vmem:[#allocation4_spill] sm:$0xff] %v13674_v15 }
 0x6db   :  { %4439 = vmatmul.mubr.f32.gmra.mrb[170].mxu1 %v13661_v40 }
 0x6dc   :  { %4443 = vmatprep.mubr.f32.mxu1 %v3506_v47  ;;  %v3509_v47 = vld [vmem:[#allocation2 + $0x2d9] sm:$0xff] }
 0x6dd   :  { %v13670_v42 = vpop.f32.mrb[128].mxu0 }
 0x6de   :  { %17013 = vst [vmem:[#allocation14_spill] sm:$0xff] %v13670_v42  ;;  %v13672_v32 = vpop.f32.mrb[129].mxu0  ;;  %v13688_v42 = vld [vmem:[#allocation2 + $0x2e8] sm:$0xff] }
 0x6df   :  { %4444 = vmatmul.mubr.f32.gmra.mrb[172].mxu1 %v13664_v26  ;;  %17014 = vst [vmem:[#allocation6_spill] sm:$0xff] %v13672_v32  ;;  %17021 = vst [vmem:[#allocation10_spill] sm:$0xff] %v13688_v42  ;;  %v3511_v32 = vld [vmem:[#allocation2 + $0x2f1] sm:$0xff] }
 0x6e0   :  { %4448 = vmatprep.mubr.f32.mxu1 %v3507_v61  ;;  %v13681_v61 = vld [vmem:[#allocation2 + $0x2d8] sm:$0xff] }
 0x6e1   :  { %17018 = vst [vmem:[#allocation12_spill] sm:$0xff] %v13681_v61 }
 0x6e3   :  { %4449 = vmatmul.mubr.f32.gmra.mrb[174].mxu1 %v13667_v37  ;;  %v3510_v37 = vld [vmem:[#allocation2 + $0x2e9] sm:$0xff] }
 0x6e4   :  { %4453 = vmatprep.mubr.f32.mxu1 %v3508_v44 }
 0x6e5   :  { %v13677_v40 = vpop.f32.mrb[130].mxu0 }
 0x6e6   :  { %17016 = vst [vmem:[#allocation5_spill] sm:$0xff] %v13677_v40  ;;  %v13679_v26 = vpop.f32.mrb[131].mxu0  ;;  %v13695_v40 = vld [vmem:[#allocation2 + $0x2f0] sm:$0xff] }
 0x6e7   :  { %4454 = vmatmul.mubr.f32.gmra.mrb[176].mxu1 %v13674_v15  ;;  %17017 = vst [vmem:[#allocation9_spill] sm:$0xff] %v13679_v26  ;;  %17024 = vst [vmem:[#allocation32_spill] sm:$0xff] %v13695_v40  ;;  %v3512_v26 = vld [vmem:[#allocation2 + $0x301] sm:$0xff] }
 0x6e8   :  { %4458 = vmatprep.mubr.f32.mxu1 %v3509_v47 }
 0x6eb   :  { %4459 = vmatmul.mubr.f32.gmra.mrb[178].mxu1 %v13681_v61 }
 0x6ec   :  { %v13684_v28 = vpop.f32.mrb[132].mxu0  ;;  %4463 = vmatprep.mubr.f32.mxu1 %v3510_v37 }
 0x6ed   :  { %17019 = vst [vmem:[#allocation8_spill] sm:$0xff] %v13684_v28  ;;  %v13686_v44 = vpop.f32.mrb[133].mxu0  ;;  %v13702_v28 = vld [vmem:[#allocation2 + $0x300] sm:$0xff] }
 0x6ee   :  { %17020 = vst [vmem:[#allocation7_spill] sm:$0xff] %v13686_v44  ;;  %17027 = vst [vmem:[#allocation35_spill] sm:$0xff] %v13702_v28  ;;  %v3513_v44 = vld [vmem:[#allocation2 + $0x309] sm:$0xff] }
 0x6ef   :  { %4464 = vmatmul.mubr.f32.gmra.mrb[180].mxu1 %v13688_v42 }
 0x6f0   :  { %v13691_v15 = vpop.f32.mrb[134].mxu0  ;;  %4468 = vmatprep.mubr.f32.mxu1 %v3511_v32 }
 0x6f1   :  { %17022 = vst [vmem:[#allocation30_spill] sm:$0xff] %v13691_v15  ;;  %v13693_v47 = vpop.f32.mrb[135].mxu0  ;;  %v13709_v15 = vld [vmem:[#allocation2 + $0x308] sm:$0xff] }
 0x6f2   :  { %17023 = vst [vmem:[#allocation31_spill] sm:$0xff] %v13693_v47  ;;  %17030 = vst [vmem:[#allocation38_spill] sm:$0xff] %v13709_v15  ;;  %v3514_v47 = vld [vmem:[#allocation2 + $0x319] sm:$0xff] }
 0x6f3   :  { %4469 = vmatmul.mubr.f32.gmra.mrb[182].mxu1 %v13695_v40 }
 0x6f4   :  { %v13698_v61 = vpop.f32.mrb[136].mxu0  ;;  %4473 = vmatprep.mubr.f32.mxu1 %v3512_v26 }
 0x6f5   :  { %17025 = vst [vmem:[#allocation33_spill] sm:$0xff] %v13698_v61  ;;  %v13700_v37 = vpop.f32.mrb[137].mxu0  ;;  %v13716_v61 = vld [vmem:[#allocation2 + $0x318] sm:$0xff] }
 0x6f6   :  { %17026 = vst [vmem:[#allocation34_spill] sm:$0xff] %v13700_v37  ;;  %17033 = vst [vmem:[#allocation41_spill] sm:$0xff] %v13716_v61  ;;  %v3515_v37 = vld [vmem:[#allocation2 + $0x321] sm:$0xff] }
 0x6f7   :  { %4474 = vmatmul.mubr.f32.gmra.mrb[184].mxu1 %v13702_v28 }
 0x6f8   :  { %v13705_v42 = vpop.f32.mrb[138].mxu0  ;;  %4478 = vmatprep.mubr.f32.mxu1 %v3513_v44 }
 0x6f9   :  { %17028 = vst [vmem:[#allocation36_spill] sm:$0xff] %v13705_v42  ;;  %v13707_v32 = vpop.f32.mrb[139].mxu0  ;;  %v4029_v42 = vld [vmem:[%s16593_s2 + $0x200] sm:$0xff] }
 0x6fa   :  { %17029 = vst [vmem:[#allocation37_spill] sm:$0xff] %v13707_v32  ;;  %v17038_v32 = vld [vmem:[#allocation17_spill] sm:$0xff] }
 0x6fb   :  { %4479 = vmatmul.mubr.f32.gmra.mrb[186].mxu1 %v13709_v15  ;;  %v4032_v15 = vld [vmem:[%s16593_s2 + $0x218] sm:$0xff] }
 0x6fc   :  { %v13712_v40 = vpop.f32.mrb[140].mxu0  ;;  %4483 = vmatprep.mubr.f32.mxu1 %v3514_v47  ;;  %v4030_v47 = vld [vmem:[%s16593_s2 + $0x208] sm:$0xff] }
 0x6fd   :  { %17031 = vst [vmem:[#allocation39_spill] sm:$0xff] %v13712_v40  ;;  %v13714_v26 = vpop.f32.mrb[141].mxu0  ;;  %v13729_v40 = vld [vmem:[#allocation2 + $0x320] sm:$0xff] }
 0x6fe   :  { %17032 = vst [vmem:[#allocation40_spill] sm:$0xff] %v13714_v26  ;;  %17036 = vst [vmem:[#allocation44_spill] sm:$0xff] %v13729_v40 }
 0x6ff   :  { %4484 = vmatmul.mubr.f32.gmra.mrb[188].mxu1 %v13716_v61 }
 0x700   :  { %v13719_v28 = vpop.f32.mrb[142].mxu0  ;;  %4488 = vmatprep.mubr.f32.mxu1 %v3515_v37  ;;  %v7959_v37 = vpack.c.bf16 %v4030_v47, %v4029_v42  ;;  %v4033_v42 = vld [vmem:[%s16593_s2 + $0x220] sm:$0xff]  ;;  %v4034_v47 = vld [vmem:[%s16593_s2 + $0x228] sm:$0xff] }
 0x701   :  { %17034 = vst [vmem:[#allocation42_spill] sm:$0xff] %v13719_v28  ;;  %v13721_v44 = vpop.f32.mrb[143].mxu0  ;;  %v3516_v28 = vld [vmem:[#allocation2 + $0x2] sm:$0xff] }
 0x702   :  { %17035 = vst [vmem:[#allocation43_spill] sm:$0xff] %v13721_v44  ;;  %v4031_v44 = vld [vmem:[%s16593_s2 + $0x210] sm:$0xff] }
 0x703   :  { %4489 = vmatmul.mubr.f32.gmra.mrb[190].mxu1 %v13729_v40 }
 0x704   :  { %v13732_v26 = vpop.f32.mrb[144].mxu0  ;;  %4558 = vmatprep.mubr.f32.mxu1 %v17038_v32  ;;  %v7962_v32 = vpack.c.bf16 %v4032_v15, %v4031_v44  ;;  %v4035_v44 = vld [vmem:[%s16593_s2 + $0x230] sm:$0xff] }
 0x705   :  { %17037 = vst [vmem:[#allocation45_spill] sm:$0xff] %v13732_v26  ;;  %v13735_v61 = vpop.f32.mrb[145].mxu0  ;;  %v3517_v26 = vld [vmem:[#allocation2 + $0xa] sm:$0xff] }
 0x706   :  { %17039 = vst [vmem:[#allocation17_spill] sm:$0xff] %v13735_v61  ;;  %v3717_v61 = vld [vmem:[#allocation2 + $0x82] sm:$0xff] }
 0x707   :  { %4559 = vmatmul.mubr.f32.vlgmr.msra.gmra.mrb[64].mxu1 %v3516_v28 }
 0x708   :  { %v13743_v21 = vpop.f32.mrb[146].mxu0  ;;  %4563 = vmatprep.mubr.f32.mxu1 %v13324_v3  ;;  %7960 = vmatpush1.bf16.msra.mxu1 %v7959_v37  ;;  %v7965_v3 = vpack.c.bf16 %v4034_v47, %v4033_v42  ;;  %v4036_v37 = vld [vmem:[%s16593_s2 + $0x238] sm:$0xff]  ;;  %v4037_v42 = vld [vmem:[%s16593_s2 + $0x240] sm:$0xff]  ;;  %v4038_v47 = vld [vmem:[%s16593_s2 + $0x248] sm:$0xff] }
 0x709   :  { %17040 = vst [vmem:[#allocation46_spill] sm:$0xff] %v13743_v21  ;;  %v13746_v40 = vpop.f32.mrb[147].mxu0  ;;  %7961 = vmatprep.subr.bf16.mxu1 %v16959_v60  ;;  %v13767_v21 = vld [vmem:[#allocation2 + $0x1a] sm:$0xff] }
 0x70a   :  { %17041 = vst [vmem:[#allocation47_spill] sm:$0xff] %v13746_v40  ;;  %v3716_v40 = vld [vmem:[#allocation2 + $0x7a] sm:$0xff] }
 0x70b   :  { %4564 = vmatmul.mubr.f32.gmra.mrb[66].mxu1 %v3517_v26 }
 0x70c   :  { %v13755_v28 = vpop.f32.mrb[148].mxu0  ;;  %4568 = vmatprep.mubr.f32.mxu1 %v13354_v22  ;;  %7963 = vmatpush1.bf16.msra.mxu1 %v7962_v32  ;;  %v7968_v22 = vpack.c.bf16 %v4036_v37, %v4035_v44  ;;  %v4039_v44 = vld [vmem:[%s16593_s2 + $0x250] sm:$0xff]  ;;  %v4040_v37 = vld [vmem:[%s16593_s2 + $0x258] sm:$0xff] }
 0x70d   :  { %17042 = vst [vmem:[#allocation48_spill] sm:$0xff] %v13755_v28  ;;  %v13758_v15 = vpop.f32.mrb[149].mxu0  ;;  %7964 = vmatprep.subr.bf16.mxu1 %v16959_v60  ;;  %v13782_v28 = vld [vmem:[#allocation2 + $0x22] sm:$0xff] }
 0x70e   :  { %17043 = vst [vmem:[#allocation49_spill] sm:$0xff] %v13758_v15 }
 0x70f   :  { %4569 = vmatmul.mubr.f32.gmra.mrb[68].mxu1 %v13767_v21 }
 0x710   :  { %v13770_v26 = vpop.f32.mrb[150].mxu0  ;;  %4573 = vmatprep.mubr.f32.mxu1 %v13372_v27  ;;  %7966 = vmatpush1.bf16.msra.mxu1 %v7965_v3  ;;  %v7971_v27 = vpack.c.bf16 %v4038_v47, %v4037_v42  ;;  %v4041_v42 = vld [vmem:[%s16593_s2 + $0x260] sm:$0xff]  ;;  %v4042_v47 = vld [vmem:[%s16593_s2 + $0x268] sm:$0xff] }
 0x711   :  { %17044 = vst [vmem:[#allocation50_spill] sm:$0xff] %v13770_v26  ;;  %v13773_v32 = vpop.f32.mrb[151].mxu0  ;;  %7967 = vmatprep.subr.bf16.mxu1 %v16959_v60 }
 0x712   :  { %17045 = vst [vmem:[#allocation51_spill] sm:$0xff] %v13773_v32  ;;  %v17048_v32 = vld [vmem:[#allocation18_spill] sm:$0xff] }
 0x713   :  { %4574 = vmatmul.mubr.f32.gmra.mrb[70].mxu1 %v13782_v28 }
 0x714   :  { %v13785_v26 = vpop.f32.mrb[152].mxu0  ;;  %4578 = vmatprep.mubr.f32.mxu1 %v13390_v31  ;;  %7969 = vmatpush1.bf16.msra.mxu1 %v7968_v22  ;;  %v7974_v31 = vpack.c.bf16 %v4040_v37, %v4039_v44  ;;  %v4043_v44 = vld [vmem:[%s16593_s2 + $0x270] sm:$0xff]  ;;  %v4044_v37 = vld [vmem:[%s16593_s2 + $0x278] sm:$0xff] }
 0x715   :  { %17046 = vst [vmem:[#allocation52_spill] sm:$0xff] %v13785_v26  ;;  %v13788_v3 = vpop.f32.mrb[153].mxu0  ;;  %7970 = vmatprep.subr.bf16.mxu1 %v16959_v60  ;;  %v17051_v26 = vld [vmem:[#allocation20_spill] sm:$0xff] }
 0x716   :  { %17047 = vst [vmem:[#allocation53_spill] sm:$0xff] %v13788_v3  ;;  %v3715_v3 = vld [vmem:[#allocation2 + $0x6a] sm:$0xff] }
 0x717   :  { %4579 = vmatmul.mubr.f32.gmra.mrb[72].mxu1 %v17048_v32 }
 0x718   :  { %v13798_v15 = vpop.f32.mrb[154].mxu0  ;;  %4583 = vmatprep.mubr.f32.mxu1 %v13399_v6  ;;  %7972 = vmatpush1.bf16.msra.mxu1 %v7971_v27  ;;  %v7977_v6 = vpack.c.bf16 %v4042_v47, %v4041_v42  ;;  %v4045_v42 = vld [vmem:[%s16593_s2 + $0x280] sm:$0xff]  ;;  %v4046_v47 = vld [vmem:[%s16593_s2 + $0x288] sm:$0xff] }
 0x719   :  { %17049 = vst [vmem:[#allocation18_spill] sm:$0xff] %v13798_v15  ;;  %v13801_v22 = vpop.f32.mrb[155].mxu0  ;;  %7973 = vmatprep.subr.bf16.mxu1 %v16959_v60  ;;  %v17054_v15 = vld [vmem:[#allocation21_spill] sm:$0xff] }
 0x71a   :  { %17050 = vst [vmem:[#allocation54_spill] sm:$0xff] %v13801_v22  ;;  %v3714_v22 = vld [vmem:[#allocation2 + $0x62] sm:$0xff] }
 0x71b   :  { %4584 = vmatmul.mubr.f32.gmra.mrb[74].mxu1 %v17051_v26 }
 0x71c   :  { %v13811_v32 = vpop.f32.mrb[156].mxu0  ;;  %4588 = vmatprep.mubr.f32.mxu1 %v13405_v24  ;;  %7975 = vmatpush1.bf16.msra.mxu1 %v7974_v31  ;;  %v7980_v24 = vpack.c.bf16 %v4044_v37, %v4043_v44  ;;  %v4047_v44 = vld [vmem:[%s16593_s2 + $0x290] sm:$0xff]  ;;  %v4048_v37 = vld [vmem:[%s16593_s2 + $0x298] sm:$0xff] }
 0x71d   :  { %17052 = vst [vmem:[#allocation20_spill] sm:$0xff] %v13811_v32  ;;  %v13814_v27 = vpop.f32.mrb[157].mxu0  ;;  %7976 = vmatprep.subr.bf16.mxu1 %v16959_v60  ;;  %v3710_v32 = vld [vmem:[#allocation2 + $0x32] sm:$0xff] }
 0x71e   :  { %17053 = vst [vmem:[#allocation55_spill] sm:$0xff] %v13814_v27  ;;  %v3713_v27 = vld [vmem:[#allocation2 + $0x52] sm:$0xff] }
 0x71f   :  { %4589 = vmatmul.mubr.f32.gmra.mrb[76].mxu1 %v17054_v15 }
 0x720   :  { %4593 = vmatprep.mubr.f32.mxu1 %v13410_v12  ;;  %v13825_v26 = vpop.f32.mrb[158].mxu0  ;;  %7978 = vmatpush1.bf16.msra.mxu1 %v7977_v6  ;;  %v7983_v12 = vpack.c.bf16 %v4046_v47, %v4045_v42  ;;  %v4049_v42 = vld [vmem:[%s16593_s2 + $0x2a0] sm:$0xff]  ;;  %v4050_v47 = vld [vmem:[%s16593_s2 + $0x2a8] sm:$0xff] }
 0x721   :  { %17055 = vst [vmem:[#allocation21_spill] sm:$0xff] %v13825_v26  ;;  %v13827_v31 = vpop.f32.mrb[159].mxu0  ;;  %7979 = vmatprep.subr.bf16.mxu1 %v16959_v60  ;;  %v3644_v26 = vld [vmem:[#allocation2 + $0x19] sm:$0xff] }
 0x722   :  { %17056 = vst [vmem:[#allocation56_spill] sm:$0xff] %v13827_v31 }
 0x723   :  { %4594 = vmatmul.mubr.f32.gmra.mrb[78].mxu1 %v13340_v14 }
 0x724   :  { %v13837_v15 = vpop.f32.mrb[160].mxu0  ;;  %4598 = vmatprep.mubr.f32.mxu1 %v13421_v62  ;;  %7981 = vmatpush1.bf16.msra.mxu1 %v7980_v24  ;;  %v7986_v62 = vpack.c.bf16 %v4048_v37, %v4047_v44 }
 0x725   :  { %17057 = vst [vmem:[#allocation57_spill] sm:$0xff] %v13837_v15  ;;  %v13840_v6 = vpop.f32.mrb[161].mxu0  ;;  %7982 = vmatprep.subr.bf16.mxu1 %v16959_v60  ;;  %v14141_v15 = vld [vmem:[#allocation2 + $0x322] sm:$0xff] }
 0x726   :  { %17058 = vst [vmem:[#allocation58_spill] sm:$0xff] %v13840_v6  ;;  %v4063_v6 = vld [vmem:[%s16593_s2 + $0x310] sm:$0xff] }
 0x727   :  { %4599 = vmatmul.mubr.f32.gmra.mrb[80].mxu1 %v13345_v39 }
 0x728   :  { %v13850_v14 = vpop.f32.mrb[162].mxu0  ;;  %4603 = vmatprep.mubr.f32.mxu1 %v13433_v17  ;;  %7984 = vmatpush1.bf16.msra.mxu1 %v7983_v12  ;;  %v7989_v17 = vpack.c.bf16 %v4050_v47, %v4049_v42 }
 0x729   :  { %17059 = vst [vmem:[#allocation59_spill] sm:$0xff] %v13850_v14  ;;  %v13853_v24 = vpop.f32.mrb[163].mxu0  ;;  %7985 = vmatprep.subr.bf16.mxu1 %v16959_v60  ;;  %v14129_v14 = vld [vmem:[#allocation2 + $0x30a] sm:$0xff] }
 0x72a   :  { %17060 = vst [vmem:[#allocation60_spill] sm:$0xff] %v13853_v24  ;;  %v14132_v24 = vld [vmem:[#allocation2 + $0x31a] sm:$0xff] }
 0x72b   :  { %4604 = vmatmul.mubr.f32.gmra.mrb[82].mxu1 %v13357_v34 }
 0x72c   :  { %v13863_v39 = vpop.f32.mrb[164].mxu0  ;;  %4608 = vmatprep.mubr.f32.mxu1 %v13439_v8  ;;  %7987 = vmatpush1.bf16.msra.mxu1 %v7986_v62 }
 0x72d   :  { %17061 = vst [vmem:[#allocation61_spill] sm:$0xff] %v13863_v39  ;;  %v13866_v12 = vpop.f32.mrb[165].mxu0  ;;  %7988 = vmatprep.subr.bf16.mxu1 %v16959_v60  ;;  %v14121_v39 = vld [vmem:[#allocation2 + $0x2f2] sm:$0xff] }
 0x72e   :  { %17062 = vst [vmem:[#allocation62_spill] sm:$0xff] %v13866_v12  ;;  %v14125_v12 = vld [vmem:[#allocation2 + $0x302] sm:$0xff] }
 0x72f   :  { %4609 = vmatmul.mubr.f32.gmra.mrb[84].mxu1 %v13362_v51 }
 0x730   :  { %v13870_v44 = vpop.f32.mrb[166].mxu0  ;;  %4613 = vmatprep.mubr.f32.mxu1 %v13450_v30  ;;  %7990 = vmatpush1.bf16.msra.mxu1 %v7989_v17  ;;  %v4051_v30 = vld [vmem:[%s16593_s2 + $0x2b0] sm:$0xff] }
 0x731   :  { %17063 = vst [vmem:[#allocation63_spill] sm:$0xff] %v13870_v44  ;;  %v13873_v37 = vpop.f32.mrb[167].mxu0  ;;  %7991 = vmatprep.subr.bf16.mxu1 %v16959_v60  ;;  %v14113_v44 = vld [vmem:[#allocation2 + $0x2da] sm:$0xff] }
 0x732   :  { %17064 = vst [vmem:[#allocation64_spill] sm:$0xff] %v13873_v37  ;;  %v14117_v37 = vld [vmem:[#allocation2 + $0x2ea] sm:$0xff] }
 0x733   :  { %4614 = vmatmul.mubr.f32.gmra.mrb[86].mxu1 %v13375_v58  ;;  %v4052_v58 = vld [vmem:[%s16593_s2 + $0x2b8] sm:$0xff] }
 0x734   :  { %v13877_v34 = vpop.f32.mrb[168].mxu0  ;;  %4618 = vmatprep.mubr.f32.mxu1 %v13456_v57  ;;  %v7992_v42 = vpack.c.bf16 %v4052_v58, %v4051_v30  ;;  %v13917_v58 = vld [vmem:[#allocation2 + $0xc2] sm:$0xff] }
 0x735   :  { %17065 = vst [vmem:[#allocation65_spill] sm:$0xff] %v13877_v34  ;;  %v13880_v8 = vpop.f32.mrb[169].mxu0  ;;  %v14105_v34 = vld [vmem:[#allocation2 + $0x2c2] sm:$0xff] }
 0x736   :  { %17066 = vst [vmem:[#allocation66_spill] sm:$0xff] %v13880_v8  ;;  %7993 = vmatpush1.bf16.msra.mxu1 %v7992_v42  ;;  %v14109_v8 = vld [vmem:[#allocation2 + $0x2d2] sm:$0xff] }
 0x737   :  { %4619 = vmatmul.mubr.f32.gmra.mrb[88].mxu1 %v13380_v35  ;;  %7994 = vmatprep.subr.bf16.mxu1 %v16959_v60 }
 0x738   :  { %v13883_v51 = vpop.f32.mrb[170].mxu0  ;;  %4623 = vmatprep.mubr.f32.mxu1 %v13461_v63  ;;  %v13901_v63 = vld [vmem:[#allocation2 + $0xaa] sm:$0xff] }
 0x739   :  { %17067 = vst [vmem:[#allocation67_spill] sm:$0xff] %v13883_v51  ;;  %v13892_v62 = vpop.f32.mrb[171].mxu0  ;;  %v14097_v51 = vld [vmem:[#allocation2 + $0x2aa] sm:$0xff] }
 0x73a   :  { %17068 = vst [vmem:[#allocation68_spill] sm:$0xff] %v13892_v62  ;;  %v14101_v62 = vld [vmem:[#allocation2 + $0x2ba] sm:$0xff] }
 0x73b   :  { %4624 = vmatmul.mubr.f32.gmra.mrb[90].mxu1 %v13393_v13  ;;  %v13909_v13 = vld [vmem:[#allocation2 + $0xb2] sm:$0xff] }
 0x73c   :  { %v13895_v57 = vpop.f32.mrb[172].mxu0  ;;  %4628 = vmatprep.mubr.f32.mxu1 %v13466_v52 }
 0x73d   :  { %17069 = vst [vmem:[#allocation69_spill] sm:$0xff] %v13895_v57  ;;  %v13898_v35 = vpop.f32.mrb[173].mxu0 }
 0x73e   :  { %17070 = vst [vmem:[#allocation70_spill] sm:$0xff] %v13898_v35  ;;  %v14093_v35 = vld [vmem:[#allocation2 + $0x2a2] sm:$0xff] }
 0x73f   :  { %4629 = vmatmul.mubr.f32.gmra.mrb[92].mxu1 %v13901_v63 }
 0x740   :  { %v13904_v47 = vpop.f32.mrb[174].mxu0  ;;  %4633 = vmatprep.mubr.f32.mxu1 %v13477_v36  ;;  %v4053_v36 = vld [vmem:[%s16593_s2 + $0x2c0] sm:$0xff] }
 0x741   :  { %17071 = vst [vmem:[#allocation71_spill] sm:$0xff] %v13904_v47  ;;  %v13907_v17 = vpop.f32.mrb[175].mxu0 }
 0x742   :  { %17072 = vst [vmem:[#allocation72_spill] sm:$0xff] %v13907_v17 }
 0x743   :  { %4634 = vmatmul.mubr.f32.gmra.mrb[94].mxu1 %v13909_v13 }
 0x744   :  { %v13912_v52 = vpop.f32.mrb[176].mxu0  ;;  %4638 = vmatprep.mubr.f32.mxu1 %v13483_v53 }
 0x745   :  { %17073 = vst [vmem:[#allocation73_spill] sm:$0xff] %v13912_v52  ;;  %v13915_v30 = vpop.f32.mrb[177].mxu0  ;;  %v4054_v52 = vld [vmem:[%s16593_s2 + $0x2c8] sm:$0xff] }
 0x746   :  { %17074 = vst [vmem:[#allocation74_spill] sm:$0xff] %v13915_v30  ;;  %v7995_v53 = vpack.c.bf16 %v4054_v52, %v4053_v36  ;;  %v13931_v30 = vld [vmem:[#allocation2 + $0xca] sm:$0xff]  ;;  %v13948_v36 = vld [vmem:[#allocation2 + $0xe2] sm:$0xff] }
 0x747   :  { %4639 = vmatmul.mubr.f32.gmra.mrb[96].mxu1 %v13917_v58 }
 0x748   :  { %v13920_v42 = vpop.f32.mrb[178].mxu0  ;;  %4643 = vmatprep.mubr.f32.mxu1 %v13488_v56  ;;  %7996 = vmatpush1.bf16.msra.mxu1 %v7995_v53  ;;  %v4055_v53 = vld [vmem:[%s16593_s2 + $0x2d0] sm:$0xff] }
 0x749   :  { %17075 = vst [vmem:[#allocation75_spill] sm:$0xff] %v13920_v42  ;;  %v13929_v47 = vpop.f32.mrb[179].mxu0  ;;  %7997 = vmatprep.subr.bf16.mxu1 %v16959_v60  ;;  %v13940_v42 = vld [vmem:[#allocation2 + $0xda] sm:$0xff] }
 0x74a   :  { %17076 = vst [vmem:[#allocation76_spill] sm:$0xff] %v13929_v47  ;;  %v14089_v47 = vld [vmem:[#allocation2 + $0x292] sm:$0xff] }
 0x74b   :  { %4644 = vmatmul.mubr.f32.gmra.mrb[98].mxu1 %v13931_v30 }
 0x74c   :  { %v13934_v17 = vpop.f32.mrb[180].mxu0  ;;  %4648 = vmatprep.mubr.f32.mxu1 %v13493_v45  ;;  %v13952_v45 = vld [vmem:[#allocation2 + $0xf2] sm:$0xff] }
 0x74d   :  { %17077 = vst [vmem:[#allocation77_spill] sm:$0xff] %v13934_v17  ;;  %v13937_v56 = vpop.f32.mrb[181].mxu0  ;;  %v14012_v17 = vld [vmem:[#allocation2 + $0x16a] sm:$0xff] }
 0x74e   :  { %17078 = vst [vmem:[#allocation78_spill] sm:$0xff] %v13937_v56  ;;  %v14015_v56 = vld [vmem:[#allocation2 + $0x172] sm:$0xff] }
 0x74f   :  { %4649 = vmatmul.mubr.f32.gmra.mrb[100].mxu1 %v13940_v42 }
 0x750   :  { %v13943_v57 = vpop.f32.mrb[182].mxu0  ;;  %4653 = vmatprep.mubr.f32.mxu1 %v13504_v25  ;;  %v4056_v25 = vld [vmem:[%s16593_s2 + $0x2d8] sm:$0xff] }
 0x751   :  { %17079 = vst [vmem:[#allocation79_spill] sm:$0xff] %v13943_v57  ;;  %v13946_v52 = vpop.f32.mrb[183].mxu0  ;;  %v7998_v57 = vpack.c.bf16 %v4056_v25, %v4055_v53  ;;  %v13975_v53 = vld [vmem:[#allocation2 + $0x122] sm:$0xff]  ;;  %v13985_v25 = vld [vmem:[#allocation2 + $0x12a] sm:$0xff] }
 0x752   :  { %17080 = vst [vmem:[#allocation80_spill] sm:$0xff] %v13946_v52  ;;  %v13962_v52 = vld [vmem:[#allocation2 + $0xfa] sm:$0xff] }
 0x753   :  { %4654 = vmatmul.mubr.f32.gmra.mrb[102].mxu1 %v13948_v36 }
 0x754   :  { %4658 = vmatprep.mubr.f32.mxu1 %v13510_v0  ;;  %7999 = vmatpush1.bf16.msra.mxu1 %v7998_v57  ;;  %v13967_v0 = vld [vmem:[#allocation2 + $0x10a] sm:$0xff] }
 0x755   :  { %8000 = vmatprep.subr.bf16.mxu1 %v16959_v60 }
 0x757   :  { %4659 = vmatmul.mubr.f32.gmra.mrb[104].mxu1 %v13952_v45 }
 0x758   :  { %4663 = vmatprep.mubr.f32.mxu1 %v13515_v2  ;;  %v13971_v2 = vld [vmem:[#allocation2 + $0x112] sm:$0xff] }
 0x75b   :  { %4664 = vmatmul.mubr.f32.gmra.mrb[106].mxu1 %v13962_v52 }
 0x75c   :  { %4668 = vmatprep.mubr.f32.mxu1 %v13520_v29  ;;  %v4057_v29 = vld [vmem:[%s16593_s2 + $0x2e0] sm:$0xff] }
 0x75f   :  { %4669 = vmatmul.mubr.f32.gmra.mrb[108].mxu1 %v13967_v0 }
 0x760   :  { %4673 = vmatprep.mubr.f32.mxu1 %v13531_v46  ;;  %v4058_v46 = vld [vmem:[%s16593_s2 + $0x2e8] sm:$0xff] }
 0x761   :  { %v8001_v57 = vpack.c.bf16 %v4058_v46, %v4057_v29  ;;  %v13998_v29 = vld [vmem:[#allocation2 + $0x152] sm:$0xff] }
 0x763   :  { %4674 = vmatmul.mubr.f32.gmra.mrb[110].mxu1 %v13971_v2 }
 0x764   :  { %4678 = vmatprep.mubr.f32.mxu1 %v13537_v5  ;;  %8002 = vmatpush1.bf16.msra.mxu1 %v8001_v57  ;;  %v13990_v5 = vld [vmem:[#allocation2 + $0x13a] sm:$0xff] }
 0x765   :  { %8003 = vmatprep.subr.bf16.mxu1 %v16959_v60  ;;  %v14008_v57 = vld [vmem:[#allocation2 + $0x15a] sm:$0xff] }
 0x767   :  { %4679 = vmatmul.mubr.f32.gmra.mrb[112].mxu1 %v13975_v53 }
 0x768   :  { %4683 = vmatprep.mubr.f32.mxu1 %v13542_v7  ;;  %v13994_v7 = vld [vmem:[#allocation2 + $0x142] sm:$0xff] }
 0x76b   :  { %4684 = vmatmul.mubr.f32.gmra.mrb[114].mxu1 %v13985_v25 }
 0x76c   :  { %4688 = vmatprep.mubr.f32.mxu1 %v13547_v48  ;;  %v4059_v48 = vld [vmem:[%s16593_s2 + $0x2f0] sm:$0xff] }
 0x76f   :  { %4689 = vmatmul.mubr.f32.gmra.mrb[116].mxu1 %v13990_v5 }
 0x770   :  { %4693 = vmatprep.mubr.f32.mxu1 %v13558_v38  ;;  %v4060_v38 = vld [vmem:[%s16593_s2 + $0x2f8] sm:$0xff] }
 0x771   :  { %v8004_v46 = vpack.c.bf16 %v4060_v38, %v4059_v48  ;;  %v3548_v48 = vld [vmem:[#allocation2 + $0x1b2] sm:$0xff]  ;;  %v3549_v38 = vld [vmem:[#allocation2 + $0x1ba] sm:$0xff] }
 0x773   :  { %4694 = vmatmul.mubr.f32.gmra.mrb[118].mxu1 %v13994_v7 }
 0x774   :  { %4698 = vmatprep.mubr.f32.mxu1 %v13564_v54  ;;  %v3610_v54 = vld [vmem:[#allocation2 + $0x180] sm:$0xff]  ;;  %8005 = vmatpush1.bf16.msra.mxu1 %v8004_v46  ;;  %v14021_v46 = vld [vmem:[#allocation2 + $0x1ca] sm:$0xff] }
 0x775   :  { %8006 = vmatprep.subr.bf16.mxu1 %v16959_v60 }
 0x777   :  { %4699 = vmatmul.mubr.f32.gmra.mrb[120].mxu1 %v13998_v29 }
 0x778   :  { %4703 = vmatprep.mubr.f32.mxu1 %v13569_v49  ;;  %v3611_v49 = vld [vmem:[#allocation2 + $0x188] sm:$0xff] }
 0x77b   :  { %4704 = vmatmul.mubr.f32.gmra.mrb[122].mxu1 %v14008_v57 }
 0x77c   :  { %4708 = vmatprep.mubr.f32.mxu1 %v3610_v54  ;;  %v14025_v54 = vld [vmem:[#allocation2 + $0x1d2] sm:$0xff] }
 0x77f   :  { %4709 = vmatmul.mubr.f32.gmra.mrb[124].mxu1 %v14012_v17 }
 0x780   :  { %4713 = vmatprep.mubr.f32.mxu1 %v3611_v49  ;;  %v14077_v49 = vld [vmem:[#allocation2 + $0x272] sm:$0xff] }
 0x783   :  { %4714 = vmatmul.mubr.f32.gmra.mrb[126].mxu1 %v14015_v56 }
 0x784   :  { %4718 = vmatprep.mubr.f32.mxu1 %v13574_v59  ;;  %v14029_v59 = vld [vmem:[#allocation2 + $0x1e2] sm:$0xff] }
 0x787   :  { %4719 = vmatmul.mubr.f32.gmra.mrb[128].mxu1 %v3548_v48  ;;  %v14081_v48 = vld [vmem:[#allocation2 + $0x27a] sm:$0xff] }
 0x788   :  { %4723 = vmatprep.mubr.f32.mxu1 %v13579_v16  ;;  %v14033_v16 = vld [vmem:[#allocation2 + $0x1ea] sm:$0xff] }
 0x78b   :  { %4724 = vmatmul.mubr.f32.gmra.mrb[130].mxu1 %v3549_v38  ;;  %v14085_v38 = vld [vmem:[#allocation2 + $0x28a] sm:$0xff] }
 0x78c   :  { %4728 = vmatprep.mubr.f32.mxu1 %v13584_v55  ;;  %v14037_v55 = vld [vmem:[#allocation2 + $0x1fa] sm:$0xff] }
 0x78f   :  { %4729 = vmatmul.mubr.f32.gmra.mrb[132].mxu1 %v14021_v46 }
 0x790   :  { %4733 = vmatprep.mubr.f32.mxu1 %v13589_v11  ;;  %v14041_v11 = vld [vmem:[#allocation2 + $0x202] sm:$0xff] }
 0x793   :  { %4734 = vmatmul.mubr.f32.gmra.mrb[134].mxu1 %v14025_v54 }
 0x794   :  { %4738 = vmatprep.mubr.f32.mxu1 %v13594_v18  ;;  %v14045_v18 = vld [vmem:[#allocation2 + $0x212] sm:$0xff] }
 0x797   :  { %4739 = vmatmul.mubr.f32.gmra.mrb[136].mxu1 %v14029_v59 }
 0x798   :  { %4743 = vmatprep.mubr.f32.mxu1 %v13599_v33  ;;  %v14049_v33 = vld [vmem:[#allocation2 + $0x21a] sm:$0xff] }
 0x79b   :  { %4744 = vmatmul.mubr.f32.gmra.mrb[138].mxu1 %v14033_v16 }
 0x79c   :  { %4748 = vmatprep.mubr.f32.mxu1 %v13604_v20  ;;  %v14053_v20 = vld [vmem:[#allocation2 + $0x22a] sm:$0xff] }
 0x79f   :  { %4749 = vmatmul.mubr.f32.gmra.mrb[140].mxu1 %v14037_v55 }
 0x7a0   :  { %4753 = vmatprep.mubr.f32.mxu1 %v13609_v41  ;;  %v14057_v41 = vld [vmem:[#allocation2 + $0x232] sm:$0xff] }
 0x7a3   :  { %4754 = vmatmul.mubr.f32.gmra.mrb[142].mxu1 %v14041_v11 }
 0x7a4   :  { %4758 = vmatprep.mubr.f32.mxu1 %v13614_v10  ;;  %v14061_v10 = vld [vmem:[#allocation2 + $0x242] sm:$0xff] }
 0x7a7   :  { %4759 = vmatmul.mubr.f32.gmra.mrb[144].mxu1 %v14045_v18 }
 0x7a8   :  { %4763 = vmatprep.mubr.f32.mxu1 %v13619_v50  ;;  %v14065_v50 = vld [vmem:[#allocation2 + $0x24a] sm:$0xff] }
 0x7ab   :  { %4764 = vmatmul.mubr.f32.gmra.mrb[146].mxu1 %v14049_v33 }
 0x7ac   :  { %4768 = vmatprep.mubr.f32.mxu1 %v13624_v43  ;;  %v14069_v43 = vld [vmem:[#allocation2 + $0x25a] sm:$0xff] }
 0x7af   :  { %4769 = vmatmul.mubr.f32.gmra.mrb[148].mxu1 %v14053_v20 }
 0x7b0   :  { %4773 = vmatprep.mubr.f32.mxu1 %v13629_v4  ;;  %v14073_v4 = vld [vmem:[#allocation2 + $0x262] sm:$0xff] }
 0x7b3   :  { %4774 = vmatmul.mubr.f32.gmra.mrb[150].mxu1 %v14057_v41 }
 0x7b4   :  { %4778 = vmatprep.mubr.f32.mxu1 %v13634_v1  ;;  %v17081_v1 = vld [vmem:[#allocation23_spill] sm:$0xff] }
 0x7b7   :  { %4779 = vmatmul.mubr.f32.gmra.mrb[152].mxu1 %v14061_v10 }
 0x7b8   :  { %4783 = vmatprep.mubr.f32.mxu1 %v13639_v19  ;;  %v17082_v19 = vld [vmem:[#allocation24_spill] sm:$0xff] }
 0x7bb   :  { %4784 = vmatmul.mubr.f32.gmra.mrb[154].mxu1 %v14065_v50 }
 0x7bc   :  { %4788 = vmatprep.mubr.f32.mxu1 %v13644_v9  ;;  %v17083_v9 = vld [vmem:[#allocation25_spill] sm:$0xff] }
 0x7bf   :  { %4789 = vmatmul.mubr.f32.gmra.mrb[156].mxu1 %v14069_v43 }
 0x7c0   :  { %4793 = vmatprep.mubr.f32.mxu1 %v13649_v23  ;;  %v17084_v23 = vld [vmem:[#allocation27_spill] sm:$0xff] }
 0x7c3   :  { %4794 = vmatmul.mubr.f32.gmra.mrb[158].mxu1 %v14073_v4 }
 0x7c4   :  { %4798 = vmatprep.mubr.f32.mxu1 %v17081_v1  ;;  %v17085_v1 = vld [vmem:[#allocation11_spill] sm:$0xff] }
 0x7c7   :  { %4799 = vmatmul.mubr.f32.gmra.mrb[160].mxu1 %v14077_v49 }
 0x7c8   :  { %4803 = vmatprep.mubr.f32.mxu1 %v17082_v19  ;;  %v17086_v19 = vld [vmem:[#allocation15_spill] sm:$0xff] }
 0x7cb   :  { %4804 = vmatmul.mubr.f32.gmra.mrb[162].mxu1 %v14081_v48 }
 0x7cc   :  { %4808 = vmatprep.mubr.f32.mxu1 %v17083_v9  ;;  %v17087_v9 = vld [vmem:[#allocation4_spill] sm:$0xff] }
 0x7cf   :  { %4809 = vmatmul.mubr.f32.gmra.mrb[164].mxu1 %v14085_v38 }
 0x7d0   :  { %4813 = vmatprep.mubr.f32.mxu1 %v17084_v23  ;;  %v17088_v23 = vld [vmem:[#allocation12_spill] sm:$0xff] }
 0x7d3   :  { %4814 = vmatmul.mubr.f32.gmra.mrb[166].mxu1 %v14089_v47 }
 0x7d4   :  { %4818 = vmatprep.mubr.f32.mxu1 %v17085_v1  ;;  %v17089_v1 = vld [vmem:[#allocation10_spill] sm:$0xff] }
 0x7d7   :  { %4819 = vmatmul.mubr.f32.gmra.mrb[168].mxu1 %v14093_v35 }
 0x7d8   :  { %4823 = vmatprep.mubr.f32.mxu1 %v17086_v19  ;;  %v17090_v19 = vld [vmem:[#allocation32_spill] sm:$0xff] }
 0x7db   :  { %4824 = vmatmul.mubr.f32.gmra.mrb[170].mxu1 %v14097_v51 }
 0x7dc   :  { %4828 = vmatprep.mubr.f32.mxu1 %v17087_v9  ;;  %v17091_v9 = vld [vmem:[#allocation35_spill] sm:$0xff] }
 0x7df   :  { %4829 = vmatmul.mubr.f32.gmra.mrb[172].mxu1 %v14101_v62 }
 0x7e0   :  { %4833 = vmatprep.mubr.f32.mxu1 %v17088_v23  ;;  %v17092_v23 = vld [vmem:[#allocation38_spill] sm:$0xff] }
 0x7e3   :  { %4834 = vmatmul.mubr.f32.gmra.mrb[174].mxu1 %v14105_v34 }
 0x7e4   :  { %4838 = vmatprep.mubr.f32.mxu1 %v17089_v1  ;;  %v17093_v1 = vld [vmem:[#allocation41_spill] sm:$0xff] }
 0x7e7   :  { %4839 = vmatmul.mubr.f32.gmra.mrb[176].mxu1 %v14109_v8 }
 0x7e8   :  { %4843 = vmatprep.mubr.f32.mxu1 %v17090_v19  ;;  %v17094_v19 = vld [vmem:[#allocation44_spill] sm:$0xff] }
 0x7eb   :  { %4844 = vmatmul.mubr.f32.gmra.mrb[178].mxu1 %v14113_v44 }
 0x7ec   :  { %4848 = vmatprep.mubr.f32.mxu1 %v17091_v9  ;;  %v3642_v9 = vld [vmem:[#allocation2 + $0x330] sm:$0xff] }
 0x7ef   :  { %4849 = vmatmul.mubr.f32.gmra.mrb[180].mxu1 %v14117_v37 }
 0x7f0   :  { %4853 = vmatprep.mubr.f32.mxu1 %v17092_v23  ;;  %v3643_v23 = vld [vmem:[#allocation2 + $0x338] sm:$0xff] }
 0x7f3   :  { %4854 = vmatmul.mubr.f32.gmra.mrb[182].mxu1 %v14121_v39 }
 0x7f4   :  { %4858 = vmatprep.mubr.f32.mxu1 %v17093_v1  ;;  %v4061_v1 = vld [vmem:[%s16593_s2 + $0x300] sm:$0xff] }
 0x7f7   :  { %4859 = vmatmul.mubr.f32.gmra.mrb[184].mxu1 %v14125_v12 }
 0x7f8   :  { %4863 = vmatprep.mubr.f32.mxu1 %v17094_v19  ;;  %v4062_v19 = vld [vmem:[%s16593_s2 + $0x308] sm:$0xff] }
 0x7fb   :  { %4864 = vmatmul.mubr.f32.gmra.mrb[186].mxu1 %v14129_v14 }
 0x7fc   :  { %4868 = vmatprep.mubr.f32.mxu1 %v3642_v9  ;;  %v8007_v9 = vpack.c.bf16 %v4062_v19, %v4061_v1  ;;  %v4066_v1 = vld [vmem:[%s16593_s2 + $0x328] sm:$0xff] }
 0x7fd   :  { %v3645_v19 = vld [vmem:[#allocation2 + $0x21] sm:$0xff] }
 0x7ff   :  { %4869 = vmatmul.mubr.f32.gmra.mrb[188].mxu1 %v14132_v24 }
 0x800   :  { %4873 = vmatprep.mubr.f32.mxu1 %v3643_v23  ;;  %v4064_v23 = vld [vmem:[%s16593_s2 + $0x318] sm:$0xff] }
 0x801   :  { %v8010_v31 = vpack.c.bf16 %v4064_v23, %v4063_v6  ;;  %v4068_v6 = vld [vmem:[%s16593_s2 + $0x338] sm:$0xff] }
 0x802   :  { %v3711_v23 = vld [vmem:[#allocation2 + $0x3a] sm:$0xff] }
 0x803   :  { %4874 = vmatmul.mubr.f32.gmra.mrb[190].mxu1 %v14141_v15 }
 0x804   :  { %4943 = vmatprep.mubr.f32.mxu1 %v13767_v21  ;;  %v4065_v21 = vld [vmem:[%s16593_s2 + $0x320] sm:$0xff] }
 0x807   :  { %4944 = vmatmul.mubr.f32.vlgmr.msra.gmra.mrb[64].mxu1 %v3644_v26  ;;  %v8013_v26 = vpack.c.bf16 %v4066_v1, %v4065_v21  ;;  %v4070_v21 = vld [vmem:[%s16593_s2 + $0x348] sm:$0xff]  ;;  %v14176_v1 = vld [vmem:[#allocation2 + $0x39] sm:$0xff] }
 0x808   :  { %4948 = vmatprep.mubr.f32.mxu1 %v13782_v28  ;;  %8008 = vmatpush1.bf16.msra.mxu1 %v8007_v9  ;;  %v4067_v28 = vld [vmem:[%s16593_s2 + $0x330] sm:$0xff] }
 0x809   :  { %8009 = vmatprep.subr.bf16.mxu1 %v16959_v60  ;;  %v14166_v9 = vld [vmem:[#allocation2 + $0x31] sm:$0xff] }
 0x80b   :  { %4949 = vmatmul.mubr.f32.gmra.mrb[66].mxu1 %v3645_v19  ;;  %v3712_v19 = vld [vmem:[#allocation2 + $0x4a] sm:$0xff] }
 0x80c   :  { %4953 = vmatprep.mubr.f32.mxu1 %v3710_v32  ;;  %8011 = vmatpush1.bf16.msra.mxu1 %v8010_v31  ;;  %v8016_v32 = vpack.c.bf16 %v4068_v6, %v4067_v28  ;;  %v4069_v31 = vld [vmem:[%s16593_s2 + $0x340] sm:$0xff]  ;;  %v4072_v28 = vld [vmem:[%s16593_s2 + $0x358] sm:$0xff]  ;;  %v14186_v6 = vld [vmem:[#allocation2 + $0x49] sm:$0xff] }
 0x80d   :  { %8012 = vmatprep.subr.bf16.mxu1 %v16959_v60 }
 0x80f   :  { %4954 = vmatmul.mubr.f32.gmra.mrb[68].mxu1 %v14166_v9 }
 0x810   :  { %4958 = vmatprep.mubr.f32.mxu1 %v3711_v23  ;;  %8014 = vmatpush1.bf16.msra.mxu1 %v8013_v26  ;;  %v8019_v23 = vpack.c.bf16 %v4070_v21, %v4069_v31  ;;  %v4071_v26 = vld [vmem:[%s16593_s2 + $0x350] sm:$0xff]  ;;  %v4074_v31 = vld [vmem:[%s16593_s2 + $0x368] sm:$0xff] }
 0x811   :  { %8015 = vmatprep.subr.bf16.mxu1 %v16959_v60  ;;  %v14196_v21 = vld [vmem:[#allocation2 + $0x51] sm:$0xff] }
 0x813   :  { %4959 = vmatmul.mubr.f32.gmra.mrb[70].mxu1 %v14176_v1 }
 0x814   :  { %4963 = vmatprep.mubr.f32.mxu1 %v3712_v19  ;;  %8017 = vmatpush1.bf16.msra.mxu1 %v8016_v32  ;;  %v8022_v19 = vpack.c.bf16 %v4072_v28, %v4071_v26  ;;  %v4073_v32 = vld [vmem:[%s16593_s2 + $0x360] sm:$0xff]  ;;  %v4076_v26 = vld [vmem:[%s16593_s2 + $0x378] sm:$0xff] }
 0x815   :  { %8018 = vmatprep.subr.bf16.mxu1 %v16959_v60  ;;  %v14206_v28 = vld [vmem:[#allocation2 + $0x61] sm:$0xff] }
 0x817   :  { %4964 = vmatmul.mubr.f32.gmra.mrb[72].mxu1 %v14186_v6 }
 0x818   :  { %4968 = vmatprep.mubr.f32.mxu1 %v3713_v27  ;;  %8020 = vmatpush1.bf16.msra.mxu1 %v8019_v23  ;;  %v8025_v27 = vpack.c.bf16 %v4074_v31, %v4073_v32  ;;  %v4075_v23 = vld [vmem:[%s16593_s2 + $0x370] sm:$0xff]  ;;  %v4078_v32 = vld [vmem:[%s16593_s2 + $0x388] sm:$0xff] }
 0x819   :  { %8021 = vmatprep.subr.bf16.mxu1 %v16959_v60  ;;  %v14216_v31 = vld [vmem:[#allocation2 + $0x69] sm:$0xff] }
 0x81a   :  { %17095 = vst [vmem:[#allocation23_spill] sm:$0xff] %v14216_v31 }
 0x81b   :  { %4969 = vmatmul.mubr.f32.gmra.mrb[74].mxu1 %v14196_v21 }
 0x81c   :  { %4973 = vmatprep.mubr.f32.mxu1 %v3714_v22  ;;  %8023 = vmatpush1.bf16.msra.mxu1 %v8022_v19  ;;  %v8028_v22 = vpack.c.bf16 %v4076_v26, %v4075_v23  ;;  %v4077_v19 = vld [vmem:[%s16593_s2 + $0x380] sm:$0xff]  ;;  %v4080_v23 = vld [vmem:[%s16593_s2 + $0x398] sm:$0xff] }
 0x81d   :  { %8024 = vmatprep.subr.bf16.mxu1 %v16959_v60  ;;  %v14226_v26 = vld [vmem:[#allocation2 + $0x79] sm:$0xff] }
 0x81f   :  { %4974 = vmatmul.mubr.f32.gmra.mrb[76].mxu1 %v14206_v28 }
 0x820   :  { %4978 = vmatprep.mubr.f32.mxu1 %v3715_v3  ;;  %8026 = vmatpush1.bf16.msra.mxu1 %v8025_v27  ;;  %v8031_v3 = vpack.c.bf16 %v4078_v32, %v4077_v19  ;;  %v4079_v27 = vld [vmem:[%s16593_s2 + $0x390] sm:$0xff]  ;;  %v4082_v19 = vld [vmem:[%s16593_s2 + $0x3a8] sm:$0xff] }
 0x821   :  { %8027 = vmatprep.subr.bf16.mxu1 %v16959_v60  ;;  %v14236_v32 = vld [vmem:[#allocation2 + $0x81] sm:$0xff] }
 0x823   :  { %4979 = vmatmul.mubr.f32.gmra.mrb[78].mxu1 %v14216_v31  ;;  %v3718_v31 = vld [vmem:[#allocation2 + $0x92] sm:$0xff] }
 0x824   :  { %4983 = vmatprep.mubr.f32.mxu1 %v3716_v40  ;;  %8029 = vmatpush1.bf16.msra.mxu1 %v8028_v22  ;;  %v8034_v40 = vpack.c.bf16 %v4080_v23, %v4079_v27  ;;  %v4081_v22 = vld [vmem:[%s16593_s2 + $0x3a0] sm:$0xff] }
 0x825   :  { %8030 = vmatprep.subr.bf16.mxu1 %v16959_v60  ;;  %v3719_v27 = vld [vmem:[#allocation2 + $0x9a] sm:$0xff] }
 0x826   :  { %v14244_v23 = vld [vmem:[#allocation2 + $0x99] sm:$0xff] }
 0x827   :  { %4984 = vmatmul.mubr.f32.gmra.mrb[80].mxu1 %v14226_v26 }
 0x828   :  { %4988 = vmatprep.mubr.f32.mxu1 %v3717_v61  ;;  %8032 = vmatpush1.bf16.msra.mxu1 %v8031_v3  ;;  %v8037_v61 = vpack.c.bf16 %v4082_v19, %v4081_v22  ;;  %v14240_v3 = vld [vmem:[#allocation2 + $0x91] sm:$0xff] }
 0x829   :  { %8033 = vmatprep.subr.bf16.mxu1 %v16959_v60  ;;  %v4084_v22 = vld [vmem:[%s16593_s2 + $0x3b8] sm:$0xff] }
 0x82b   :  { %4989 = vmatmul.mubr.f32.gmra.mrb[82].mxu1 %v14236_v32 }
 0x82c   :  { %4993 = vmatprep.mubr.f32.mxu1 %v3718_v31  ;;  %8035 = vmatpush1.bf16.msra.mxu1 %v8034_v40  ;;  %v14248_v31 = vld [vmem:[#allocation2 + $0xa9] sm:$0xff] }
 0x82d   :  { %8036 = vmatprep.subr.bf16.mxu1 %v16959_v60  ;;  %v4083_v40 = vld [vmem:[%s16593_s2 + $0x3b0] sm:$0xff] }
 0x82e   :  { %v8040_v19 = vpack.c.bf16 %v4084_v22, %v4083_v40  ;;  %v14281_v22 = vld [vmem:[#allocation2 + $0xe1] sm:$0xff] }
 0x82f   :  { %4994 = vmatmul.mubr.f32.gmra.mrb[84].mxu1 %v14240_v3 }
 0x830   :  { %4998 = vmatprep.mubr.f32.mxu1 %v3719_v27  ;;  %8038 = vmatpush1.bf16.msra.mxu1 %v8037_v61  ;;  %v14258_v61 = vld [vmem:[#allocation2 + $0xb1] sm:$0xff]  ;;  %v14271_v27 = vld [vmem:[#allocation2 + $0xd9] sm:$0xff] }
 0x831   :  { %8039 = vmatprep.subr.bf16.mxu1 %v16959_v60 }
 0x833   :  { %4999 = vmatmul.mubr.f32.gmra.mrb[86].mxu1 %v14244_v23 }
 0x834   :  { %5003 = vmatprep.mubr.f32.mxu1 %v13901_v63  ;;  %8041 = vmatpush1.bf16.msra.mxu1 %v8040_v19  ;;  %v14263_v63 = vld [vmem:[#allocation2 + $0xc1] sm:$0xff]  ;;  %v14294_v19 = vld [vmem:[#allocation2 + $0x109] sm:$0xff] }
 0x835   :  { %8042 = vmatprep.subr.bf16.mxu1 %v16959_v60 }
 0x837   :  { %5004 = vmatmul.mubr.f32.gmra.mrb[88].mxu1 %v14248_v31 }
 0x838   :  { %5008 = vmatprep.mubr.f32.mxu1 %v13909_v13  ;;  %v14267_v13 = vld [vmem:[#allocation2 + $0xc9] sm:$0xff] }
 0x83b   :  { %5009 = vmatmul.mubr.f32.gmra.mrb[90].mxu1 %v14258_v61 }
 0x83c   :  { %5013 = vmatprep.mubr.f32.mxu1 %v13917_v58  ;;  %v4085_v58 = vld [vmem:[%s16593_s2 + $0x3c0] sm:$0xff] }
 0x83f   :  { %5014 = vmatmul.mubr.f32.gmra.mrb[92].mxu1 %v14263_v63 }
 0x840   :  { %5018 = vmatprep.mubr.f32.mxu1 %v13931_v30  ;;  %v4086_v30 = vld [vmem:[%s16593_s2 + $0x3c8] sm:$0xff] }
 0x841   :  { %v8043_v40 = vpack.c.bf16 %v4086_v30, %v4085_v58  ;;  %v14304_v30 = vld [vmem:[#allocation2 + $0x111] sm:$0xff] }
 0x843   :  { %5019 = vmatmul.mubr.f32.gmra.mrb[94].mxu1 %v14267_v13 }
 0x844   :  { %5023 = vmatprep.mubr.f32.mxu1 %v13940_v42  ;;  %8044 = vmatpush1.bf16.msra.mxu1 %v8043_v40  ;;  %v14286_v42 = vld [vmem:[#allocation2 + $0xf1] sm:$0xff]  ;;  %v14317_v40 = vld [vmem:[#allocation2 + $0x139] sm:$0xff] }
 0x845   :  { %8045 = vmatprep.subr.bf16.mxu1 %v16959_v60 }
 0x847   :  { %5024 = vmatmul.mubr.f32.gmra.mrb[96].mxu1 %v14271_v27 }
 0x848   :  { %5028 = vmatprep.mubr.f32.mxu1 %v13948_v36  ;;  %v14290_v36 = vld [vmem:[#allocation2 + $0xf9] sm:$0xff] }
 0x84b   :  { %5029 = vmatmul.mubr.f32.gmra.mrb[98].mxu1 %v14281_v22 }
 0x84c   :  { %5033 = vmatprep.mubr.f32.mxu1 %v13952_v45  ;;  %v4087_v45 = vld [vmem:[%s16593_s2 + $0x3d0] sm:$0xff] }
 0x84f   :  { %5034 = vmatmul.mubr.f32.gmra.mrb[100].mxu1 %v14286_v42 }
 0x850   :  { %5038 = vmatprep.mubr.f32.mxu1 %v13962_v52  ;;  %v4088_v52 = vld [vmem:[%s16593_s2 + $0x3d8] sm:$0xff] }
 0x851   :  { %v8046_v58 = vpack.c.bf16 %v4088_v52, %v4087_v45  ;;  %v14327_v52 = vld [vmem:[#allocation2 + $0x141] sm:$0xff] }
 0x853   :  { %5039 = vmatmul.mubr.f32.gmra.mrb[102].mxu1 %v14290_v36 }
 0x854   :  { %5043 = vmatprep.mubr.f32.mxu1 %v13967_v0  ;;  %8047 = vmatpush1.bf16.msra.mxu1 %v8046_v58  ;;  %v14309_v0 = vld [vmem:[#allocation2 + $0x121] sm:$0xff]  ;;  %v14340_v58 = vld [vmem:[#allocation2 + $0x169] sm:$0xff] }
 0x855   :  { %8048 = vmatprep.subr.bf16.mxu1 %v16959_v60  ;;  %17096 = vst [vmem:[#allocation24_spill] sm:$0xff] %v14340_v58 }
 0x857   :  { %5044 = vmatmul.mubr.f32.gmra.mrb[104].mxu1 %v14294_v19 }
 0x858   :  { %5048 = vmatprep.mubr.f32.mxu1 %v13971_v2  ;;  %v14313_v2 = vld [vmem:[#allocation2 + $0x129] sm:$0xff] }
 0x85b   :  { %5049 = vmatmul.mubr.f32.gmra.mrb[106].mxu1 %v14304_v30 }
 0x85c   :  { %5053 = vmatprep.mubr.f32.mxu1 %v13975_v53  ;;  %v4089_v53 = vld [vmem:[%s16593_s2 + $0x3e0] sm:$0xff] }
 0x85f   :  { %5054 = vmatmul.mubr.f32.gmra.mrb[108].mxu1 %v14309_v0 }
 0x860   :  { %5058 = vmatprep.mubr.f32.mxu1 %v13985_v25  ;;  %v4090_v25 = vld [vmem:[%s16593_s2 + $0x3e8] sm:$0xff] }
 0x861   :  { %v8049_v45 = vpack.c.bf16 %v4090_v25, %v4089_v53  ;;  %v14350_v53 = vld [vmem:[#allocation2 + $0x171] sm:$0xff] }
 0x862   :  { %v17097_v25 = vld [vmem:[#allocation13_spill] sm:$0xff] }
 0x863   :  { %5059 = vmatmul.mubr.f32.gmra.mrb[110].mxu1 %v14313_v2 }
 0x864   :  { %5063 = vmatprep.mubr.f32.mxu1 %v13990_v5  ;;  %8050 = vmatpush1.bf16.msra.mxu1 %v8049_v45  ;;  %v14332_v5 = vld [vmem:[#allocation2 + $0x151] sm:$0xff]  ;;  %v14354_v45 = vld [vmem:[#allocation2 + $0x181] sm:$0xff] }
 0x865   :  { %8051 = vmatprep.subr.bf16.mxu1 %v16959_v60  ;;  %v4091_v60 = vld [vmem:[%s16593_s2 + $0x3f0] sm:$0xff] }
 0x867   :  { %5064 = vmatmul.mubr.f32.gmra.mrb[112].mxu1 %v14317_v40 }
 0x868   :  { %5068 = vmatprep.mubr.f32.mxu1 %v13994_v7  ;;  %v14336_v7 = vld [vmem:[#allocation2 + $0x159] sm:$0xff] }
 0x86b   :  { %5069 = vmatmul.mubr.f32.gmra.mrb[114].mxu1 %v14327_v52 }
 0x86c   :  { %5073 = vmatprep.mubr.f32.mxu1 %v13998_v29  ;;  %v4092_v29 = vld [vmem:[%s16593_s2 + $0x3f8] sm:$0xff] }
 0x86f   :  { %5074 = vmatmul.mubr.f32.gmra.mrb[116].mxu1 %v14332_v5 }
 0x870   :  { %5078 = vmatprep.mubr.f32.mxu1 %v14008_v57  ;;  %v8052_v57 = vpack.c.bf16 %v4092_v29, %v4091_v60  ;;  %v3676_v60 = vld [vmem:[#allocation2 + $0x1c9] sm:$0xff]  ;;  %v3677_v29 = vld [vmem:[#allocation2 + $0x1d1] sm:$0xff] }
 0x872   :  { %8053 = vmatpush1.bf16.msra.mxu1 %v8052_v57  ;;  %v14363_v57 = vld [vmem:[#allocation2 + $0x1e1] sm:$0xff] }
 0x873   :  { %5079 = vmatmul.mubr.f32.gmra.mrb[118].mxu1 %v14336_v7  ;;  %8086 = vmatprep.subr.bf16.mxu1 %v17097_v25 }
 0x874   :  { %5083 = vmatprep.mubr.f32.mxu1 %v14012_v17  ;;  %v3738_v17 = vld [vmem:[#allocation2 + $0x182] sm:$0xff] }
 0x877   :  { %5084 = vmatmul.mubr.f32.gmra.mrb[120].mxu1 %v14340_v58  ;;  %v14357_v58 = vld [vmem:[#allocation2 + $0x189] sm:$0xff] }
 0x878   :  { %5088 = vmatprep.mubr.f32.mxu1 %v14015_v56  ;;  %v3739_v56 = vld [vmem:[#allocation2 + $0x18a] sm:$0xff] }
 0x87b   :  { %5089 = vmatmul.mubr.f32.gmra.mrb[122].mxu1 %v14350_v53 }
 0x87c   :  { %5093 = vmatprep.mubr.f32.mxu1 %v3738_v17  ;;  %v14367_v17 = vld [vmem:[#allocation2 + $0x1e9] sm:$0xff] }
 0x87f   :  { %5094 = vmatmul.mubr.f32.gmra.mrb[124].mxu1 %v14354_v45 }
 0x880   :  { %5098 = vmatprep.mubr.f32.mxu1 %v3739_v56  ;;  %v14480_v56 = vld [vmem:[#allocation2 + $0x33a] sm:$0xff] }
 0x881   :  { %17099 = vst [vmem:[#allocation27_spill] sm:$0xff] %v14480_v56 }
 0x883   :  { %5099 = vmatmul.mubr.f32.gmra.mrb[126].mxu1 %v14357_v58 }
 0x884   :  { %5103 = vmatprep.mubr.f32.mxu1 %v14021_v46  ;;  %v14371_v46 = vld [vmem:[#allocation2 + $0x1f9] sm:$0xff] }
 0x887   :  { %5104 = vmatmul.mubr.f32.gmra.mrb[128].mxu1 %v3676_v60  ;;  %v17100_v60 = vld [vmem:[#allocation3_spill] sm:$0xff] }
 0x888   :  { %5108 = vmatprep.mubr.f32.mxu1 %v14025_v54  ;;  %v14375_v54 = vld [vmem:[#allocation2 + $0x201] sm:$0xff] }
 0x88b   :  { %5109 = vmatmul.mubr.f32.gmra.mrb[130].mxu1 %v3677_v29  ;;  %v3774_v29 = vld [vmem:[#allocation2 + $0x38] sm:$0xff] }
 0x88c   :  { %5113 = vmatprep.mubr.f32.mxu1 %v14029_v59  ;;  %v14379_v59 = vld [vmem:[#allocation2 + $0x211] sm:$0xff] }
 0x88f   :  { %5114 = vmatmul.mubr.f32.gmra.mrb[132].mxu1 %v14363_v57 }
 0x890   :  { %5118 = vmatprep.mubr.f32.mxu1 %v14033_v16  ;;  %v14383_v16 = vld [vmem:[#allocation2 + $0x219] sm:$0xff] }
 0x893   :  { %5119 = vmatmul.mubr.f32.gmra.mrb[134].mxu1 %v14367_v17 }
 0x894   :  { %5123 = vmatprep.mubr.f32.mxu1 %v14037_v55  ;;  %v14387_v55 = vld [vmem:[#allocation2 + $0x229] sm:$0xff] }
 0x897   :  { %5124 = vmatmul.mubr.f32.gmra.mrb[136].mxu1 %v14371_v46 }
 0x898   :  { %5128 = vmatprep.mubr.f32.mxu1 %v14041_v11  ;;  %v14391_v11 = vld [vmem:[#allocation2 + $0x231] sm:$0xff] }
 0x89b   :  { %5129 = vmatmul.mubr.f32.gmra.mrb[138].mxu1 %v14375_v54 }
 0x89c   :  { %5133 = vmatprep.mubr.f32.mxu1 %v14045_v18  ;;  %v14395_v18 = vld [vmem:[#allocation2 + $0x241] sm:$0xff] }
 0x89f   :  { %5134 = vmatmul.mubr.f32.gmra.mrb[140].mxu1 %v14379_v59 }
 0x8a0   :  { %5138 = vmatprep.mubr.f32.mxu1 %v14049_v33  ;;  %v14399_v33 = vld [vmem:[#allocation2 + $0x249] sm:$0xff] }
 0x8a3   :  { %5139 = vmatmul.mubr.f32.gmra.mrb[142].mxu1 %v14383_v16 }
 0x8a4   :  { %5143 = vmatprep.mubr.f32.mxu1 %v14053_v20  ;;  %v14403_v20 = vld [vmem:[#allocation2 + $0x259] sm:$0xff] }
 0x8a7   :  { %5144 = vmatmul.mubr.f32.gmra.mrb[144].mxu1 %v14387_v55 }
 0x8a8   :  { %5148 = vmatprep.mubr.f32.mxu1 %v14057_v41  ;;  %v14407_v41 = vld [vmem:[#allocation2 + $0x261] sm:$0xff] }
 0x8ab   :  { %5149 = vmatmul.mubr.f32.gmra.mrb[146].mxu1 %v14391_v11 }
 0x8ac   :  { %5153 = vmatprep.mubr.f32.mxu1 %v14061_v10  ;;  %v14411_v10 = vld [vmem:[#allocation2 + $0x271] sm:$0xff] }
 0x8af   :  { %5154 = vmatmul.mubr.f32.gmra.mrb[148].mxu1 %v14395_v18 }
 0x8b0   :  { %5158 = vmatprep.mubr.f32.mxu1 %v14065_v50  ;;  %v14415_v50 = vld [vmem:[#allocation2 + $0x279] sm:$0xff] }
 0x8b3   :  { %5159 = vmatmul.mubr.f32.gmra.mrb[150].mxu1 %v14399_v33 }
 0x8b4   :  { %5163 = vmatprep.mubr.f32.mxu1 %v14069_v43  ;;  %v14419_v43 = vld [vmem:[#allocation2 + $0x289] sm:$0xff] }
 0x8b7   :  { %5164 = vmatmul.mubr.f32.gmra.mrb[152].mxu1 %v14403_v20 }
 0x8b8   :  { %5168 = vmatprep.mubr.f32.mxu1 %v14073_v4  ;;  %v14423_v4 = vld [vmem:[#allocation2 + $0x291] sm:$0xff] }
 0x8bb   :  { %5169 = vmatmul.mubr.f32.gmra.mrb[154].mxu1 %v14407_v41 }
 0x8bc   :  { %5173 = vmatprep.mubr.f32.mxu1 %v14077_v49  ;;  %v14427_v49 = vld [vmem:[#allocation2 + $0x2a1] sm:$0xff] }
 0x8bf   :  { %5174 = vmatmul.mubr.f32.gmra.mrb[156].mxu1 %v14411_v10 }
 0x8c0   :  { %5178 = vmatprep.mubr.f32.mxu1 %v14081_v48  ;;  %v14431_v48 = vld [vmem:[#allocation2 + $0x2a9] sm:$0xff] }
 0x8c3   :  { %5179 = vmatmul.mubr.f32.gmra.mrb[158].mxu1 %v14415_v50 }
 0x8c4   :  { %5183 = vmatprep.mubr.f32.mxu1 %v14085_v38  ;;  %v14435_v38 = vld [vmem:[#allocation2 + $0x2b9] sm:$0xff] }
 0x8c7   :  { %5184 = vmatmul.mubr.f32.gmra.mrb[160].mxu1 %v14419_v43 }
 0x8c8   :  { %5188 = vmatprep.mubr.f32.mxu1 %v14089_v47  ;;  %v14439_v47 = vld [vmem:[#allocation2 + $0x2c1] sm:$0xff] }
 0x8cb   :  { %5189 = vmatmul.mubr.f32.gmra.mrb[162].mxu1 %v14423_v4 }
 0x8cc   :  { %5193 = vmatprep.mubr.f32.mxu1 %v14093_v35  ;;  %v14443_v35 = vld [vmem:[#allocation2 + $0x2d1] sm:$0xff] }
 0x8cf   :  { %5194 = vmatmul.mubr.f32.gmra.mrb[164].mxu1 %v14427_v49 }
 0x8d0   :  { %5198 = vmatprep.mubr.f32.mxu1 %v14097_v51  ;;  %v14447_v51 = vld [vmem:[#allocation2 + $0x2d9] sm:$0xff] }
 0x8d3   :  { %5199 = vmatmul.mubr.f32.gmra.mrb[166].mxu1 %v14431_v48 }
 0x8d4   :  { %5203 = vmatprep.mubr.f32.mxu1 %v14101_v62  ;;  %v14451_v62 = vld [vmem:[#allocation2 + $0x2e9] sm:$0xff] }
 0x8d7   :  { %5204 = vmatmul.mubr.f32.gmra.mrb[168].mxu1 %v14435_v38 }
 0x8d8   :  { %5208 = vmatprep.mubr.f32.mxu1 %v14105_v34  ;;  %v14455_v34 = vld [vmem:[#allocation2 + $0x2f1] sm:$0xff] }
 0x8db   :  { %5209 = vmatmul.mubr.f32.gmra.mrb[170].mxu1 %v14439_v47 }
 0x8dc   :  { %5213 = vmatprep.mubr.f32.mxu1 %v14109_v8  ;;  %v14459_v8 = vld [vmem:[#allocation2 + $0x301] sm:$0xff] }
 0x8df   :  { %5214 = vmatmul.mubr.f32.gmra.mrb[172].mxu1 %v14443_v35 }
 0x8e0   :  { %5218 = vmatprep.mubr.f32.mxu1 %v14113_v44  ;;  %v14463_v44 = vld [vmem:[#allocation2 + $0x309] sm:$0xff] }
 0x8e3   :  { %5219 = vmatmul.mubr.f32.gmra.mrb[174].mxu1 %v14447_v51 }
 0x8e4   :  { %5223 = vmatprep.mubr.f32.mxu1 %v14117_v37  ;;  %v14467_v37 = vld [vmem:[#allocation2 + $0x319] sm:$0xff] }
 0x8e7   :  { %5224 = vmatmul.mubr.f32.gmra.mrb[176].mxu1 %v14451_v62 }
 0x8e8   :  { %5228 = vmatprep.mubr.f32.mxu1 %v14121_v39  ;;  %v14471_v39 = vld [vmem:[#allocation2 + $0x321] sm:$0xff] }
 0x8eb   :  { %5229 = vmatmul.mubr.f32.gmra.mrb[178].mxu1 %v14455_v34 }
 0x8ec   :  { %5233 = vmatprep.mubr.f32.mxu1 %v14125_v12  ;;  %v14474_v12 = vld [vmem:[#allocation2 + $0x332] sm:$0xff] }
 0x8ed   :  { %17098 = vst [vmem:[#allocation25_spill] sm:$0xff] %v14474_v12 }
 0x8ef   :  { %5234 = vmatmul.mubr.f32.gmra.mrb[180].mxu1 %v14459_v8 }
 0x8f0   :  { %5238 = vmatprep.mubr.f32.mxu1 %v14129_v14  ;;  %v14477_v14 = vld [vmem:[#allocation2 + $0x331] sm:$0xff] }
 0x8f3   :  { %5239 = vmatmul.mubr.f32.gmra.mrb[182].mxu1 %v14463_v44 }
 0x8f4   :  { %5243 = vmatprep.mubr.f32.mxu1 %v14132_v24  ;;  %v14483_v24 = vld [vmem:[#allocation2 + $0x339] sm:$0xff] }
 0x8f7   :  { %5244 = vmatmul.mubr.f32.gmra.mrb[184].mxu1 %v14467_v37 }
 0x8f8   :  { %5248 = vmatprep.mubr.f32.mxu1 %v14141_v15  ;;  %v3773_v15 = vld [vmem:[#allocation2 + $0x30] sm:$0xff] }
 0x8fb   :  { %5249 = vmatmul.mubr.f32.gmra.mrb[186].mxu1 %v14471_v39 }
 0x8fc   :  { %5253 = vmatprep.mubr.f32.mxu1 %v14474_v12  ;;  %v3775_v12 = vld [vmem:[#allocation2 + $0x48] sm:$0xff] }
 0x8ff   :  { %5254 = vmatmul.mubr.f32.gmra.mrb[188].mxu1 %v14477_v14 }
 0x900   :  { %5258 = vmatprep.mubr.f32.mxu1 %v14480_v56  ;;  %v17101_v56 = vld [vmem:[#allocation16_spill] sm:$0xff] }
 0x903   :  { %5259 = vmatmul.mubr.f32.gmra.mrb[190].mxu1 %v14483_v24 }
 0x904   :  { %5328 = vmatprep.mubr.f32.mxu1 %v14166_v9  ;;  %v17102_v9 = vld [vmem:[#allocation19_spill] sm:$0xff] }
 0x907   :  { %5329 = vmatmul.mubr.f32.vlgmr.msra.gmra.mrb[64].mxu1 %v3773_v15  ;;  %v17104_v15 = vld [vmem:[#allocation23_spill] sm:$0xff] }
 0x908   :  { %5333 = vmatprep.mubr.f32.mxu1 %v14176_v1  ;;  %8094 = vmatpush3.bf16.msra.mxu1 %v17097_v25  ;;  %v3776_v1 = vld [vmem:[#allocation2 + $0x50] sm:$0xff]  ;;  %v17103_v25 = vld [vmem:[#allocation22_spill] sm:$0xff] }
 0x909   :  { %8087 = vmatprep.subr.bf16.mxu1 %v17100_v60 }
 0x90b   :  { %5334 = vmatmul.mubr.f32.gmra.mrb[66].mxu1 %v3774_v29  ;;  %v3780_v29 = vld [vmem:[#allocation2 + $0x80] sm:$0xff] }
 0x90c   :  { %5338 = vmatprep.mubr.f32.mxu1 %v14186_v6  ;;  %8095 = vmatpush3.bf16.msra.mxu1 %v17100_v60  ;;  %v3777_v6 = vld [vmem:[#allocation2 + $0x60] sm:$0xff]  ;;  %v17107_v60 = vld [vmem:[#allocation28_spill] sm:$0xff] }
 0x90d   :  { %8088 = vmatprep.subr.bf16.mxu1 %v17101_v56 }
 0x90f   :  { %5339 = vmatmul.mubr.f32.gmra.mrb[68].mxu1 %v3775_v12  ;;  %v17105_v12 = vld [vmem:[#allocation29_spill] sm:$0xff] }
 0x910   :  { %5343 = vmatprep.mubr.f32.mxu1 %v14196_v21  ;;  %8096 = vmatpush3.bf16.msra.mxu1 %v17101_v56  ;;  %v3778_v21 = vld [vmem:[#allocation2 + $0x68] sm:$0xff]  ;;  %v17106_v56 = vld [vmem:[#allocation26_spill] sm:$0xff] }
 0x911   :  { %8089 = vmatprep.subr.bf16.mxu1 %v17102_v9 }
 0x913   :  { %5344 = vmatmul.mubr.f32.gmra.mrb[70].mxu1 %v3776_v1  ;;  %v3783_v1 = vld [vmem:[#allocation2 + $0xa8] sm:$0xff] }
 0x914   :  { %5348 = vmatprep.mubr.f32.mxu1 %v14206_v28  ;;  %8097 = vmatpush3.bf16.msra.mxu1 %v17102_v9  ;;  %v3779_v28 = vld [vmem:[#allocation2 + $0x78] sm:$0xff]  ;;  %v3781_v9 = vld [vmem:[#allocation2 + $0x90] sm:$0xff] }
 0x915   :  { %8090 = vmatprep.subr.bf16.mxu1 %v17103_v25 }
 0x917   :  { %5349 = vmatmul.mubr.f32.gmra.mrb[72].mxu1 %v3777_v6  ;;  %v17108_v6 = vld [vmem:[#allocation24_spill] sm:$0xff] }
 0x918   :  { %5353 = vmatprep.mubr.f32.mxu1 %v17104_v15  ;;  %8098 = vmatpush3.bf16.msra.mxu1 %v17103_v25  ;;  %v3785_v25 = vld [vmem:[#allocation2 + $0xc0] sm:$0xff]  ;;  %v3802_v15 = vld [vmem:[#allocation2 + $0x188] sm:$0xff] }
 0x919   :  { %8091 = vmatprep.subr.bf16.mxu1 %v17105_v12 }
 0x91b   :  { %5354 = vmatmul.mubr.f32.gmra.mrb[74].mxu1 %v3778_v21  ;;  %v3808_v21 = vld [vmem:[#allocation2 + $0x200] sm:$0xff] }
 0x91c   :  { %5358 = vmatprep.mubr.f32.mxu1 %v14226_v26  ;;  %8099 = vmatpush3.bf16.msra.mxu1 %v17105_v12  ;;  %v3782_v26 = vld [vmem:[#allocation2 + $0x98] sm:$0xff]  ;;  %v14531_v12 = vld [vmem:[#allocation2] sm:$0xff] }
 0x91d   :  { %8092 = vmatprep.subr.bf16.mxu1 %v17106_v56 }
 0x91f   :  { %5359 = vmatmul.mubr.f32.gmra.mrb[76].mxu1 %v3779_v28  ;;  %v3826_v28 = vld [vmem:[#allocation2 + $0x2d8] sm:$0xff] }
 0x920   :  { %5363 = vmatprep.mubr.f32.mxu1 %v14236_v32  ;;  %8100 = vmatpush3.bf16.msra.mxu1 %v17106_v56  ;;  %v3784_v32 = vld [vmem:[#allocation2 + $0xb0] sm:$0xff] }
 0x921   :  { %8093 = vmatprep.subr.bf16.mxu1 %v17107_v60  ;;  %v3809_v56 = vld [vmem:[#allocation2 + $0x210] sm:$0xff] }
 0x923   :  { %5364 = vmatmul.mubr.f32.gmra.mrb[78].mxu1 %v3780_v29 }
 0x924   :  { %5368 = vmatprep.mubr.f32.mxu1 %v14240_v3  ;;  %8101 = vmatpush3.bf16.msra.mxu1 %v17107_v60  ;;  %v3786_v3 = vld [vmem:[#allocation2 + $0xc8] sm:$0xff]  ;;  %v17109_v60 = vld [vmem:[#allocation6_spill] sm:$0xff] }
 0x927   :  { %5369 = vmatmul.mubr.f32.gmra.mrb[80].mxu1 %v3781_v9  ;;  %v3827_v9 = vld [vmem:[#allocation2 + $0x2e8] sm:$0xff] }
 0x928   :  { %5373 = vmatprep.mubr.f32.mxu1 %v14244_v23  ;;  %v3787_v23 = vld [vmem:[#allocation2 + $0xd8] sm:$0xff] }
 0x92b   :  { %5374 = vmatmul.mubr.f32.gmra.mrb[82].mxu1 %v3782_v26 }
 0x92c   :  { %5378 = vmatprep.mubr.f32.mxu1 %v14248_v31  ;;  %v3788_v31 = vld [vmem:[#allocation2 + $0xe0] sm:$0xff] }
 0x92f   :  { %5379 = vmatmul.mubr.f32.gmra.mrb[84].mxu1 %v3783_v1 }
 0x930   :  { %5383 = vmatprep.mubr.f32.mxu1 %v14258_v61  ;;  %v3789_v61 = vld [vmem:[#allocation2 + $0xf0] sm:$0xff] }
 0x933   :  { %5384 = vmatmul.mubr.f32.gmra.mrb[86].mxu1 %v3784_v32  ;;  %v17111_v32 = vld [vmem:[#allocation9_spill] sm:$0xff] }
 0x934   :  { %5388 = vmatprep.mubr.f32.mxu1 %v14263_v63  ;;  %v3790_v63 = vld [vmem:[#allocation2 + $0xf8] sm:$0xff] }
 0x937   :  { %5389 = vmatmul.mubr.f32.gmra.mrb[88].mxu1 %v3785_v25 }
 0x938   :  { %5393 = vmatprep.mubr.f32.mxu1 %v14267_v13  ;;  %v3791_v13 = vld [vmem:[#allocation2 + $0x108] sm:$0xff] }
 0x93b   :  { %5394 = vmatmul.mubr.f32.gmra.mrb[90].mxu1 %v3786_v3 }
 0x93c   :  { %5398 = vmatprep.mubr.f32.mxu1 %v14271_v27  ;;  %v3792_v27 = vld [vmem:[#allocation2 + $0x110] sm:$0xff] }
 0x93f   :  { %5399 = vmatmul.mubr.f32.gmra.mrb[92].mxu1 %v3787_v23 }
 0x940   :  { %5403 = vmatprep.mubr.f32.mxu1 %v14281_v22  ;;  %v3793_v22 = vld [vmem:[#allocation2 + $0x120] sm:$0xff] }
 0x943   :  { %5404 = vmatmul.mubr.f32.gmra.mrb[94].mxu1 %v3788_v31  ;;  %v17112_v31 = vld [vmem:[#allocation5_spill] sm:$0xff] }
 0x944   :  { %5408 = vmatprep.mubr.f32.mxu1 %v14286_v42  ;;  %v3794_v42 = vld [vmem:[#allocation2 + $0x128] sm:$0xff] }
 0x947   :  { %5409 = vmatmul.mubr.f32.gmra.mrb[96].mxu1 %v3789_v61 }
 0x948   :  { %5413 = vmatprep.mubr.f32.mxu1 %v14290_v36  ;;  %v3795_v36 = vld [vmem:[#allocation2 + $0x138] sm:$0xff] }
 0x94b   :  { %5414 = vmatmul.mubr.f32.gmra.mrb[98].mxu1 %v3790_v63 }
 0x94c   :  { %5418 = vmatprep.mubr.f32.mxu1 %v14294_v19  ;;  %v3796_v19 = vld [vmem:[#allocation2 + $0x140] sm:$0xff] }
 0x94f   :  { %5419 = vmatmul.mubr.f32.gmra.mrb[100].mxu1 %v3791_v13 }
 0x950   :  { %5423 = vmatprep.mubr.f32.mxu1 %v14304_v30  ;;  %v3797_v30 = vld [vmem:[#allocation2 + $0x150] sm:$0xff] }
 0x953   :  { %5424 = vmatmul.mubr.f32.gmra.mrb[102].mxu1 %v3792_v27  ;;  %v17113_v27 = vld [vmem:[#allocation7_spill] sm:$0xff] }
 0x954   :  { %5428 = vmatprep.mubr.f32.mxu1 %v14309_v0  ;;  %v3798_v0 = vld [vmem:[#allocation2 + $0x158] sm:$0xff] }
 0x957   :  { %5429 = vmatmul.mubr.f32.gmra.mrb[104].mxu1 %v3793_v22 }
 0x958   :  { %5433 = vmatprep.mubr.f32.mxu1 %v14313_v2  ;;  %v3799_v2 = vld [vmem:[#allocation2 + $0x168] sm:$0xff] }
 0x95b   :  { %5434 = vmatmul.mubr.f32.gmra.mrb[106].mxu1 %v3794_v42 }
 0x95c   :  { %5438 = vmatprep.mubr.f32.mxu1 %v14317_v40  ;;  %v3800_v40 = vld [vmem:[#allocation2 + $0x170] sm:$0xff] }
 0x95f   :  { %5439 = vmatmul.mubr.f32.gmra.mrb[108].mxu1 %v3795_v36 }
 0x960   :  { %5443 = vmatprep.mubr.f32.mxu1 %v14327_v52  ;;  %v3801_v52 = vld [vmem:[#allocation2 + $0x180] sm:$0xff] }
 0x963   :  { %5444 = vmatmul.mubr.f32.gmra.mrb[110].mxu1 %v3796_v19  ;;  %v17114_v19 = vld [vmem:[#allocation8_spill] sm:$0xff] }
 0x964   :  { %5448 = vmatprep.mubr.f32.mxu1 %v14332_v5  ;;  %v3867_v5 = vld [vmem:[#allocation2 + $0x199] sm:$0xff] }
 0x967   :  { %5449 = vmatmul.mubr.f32.gmra.mrb[112].mxu1 %v3797_v30 }
 0x968   :  { %5453 = vmatprep.mubr.f32.mxu1 %v14336_v7  ;;  %v3868_v7 = vld [vmem:[#allocation2 + $0x1a1] sm:$0xff] }
 0x96b   :  { %5454 = vmatmul.mubr.f32.gmra.mrb[114].mxu1 %v3798_v0 }
 0x96c   :  { %5458 = vmatprep.mubr.f32.mxu1 %v17108_v6 }
 0x96f   :  { %5459 = vmatmul.mubr.f32.gmra.mrb[116].mxu1 %v3799_v2  ;;  %v17115_v2 = vld [vmem:[#allocation31_spill] sm:$0xff] }
 0x970   :  { %5463 = vmatprep.mubr.f32.mxu1 %v14350_v53  ;;  %v3805_v53 = vld [vmem:[#allocation2 + $0x1e0] sm:$0xff] }
 0x973   :  { %5464 = vmatmul.mubr.f32.gmra.mrb[118].mxu1 %v3800_v40 }
 0x974   :  { %5468 = vmatprep.mubr.f32.mxu1 %v14354_v45  ;;  %v3806_v45 = vld [vmem:[#allocation2 + $0x1e8] sm:$0xff] }
 0x977   :  { %5469 = vmatmul.mubr.f32.gmra.mrb[120].mxu1 %v3801_v52 }
 0x978   :  { %5473 = vmatprep.mubr.f32.mxu1 %v14357_v58  ;;  %v3807_v58 = vld [vmem:[#allocation2 + $0x1f8] sm:$0xff] }
 0x97b   :  { %5474 = vmatmul.mubr.f32.gmra.mrb[122].mxu1 %v3802_v15  ;;  %v17116_v15 = vld [vmem:[#allocation30_spill] sm:$0xff] }
 0x97c   :  { %5478 = vmatprep.mubr.f32.mxu1 %v3867_v5 }
 0x97f   :  { %5479 = vmatmul.mubr.f32.gmra.mrb[124].mxu1 %v14531_v12 }
 0x980   :  { %5483 = vmatprep.mubr.f32.mxu1 %v3868_v7 }
 0x983   :  { %5484 = vmatmul.mubr.f32.gmra.mrb[126].mxu1 %v14531_v12 }
 0x984   :  { %5488 = vmatprep.mubr.f32.mxu1 %v14363_v57  ;;  %v3810_v57 = vld [vmem:[#allocation2 + $0x218] sm:$0xff] }
 0x987   :  { %5489 = vmatmul.mubr.f32.gmra.mrb[128].mxu1 %v3805_v53 }
 0x988   :  { %5493 = vmatprep.mubr.f32.mxu1 %v14367_v17  ;;  %v3811_v17 = vld [vmem:[#allocation2 + $0x228] sm:$0xff] }
 0x98b   :  { %5494 = vmatmul.mubr.f32.gmra.mrb[130].mxu1 %v3806_v45  ;;  %v3899_v45 = vld [vmem:[#allocation2 + $0x349] sm:$0xff] }
 0x98c   :  { %5498 = vmatprep.mubr.f32.mxu1 %v14371_v46  ;;  %v3812_v46 = vld [vmem:[#allocation2 + $0x230] sm:$0xff] }
 0x98f   :  { %5499 = vmatmul.mubr.f32.gmra.mrb[132].mxu1 %v3807_v58  ;;  %v3834_v58 = vld [vmem:[#allocation2 + $0x338] sm:$0xff] }
 0x990   :  { %5503 = vmatprep.mubr.f32.mxu1 %v14375_v54  ;;  %v3813_v54 = vld [vmem:[#allocation2 + $0x240] sm:$0xff] }
 0x993   :  { %5504 = vmatmul.mubr.f32.gmra.mrb[134].mxu1 %v3808_v21  ;;  %v17117_v21 = vld [vmem:[#allocation34_spill] sm:$0xff] }
 0x994   :  { %5508 = vmatprep.mubr.f32.mxu1 %v14379_v59  ;;  %v3814_v59 = vld [vmem:[#allocation2 + $0x248] sm:$0xff] }
 0x997   :  { %5509 = vmatmul.mubr.f32.gmra.mrb[136].mxu1 %v3809_v56 }
 0x998   :  { %5513 = vmatprep.mubr.f32.mxu1 %v14383_v16  ;;  %v3815_v16 = vld [vmem:[#allocation2 + $0x258] sm:$0xff] }
 0x99b   :  { %5514 = vmatmul.mubr.f32.gmra.mrb[138].mxu1 %v3810_v57 }
 0x99c   :  { %5518 = vmatprep.mubr.f32.mxu1 %v14387_v55  ;;  %v3816_v55 = vld [vmem:[#allocation2 + $0x260] sm:$0xff] }
 0x99f   :  { %5519 = vmatmul.mubr.f32.gmra.mrb[140].mxu1 %v3811_v17  ;;  %v3900_v17 = vld [vmem:[#allocation2 + $0x351] sm:$0xff] }
 0x9a0   :  { %5523 = vmatprep.mubr.f32.mxu1 %v14391_v11  ;;  %v3817_v11 = vld [vmem:[#allocation2 + $0x270] sm:$0xff] }
 0x9a3   :  { %5524 = vmatmul.mubr.f32.gmra.mrb[142].mxu1 %v3812_v46  ;;  %v17118_v46 = vld [vmem:[#allocation33_spill] sm:$0xff] }
 0x9a4   :  { %5528 = vmatprep.mubr.f32.mxu1 %v14395_v18  ;;  %v3818_v18 = vld [vmem:[#allocation2 + $0x278] sm:$0xff] }
 0x9a7   :  { %5529 = vmatmul.mubr.f32.gmra.mrb[144].mxu1 %v3813_v54 }
 0x9a8   :  { %5533 = vmatprep.mubr.f32.mxu1 %v14399_v33  ;;  %v3819_v33 = vld [vmem:[#allocation2 + $0x288] sm:$0xff] }
 0x9ab   :  { %5534 = vmatmul.mubr.f32.gmra.mrb[146].mxu1 %v3814_v59 }
 0x9ac   :  { %5538 = vmatprep.mubr.f32.mxu1 %v14403_v20  ;;  %v3820_v20 = vld [vmem:[#allocation2 + $0x290] sm:$0xff] }
 0x9af   :  { %5539 = vmatmul.mubr.f32.gmra.mrb[148].mxu1 %v3815_v16 }
 0x9b0   :  { %5543 = vmatprep.mubr.f32.mxu1 %v14407_v41  ;;  %v3821_v41 = vld [vmem:[#allocation2 + $0x2a0] sm:$0xff] }
 0x9b3   :  { %5544 = vmatmul.mubr.f32.gmra.mrb[150].mxu1 %v3816_v55 }
 0x9b4   :  { %5548 = vmatprep.mubr.f32.mxu1 %v14411_v10  ;;  %v3822_v10 = vld [vmem:[#allocation2 + $0x2a8] sm:$0xff] }
 0x9b7   :  { %5549 = vmatmul.mubr.f32.gmra.mrb[152].mxu1 %v3817_v11 }
 0x9b8   :  { %5553 = vmatprep.mubr.f32.mxu1 %v14415_v50  ;;  %v3823_v50 = vld [vmem:[#allocation2 + $0x2b8] sm:$0xff] }
 0x9bb   :  { %5554 = vmatmul.mubr.f32.gmra.mrb[154].mxu1 %v3818_v18  ;;  %v3957_v18 = vld [vmem:[#allocation2 + $0x302] sm:$0xff] }
 0x9bc   :  { %5558 = vmatprep.mubr.f32.mxu1 %v14419_v43  ;;  %v3824_v43 = vld [vmem:[#allocation2 + $0x2c0] sm:$0xff] }
 0x9bf   :  { %5559 = vmatmul.mubr.f32.gmra.mrb[156].mxu1 %v3819_v33 }
 0x9c0   :  { %5563 = vmatprep.mubr.f32.mxu1 %v14423_v4  ;;  %v3825_v4 = vld [vmem:[#allocation2 + $0x2d0] sm:$0xff] }
 0x9c3   :  { %5564 = vmatmul.mubr.f32.gmra.mrb[158].mxu1 %v3820_v20  ;;  %v3958_v20 = vld [vmem:[#allocation2 + $0x30a] sm:$0xff] }
 0x9c4   :  { %5568 = vmatprep.mubr.f32.mxu1 %v14427_v49 }
 0x9c7   :  { %5569 = vmatmul.mubr.f32.gmra.mrb[160].mxu1 %v3821_v41  ;;  %v17120_v41 = vld [vmem:[#allocation36_spill] sm:$0xff] }
 0x9c8   :  { %5573 = vmatprep.mubr.f32.mxu1 %v14431_v48 }
 0x9cb   :  { %5574 = vmatmul.mubr.f32.gmra.mrb[162].mxu1 %v3822_v10 }
 0x9cc   :  { %5578 = vmatprep.mubr.f32.mxu1 %v14435_v38 }
 0x9cf   :  { %5579 = vmatmul.mubr.f32.gmra.mrb[164].mxu1 %v3823_v50 }
 0x9d0   :  { %5583 = vmatprep.mubr.f32.mxu1 %v14439_v47  ;;  %v17110_v47 = vld [vmem:[#allocation14_spill] sm:$0xff] }
 0x9d3   :  { %5584 = vmatmul.mubr.f32.gmra.mrb[166].mxu1 %v3824_v43  ;;  %v3959_v43 = vld [vmem:[#allocation2 + $0x31a] sm:$0xff] }
 0x9d4   :  { %5588 = vmatprep.mubr.f32.mxu1 %v14443_v35 }
 0x9d7   :  { %5589 = vmatmul.mubr.f32.gmra.mrb[168].mxu1 %v3825_v4 }
 0x9d8   :  { %5593 = vmatprep.mubr.f32.mxu1 %v14447_v51  ;;  %v3828_v51 = vld [vmem:[#allocation2 + $0x2f0] sm:$0xff] }
 0x9da   :  { %v5330_v49 = vpop.f32.mrb[64].mxu1 }
 0x9db   :  { %v14558_v48 = vadd.f32 %v17109_v60, %v5330_v49  ;;  %v5332_v29 = vpop.f32.mrb[65].mxu1  ;;  %5594 = vmatmul.mubr.f32.gmra.mrb[170].mxu1 %v3826_v28  ;;  %v3960_v49 = vld [vmem:[#allocation2 + $0x322] sm:$0xff] }
 0x9dc   :  { %5598 = vmatprep.mubr.f32.mxu1 %v14451_v62  ;;  %v3829_v62 = vld [vmem:[#allocation2 + $0x300] sm:$0xff]  ;;  %v17121_v28 = vld [vmem:[#allocation40_spill] sm:$0xff] }
 0x9de   :  { %v5335_v38 = vpop.f32.mrb[66].mxu1 }
 0x9df   :  { %v14562_v26 = vadd.f32 %v17110_v47, %v5335_v38  ;;  %v5337_v1 = vpop.f32.mrb[67].mxu1  ;;  %5599 = vmatmul.mubr.f32.gmra.mrb[172].mxu1 %v3827_v9  ;;  %v17122_v38 = vld [vmem:[#allocation25_spill] sm:$0xff]  ;;  %v17123_v47 = vld [vmem:[#allocation39_spill] sm:$0xff] }
 0x9e0   :  { %5603 = vmatprep.mubr.f32.mxu1 %v14455_v34  ;;  %v3830_v34 = vld [vmem:[#allocation2 + $0x308] sm:$0xff] }
 0x9e2   :  { %v5340_v35 = vpop.f32.mrb[68].mxu1 }
 0x9e3   :  { %v14566_v25 = vadd.f32 %v17111_v32, %v5340_v35  ;;  %v5342_v3 = vpop.f32.mrb[69].mxu1  ;;  %5604 = vmatmul.mubr.f32.gmra.mrb[174].mxu1 %v3828_v51  ;;  %v17124_v51 = vld [vmem:[#allocation27_spill] sm:$0xff]  ;;  %v3964_v32 = vld [vmem:[#allocation2 + $0x352] sm:$0xff] }
 0x9e4   :  { %5608 = vmatprep.mubr.f32.mxu1 %v14459_v8  ;;  %v3831_v8 = vld [vmem:[#allocation2 + $0x318] sm:$0xff] }
 0x9e6   :  { %v5345_v23 = vpop.f32.mrb[70].mxu1 }
 0x9e7   :  { %v14570_v61 = vadd.f32 %v17112_v31, %v5345_v23  ;;  %v5347_v63 = vpop.f32.mrb[71].mxu1  ;;  %5609 = vmatmul.mubr.f32.gmra.mrb[176].mxu1 %v3829_v62  ;;  %v17125_v23 = vld [vmem:[#allocation43_spill] sm:$0xff] }
 0x9e8   :  { %5613 = vmatprep.mubr.f32.mxu1 %v14463_v44  ;;  %v3832_v44 = vld [vmem:[#allocation2 + $0x320] sm:$0xff] }
 0x9ea   :  { %v5350_v13 = vpop.f32.mrb[72].mxu1 }
 0x9eb   :  { %v14574_v22 = vadd.f32 %v17113_v27, %v5350_v13  ;;  %v5352_v42 = vpop.f32.mrb[73].mxu1  ;;  %5614 = vmatmul.mubr.f32.gmra.mrb[178].mxu1 %v3830_v34  ;;  %v17126_v13 = vld [vmem:[#allocation42_spill] sm:$0xff] }
 0x9ec   :  { %5618 = vmatprep.mubr.f32.mxu1 %v14467_v37  ;;  %v3833_v37 = vld [vmem:[#allocation2 + $0x330] sm:$0xff] }
 0x9ee   :  { %v5355_v36 = vpop.f32.mrb[74].mxu1 }
 0x9ef   :  { %v14578_v30 = vadd.f32 %v17114_v19, %v5355_v36  ;;  %v5357_v0 = vpop.f32.mrb[75].mxu1  ;;  %5619 = vmatmul.mubr.f32.gmra.mrb[180].mxu1 %v3831_v8  ;;  %v17127_v36 = vld [vmem:[#allocation17_spill] sm:$0xff] }
 0x9f0   :  { %5623 = vmatprep.mubr.f32.mxu1 %v14471_v39 }
 0x9f2   :  { %v5360_v6 = vpop.f32.mrb[76].mxu1 }
 0x9f3   :  { %v14582_v40 = vadd.f32 %v17115_v2, %v5360_v6  ;;  %v5362_v52 = vpop.f32.mrb[77].mxu1  ;;  %5624 = vmatmul.mubr.f32.gmra.mrb[182].mxu1 %v3832_v44  ;;  %v17128_v6 = vld [vmem:[#allocation45_spill] sm:$0xff] }
 0x9f4   :  { %5628 = vmatprep.mubr.f32.mxu1 %v14477_v14 }
 0x9f6   :  { %v5365_v5 = vpop.f32.mrb[78].mxu1 }
 0x9f7   :  { %v14586_v7 = vadd.f32 %v17116_v15, %v5365_v5  ;;  %v5367_v53 = vpop.f32.mrb[79].mxu1  ;;  %5629 = vmatmul.mubr.f32.gmra.mrb[184].mxu1 %v3833_v37  ;;  %v17129_v5 = vld [vmem:[#allocation47_spill] sm:$0xff] }
 0x9f8   :  { %5633 = vmatprep.mubr.f32.mxu1 %v14483_v24  ;;  %v17119_v24 = vld [vmem:[#allocation37_spill] sm:$0xff] }
 0x9fa   :  { %v5370_v39 = vpop.f32.mrb[80].mxu1 }
 0x9fb   :  { %v14590_v56 = vadd.f32 %v17117_v21, %v5370_v39  ;;  %v5372_v57 = vpop.f32.mrb[81].mxu1  ;;  %5634 = vmatmul.mubr.f32.gmra.mrb[186].mxu1 %v3834_v58 }
 0x9fc   :  { %5638 = vmatprep.mubr.f32.mxu1 %v3899_v45  ;;  %v17130_v45 = vld [vmem:[#allocation46_spill] sm:$0xff]  ;;  %v17131_v57 = vld [vmem:[#allocation49_spill] sm:$0xff] }
 0x9fe   :  { %v5375_v14 = vpop.f32.mrb[82].mxu1 }
 0x9ff   :  { %v14593_v54 = vadd.f32 %v17118_v46, %v5375_v14  ;;  %v5377_v59 = vpop.f32.mrb[83].mxu1  ;;  %5639 = vmatmul.mubr.f32.gmra.mrb[188].mxu1 %v14531_v12 }
 0xa00   :  { %5643 = vmatprep.mubr.f32.mxu1 %v3900_v17  ;;  %v17132_v59 = vld [vmem:[#allocation48_spill] sm:$0xff] }
 0xa02   :  { %v5380_v16 = vpop.f32.mrb[84].mxu1 }
 0xa03   :  { %v14597_v55 = vadd.f32 %v17119_v24, %v5380_v16  ;;  %v5382_v11 = vpop.f32.mrb[85].mxu1  ;;  %5644 = vmatmul.mubr.f32.gmra.mrb[190].mxu1 %v14531_v12  ;;  %v3963_v12 = vld [vmem:[#allocation2 + $0x34a] sm:$0xff] }
 0xa04   :  { %7626 = vmatprep.mubr.f32.mxu1 %v3957_v18  ;;  %v17133_v18 = vld [vmem:[#allocation51_spill] sm:$0xff] }
 0xa06   :  { %v5385_v33 = vpop.f32.mrb[86].mxu1 }
 0xa07   :  { %v14601_v10 = vadd.f32 %v17120_v41, %v5385_v33  ;;  %v5387_v50 = vpop.f32.mrb[87].mxu1  ;;  %7627 = vmatmul.mubr.f32.vlgmr.msra.gmra.mrb[192].mxu1 %v3958_v20 }
 0xa08   :  { %7629 = vmatprep.mubr.f32.mxu1 %v3959_v43  ;;  %v17134_v50 = vld [vmem:[#allocation50_spill] sm:$0xff] }
 0xa0a   :  { %v5390_v4 = vpop.f32.mrb[88].mxu1 }
 0xa0b   :  { %v14604_v60 = vadd.f32 %v17121_v28, %v5390_v4  ;;  %v5392_v29 = vpop.f32.mrb[89].mxu1  ;;  %7630 = vmatmul.mubr.f32.gmra.mrb[194].mxu1 %v3960_v49  ;;  %v17135_v28 = vld [vmem:[#allocation53_spill] sm:$0xff] }
 0xa0c   :  { %7632 = vmatprep.mubr.f32.mxu1 %v17122_v38 }
 0xa0e   :  { %v5395_v9 = vpop.f32.mrb[90].mxu1 }
 0xa0f   :  { %v14608_v1 = vadd.f32 %v17123_v47, %v5395_v9  ;;  %v5397_v35 = vpop.f32.mrb[91].mxu1  ;;  %7633 = vmatmul.mubr.f32.gmra.mrb[196].mxu1 %v17124_v51  ;;  %v17137_v9 = vld [vmem:[#allocation52_spill] sm:$0xff] }
 0xa10   :  { %7635 = vmatprep.mubr.f32.mxu1 %v3963_v12 }
 0xa12   :  { %v5400_v3 = vpop.f32.mrb[92].mxu1 }
 0xa13   :  { %v14612_v62 = vadd.f32 %v17125_v23, %v5400_v3  ;;  %v5402_v31 = vpop.f32.mrb[93].mxu1  ;;  %7636 = vmatmul.mubr.f32.gmra.mrb[198].mxu1 %v3964_v32  ;;  %v17138_v32 = vld [vmem:[#allocation54_spill] sm:$0xff] }
 0xa16   :  { %v5405_v63 = vpop.f32.mrb[94].mxu1 }
 0xa17   :  { %v14615_v34 = vadd.f32 %v17126_v13, %v5405_v63  ;;  %v5407_v27 = vpop.f32.mrb[95].mxu1  ;;  %v17140_v63 = vld [vmem:[#allocation18_spill] sm:$0xff] }
 0xa1a   :  { %v5410_v42 = vpop.f32.mrb[96].mxu1 }
 0xa1b   :  { %v14618_v8 = vadd.f32 %v17127_v36, %v5410_v42  ;;  %v5412_v19 = vpop.f32.mrb[97].mxu1  ;;  %v17141_v36 = vld [vmem:[#allocation55_spill] sm:$0xff] }
 0xa1e   :  { %v5415_v0 = vpop.f32.mrb[98].mxu1 }
 0xa1f   :  { %v14621_v44 = vadd.f32 %v17128_v6, %v5415_v0  ;;  %v5417_v2 = vpop.f32.mrb[99].mxu1 }
 0xa20   :  { %v17143_v2 = vld [vmem:[#allocation20_spill] sm:$0xff] }
 0xa22   :  { %v5420_v52 = vpop.f32.mrb[100].mxu1 }
 0xa23   :  { %v14624_v37 = vadd.f32 %v17129_v5, %v5420_v52  ;;  %v5422_v15 = vpop.f32.mrb[101].mxu1 }
 0xa26   :  { %v5425_v53 = vpop.f32.mrb[102].mxu1 }
 0xa27   :  { %v14627_v39 = vadd.f32 %v17130_v45, %v5425_v53  ;;  %v5427_v58 = vpop.f32.mrb[103].mxu1  ;;  %v17144_v53 = vld [vmem:[#allocation56_spill] sm:$0xff] }
 0xa2a   :  { %v5430_v21 = vpop.f32.mrb[104].mxu1 }
 0xa2b   :  { %v14630_v17 = vadd.f32 %v17131_v57, %v5430_v21  ;;  %v5432_v14 = vpop.f32.mrb[105].mxu1  ;;  %v17146_v57 = vld [vmem:[#allocation21_spill] sm:$0xff] }
 0xa2e   :  { %v5435_v46 = vpop.f32.mrb[106].mxu1 }
 0xa2f   :  { %v14633_v16 = vadd.f32 %v17132_v59, %v5435_v46  ;;  %v5437_v24 = vpop.f32.mrb[107].mxu1 }
 0xa30   :  { %v17147_v24 = vld [vmem:[#allocation58_spill] sm:$0xff] }
 0xa32   :  { %v5440_v11 = vpop.f32.mrb[108].mxu1 }
 0xa33   :  { %v14636_v33 = vadd.f32 %v17133_v18, %v5440_v11  ;;  %v5442_v20 = vpop.f32.mrb[109].mxu1 }
 0xa36   :  { %v5445_v41 = vpop.f32.mrb[110].mxu1 }
 0xa37   :  { %v14639_v43 = vadd.f32 %v17134_v50, %v5445_v41  ;;  %v5447_v4 = vpop.f32.mrb[111].mxu1  ;;  %v17149_v41 = vld [vmem:[#allocation57_spill] sm:$0xff] }
 0xa3a   :  { %v5450_v49 = vpop.f32.mrb[112].mxu1 }
 0xa3b   :  { %v14642_v29 = vadd.f32 %v17135_v28, %v5450_v49  ;;  %v5452_v38 = vpop.f32.mrb[113].mxu1  ;;  %v17150_v28 = vld [vmem:[#allocation60_spill] sm:$0xff] }
 0xa3d   :  { %17136 = vst [vmem:[#allocation11_spill] sm:$0xff] %v14642_v29 }
 0xa3e   :  { %v5455_v12 = vpop.f32.mrb[114].mxu1 }
 0xa3f   :  { %v14645_v47 = vadd.f32 %v17137_v9, %v5455_v12  ;;  %v5457_v35 = vpop.f32.mrb[115].mxu1 }
 0xa40   :  { %v17152_v35 = vld [vmem:[#allocation59_spill] sm:$0xff] }
 0xa42   :  { %v5460_v51 = vpop.f32.mrb[116].mxu1 }
 0xa43   :  { %v14648_v3 = vadd.f32 %v17138_v32, %v5460_v51  ;;  %v5462_v23 = vpop.f32.mrb[117].mxu1 }
 0xa45   :  { %17139 = vst [vmem:[#allocation15_spill] sm:$0xff] %v14648_v3 }
 0xa46   :  { %v5465_v31 = vpop.f32.mrb[118].mxu1 }
 0xa47   :  { %v14651_v13 = vadd.f32 %v17140_v63, %v5465_v31  ;;  %v5467_v27 = vpop.f32.mrb[119].mxu1  ;;  %v17153_v31 = vld [vmem:[#allocation62_spill] sm:$0xff] }
 0xa4a   :  { %v5470_v42 = vpop.f32.mrb[120].mxu1 }
 0xa4b   :  { %v14654_v19 = vadd.f32 %v17141_v36, %v5470_v42  ;;  %v5472_v0 = vpop.f32.mrb[121].mxu1  ;;  %v17155_v36 = vld [vmem:[#allocation61_spill] sm:$0xff] }
 0xa4d   :  { %17142 = vst [vmem:[#allocation4_spill] sm:$0xff] %v14654_v19 }
 0xa4e   :  { %v5475_v6 = vpop.f32.mrb[122].mxu1 }
 0xa4f   :  { %v14657_v52 = vadd.f32 %v17143_v2, %v5475_v6  ;;  %v5477_v5 = vpop.f32.mrb[123].mxu1  ;;  %v6034_v2 = vadd.f32 %v14562_v26, %v14558_v48 }
 0xa51   :  { %v6035_v5 = vadd.f32 %v6034_v2, %v14566_v25 }
 0xa52   :  { %v5480_v15 = vpop.f32.mrb[124].mxu1 }
 0xa53   :  { %v14660_v45 = vadd.f32 %v17144_v53, %v5480_v15  ;;  %v5482_v58 = vpop.f32.mrb[125].mxu1  ;;  %v17156_v53 = vld [vmem:[#allocation64_spill] sm:$0xff] }
 0xa55   :  { %17145 = vst [vmem:[#allocation12_spill] sm:$0xff] %v14660_v45 }
 0xa56   :  { %v5485_v21 = vpop.f32.mrb[126].mxu1 }
 0xa57   :  { %v14663_v14 = vadd.f32 %v17146_v57, %v5485_v21  ;;  %v5487_v46 = vpop.f32.mrb[127].mxu1  ;;  %v6036_v57 = vadd.f32 %v6035_v5, %v14570_v61  ;;  %v17162_v5 = vld [vmem:[#allocation68_spill] sm:$0xff] }
 0xa59   :  { %v6037_v46 = vadd.f32 %v6036_v57, %v14574_v22 }
 0xa5a   :  { %v5490_v59 = vpop.f32.mrb[128].mxu1 }
 0xa5b   :  { %v14666_v11 = vadd.f32 %v17147_v24, %v5490_v59  ;;  %v5492_v18 = vpop.f32.mrb[129].mxu1  ;;  %v17157_v24 = vld [vmem:[#allocation63_spill] sm:$0xff] }
 0xa5d   :  { %17148 = vst [vmem:[#allocation10_spill] sm:$0xff] %v14666_v11 }
 0xa5e   :  { %v5495_v20 = vpop.f32.mrb[130].mxu1 }
 0xa5f   :  { %v14669_v50 = vadd.f32 %v17149_v41, %v5495_v20  ;;  %v5497_v4 = vpop.f32.mrb[131].mxu1  ;;  %v6038_v41 = vadd.f32 %v6037_v46, %v14578_v30 }
 0xa61   :  { %v6039_v4 = vadd.f32 %v6038_v41, %v14582_v40 }
 0xa62   :  { %v5500_v49 = vpop.f32.mrb[132].mxu1 }
 0xa63   :  { %v14672_v38 = vadd.f32 %v17150_v28, %v5500_v49  ;;  %v5502_v12 = vpop.f32.mrb[133].mxu1  ;;  %v17159_v28 = vld [vmem:[#allocation66_spill] sm:$0xff] }
 0xa65   :  { %17151 = vst [vmem:[#allocation32_spill] sm:$0xff] %v14672_v38 }
 0xa66   :  { %v5505_v9 = vpop.f32.mrb[134].mxu1 }
 0xa67   :  { %v14675_v51 = vadd.f32 %v17152_v35, %v5505_v9  ;;  %v5507_v32 = vpop.f32.mrb[135].mxu1  ;;  %v6040_v35 = vadd.f32 %v6039_v4, %v14586_v7 }
 0xa69   :  { %v6041_v32 = vadd.f32 %v6040_v35, %v14590_v56 }
 0xa6a   :  { %v5510_v23 = vpop.f32.mrb[136].mxu1 }
 0xa6b   :  { %v14678_v63 = vadd.f32 %v17153_v31, %v5510_v23  ;;  %v5512_v27 = vpop.f32.mrb[137].mxu1  ;;  %v17160_v31 = vld [vmem:[#allocation65_spill] sm:$0xff] }
 0xa6d   :  { %17154 = vst [vmem:[#allocation35_spill] sm:$0xff] %v14678_v63 }
 0xa6e   :  { %v5515_v42 = vpop.f32.mrb[138].mxu1 }
 0xa6f   :  { %v14681_v0 = vadd.f32 %v17155_v36, %v5515_v42  ;;  %v5517_v6 = vpop.f32.mrb[139].mxu1  ;;  %v6042_v36 = vadd.f32 %v6041_v32, %v14593_v54 }
 0xa71   :  { %v6043_v6 = vadd.f32 %v6042_v36, %v14597_v55 }
 0xa72   :  { %v5520_v15 = vpop.f32.mrb[140].mxu1 }
 0xa73   :  { %v14687_v58 = vadd.f32 %v17156_v53, %v5520_v15  ;;  %v5522_v21 = vpop.f32.mrb[141].mxu1 }
 0xa74   :  { %v6044_v21 = vadd.f32 %v6043_v6, %v14601_v10 }
 0xa76   :  { %v5525_v59 = vpop.f32.mrb[142].mxu1  ;;  %v6045_v57 = vadd.f32 %v6044_v21, %v14604_v60  ;;  %v17170_v21 = vld [vmem:[#allocation72_spill] sm:$0xff] }
 0xa77   :  { %v14692_v18 = vadd.f32 %v17157_v24, %v5525_v59  ;;  %v5527_v20 = vpop.f32.mrb[143].mxu1  ;;  %v17164_v59 = vld [vmem:[#allocation67_spill] sm:$0xff] }
 0xa78   :  { %v6046_v41 = vadd.f32 %v6045_v57, %v14608_v1 }
 0xa79   :  { %17158 = vst [vmem:[#allocation38_spill] sm:$0xff] %v14692_v18 }
 0xa7a   :  { %v5530_v49 = vpop.f32.mrb[144].mxu1  ;;  %v6047_v4 = vadd.f32 %v6046_v41, %v14612_v62 }
 0xa7b   :  { %v14697_v12 = vadd.f32 %v17159_v28, %v5530_v49  ;;  %v5532_v9 = vpop.f32.mrb[145].mxu1  ;;  %v17166_v28 = vld [vmem:[#allocation70_spill] sm:$0xff] }
 0xa7c   :  { %v6048_v32 = vadd.f32 %v6047_v4, %v14615_v34  ;;  %v17172_v4 = vld [vmem:[#allocation71_spill] sm:$0xff] }
 0xa7e   :  { %v5535_v23 = vpop.f32.mrb[146].mxu1 }
 0xa7f   :  { %v14702_v27 = vadd.f32 %v17160_v31, %v5535_v23  ;;  %v5537_v42 = vpop.f32.mrb[147].mxu1  ;;  %v6049_v23 = vadd.f32 %v6048_v32, %v14618_v8 }
 0xa80   :  { %v17168_v42 = vld [vmem:[#allocation69_spill] sm:$0xff] }
 0xa81   :  { %17161 = vst [vmem:[#allocation41_spill] sm:$0xff] %v14702_v27 }
 0xa82   :  { %v5540_v2 = vpop.f32.mrb[148].mxu1 }
 0xa83   :  { %v14707_v15 = vadd.f32 %v17162_v5, %v5540_v2  ;;  %v5542_v53 = vpop.f32.mrb[149].mxu1  ;;  %v6050_v2 = vadd.f32 %v6049_v23, %v14621_v44 }
 0xa85   :  { %17163 = vst [vmem:[#allocation44_spill] sm:$0xff] %v14707_v15  ;;  %v6051_v5 = vadd.f32 %v6050_v2, %v14624_v37 }
 0xa86   :  { %v5545_v46 = vpop.f32.mrb[150].mxu1 }
 0xa87   :  { %v14712_v24 = vadd.f32 %v17164_v59, %v5545_v46  ;;  %v5547_v20 = vpop.f32.mrb[151].mxu1  ;;  %v6052_v59 = vadd.f32 %v6051_v5, %v14627_v39 }
 0xa89   :  { %17165 = vst [vmem:[#allocation13_spill] sm:$0xff] %v14712_v24  ;;  %v6053_v20 = vadd.f32 %v6052_v59, %v14630_v17 }
 0xa8a   :  { %v5550_v49 = vpop.f32.mrb[152].mxu1 }
 0xa8b   :  { %v14717_v9 = vadd.f32 %v17166_v28, %v5550_v49  ;;  %v5552_v35 = vpop.f32.mrb[153].mxu1 }
 0xa8c   :  { %v6054_v35 = vadd.f32 %v6053_v20, %v14633_v16 }
 0xa8d   :  { %17167 = vst [vmem:[#allocation3_spill] sm:$0xff] %v14717_v9 }
 0xa8e   :  { %v5555_v31 = vpop.f32.mrb[154].mxu1  ;;  %v6055_v32 = vadd.f32 %v6054_v35, %v14636_v33 }
 0xa8f   :  { %v14722_v36 = vadd.f32 %v17168_v42, %v5555_v31  ;;  %v5557_v6 = vpop.f32.mrb[155].mxu1  ;;  %v17174_v31 = vld [vmem:[#allocation74_spill] sm:$0xff] }
 0xa90   :  { %v6056_v2 = vadd.f32 %v6055_v32, %v14639_v43 }
 0xa91   :  { %17169 = vst [vmem:[#allocation16_spill] sm:$0xff] %v14722_v36 }
 0xa92   :  { %v5560_v53 = vpop.f32.mrb[156].mxu1  ;;  %v6057_v5 = vadd.f32 %v6056_v2, %v14642_v29  ;;  %v17180_v2 = vld [vmem:[#allocation75_spill] sm:$0xff] }
 0xa93   :  { %v14727_v57 = vadd.f32 %v17170_v21, %v5560_v53  ;;  %v5562_v46 = vpop.f32.mrb[157].mxu1  ;;  %v17176_v21 = vld [vmem:[#allocation73_spill] sm:$0xff] }
 0xa95   :  { %17171 = vst [vmem:[#allocation19_spill] sm:$0xff] %v14727_v57 }
 0xa96   :  { %v5565_v41 = vpop.f32.mrb[158].mxu1 }
 0xa97   :  { %v14732_v49 = vadd.f32 %v17172_v4, %v5565_v41  ;;  %v5567_v28 = vpop.f32.mrb[159].mxu1  ;;  %v6058_v41 = vadd.f32 %v6057_v5, %v14645_v47 }
 0xa98   :  { %v17178_v28 = vld [vmem:[#allocation76_spill] sm:$0xff] }
 0xa99   :  { %17173 = vst [vmem:[#allocation22_spill] sm:$0xff] %v14732_v49  ;;  %v6059_v20 = vadd.f32 %v6058_v41, %v14648_v3  ;;  %v17182_v41 = vld [vmem:[#allocation78_spill] sm:$0xff] }
 0xa9a   :  { %v5570_v23 = vpop.f32.mrb[160].mxu1 }
 0xa9b   :  { %v14737_v42 = vadd.f32 %v17174_v31, %v5570_v23  ;;  %v5572_v6 = vpop.f32.mrb[161].mxu1  ;;  %v6060_v31 = vadd.f32 %v6059_v20, %v14651_v13 }
 0xa9d   :  { %17175 = vst [vmem:[#allocation23_spill] sm:$0xff] %v14737_v42  ;;  %v6061_v32 = vadd.f32 %v6060_v31, %v14654_v19  ;;  %v17184_v31 = vld [vmem:[#allocation77_spill] sm:$0xff] }
 0xa9e   :  { %v5575_v53 = vpop.f32.mrb[162].mxu1 }
 0xa9f   :  { %v14742_v46 = vadd.f32 %v17176_v21, %v5575_v53  ;;  %v5577_v59 = vpop.f32.mrb[163].mxu1  ;;  %v6062_v21 = vadd.f32 %v6061_v32, %v14657_v52 }
 0xaa1   :  { %17177 = vst [vmem:[#allocation29_spill] sm:$0xff] %v14742_v46  ;;  %v6063_v5 = vadd.f32 %v6062_v21, %v14660_v45  ;;  %v17186_v21 = vld [vmem:[#allocation80_spill] sm:$0xff] }
 0xaa2   :  { %v5580_v4 = vpop.f32.mrb[164].mxu1 }
 0xaa3   :  { %v14747_v35 = vadd.f32 %v17178_v28, %v5580_v4  ;;  %v5582_v23 = vpop.f32.mrb[165].mxu1  ;;  %v6064_v28 = vadd.f32 %v6063_v5, %v14663_v14 }
 0xaa5   :  { %17179 = vst [vmem:[#allocation26_spill] sm:$0xff] %v14747_v35  ;;  %v6065_v20 = vadd.f32 %v6064_v28, %v14666_v11  ;;  %v17188_v28 = vld [vmem:[#allocation79_spill] sm:$0xff] }
 0xaa6   :  { %v5585_v6 = vpop.f32.mrb[166].mxu1 }
 0xaa7   :  { %v14752_v29 = vadd.f32 %v17180_v2, %v5585_v6  ;;  %v5587_v53 = vpop.f32.mrb[167].mxu1  ;;  %v6066_v2 = vadd.f32 %v6065_v20, %v14669_v50 }
 0xaa9   :  { %17181 = vst [vmem:[#allocation28_spill] sm:$0xff] %v14752_v29  ;;  %v6067_v32 = vadd.f32 %v6066_v2, %v14672_v38 }
 0xaaa   :  { %v5590_v59 = vpop.f32.mrb[168].mxu1 }
 0xaab   :  { %v14757_v3 = vadd.f32 %v17182_v41, %v5590_v59  ;;  %v5592_v4 = vpop.f32.mrb[169].mxu1  ;;  %v6068_v41 = vadd.f32 %v6067_v32, %v14675_v51 }
 0xaad   :  { %17183 = vst [vmem:[#allocation24_spill] sm:$0xff] %v14757_v3  ;;  %v6069_v5 = vadd.f32 %v6068_v41, %v14678_v63 }
 0xaae   :  { %v5595_v23 = vpop.f32.mrb[170].mxu1 }
 0xaaf   :  { %v14762_v19 = vadd.f32 %v17184_v31, %v5595_v23  ;;  %v5597_v6 = vpop.f32.mrb[171].mxu1  ;;  %v6070_v31 = vadd.f32 %v6069_v5, %v14681_v0 }
 0xab1   :  { %17185 = vst [vmem:[#allocation6_spill] sm:$0xff] %v14762_v19  ;;  %v6071_v20 = vadd.f32 %v6070_v31, %v14687_v58 }
 0xab2   :  { %v5600_v53 = vpop.f32.mrb[172].mxu1 }
 0xab3   :  { %v14767_v45 = vadd.f32 %v17186_v21, %v5600_v53  ;;  %v5602_v59 = vpop.f32.mrb[173].mxu1  ;;  %v6072_v38 = vadd.f32 %v6071_v20, %v14692_v18 }
 0xab5   :  { %17187 = vst [vmem:[#allocation14_spill] sm:$0xff] %v14767_v45  ;;  %v6073_v53 = vadd.f32 %v6072_v38, %v14697_v12 }
 0xab6   :  { %v5605_v4 = vpop.f32.mrb[174].mxu1 }
 0xab7   :  { %v14772_v11 = vadd.f32 %v17188_v28, %v5605_v4  ;;  %v5607_v23 = vpop.f32.mrb[175].mxu1  ;;  %v6074_v32 = vadd.f32 %v6073_v53, %v14702_v27 }
 0xab9   :  { %v6075_v41 = vadd.f32 %v6074_v32, %v14707_v15 }
 0xaba   :  { %v5610_v6 = vpop.f32.mrb[176].mxu1 }
 0xabb   :  { %v5612_v2 = vpop.f32.mrb[177].mxu1  ;;  %v6076_v28 = vadd.f32 %v6075_v41, %v14712_v24 }
 0xabd   :  { %v6077_v5 = vadd.f32 %v6076_v28, %v14717_v9 }
 0xabe   :  { %v5615_v21 = vpop.f32.mrb[178].mxu1 }
 0xabf   :  { %v5617_v59 = vpop.f32.mrb[179].mxu1  ;;  %v6078_v2 = vadd.f32 %v6077_v5, %v14722_v36 }
 0xac1   :  { %v6079_v20 = vadd.f32 %v6078_v2, %v14727_v57 }
 0xac2   :  { %v5620_v63 = vpop.f32.mrb[180].mxu1 }
 0xac3   :  { %v5622_v4 = vpop.f32.mrb[181].mxu1  ;;  %v6080_v59 = vadd.f32 %v6079_v20, %v14732_v49 }
 0xac5   :  { %v6081_v53 = vadd.f32 %v6080_v59, %v14737_v42 }
 0xac6   :  { %v5625_v23 = vpop.f32.mrb[182].mxu1 }
 0xac7   :  { %v5627_v31 = vpop.f32.mrb[183].mxu1  ;;  %v6082_v4 = vadd.f32 %v6081_v53, %v14742_v46 }
 0xac9   :  { %v6083_v41 = vadd.f32 %v6082_v4, %v14747_v35 }
 0xaca   :  { %v5630_v18 = vpop.f32.mrb[184].mxu1 }
 0xacb   :  { %v5632_v38 = vpop.f32.mrb[185].mxu1  ;;  %v6084_v31 = vadd.f32 %v6083_v41, %v14752_v29 }
 0xacd   :  { %v6085_v5 = vadd.f32 %v6084_v31, %v14757_v3 }
 0xace   :  { %v5635_v27 = vpop.f32.mrb[186].mxu1 }
 0xacf   :  { %v5637_v32 = vpop.f32.mrb[187].mxu1  ;;  %v6086_v38 = vadd.f32 %v6085_v5, %v14762_v19 }
 0xad1   :  { %v6087_v20 = vadd.f32 %v6086_v38, %v14767_v45 }
 0xad2   :  { %v5640_v24 = vpop.f32.mrb[188].mxu1 }
 0xad3   :  { %v5642_v28 = vpop.f32.mrb[189].mxu1  ;;  %v6088_v32 = vadd.f32 %v6087_v20, %v14772_v11 }
 0xad6   :  { %v5645_v36 = vpop.f32.mrb[190].mxu1 }
 0xad7   :  { %v5647_v2 = vpop.f32.mrb[191].mxu1 }
 0xada   :  { %v7628_v49 = vpop.f32.mrb[192].mxu1 }
 0xadb   :  { %v6001_v59 = vadd.f32 %v7628_v49, %v5615_v21  ;;  %v5995_v42 = vpop.f32.mrb[193].mxu1 }
 0xadc   :  { %v5996_v53 = vadd.f32 %v5995_v42, %v5610_v6 }
 0xade   :  { %v6089_v46 = vadd.f32 %v6088_v32, %v5996_v53  ;;  %v7631_v4 = vpop.f32.mrb[194].mxu1 }
 0xadf   :  { %v6011_v35 = vadd.f32 %v7631_v4, %v5625_v23  ;;  %v6005_v28 = vpop.f32.mrb[195].mxu1 }
 0xae0   :  { %v6006_v57 = vadd.f32 %v6005_v28, %v5620_v63  ;;  %v6090_v41 = vadd.f32 %v6089_v46, %v6001_v59 }
 0xae2   :  { %v6091_v29 = vadd.f32 %v6090_v41, %v6006_v57  ;;  %v7634_v31 = vpop.f32.mrb[196].mxu1 }
 0xae3   :  { %v6021_v3 = vadd.f32 %v7634_v31, %v5635_v27  ;;  %v6015_v2 = vpop.f32.mrb[197].mxu1 }
 0xae4   :  { %v6016_v9 = vadd.f32 %v6015_v2, %v5630_v18  ;;  %v6092_v5 = vadd.f32 %v6091_v29, %v6011_v35 }
 0xae6   :  { %v6093_v19 = vadd.f32 %v6092_v5, %v6016_v9  ;;  %v7637_v38 = vpop.f32.mrb[198].mxu1 }
 0xae7   :  { %v6031_v45 = vadd.f32 %v7637_v38, %v5645_v36  ;;  %v6025_v49 = vpop.f32.mrb[199].mxu1 }
 0xae8   :  { %v6026_v21 = vadd.f32 %v6025_v49, %v5640_v24  ;;  %v6094_v15 = vadd.f32 %v6093_v19, %v6021_v3 }
 0xaea   :  { %v6095_v20 = vadd.f32 %v6094_v15, %v6026_v21 }
 0xaec   :  { %v6096_v42 = vadd.f32 %v6095_v20, %v6031_v45 }
 0xaee   :  { %v6097_v6 = vrot.slane %v6096_v42, 4 }
 0xaf0   :  { %v6098_v32 = vadd.f32 %v6097_v6, %v6096_v42 }
 0xaf2   :  { %v6099_v23 = vrot.slane %v6098_v32, 2 }
 0xaf4   :  { %v6100_v4 = vadd.f32 %v6099_v23, %v6098_v32 }
 0xaf6   :  { %v6101_v63 = vrot.slane %v6100_v4, 1 }
 0xaf8   :  { %v6102_v46 = vadd.f32 %v6101_v63, %v6100_v4 }
 0xafa   :  { %v14793_v28 = vmul.f32 0.001953125, %v6102_v46 }
 0xafc   :  { %v14796_v27 = vsub.f32 %v5996_v53, %v14793_v28  ;;  %v14799_v29 = vsub.f32 %v6001_v59, %v14793_v28  ;;  %v14802_v18 = vsub.f32 %v6006_v57, %v14793_v28  ;;  %v14805_v19 = vsub.f32 %v6011_v35, %v14793_v28 }
 0xafd   :  { %v14808_v15 = vsub.f32 %v6016_v9, %v14793_v28  ;;  %v14811_v24 = vsub.f32 %v6021_v3, %v14793_v28  ;;  %v14814_v36 = vsub.f32 %v6026_v21, %v14793_v28  ;;  %v14817_v53 = vsub.f32 %v6031_v45, %v14793_v28 }
 0xafe   :  { %17189 = vst [vmem:[#allocation9_spill] sm:$0xff] %v14799_v29  ;;  %17190 = vst [vmem:[#allocation5_spill] sm:$0xff] %v14802_v18  ;;  %v14821_v59 = vsub.f32 %v14558_v48, %v14793_v28  ;;  %v14825_v57 = vsub.f32 %v14562_v26, %v14793_v28  ;;  %v14829_v9 = vsub.f32 %v14566_v25, %v14793_v28 }
 0xaff   :  { %17191 = vst [vmem:[#allocation7_spill] sm:$0xff] %v14805_v19  ;;  %17192 = vst [vmem:[#allocation8_spill] sm:$0xff] %v14808_v15  ;;  %v14837_v45 = vsub.f32 %v14570_v61, %v14793_v28  ;;  %v14841_v48 = vsub.f32 %v14574_v22, %v14793_v28  ;;  %v14847_v25 = vsub.f32 %v14578_v30, %v14793_v28 }
 0xb00   :  { %17193 = vst [vmem:[#allocation31_spill] sm:$0xff] %v14811_v24  ;;  %v6168_v3 = vmul.f32 %v14821_v59, %v14821_v59  ;;  %v6169_v35 = vmul.f32 %v14825_v57, %v14825_v57  ;;  %v6170_v26 = vmul.f32 %v14829_v9, %v14829_v9  ;;  %v14853_v61 = vsub.f32 %v14582_v40, %v14793_v28 }
 0xb01   :  { %v6171_v31 = vmul.f32 %v14837_v45, %v14837_v45  ;;  %v6172_v22 = vmul.f32 %v14841_v48, %v14841_v48  ;;  %v14859_v38 = vsub.f32 %v14586_v7, %v14793_v28  ;;  %v6173_v30 = vmul.f32 %v14847_v25, %v14847_v25 }
 0xb02   :  { %v6232_v41 = vadd.f32 %v6169_v35, %v6168_v3  ;;  %v14865_v21 = vsub.f32 %v14590_v56, %v14793_v28  ;;  %v6174_v40 = vmul.f32 %v14853_v61, %v14853_v61  ;;  %v14871_v42 = vsub.f32 %v14593_v54, %v14793_v28 }
 0xb03   :  { %v6175_v7 = vmul.f32 %v14859_v38, %v14859_v38  ;;  %v14877_v32 = vsub.f32 %v14597_v55, %v14793_v28  ;;  %v14883_v4 = vsub.f32 %v14601_v10, %v14793_v28  ;;  %v14889_v46 = vsub.f32 %v14604_v60, %v14793_v28 }
 0xb04   :  { %v6233_v2 = vadd.f32 %v6232_v41, %v6170_v26  ;;  %v6176_v56 = vmul.f32 %v14865_v21, %v14865_v21  ;;  %v6177_v54 = vmul.f32 %v14871_v42, %v14871_v42  ;;  %v14895_v35 = vsub.f32 %v14608_v1, %v14793_v28 }
 0xb05   :  { %v6178_v55 = vmul.f32 %v14877_v32, %v14877_v32  ;;  %v6179_v10 = vmul.f32 %v14883_v4, %v14883_v4  ;;  %v14901_v41 = vsub.f32 %v14612_v62, %v14793_v28  ;;  %v6180_v60 = vmul.f32 %v14889_v46, %v14889_v46 }
 0xb06   :  { %v6234_v5 = vadd.f32 %v6233_v2, %v6171_v31  ;;  %v14907_v2 = vsub.f32 %v14615_v34, %v14793_v28  ;;  %v6181_v1 = vmul.f32 %v14895_v35, %v14895_v35 }
 0xb07   :  { %v6182_v62 = vmul.f32 %v14901_v41, %v14901_v41 }
 0xb08   :  { %v6235_v49 = vadd.f32 %v6234_v5, %v6172_v22  ;;  %v14913_v5 = vsub.f32 %v14618_v8, %v14793_v28  ;;  %v6183_v34 = vmul.f32 %v14907_v2, %v14907_v2 }
 0xb0a   :  { %v6236_v20 = vadd.f32 %v6235_v49, %v6173_v30  ;;  %v14919_v49 = vsub.f32 %v14621_v44, %v14793_v28  ;;  %v6184_v8 = vmul.f32 %v14913_v5, %v14913_v5 }
 0xb0c   :  { %v6237_v6 = vadd.f32 %v6236_v20, %v6174_v40  ;;  %v14925_v20 = vsub.f32 %v14624_v37, %v14793_v28  ;;  %v6185_v44 = vmul.f32 %v14919_v49, %v14919_v49 }
 0xb0e   :  { %v6238_v23 = vadd.f32 %v6237_v6, %v6175_v7  ;;  %v14931_v6 = vsub.f32 %v14627_v39, %v14793_v28  ;;  %v6186_v37 = vmul.f32 %v14925_v20, %v14925_v20 }
 0xb10   :  { %v6239_v63 = vadd.f32 %v6238_v23, %v6176_v56  ;;  %v14937_v23 = vsub.f32 %v14630_v17, %v14793_v28  ;;  %v6187_v39 = vmul.f32 %v14931_v6, %v14931_v6 }
 0xb12   :  { %v6240_v3 = vadd.f32 %v6239_v63, %v6177_v54  ;;  %v14943_v63 = vsub.f32 %v14633_v16, %v14793_v28  ;;  %v6188_v17 = vmul.f32 %v14937_v23, %v14937_v23 }
 0xb14   :  { %v6241_v26 = vadd.f32 %v6240_v3, %v6178_v55  ;;  %v14949_v3 = vsub.f32 %v14636_v33, %v14793_v28  ;;  %v6189_v16 = vmul.f32 %v14943_v63, %v14943_v63 }
 0xb16   :  { %v6242_v31 = vadd.f32 %v6241_v26, %v6179_v10  ;;  %v14955_v26 = vsub.f32 %v14639_v43, %v14793_v28  ;;  %v6190_v33 = vmul.f32 %v14949_v3, %v14949_v3 }
 0xb18   :  { %v6243_v22 = vadd.f32 %v6242_v31, %v6180_v60  ;;  %v17194_v31 = vld [vmem:[#allocation11_spill] sm:$0xff]  ;;  %v6191_v43 = vmul.f32 %v14955_v26, %v14955_v26 }
 0xb1a   :  { %v6244_v30 = vadd.f32 %v6243_v22, %v6181_v1  ;;  %v14961_v1 = vsub.f32 %v17194_v31, %v14793_v28 }
 0xb1c   :  { %v6245_v40 = vadd.f32 %v6244_v30, %v6182_v62  ;;  %v14967_v62 = vsub.f32 %v14645_v47, %v14793_v28 }
 0xb1e   :  { %v6246_v7 = vadd.f32 %v6245_v40, %v6183_v34  ;;  %v17195_v34 = vld [vmem:[#allocation15_spill] sm:$0xff]  ;;  %v6193_v47 = vmul.f32 %v14967_v62, %v14967_v62 }
 0xb1f   :  { %v14973_v40 = vsub.f32 %v17195_v34, %v14793_v28 }
 0xb20   :  { %v6247_v56 = vadd.f32 %v6246_v7, %v6184_v8  ;;  %v6192_v8 = vmul.f32 %v14961_v1, %v14961_v1 }
 0xb22   :  { %v6248_v54 = vadd.f32 %v6247_v56, %v6185_v44  ;;  %v14979_v44 = vsub.f32 %v14651_v13, %v14793_v28 }
 0xb24   :  { %v6249_v55 = vadd.f32 %v6248_v54, %v6186_v37  ;;  %v17196_v37 = vld [vmem:[#allocation4_spill] sm:$0xff]  ;;  %v6195_v13 = vmul.f32 %v14979_v44, %v14979_v44 }
 0xb25   :  { %v14985_v54 = vsub.f32 %v17196_v37, %v14793_v28  ;;  %v17199_v37 = vld [vmem:[#allocation32_spill] sm:$0xff] }
 0xb26   :  { %v6250_v10 = vadd.f32 %v6249_v55, %v6187_v39  ;;  %v6194_v39 = vmul.f32 %v14973_v40, %v14973_v40 }
 0xb27   :  { %v6196_v31 = vmul.f32 %v14985_v54, %v14985_v54 }
 0xb28   :  { %v6251_v60 = vadd.f32 %v6250_v10, %v6188_v17  ;;  %v14991_v17 = vsub.f32 %v14657_v52, %v14793_v28 }
 0xb2a   :  { %v6252_v22 = vadd.f32 %v6251_v60, %v6189_v16  ;;  %v17197_v16 = vld [vmem:[#allocation12_spill] sm:$0xff]  ;;  %v6197_v52 = vmul.f32 %v14991_v17, %v14991_v17 }
 0xb2b   :  { %v14997_v60 = vsub.f32 %v17197_v16, %v14793_v28 }
 0xb2c   :  { %v6253_v30 = vadd.f32 %v6252_v22, %v6190_v33  ;;  %v15003_v22 = vsub.f32 %v14663_v14, %v14793_v28 }
 0xb2e   :  { %v6254_v7 = vadd.f32 %v6253_v30, %v6191_v43  ;;  %v17198_v30 = vld [vmem:[#allocation10_spill] sm:$0xff]  ;;  %v6199_v14 = vmul.f32 %v15003_v22, %v15003_v22 }
 0xb2f   :  { %v15009_v34 = vsub.f32 %v17198_v30, %v14793_v28  ;;  %v15039_v30 = vsub.f32 %v14681_v0, %v14793_v28 }
 0xb30   :  { %v6255_v56 = vadd.f32 %v6254_v7, %v6192_v8  ;;  %v6198_v8 = vmul.f32 %v14997_v60, %v14997_v60 }
 0xb31   :  { %v6205_v0 = vmul.f32 %v15039_v30, %v15039_v30 }
 0xb32   :  { %v6256_v55 = vadd.f32 %v6255_v56, %v6193_v47  ;;  %v15015_v47 = vsub.f32 %v14669_v50, %v14793_v28 }
 0xb34   :  { %v6257_v10 = vadd.f32 %v6256_v55, %v6194_v39  ;;  %v15021_v39 = vsub.f32 %v17199_v37, %v14793_v28  ;;  %v6200_v55 = vmul.f32 %v15009_v34, %v15009_v34  ;;  %v6201_v50 = vmul.f32 %v15015_v47, %v15015_v47  ;;  %v17202_v37 = vld [vmem:[#allocation38_spill] sm:$0xff] }
 0xb36   :  { %v6258_v33 = vadd.f32 %v6257_v10, %v6195_v13  ;;  %v15027_v10 = vsub.f32 %v14675_v51, %v14793_v28 }
 0xb38   :  { %v6259_v43 = vadd.f32 %v6258_v33, %v6196_v31  ;;  %v17200_v31 = vld [vmem:[#allocation35_spill] sm:$0xff]  ;;  %v6203_v51 = vmul.f32 %v15027_v10, %v15027_v10 }
 0xb39   :  { %v15033_v33 = vsub.f32 %v17200_v31, %v14793_v28  ;;  %v17205_v31 = vld [vmem:[#allocation41_spill] sm:$0xff] }
 0xb3a   :  { %v6260_v7 = vadd.f32 %v6259_v43, %v6197_v52  ;;  %v6202_v52 = vmul.f32 %v15021_v39, %v15021_v39 }
 0xb3c   :  { %v6261_v56 = vadd.f32 %v6260_v7, %v6198_v8  ;;  %v15045_v7 = vsub.f32 %v14687_v58, %v14793_v28 }
 0xb3e   :  { %v6262_v13 = vadd.f32 %v6261_v56, %v6199_v14  ;;  %17201 = vst [vmem:[#allocation30_spill] sm:$0xff] %v15045_v7  ;;  %v6204_v14 = vmul.f32 %v15033_v33, %v15033_v33  ;;  %v6206_v58 = vmul.f32 %v15045_v7, %v15045_v7 }
 0xb40   :  { %v6263_v16 = vadd.f32 %v6262_v13, %v6200_v55  ;;  %v15051_v55 = vsub.f32 %v17202_v37, %v14793_v28 }
 0xb42   :  { %v6264_v43 = vadd.f32 %v6263_v16, %v6201_v50  ;;  %17203 = vst [vmem:[#allocation34_spill] sm:$0xff] %v15051_v55  ;;  %v15057_v50 = vsub.f32 %v14697_v12, %v14793_v28 }
 0xb44   :  { %v6265_v8 = vadd.f32 %v6264_v43, %v6202_v52  ;;  %17204 = vst [vmem:[#allocation33_spill] sm:$0xff] %v15057_v50  ;;  %v15063_v52 = vsub.f32 %v17205_v31, %v14793_v28  ;;  %v6207_v43 = vmul.f32 %v15051_v55, %v15051_v55  ;;  %v6208_v12 = vmul.f32 %v15057_v50, %v15057_v50  ;;  %v17211_v31 = vld [vmem:[#allocation3_spill] sm:$0xff] }
 0xb45   :  { %v15081_v55 = vsub.f32 %v17211_v31, %v14793_v28  ;;  %v17217_v31 = vld [vmem:[#allocation22_spill] sm:$0xff] }
 0xb46   :  { %v6266_v56 = vadd.f32 %v6265_v8, %v6203_v51  ;;  %17206 = vst [vmem:[#allocation37_spill] sm:$0xff] %v15063_v52  ;;  %v17207_v8 = vld [vmem:[#allocation44_spill] sm:$0xff] }
 0xb47   :  { %v15069_v37 = vsub.f32 %v17207_v8, %v14793_v28  ;;  %17212 = vst [vmem:[#allocation25_spill] sm:$0xff] %v15081_v55  ;;  %v17213_v8 = vld [vmem:[#allocation16_spill] sm:$0xff] }
 0xb48   :  { %v6267_v13 = vadd.f32 %v6266_v56, %v6204_v14  ;;  %v17209_v56 = vld [vmem:[#allocation13_spill] sm:$0xff]  ;;  %v15087_v50 = vsub.f32 %v17213_v8, %v14793_v28  ;;  %v17219_v8 = vld [vmem:[#allocation23_spill] sm:$0xff] }
 0xb49   :  { %17208 = vst [vmem:[#allocation36_spill] sm:$0xff] %v15069_v37  ;;  %v15075_v7 = vsub.f32 %v17209_v56, %v14793_v28  ;;  %v17215_v56 = vld [vmem:[#allocation19_spill] sm:$0xff] }
 0xb4a   :  { %v6268_v16 = vadd.f32 %v6267_v13, %v6205_v0  ;;  %v6209_v0 = vmul.f32 %v15063_v52, %v15063_v52  ;;  %17214 = vst [vmem:[#allocation39_spill] sm:$0xff] %v15087_v50  ;;  %v15093_v52 = vsub.f32 %v17215_v56, %v14793_v28  ;;  %v17221_v56 = vld [vmem:[#allocation29_spill] sm:$0xff] }
 0xb4b   :  { %17210 = vst [vmem:[#allocation40_spill] sm:$0xff] %v15075_v7 }
 0xb4c   :  { %v6269_v51 = vadd.f32 %v6268_v16, %v6206_v58  ;;  %v6210_v58 = vmul.f32 %v15069_v37, %v15069_v37  ;;  %17216 = vst [vmem:[#allocation27_spill] sm:$0xff] %v15093_v52  ;;  %v15099_v37 = vsub.f32 %v17217_v31, %v14793_v28  ;;  %v17223_v31 = vld [vmem:[#allocation26_spill] sm:$0xff] }
 0xb4e   :  { %v6270_v14 = vadd.f32 %v6269_v51, %v6207_v43  ;;  %v6211_v43 = vmul.f32 %v15075_v7, %v15075_v7  ;;  %17218 = vst [vmem:[#allocation43_spill] sm:$0xff] %v15099_v37  ;;  %v15105_v7 = vsub.f32 %v17219_v8, %v14793_v28  ;;  %v17224_v8 = vld [vmem:[#allocation28_spill] sm:$0xff] }
 0xb50   :  { %v6271_v13 = vadd.f32 %v6270_v14, %v6208_v12  ;;  %v6212_v12 = vmul.f32 %v15081_v55, %v15081_v55  ;;  %17220 = vst [vmem:[#allocation42_spill] sm:$0xff] %v15105_v7  ;;  %v15111_v55 = vsub.f32 %v17221_v56, %v14793_v28  ;;  %v17225_v56 = vld [vmem:[#allocation24_spill] sm:$0xff] }
 0xb52   :  { %v6272_v16 = vadd.f32 %v6271_v13, %v6209_v0  ;;  %v6213_v0 = vmul.f32 %v15087_v50, %v15087_v50  ;;  %17222 = vst [vmem:[#allocation17_spill] sm:$0xff] %v15111_v55  ;;  %v15117_v50 = vsub.f32 %v17223_v31, %v14793_v28  ;;  %v17227_v31 = vld [vmem:[#allocation6_spill] sm:$0xff] }
 0xb54   :  { %v6273_v51 = vadd.f32 %v6272_v16, %v6210_v58  ;;  %v6214_v58 = vmul.f32 %v15093_v52, %v15093_v52  ;;  %v15123_v52 = vsub.f32 %v17224_v8, %v14793_v28  ;;  %v17228_v8 = vld [vmem:[#allocation14_spill] sm:$0xff] }
 0xb56   :  { %v6274_v14 = vadd.f32 %v6273_v51, %v6211_v43  ;;  %v6215_v43 = vmul.f32 %v15099_v37, %v15099_v37  ;;  %v15129_v37 = vsub.f32 %v17225_v56, %v14793_v28  ;;  %v15147_v56 = vsub.f32 %v14772_v11, %v14793_v28 }
 0xb57   :  { %v6225_v11 = vmul.f32 %v14799_v29, %v14799_v29 }
 0xb58   :  { %v6275_v13 = vadd.f32 %v6274_v14, %v6212_v12  ;;  %v6216_v12 = vmul.f32 %v15105_v7, %v15105_v7  ;;  %17226 = vst [vmem:[#allocation45_spill] sm:$0xff] %v15129_v37  ;;  %v15135_v7 = vsub.f32 %v17227_v31, %v14793_v28 }
 0xb5a   :  { %v6276_v16 = vadd.f32 %v6275_v13, %v6213_v0  ;;  %v6217_v0 = vmul.f32 %v15111_v55, %v15111_v55  ;;  %v15141_v55 = vsub.f32 %v17228_v8, %v14793_v28 }
 0xb5c   :  { %v6277_v51 = vadd.f32 %v6276_v16, %v6214_v58  ;;  %v6218_v58 = vmul.f32 %v15117_v50, %v15117_v50  ;;  %v6222_v31 = vmul.f32 %v15141_v55, %v15141_v55 }
 0xb5e   :  { %v6278_v14 = vadd.f32 %v6277_v51, %v6215_v43  ;;  %v6219_v43 = vmul.f32 %v15123_v52, %v15123_v52 }
 0xb60   :  { %v6279_v13 = vadd.f32 %v6278_v14, %v6216_v12  ;;  %v6220_v12 = vmul.f32 %v15129_v37, %v15129_v37  ;;  %v6224_v37 = vmul.f32 %v14796_v27, %v14796_v27 }
 0xb62   :  { %v6280_v16 = vadd.f32 %v6279_v13, %v6217_v0  ;;  %v6221_v0 = vmul.f32 %v15135_v7, %v15135_v7 }
 0xb64   :  { %v6281_v51 = vadd.f32 %v6280_v16, %v6218_v58  ;;  %v6223_v16 = vmul.f32 %v15147_v56, %v15147_v56 }
 0xb66   :  { %v6282_v14 = vadd.f32 %v6281_v51, %v6219_v43  ;;  %v6226_v51 = vmul.f32 %v14802_v18, %v14802_v18 }
 0xb68   :  { %v6283_v13 = vadd.f32 %v6282_v14, %v6220_v12  ;;  %v6227_v14 = vmul.f32 %v14805_v19, %v14805_v19 }
 0xb6a   :  { %v6284_v58 = vadd.f32 %v6283_v13, %v6221_v0  ;;  %v6228_v13 = vmul.f32 %v14808_v15, %v14808_v15 }
 0xb6c   :  { %v6285_v8 = vadd.f32 %v6284_v58, %v6222_v31  ;;  %v6229_v58 = vmul.f32 %v14811_v24, %v14811_v24 }
 0xb6e   :  { %v6286_v43 = vadd.f32 %v6285_v8, %v6223_v16  ;;  %v6230_v8 = vmul.f32 %v14814_v36, %v14814_v36 }
 0xb70   :  { %v6287_v28 = vadd.f32 %v6286_v43, %v6224_v37  ;;  %v6231_v43 = vmul.f32 %v14817_v53, %v14817_v53 }
 0xb72   :  { %v6288_v12 = vadd.f32 %v6287_v28, %v6225_v11 }
 0xb74   :  { %v6289_v0 = vadd.f32 %v6288_v12, %v6226_v51 }
 0xb76   :  { %v6290_v31 = vadd.f32 %v6289_v0, %v6227_v14 }
 0xb78   :  { %v6291_v16 = vadd.f32 %v6290_v31, %v6228_v13 }
 0xb7a   :  { %v6292_v37 = vadd.f32 %v6291_v16, %v6229_v58  ;;  %v17230_v58 = vld [vmem:[#allocation34_spill] sm:$0xff]  ;;  %v17231_v16 = vld [vmem:[#allocation33_spill] sm:$0xff] }
 0xb7c   :  { %v6293_v11 = vadd.f32 %v6292_v37, %v6230_v8  ;;  %v17232_v8 = vld [vmem:[#allocation37_spill] sm:$0xff]  ;;  %v17233_v37 = vld [vmem:[#allocation36_spill] sm:$0xff] }
 0xb7e   :  { %v6294_v28 = vadd.f32 %v6293_v11, %v6231_v43  ;;  %v17234_v43 = vld [vmem:[#allocation40_spill] sm:$0xff] }
 0xb80   :  { %v6295_v18 = vrot.slane %v6294_v28, 4 }
 0xb82   :  { %v6296_v19 = vadd.f32 %v6295_v18, %v6294_v28  ;;  %v17235_v28 = vld [vmem:[#allocation25_spill] sm:$0xff] }
 0xb84   :  { %v6297_v51 = vrot.slane %v6296_v19, 2 }
 0xb86   :  { %v6298_v12 = vadd.f32 %v6297_v51, %v6296_v19 }
 0xb88   :  { %v6299_v29 = vrot.slane %v6298_v12, 1 }
 0xb8a   :  { %v6300_v15 = vadd.f32 %v6299_v29, %v6298_v12  ;;  %v17236_v12 = vld [vmem:[#allocation39_spill] sm:$0xff] }
 0xb8c   :  { %v6301_v14 = vmul.f32 0.001953125, %v6300_v15 }
 0xb8e   :  { %v6302_v0 = vadd.f32 1e-05, %v6301_v14 }
 0xb90   :  { %8874 = vrsqrt.f32 %v6302_v0  ;;  %v17237_v0 = vld [vmem:[#allocation27_spill] sm:$0xff] }
 0xb9a   :  { %v15171_v24 = vpop.eup %8874 }
 0xb9b   :  { %v15175_v13 = vmul.f32 %v15171_v24, %v14821_v59  ;;  %v15179_v31 = vmul.f32 %v15171_v24, %v14825_v57  ;;  %v15183_v18 = vmul.f32 %v15171_v24, %v14829_v9  ;;  %v15187_v29 = vmul.f32 %v15171_v24, %v14837_v45 }
 0xb9c   :  { %v15191_v19 = vmul.f32 %v15171_v24, %v14841_v48  ;;  %v15195_v15 = vmul.f32 %v15171_v24, %v14847_v25  ;;  %v15199_v59 = vmul.f32 %v15171_v24, %v14853_v61  ;;  %v15203_v57 = vmul.f32 %v15171_v24, %v14859_v38 }
 0xb9d   :  { %v15207_v9 = vmul.f32 %v15171_v24, %v14865_v21  ;;  %v15211_v45 = vmul.f32 %v15171_v24, %v14871_v42  ;;  %v15215_v48 = vmul.f32 %v15171_v24, %v14877_v32  ;;  %v15219_v25 = vmul.f32 %v15171_v24, %v14883_v4 }
 0xb9e   :  { %v15223_v61 = vmul.f32 %v15171_v24, %v14889_v46  ;;  %v15227_v38 = vmul.f32 %v15171_v24, %v14895_v35  ;;  %v15231_v21 = vmul.f32 %v15171_v24, %v14901_v41  ;;  %v15235_v42 = vmul.f32 %v15171_v24, %v14907_v2 }
 0xb9f   :  { %v15239_v32 = vmul.f32 %v15171_v24, %v14913_v5  ;;  %v15243_v4 = vmul.f32 %v15171_v24, %v14919_v49  ;;  %v15247_v46 = vmul.f32 %v15171_v24, %v14925_v20  ;;  %v15251_v35 = vmul.f32 %v15171_v24, %v14931_v6 }
 0xba0   :  { %v15255_v41 = vmul.f32 %v15171_v24, %v14937_v23  ;;  %v15259_v2 = vmul.f32 %v15171_v24, %v14943_v63  ;;  %v15263_v5 = vmul.f32 %v15171_v24, %v14949_v3  ;;  %v15267_v49 = vmul.f32 %v15171_v24, %v14955_v26 }
 0xba1   :  { %v15271_v20 = vmul.f32 %v15171_v24, %v14961_v1  ;;  %v15275_v6 = vmul.f32 %v15171_v24, %v14967_v62  ;;  %v15279_v23 = vmul.f32 %v15171_v24, %v14973_v40  ;;  %v15283_v63 = vmul.f32 %v15171_v24, %v14979_v44 }
 0xba2   :  { %v15287_v3 = vmul.f32 %v15171_v24, %v14985_v54  ;;  %v15291_v26 = vmul.f32 %v15171_v24, %v14991_v17  ;;  %v15295_v1 = vmul.f32 %v15171_v24, %v14997_v60  ;;  %v15299_v62 = vmul.f32 %v15171_v24, %v15003_v22 }
 0xba3   :  { %v15303_v40 = vmul.f32 %v15171_v24, %v15009_v34  ;;  %v15307_v44 = vmul.f32 %v15171_v24, %v15015_v47  ;;  %v15311_v54 = vmul.f32 %v15171_v24, %v15021_v39  ;;  %v15315_v17 = vmul.f32 %v15171_v24, %v15027_v10  ;;  %v17229_v34 = vld [vmem:[#allocation30_spill] sm:$0xff] }
 0xba4   :  { %v15319_v60 = vmul.f32 %v15171_v24, %v15033_v33  ;;  %v15323_v22 = vmul.f32 %v15171_v24, %v15039_v30  ;;  %v15327_v47 = vmul.f32 %v15171_v24, %v17229_v34  ;;  %v15331_v39 = vmul.f32 %v15171_v24, %v17230_v58  ;;  %v17239_v58 = vld [vmem:[#allocation43_spill] sm:$0xff] }
 0xba5   :  { %v15335_v10 = vmul.f32 %v15171_v24, %v17231_v16  ;;  %v15339_v33 = vmul.f32 %v15171_v24, %v17232_v8  ;;  %v15343_v30 = vmul.f32 %v15171_v24, %v17233_v37  ;;  %v15347_v11 = vmul.f32 %v15171_v24, %v17234_v43  ;;  %v17240_v8 = vld [vmem:[#allocation42_spill] sm:$0xff]  ;;  %v17241_v43 = vld [vmem:[#allocation17_spill] sm:$0xff] }
 0xba6   :  { %v15351_v51 = vmul.f32 %v15171_v24, %v17235_v28  ;;  %v15355_v14 = vmul.f32 %v15171_v24, %v17236_v12  ;;  %v15359_v34 = vmul.f32 %v15171_v24, %v17237_v0  ;;  %v15363_v16 = vmul.f32 %v15171_v24, %v17239_v58 }
 0xba7   :  { %v15367_v37 = vmul.f32 %v15171_v24, %v17240_v8  ;;  %v15371_v28 = vmul.f32 %v15171_v24, %v17241_v43  ;;  %v15375_v12 = vmul.f32 %v15171_v24, %v15117_v50  ;;  %v15379_v0 = vmul.f32 %v15171_v24, %v15123_v52  ;;  %v15400_v52 = vld [vmem:[%s16596_s5] ss:$0 sm:$0xff] }
 0xba8   :  { %17238 = vst [vmem:[#allocation47_spill] sm:$0xff] %v15359_v34  ;;  %v17244_v34 = vld [vmem:[#allocation45_spill] sm:$0xff]  ;;  %v15387_v8 = vmul.f32 %v15171_v24, %v15135_v7  ;;  %v15391_v43 = vmul.f32 %v15171_v24, %v15141_v55  ;;  %v15395_v50 = vmul.f32 %v15171_v24, %v15147_v56 }
 0xba9   :  { %17242 = vst [vmem:[#allocation46_spill] sm:$0xff] %v15375_v12  ;;  %17243 = vst [vmem:[#allocation49_spill] sm:$0xff] %v15379_v0  ;;  %v15383_v58 = vmul.f32 %v15171_v24, %v17244_v34  ;;  %v15404_v34 = vmul.f32 %v15171_v24, %v14796_v27  ;;  %v17253_v12 = vld [vmem:[#allocation31_spill] sm:$0xff] }
 0xbaa   :  { %17246 = vst [vmem:[#allocation51_spill] sm:$0xff] %v15387_v8  ;;  %17247 = vst [vmem:[#allocation50_spill] sm:$0xff] %v15391_v43  ;;  %v17250_v8 = vld [vmem:[#allocation5_spill] sm:$0xff]  ;;  %v17251_v43 = vld [vmem:[#allocation7_spill] sm:$0xff]  ;;  %v15424_v27 = vmul.f32 %v15171_v24, %v17253_v12  ;;  %v15444_v12 = vmul.f32 %v15400_v52, %v15183_v18  ;;  %v15468_v18 = vmul.f32 %v15400_v52, %v15207_v9 }
 0xbab   :  { %17245 = vst [vmem:[#allocation48_spill] sm:$0xff] %v15383_v58  ;;  %17248 = vst [vmem:[#allocation53_spill] sm:$0xff] %v15395_v50  ;;  %v17249_v58 = vld [vmem:[#allocation9_spill] sm:$0xff]  ;;  %v15412_v55 = vmul.f32 %v15171_v24, %v17250_v8  ;;  %v15416_v56 = vmul.f32 %v15171_v24, %v17251_v43  ;;  %v17252_v50 = vld [vmem:[#allocation8_spill] sm:$0xff]  ;;  %v15432_v8 = vmul.f32 %v15171_v24, %v14817_v53 }
 0xbac   :  { %v15408_v7 = vmul.f32 %v15171_v24, %v17249_v58  ;;  %v15420_v0 = vmul.f32 %v15171_v24, %v17252_v50  ;;  %v15428_v58 = vmul.f32 %v15171_v24, %v14814_v36  ;;  %v15436_v43 = vmul.f32 %v15400_v52, %v15175_v13 }
 0xbad   :  { %v15440_v50 = vmul.f32 %v15400_v52, %v15179_v31  ;;  %v15448_v36 = vmul.f32 %v15400_v52, %v15187_v29  ;;  %v15452_v24 = vmul.f32 %v15400_v52, %v15191_v19  ;;  %v15456_v53 = vmul.f32 %v15400_v52, %v15195_v15 }
 0xbae   :  { %v15460_v13 = vmul.f32 %v15400_v52, %v15199_v59  ;;  %v15464_v31 = vmul.f32 %v15400_v52, %v15203_v57  ;;  %v15472_v29 = vmul.f32 %v15400_v52, %v15211_v45  ;;  %v15476_v19 = vmul.f32 %v15400_v52, %v15215_v48 }
 0xbaf   :  { %v15480_v15 = vmul.f32 %v15400_v52, %v15219_v25  ;;  %v15484_v59 = vmul.f32 %v15400_v52, %v15223_v61  ;;  %v15488_v57 = vmul.f32 %v15400_v52, %v15227_v38  ;;  %v15492_v9 = vmul.f32 %v15400_v52, %v15231_v21 }
 0xbb0   :  { %v15496_v45 = vmul.f32 %v15400_v52, %v15235_v42  ;;  %v15500_v48 = vmul.f32 %v15400_v52, %v15239_v32  ;;  %v15504_v25 = vmul.f32 %v15400_v52, %v15243_v4  ;;  %v15508_v61 = vmul.f32 %v15400_v52, %v15247_v46 }
 0xbb1   :  { %v15512_v38 = vmul.f32 %v15400_v52, %v15251_v35  ;;  %v15516_v21 = vmul.f32 %v15400_v52, %v15255_v41  ;;  %v15520_v42 = vmul.f32 %v15400_v52, %v15259_v2  ;;  %v15524_v32 = vmul.f32 %v15400_v52, %v15263_v5 }
 0xbb2   :  { %v15528_v4 = vmul.f32 %v15400_v52, %v15267_v49  ;;  %v15532_v46 = vmul.f32 %v15400_v52, %v15271_v20  ;;  %v15536_v35 = vmul.f32 %v15400_v52, %v15275_v6  ;;  %v15540_v41 = vmul.f32 %v15400_v52, %v15279_v23 }
 0xbb3   :  { %v15544_v2 = vmul.f32 %v15400_v52, %v15283_v63  ;;  %v15548_v5 = vmul.f32 %v15400_v52, %v15287_v3  ;;  %v15552_v49 = vmul.f32 %v15400_v52, %v15291_v26  ;;  %v15556_v20 = vmul.f32 %v15400_v52, %v15295_v1 }
 0xbb4   :  { %v15560_v6 = vmul.f32 %v15400_v52, %v15299_v62  ;;  %v15564_v23 = vmul.f32 %v15400_v52, %v15303_v40  ;;  %v15568_v63 = vmul.f32 %v15400_v52, %v15307_v44  ;;  %v15572_v3 = vmul.f32 %v15400_v52, %v15311_v54 }
 0xbb5   :  { %v15576_v26 = vmul.f32 %v15400_v52, %v15315_v17  ;;  %v15580_v1 = vmul.f32 %v15400_v52, %v15319_v60  ;;  %v15584_v62 = vmul.f32 %v15400_v52, %v15323_v22  ;;  %v15588_v40 = vmul.f32 %v15400_v52, %v15327_v47 }
 0xbb6   :  { %v15592_v44 = vmul.f32 %v15400_v52, %v15331_v39  ;;  %v15596_v54 = vmul.f32 %v15400_v52, %v15335_v10  ;;  %v15600_v17 = vmul.f32 %v15400_v52, %v15339_v33  ;;  %v15604_v60 = vmul.f32 %v15400_v52, %v15343_v30  ;;  %v17256_v10 = vld [vmem:[#allocation47_spill] sm:$0xff] }
 0xbb7   :  { %v15608_v22 = vmul.f32 %v15400_v52, %v15347_v11  ;;  %v15612_v47 = vmul.f32 %v15400_v52, %v15351_v51  ;;  %v15616_v39 = vmul.f32 %v15400_v52, %v15355_v14  ;;  %v15620_v33 = vmul.f32 %v15400_v52, %v17256_v10 }
 0xbb8   :  { %v15624_v30 = vmul.f32 %v15400_v52, %v15363_v16  ;;  %v15628_v11 = vmul.f32 %v15400_v52, %v15367_v37  ;;  %v15632_v51 = vmul.f32 %v15400_v52, %v15371_v28 }
 0xbb9   :  { %17254 = vst [vmem:[#allocation52_spill] sm:$0xff] %v15612_v47  ;;  %17255 = vst [vmem:[#allocation54_spill] sm:$0xff] %v15616_v39  ;;  %v17261_v47 = vld [vmem:[#allocation46_spill] sm:$0xff]  ;;  %v17262_v39 = vld [vmem:[#allocation49_spill] sm:$0xff] }
 0xbba   :  { %17257 = vst [vmem:[#allocation18_spill] sm:$0xff] %v15620_v33  ;;  %17258 = vst [vmem:[#allocation55_spill] sm:$0xff] %v15624_v30  ;;  %v15636_v14 = vmul.f32 %v15400_v52, %v17261_v47  ;;  %v15640_v10 = vmul.f32 %v15400_v52, %v17262_v39  ;;  %v17263_v33 = vld [vmem:[#allocation48_spill] sm:$0xff]  ;;  %v17264_v30 = vld [vmem:[#allocation51_spill] sm:$0xff] }
 0xbbb   :  { %17259 = vst [vmem:[#allocation20_spill] sm:$0xff] %v15628_v11  ;;  %17260 = vst [vmem:[#allocation56_spill] sm:$0xff] %v15632_v51  ;;  %v15644_v16 = vmul.f32 %v15400_v52, %v17263_v33  ;;  %v15648_v37 = vmul.f32 %v15400_v52, %v17264_v30  ;;  %v17265_v11 = vld [vmem:[#allocation50_spill] sm:$0xff]  ;;  %v17266_v51 = vld [vmem:[#allocation53_spill] sm:$0xff]  ;;  %v15665_v33 = vmul.f32 %v15400_v52, %v15404_v34 }
 0xbbc   :  { %v15652_v28 = vmul.f32 %v15400_v52, %v17265_v11  ;;  %v15656_v47 = vmul.f32 %v15400_v52, %v17266_v51  ;;  %v15661_v39 = vld [vmem:[%s16597_s6] ss:$0 sm:$0xff]  ;;  %v15669_v30 = vmul.f32 %v15400_v52, %v15408_v7  ;;  %v15673_v11 = vmul.f32 %v15400_v52, %v15412_v55 }
 0xbbd   :  { %v15677_v51 = vmul.f32 %v15400_v52, %v15416_v56  ;;  %v15685_v34 = vmul.f32 %v15400_v52, %v15424_v27  ;;  %v15689_v7 = vmul.f32 %v15400_v52, %v15428_v58  ;;  %v15693_v55 = vmul.f32 %v15400_v52, %v15432_v8 }
 0xbbe   :  { %17267 = vst [vmem:[#allocation21_spill] sm:$0xff] %v15656_v47  ;;  %v15681_v47 = vmul.f32 %v15400_v52, %v15420_v0  ;;  %v15697_v56 = vadd.f32 %v15661_v39, %v15436_v43  ;;  %v15701_v0 = vadd.f32 %v15661_v39, %v15440_v50  ;;  %v15705_v27 = vadd.f32 %v15661_v39, %v15444_v12 }
 0xbbf   :  { %v15709_v58 = vadd.f32 %v15661_v39, %v15448_v36  ;;  %v15713_v52 = vadd.f32 %v15661_v39, %v15452_v24  ;;  %v15717_v8 = vadd.f32 %v15661_v39, %v15456_v53  ;;  %v15721_v43 = vadd.f32 %v15661_v39, %v15460_v13 }
 0xbc0   :  { %v15725_v50 = vadd.f32 %v15661_v39, %v15464_v31  ;;  %v15729_v12 = vadd.f32 %v15661_v39, %v15468_v18  ;;  %v15733_v36 = vadd.f32 %v15661_v39, %v15472_v29  ;;  %v15737_v24 = vadd.f32 %v15661_v39, %v15476_v19 }
 0xbc1   :  { %v15741_v53 = vadd.f32 %v15661_v39, %v15480_v15  ;;  %v15745_v13 = vadd.f32 %v15661_v39, %v15484_v59  ;;  %v15749_v31 = vadd.f32 %v15661_v39, %v15488_v57  ;;  %v15753_v18 = vadd.f32 %v15661_v39, %v15492_v9 }
 0xbc2   :  { %v15757_v29 = vadd.f32 %v15661_v39, %v15496_v45  ;;  %v15761_v19 = vadd.f32 %v15661_v39, %v15500_v48  ;;  %v15765_v15 = vadd.f32 %v15661_v39, %v15504_v25  ;;  %v15769_v59 = vadd.f32 %v15661_v39, %v15508_v61 }
 0xbc3   :  { %v15773_v57 = vadd.f32 %v15661_v39, %v15512_v38  ;;  %v15777_v9 = vadd.f32 %v15661_v39, %v15516_v21  ;;  %v15781_v45 = vadd.f32 %v15661_v39, %v15520_v42  ;;  %v15785_v48 = vadd.f32 %v15661_v39, %v15524_v32 }
 0xbc4   :  { %v15789_v25 = vadd.f32 %v15661_v39, %v15528_v4  ;;  %v15793_v61 = vadd.f32 %v15661_v39, %v15532_v46  ;;  %v15797_v38 = vadd.f32 %v15661_v39, %v15536_v35  ;;  %v15801_v21 = vadd.f32 %v15661_v39, %v15540_v41 }
 0xbc5   :  { %v15805_v42 = vadd.f32 %v15661_v39, %v15544_v2  ;;  %v15809_v32 = vadd.f32 %v15661_v39, %v15548_v5  ;;  %v15813_v4 = vadd.f32 %v15661_v39, %v15552_v49  ;;  %v15817_v46 = vadd.f32 %v15661_v39, %v15556_v20 }
 0xbc6   :  { %v15821_v35 = vadd.f32 %v15661_v39, %v15560_v6  ;;  %v15825_v41 = vadd.f32 %v15661_v39, %v15564_v23  ;;  %v15829_v2 = vadd.f32 %v15661_v39, %v15568_v63  ;;  %v15833_v5 = vadd.f32 %v15661_v39, %v15572_v3 }
 0xbc7   :  { %v15837_v49 = vadd.f32 %v15661_v39, %v15576_v26  ;;  %v15841_v20 = vadd.f32 %v15661_v39, %v15580_v1  ;;  %v15845_v6 = vadd.f32 %v15661_v39, %v15584_v62  ;;  %v15849_v23 = vadd.f32 %v15661_v39, %v15588_v40  ;;  %v17278_v40 = vld [vmem:[#allocation52_spill] sm:$0xff] }
 0xbc8   :  { %17268 = vst [vmem:[#allocation58_spill] sm:$0xff] %v15833_v5  ;;  %v15853_v63 = vadd.f32 %v15661_v39, %v15592_v44  ;;  %v15857_v3 = vadd.f32 %v15661_v39, %v15596_v54  ;;  %v15861_v26 = vadd.f32 %v15661_v39, %v15600_v17  ;;  %v15865_v1 = vadd.f32 %v15661_v39, %v15604_v60  ;;  %v7183_v5 = vld [vmem:[%s16592_s0 + $0x141] sm:$0xff] }
 0xbc9   :  { %17269 = vst [vmem:[#allocation57_spill] sm:$0xff] %v15837_v49  ;;  %17270 = vst [vmem:[#allocation60_spill] sm:$0xff] %v15841_v20  ;;  %v15869_v62 = vadd.f32 %v15661_v39, %v15608_v22  ;;  %v15873_v44 = vadd.f32 %v15661_v39, %v17278_v40  ;;  %v7158_v22 = vld [vmem:[%s16592_s0 + $0x19] sm:$0xff]  ;;  %v7159_v40 = vld [vmem:[%s16592_s0 + $0x21] sm:$0xff] }
 0xbca   :  { %17271 = vst [vmem:[#allocation59_spill] sm:$0xff] %v15845_v6  ;;  %17272 = vst [vmem:[#allocation62_spill] sm:$0xff] %v15849_v23  ;;  %v7166_v23 = vld [vmem:[%s16592_s0 + $0x79] sm:$0xff] }
 0xbcb   :  { %17273 = vst [vmem:[#allocation61_spill] sm:$0xff] %v15853_v63  ;;  %17274 = vst [vmem:[#allocation64_spill] sm:$0xff] %v15857_v3  ;;  %v17280_v63 = vld [vmem:[#allocation54_spill] sm:$0xff] }
 0xbcc   :  { %17275 = vst [vmem:[#allocation63_spill] sm:$0xff] %v15861_v26  ;;  %17276 = vst [vmem:[#allocation66_spill] sm:$0xff] %v15865_v1  ;;  %v15877_v54 = vadd.f32 %v15661_v39, %v17280_v63  ;;  %v17282_v3 = vld [vmem:[#allocation18_spill] sm:$0xff]  ;;  %v17284_v26 = vld [vmem:[#allocation55_spill] sm:$0xff] }
 0xbcd   :  { %17277 = vst [vmem:[#allocation65_spill] sm:$0xff] %v15869_v62  ;;  %17279 = vst [vmem:[#allocation68_spill] sm:$0xff] %v15873_v44  ;;  %v15881_v17 = vadd.f32 %v15661_v39, %v17282_v3  ;;  %v15885_v60 = vadd.f32 %v15661_v39, %v17284_v26  ;;  %v7160_v63 = vld [vmem:[%s16592_s0 + $0x31] sm:$0xff]  ;;  %v7161_v3 = vld [vmem:[%s16592_s0 + $0x39] sm:$0xff]  ;;  %v15909_v44 = vadd.f32 %v15661_v39, %v15636_v14 }
 0xbce   :  { %17281 = vst [vmem:[#allocation67_spill] sm:$0xff] %v15877_v54  ;;  %v15913_v62 = vadd.f32 %v15661_v39, %v15640_v10  ;;  %v7162_v1 = vld [vmem:[%s16592_s0 + $0x49] sm:$0xff]  ;;  %v15929_v10 = vadd.f32 %v15661_v39, %v15644_v16  ;;  %v7167_v16 = vld [vmem:[%s16592_s0 + $0x81] sm:$0xff]  ;;  %v16030_v6 = vadd.f32 %v7160_v63, %v15705_v27  ;;  %v16033_v20 = vadd.f32 %v7161_v3, %v15709_v58  ;;  %v7182_v49 = vld [vmem:[%s16592_s0 + $0x139] sm:$0xff] }
 0xbcf   :  { %17283 = vst [vmem:[#allocation70_spill] sm:$0xff] %v15881_v17  ;;  %17285 = vst [vmem:[#allocation69_spill] sm:$0xff] %v15885_v60  ;;  %v17286_v17 = vld [vmem:[#allocation20_spill] sm:$0xff]  ;;  %v16048_v27 = vadd.f32 %v7162_v1, %v15713_v52  ;;  %v7187_v3 = vld [vmem:[%s16592_s0 + $0x171] sm:$0xff] }
 0xbd0   :  { %v15901_v26 = vadd.f32 %v15661_v39, %v17286_v17  ;;  %v17288_v60 = vld [vmem:[#allocation56_spill] sm:$0xff]  ;;  %17290 = vst [vmem:[#allocation74_spill] sm:$0xff] %v15909_v44  ;;  %17291 = vst [vmem:[#allocation73_spill] sm:$0xff] %v15913_v62  ;;  %v7163_v17 = vld [vmem:[%s16592_s0 + $0x51] sm:$0xff]  ;;  %v15933_v62 = vadd.f32 %v15661_v39, %v15648_v37  ;;  %v15937_v44 = vadd.f32 %v15661_v39, %v15652_v28 }
 0xbd1   :  { %v15905_v54 = vadd.f32 %v15661_v39, %v17288_v60  ;;  %v7164_v60 = vld [vmem:[%s16592_s0 + $0x61] sm:$0xff]  ;;  %v7165_v14 = vld [vmem:[%s16592_s0 + $0x69] sm:$0xff]  ;;  %17292 = vst [vmem:[#allocation76_spill] sm:$0xff] %v15929_v10  ;;  %v7168_v37 = vld [vmem:[%s16592_s0 + $0x91] sm:$0xff]  ;;  %v16051_v58 = vadd.f32 %v7163_v17, %v15717_v8 }
 0xbd2   :  { %17287 = vst [vmem:[#allocation72_spill] sm:$0xff] %v15901_v26  ;;  %17293 = vst [vmem:[#allocation75_spill] sm:$0xff] %v15933_v62  ;;  %v7169_v28 = vld [vmem:[%s16592_s0 + $0x99] sm:$0xff]  ;;  %v15969_v62 = vadd.f32 %v15661_v39, %v15677_v51  ;;  %v7170_v10 = vld [vmem:[%s16592_s0 + $0xa9] sm:$0xff]  ;;  %v15985_v51 = vadd.f32 %v15661_v39, %v15681_v47  ;;  %v16078_v1 = vadd.f32 %v7168_v37, %v15737_v24 }
 0xbd3   :  { %17289 = vst [vmem:[#allocation71_spill] sm:$0xff] %v15905_v54  ;;  %17294 = vst [vmem:[#allocation78_spill] sm:$0xff] %v15937_v44  ;;  %v17295_v54 = vld [vmem:[#allocation21_spill] sm:$0xff]  ;;  %v15965_v44 = vadd.f32 %v15661_v39, %v15673_v11  ;;  %v7175_v47 = vld [vmem:[%s16592_s0 + $0xe1] sm:$0xff]  ;;  %v16081_v17 = vadd.f32 %v7169_v28, %v15741_v53  ;;  %v16096_v24 = vadd.f32 %v7170_v10, %v15745_v13 }
 0xbd4   :  { %v15941_v26 = vadd.f32 %v15661_v39, %v17295_v54  ;;  %v15957_v54 = vadd.f32 %v15661_v39, %v15665_v33  ;;  %17300 = vst [vmem:[#allocation15_spill] sm:$0xff] %v15969_v62  ;;  %v7171_v33 = vld [vmem:[%s16592_s0 + $0xb1] sm:$0xff]  ;;  %v7173_v11 = vld [vmem:[%s16592_s0 + $0xc9] sm:$0xff]  ;;  %17301 = vst [vmem:[#allocation4_spill] sm:$0xff] %v15985_v51  ;;  %v15989_v62 = vadd.f32 %v15661_v39, %v15685_v34 }
 0xbd5   :  { %17299 = vst [vmem:[#allocation11_spill] sm:$0xff] %v15965_v44  ;;  %v15993_v44 = vadd.f32 %v15661_v39, %v15689_v7  ;;  %v7176_v34 = vld [vmem:[%s16592_s0 + $0xf1] sm:$0xff]  ;;  %v7177_v7 = vld [vmem:[%s16592_s0 + $0xf9] sm:$0xff]  ;;  %v16027_v51 = vadd.f32 %v7159_v40, %v15701_v0  ;;  %v16057_v40 = vadd.f32 %v7165_v14, %v15725_v50  ;;  %v7186_v63 = vld [vmem:[%s16592_s0 + $0x169] sm:$0xff]  ;;  %v16075_v50 = vadd.f32 %v7167_v16, %v15733_v36 }
 0xbd6   :  { %17296 = vst [vmem:[#allocation77_spill] sm:$0xff] %v15941_v26  ;;  %17297 = vst [vmem:[#allocation80_spill] sm:$0xff] %v15957_v54  ;;  %v15961_v26 = vadd.f32 %v15661_v39, %v15669_v30  ;;  %v7172_v30 = vld [vmem:[%s16592_s0 + $0xc1] sm:$0xff]  ;;  %v7174_v54 = vld [vmem:[%s16592_s0 + $0xd9] sm:$0xff]  ;;  %v16099_v53 = vadd.f32 %v7171_v33, %v15749_v31  ;;  %v16105_v16 = vadd.f32 %v7173_v11, %v15757_v29 }
 0xbd7   :  { %17302 = vst [vmem:[#allocation12_spill] sm:$0xff] %v15989_v62  ;;  %17303 = vst [vmem:[#allocation10_spill] sm:$0xff] %v15993_v44  ;;  %v7181_v44 = vld [vmem:[%s16592_s0 + $0x129] sm:$0xff]  ;;  %v16024_v62 = vadd.f32 %v7158_v22, %v15697_v56  ;;  %v7184_v56 = vld [vmem:[%s16592_s0 + $0x151] sm:$0xff]  ;;  %v16054_v22 = vadd.f32 %v7164_v60, %v15721_v43  ;;  %v16072_v43 = vadd.f32 %v7166_v23, %v15729_v12 }
 0xbd8   :  { %17298 = vst [vmem:[#allocation79_spill] sm:$0xff] %v15961_v26  ;;  %v15997_v26 = vadd.f32 %v15661_v39, %v15693_v55  ;;  %v7178_v39 = vld [vmem:[%s16592_s0 + $0x109] sm:$0xff]  ;;  %v7179_v55 = vld [vmem:[%s16592_s0 + $0x111] sm:$0xff]  ;;  %v7185_v0 = vld [vmem:[%s16592_s0 + $0x159] sm:$0xff]  ;;  %v16102_v23 = vadd.f32 %v7172_v30, %v15753_v18  ;;  %v16120_v18 = vadd.f32 %v7174_v54, %v15761_v19  ;;  %v16123_v29 = vadd.f32 %v7175_v47, %v15765_v15 }
 0xbd9   :  { %v7188_v52 = vld [vmem:[%s16592_s0 + $0x181] sm:$0xff]  ;;  %v7189_v8 = vld [vmem:[%s16592_s0 + $0x189] sm:$0xff]  ;;  %v7191_v14 = vld [vmem:[%s16592_s0 + $0x1d1] sm:$0xff]  ;;  %v16126_v10 = vadd.f32 %v7176_v34, %v15769_v59  ;;  %v16129_v33 = vadd.f32 %v7177_v7, %v15773_v57  ;;  %v16141_v15 = vadd.f32 %v7178_v39, %v15777_v9  ;;  %v16144_v59 = vadd.f32 %v7179_v55, %v15781_v45 }
 0xbda   :  { %17304 = vst [vmem:[#allocation32_spill] sm:$0xff] %v15997_v26  ;;  %v7180_v26 = vld [vmem:[%s16592_s0 + $0x121] sm:$0xff]  ;;  %v7190_v60 = vld [vmem:[%s16592_s0 + $0x1c9] sm:$0xff]  ;;  %v7194_v37 = vld [vmem:[%s16592_s0 + $0x1f9] sm:$0xff]  ;;  %v16150_v54 = vadd.f32 %v7181_v44, %v15789_v25  ;;  %v16162_v45 = vadd.f32 %v7182_v49, %v15793_v61  ;;  %v16168_v25 = vadd.f32 %v7184_v56, %v15801_v21  ;;  %v16171_v44 = vadd.f32 %v7185_v0, %v15805_v42 }
 0xbdb   :  { %v7192_v12 = vld [vmem:[%s16592_s0 + $0x1e1] sm:$0xff]  ;;  %v7193_v36 = vld [vmem:[%s16592_s0 + $0x1e9] sm:$0xff]  ;;  %v7196_v13 = vld [vmem:[%s16592_s0 + $0x211] sm:$0xff]  ;;  %v16147_v57 = vadd.f32 %v7180_v26, %v15785_v48  ;;  %v16165_v48 = vadd.f32 %v7183_v5, %v15797_v38  ;;  %v16183_v38 = vadd.f32 %v7186_v63, %v15809_v32  ;;  %v16186_v21 = vadd.f32 %v7187_v3, %v15813_v4 }
 0xbdc   :  { %v7195_v28 = vld [vmem:[%s16592_s0 + $0x201] sm:$0xff]  ;;  %v7197_v31 = vld [vmem:[%s16592_s0 + $0x219] sm:$0xff]  ;;  %v7198_v30 = vld [vmem:[%s16592_s0 + $0x229] sm:$0xff]  ;;  %v16189_v42 = vadd.f32 %v7188_v52, %v15817_v46  ;;  %v16192_v5 = vadd.f32 %v7189_v8, %v15821_v35  ;;  %v16204_v4 = vadd.f32 %v7190_v60, %v15825_v41  ;;  %v16207_v46 = vadd.f32 %v7191_v14, %v15829_v2 }
 0xbdd   :  { %v7199_v11 = vld [vmem:[%s16592_s0 + $0x231] sm:$0xff]  ;;  %v7200_v19 = vld [vmem:[%s16592_s0 + $0x241] sm:$0xff]  ;;  %v7201_v47 = vld [vmem:[%s16592_s0 + $0x249] sm:$0xff] }
 0xbde   :  { %v7202_v34 = vld [vmem:[%s16592_s0 + $0x259] sm:$0xff]  ;;  %v7203_v9 = vld [vmem:[%s16592_s0 + $0x261] sm:$0xff]  ;;  %v7204_v26 = vld [vmem:[%s16592_s0 + $0x271] sm:$0xff] }
 0xbdf   :  { %v7205_v7 = vld [vmem:[%s16592_s0 + $0x279] sm:$0xff]  ;;  %v7206_v61 = vld [vmem:[%s16592_s0 + $0x289] sm:$0xff]  ;;  %v7207_v49 = vld [vmem:[%s16592_s0 + $0x291] sm:$0xff] }
 0xbe0   :  { %v7208_v39 = vld [vmem:[%s16592_s0 + $0x2a1] sm:$0xff]  ;;  %v7209_v32 = vld [vmem:[%s16592_s0 + $0x2a9] sm:$0xff]  ;;  %v17305_v35 = vld [vmem:[#allocation58_spill] sm:$0xff] }
 0xbe1   :  { %v16210_v55 = vadd.f32 %v7192_v12, %v17305_v35  ;;  %v17307_v56 = vld [vmem:[#allocation57_spill] sm:$0xff]  ;;  %v7210_v63 = vld [vmem:[%s16592_s0 + $0x2b9] sm:$0xff]  ;;  %v7211_v3 = vld [vmem:[%s16592_s0 + $0x2c1] sm:$0xff] }
 0xbe2   :  { %v16213_v0 = vadd.f32 %v7193_v36, %v17307_v56  ;;  %v7212_v41 = vld [vmem:[%s16592_s0 + $0x2d1] sm:$0xff]  ;;  %v17309_v2 = vld [vmem:[#allocation60_spill] sm:$0xff]  ;;  %v17311_v8 = vld [vmem:[#allocation59_spill] sm:$0xff] }
 0xbe3   :  { %17306 = vst [vmem:[#allocation35_spill] sm:$0xff] %v16210_v55  ;;  %v16225_v52 = vadd.f32 %v7194_v37, %v17309_v2  ;;  %v16228_v60 = vadd.f32 %v7195_v28, %v17311_v8  ;;  %v17313_v14 = vld [vmem:[#allocation62_spill] sm:$0xff]  ;;  %v17315_v36 = vld [vmem:[#allocation61_spill] sm:$0xff]  ;;  %v17317_v28 = vld [vmem:[#allocation64_spill] sm:$0xff] }
 0xbe4   :  { %17308 = vst [vmem:[#allocation38_spill] sm:$0xff] %v16213_v0  ;;  %v16231_v12 = vadd.f32 %v7196_v13, %v17313_v14  ;;  %v16234_v35 = vadd.f32 %v7197_v31, %v17315_v36  ;;  %v7213_v56 = vld [vmem:[%s16592_s0 + $0x2d9] sm:$0xff]  ;;  %v7214_v0 = vld [vmem:[%s16592_s0 + $0x2e9] sm:$0xff]  ;;  %v7215_v37 = vld [vmem:[%s16592_s0 + $0x2f1] sm:$0xff]  ;;  %v16246_v2 = vadd.f32 %v7198_v30, %v17317_v28 }
 0xbe5   :  { %17310 = vst [vmem:[#allocation41_spill] sm:$0xff] %v16225_v52  ;;  %17312 = vst [vmem:[#allocation44_spill] sm:$0xff] %v16228_v60  ;;  %v17319_v13 = vld [vmem:[#allocation63_spill] sm:$0xff]  ;;  %v17321_v31 = vld [vmem:[#allocation66_spill] sm:$0xff] }
 0xbe6   :  { %17314 = vst [vmem:[#allocation13_spill] sm:$0xff] %v16231_v12  ;;  %17316 = vst [vmem:[#allocation3_spill] sm:$0xff] %v16234_v35  ;;  %v16249_v8 = vadd.f32 %v7199_v11, %v17319_v13  ;;  %v16252_v14 = vadd.f32 %v7200_v19, %v17321_v31  ;;  %v17323_v36 = vld [vmem:[#allocation65_spill] sm:$0xff]  ;;  %v7216_v12 = vld [vmem:[%s16592_s0 + $0x301] sm:$0xff] }
 0xbe7   :  { %17318 = vst [vmem:[#allocation16_spill] sm:$0xff] %v16246_v2  ;;  %v16255_v35 = vadd.f32 %v7201_v47, %v17323_v36  ;;  %v7217_v60 = vld [vmem:[%s16592_s0 + $0x309] sm:$0xff]  ;;  %v7218_v30 = vld [vmem:[%s16592_s0 + $0x319] sm:$0xff] }
 0xbe8   :  { %17320 = vst [vmem:[#allocation19_spill] sm:$0xff] %v16249_v8  ;;  %17322 = vst [vmem:[#allocation22_spill] sm:$0xff] %v16252_v14  ;;  %v17325_v11 = vld [vmem:[#allocation68_spill] sm:$0xff]  ;;  %v17327_v19 = vld [vmem:[#allocation67_spill] sm:$0xff] }
 0xbe9   :  { %17324 = vst [vmem:[#allocation23_spill] sm:$0xff] %v16255_v35  ;;  %v16267_v28 = vadd.f32 %v7202_v34, %v17325_v11  ;;  %v16270_v13 = vadd.f32 %v7203_v9, %v17327_v19  ;;  %v17329_v47 = vld [vmem:[#allocation70_spill] sm:$0xff]  ;;  %v17331_v36 = vld [vmem:[#allocation69_spill] sm:$0xff]  ;;  %v7219_v14 = vld [vmem:[%s16592_s0 + $0x321] sm:$0xff] }
 0xbea   :  { %v16273_v31 = vadd.f32 %v7204_v26, %v17329_v47  ;;  %v16276_v35 = vadd.f32 %v7205_v7, %v17331_v36  ;;  %v7220_v8 = vld [vmem:[%s16592_s0 + $0x331] sm:$0xff]  ;;  %v7221_v34 = vld [vmem:[%s16592_s0 + $0x339] sm:$0xff]  ;;  %v17333_v9 = vld [vmem:[#allocation72_spill] sm:$0xff] }
 0xbeb   :  { %17326 = vst [vmem:[#allocation29_spill] sm:$0xff] %v16267_v28  ;;  %17328 = vst [vmem:[#allocation26_spill] sm:$0xff] %v16270_v13  ;;  %v16288_v11 = vadd.f32 %v7206_v61, %v17333_v9  ;;  %v17334_v26 = vld [vmem:[#allocation71_spill] sm:$0xff]  ;;  %v17335_v7 = vld [vmem:[#allocation74_spill] sm:$0xff] }
 0xbec   :  { %17330 = vst [vmem:[#allocation28_spill] sm:$0xff] %v16273_v31  ;;  %17332 = vst [vmem:[#allocation24_spill] sm:$0xff] %v16276_v35  ;;  %v16291_v19 = vadd.f32 %v7207_v49, %v17334_v26  ;;  %v16294_v47 = vadd.f32 %v7208_v39, %v17335_v7  ;;  %v17336_v36 = vld [vmem:[#allocation73_spill] sm:$0xff]  ;;  %v17337_v31 = vld [vmem:[#allocation76_spill] sm:$0xff] }
 0xbed   :  { %v16297_v35 = vadd.f32 %v7209_v32, %v17336_v36  ;;  %v16300_v13 = vadd.f32 %v7210_v63, %v17337_v31  ;;  %v17338_v28 = vld [vmem:[#allocation75_spill] sm:$0xff]  ;;  %v17339_v52 = vld [vmem:[#allocation78_spill] sm:$0xff]  ;;  %v17340_v61 = vld [vmem:[#allocation77_spill] sm:$0xff] }
 0xbee   :  { %v16303_v2 = vadd.f32 %v7211_v3, %v17338_v28  ;;  %v16306_v55 = vadd.f32 %v7212_v41, %v17339_v52  ;;  %v16309_v9 = vadd.f32 %v7213_v56, %v17340_v61  ;;  %v17341_v49 = vld [vmem:[#allocation80_spill] sm:$0xff]  ;;  %v17342_v39 = vld [vmem:[#allocation79_spill] sm:$0xff]  ;;  %v17347_v56 = vld [vmem:[#allocation10_spill] sm:$0xff] }
 0xbef   :  { %v16312_v26 = vadd.f32 %v7214_v0, %v17341_v49  ;;  %v16315_v7 = vadd.f32 %v7215_v37, %v17342_v39  ;;  %v17343_v32 = vld [vmem:[#allocation11_spill] sm:$0xff]  ;;  %v17345_v3 = vld [vmem:[#allocation4_spill] sm:$0xff]  ;;  %v16330_v61 = vadd.f32 %v7220_v8, %v17347_v56  ;;  %v6638_v37 = vmax.f32 %v16024_v62, 0.0 }
 0xbf0   :  { %v16318_v36 = vadd.f32 %v7216_v12, %v17343_v32  ;;  %v17344_v63 = vld [vmem:[#allocation15_spill] sm:$0xff]  ;;  %v16324_v28 = vadd.f32 %v7218_v30, %v17345_v3  ;;  %v17346_v41 = vld [vmem:[#allocation12_spill] sm:$0xff]  ;;  %v6639_v12 = vmax.f32 %v16027_v51, 0.0  ;;  %v6640_v39 = vmax.f32 %v16030_v6, 0.0 }
 0xbf1   :  { %v16321_v31 = vadd.f32 %v7217_v60, %v17344_v63  ;;  %v16327_v52 = vadd.f32 %v7219_v14, %v17346_v41  ;;  %v17348_v0 = vld [vmem:[#allocation32_spill] sm:$0xff]  ;;  %v6641_v60 = vmax.f32 %v16033_v20, 0.0  ;;  %v6642_v30 = vmax.f32 %v16048_v27, 0.0  ;;  %6702 = vst [vmem:[%s16598_s7] sm:$0xff] %v6638_v37  ;;  %v17354_v3 = vld [vmem:[#allocation3_spill] sm:$0xff] }
 0xbf2   :  { %v16333_v49 = vadd.f32 %v7221_v34, %v17348_v0  ;;  %v6643_v32 = vmax.f32 %v16051_v58, 0.0  ;;  %v6644_v14 = vmax.f32 %v16054_v22, 0.0  ;;  %v6645_v8 = vmax.f32 %v16057_v40, 0.0  ;;  %6703 = vst [vmem:[%s16598_s7 + $0x8] sm:$0xff] %v6639_v12  ;;  %6704 = vst [vmem:[%s16598_s7 + $0x10] sm:$0xff] %v6640_v39  ;;  %v17355_v56 = vld [vmem:[#allocation16_spill] sm:$0xff] }
 0xbf3   :  { %v6646_v63 = vmax.f32 %v16072_v43, 0.0  ;;  %v6647_v34 = vmax.f32 %v16075_v50, 0.0  ;;  %v6648_v62 = vmax.f32 %v16078_v1, 0.0  ;;  %v6649_v51 = vmax.f32 %v16081_v17, 0.0  ;;  %6705 = vst [vmem:[%s16598_s7 + $0x18] sm:$0xff] %v6641_v60  ;;  %6706 = vst [vmem:[%s16598_s7 + $0x20] sm:$0xff] %v6642_v30 }
 0xbf4   :  { %v6650_v20 = vmax.f32 %v16096_v24, 0.0  ;;  %v6651_v6 = vmax.f32 %v16099_v53, 0.0  ;;  %v6652_v27 = vmax.f32 %v16102_v23, 0.0  ;;  %v6653_v58 = vmax.f32 %v16105_v16, 0.0  ;;  %6707 = vst [vmem:[%s16598_s7 + $0x28] sm:$0xff] %v6643_v32  ;;  %6708 = vst [vmem:[%s16598_s7 + $0x30] sm:$0xff] %v6644_v14 }
 0xbf5   :  { %6709 = vst [vmem:[%s16598_s7 + $0x38] sm:$0xff] %v6645_v8  ;;  %v6654_v22 = vmax.f32 %v16120_v18, 0.0  ;;  %v6655_v40 = vmax.f32 %v16123_v29, 0.0  ;;  %v6656_v43 = vmax.f32 %v16126_v10, 0.0  ;;  %v6657_v50 = vmax.f32 %v16129_v33, 0.0  ;;  %6710 = vst [vmem:[%s16598_s7 + $0x40] sm:$0xff] %v6646_v63 }
 0xbf6   :  { %6711 = vst [vmem:[%s16598_s7 + $0x48] sm:$0xff] %v6647_v34  ;;  %6712 = vst [vmem:[%s16598_s7 + $0x50] sm:$0xff] %v6648_v62  ;;  %v6658_v1 = vmax.f32 %v16141_v15, 0.0  ;;  %v6659_v17 = vmax.f32 %v16144_v59, 0.0  ;;  %v6660_v24 = vmax.f32 %v16147_v57, 0.0  ;;  %v6661_v53 = vmax.f32 %v16150_v54, 0.0 }
 0xbf7   :  { %6713 = vst [vmem:[%s16598_s7 + $0x58] sm:$0xff] %v6649_v51  ;;  %6714 = vst [vmem:[%s16598_s7 + $0x60] sm:$0xff] %v6650_v20  ;;  %v6662_v23 = vmax.f32 %v16162_v45, 0.0  ;;  %v6663_v16 = vmax.f32 %v16165_v48, 0.0  ;;  %v6664_v18 = vmax.f32 %v16168_v25, 0.0  ;;  %v6665_v29 = vmax.f32 %v16171_v44, 0.0 }
 0xbf8   :  { %6715 = vst [vmem:[%s16598_s7 + $0x68] sm:$0xff] %v6651_v6  ;;  %6716 = vst [vmem:[%s16598_s7 + $0x70] sm:$0xff] %v6652_v27  ;;  %v6666_v10 = vmax.f32 %v16183_v38, 0.0  ;;  %v6667_v33 = vmax.f32 %v16186_v21, 0.0  ;;  %v6668_v15 = vmax.f32 %v16189_v42, 0.0  ;;  %v6669_v59 = vmax.f32 %v16192_v5, 0.0 }
 0xbf9   :  { %6717 = vst [vmem:[%s16598_s7 + $0x78] sm:$0xff] %v6653_v58  ;;  %6718 = vst [vmem:[%s16598_s7 + $0x80] sm:$0xff] %v6654_v22  ;;  %v6670_v57 = vmax.f32 %v16204_v4, 0.0  ;;  %v6671_v54 = vmax.f32 %v16207_v46, 0.0  ;;  %v17349_v45 = vld [vmem:[#allocation35_spill] sm:$0xff]  ;;  %v17350_v25 = vld [vmem:[#allocation38_spill] sm:$0xff] }
 0xbfa   :  { %6719 = vst [vmem:[%s16598_s7 + $0x88] sm:$0xff] %v6655_v40  ;;  %6720 = vst [vmem:[%s16598_s7 + $0x90] sm:$0xff] %v6656_v43  ;;  %v6672_v48 = vmax.f32 %v17349_v45, 0.0  ;;  %v6673_v44 = vmax.f32 %v17350_v25, 0.0  ;;  %v17351_v38 = vld [vmem:[#allocation41_spill] sm:$0xff]  ;;  %v17352_v42 = vld [vmem:[#allocation44_spill] sm:$0xff] }
 0xbfb   :  { %6721 = vst [vmem:[%s16598_s7 + $0x98] sm:$0xff] %v6657_v50  ;;  %6722 = vst [vmem:[%s16598_s7 + $0xa0] sm:$0xff] %v6658_v1  ;;  %v6674_v21 = vmax.f32 %v17351_v38, 0.0  ;;  %v6675_v5 = vmax.f32 %v17352_v42, 0.0  ;;  %v17353_v4 = vld [vmem:[#allocation13_spill] sm:$0xff]  ;;  %v6677_v41 = vmax.f32 %v17354_v3, 0.0 }
 0xbfc   :  { %6723 = vst [vmem:[%s16598_s7 + $0xa8] sm:$0xff] %v6659_v17  ;;  %6724 = vst [vmem:[%s16598_s7 + $0xb0] sm:$0xff] %v6660_v24  ;;  %v6676_v46 = vmax.f32 %v17353_v4, 0.0  ;;  %v6678_v0 = vmax.f32 %v17355_v56, 0.0  ;;  %v17356_v37 = vld [vmem:[#allocation19_spill] sm:$0xff]  ;;  %v17357_v39 = vld [vmem:[#allocation22_spill] sm:$0xff] }
 0xbfd   :  { %6725 = vst [vmem:[%s16598_s7 + $0xb8] sm:$0xff] %v6661_v53  ;;  %6726 = vst [vmem:[%s16598_s7 + $0xc0] sm:$0xff] %v6662_v23  ;;  %v6679_v12 = vmax.f32 %v17356_v37, 0.0  ;;  %v6680_v60 = vmax.f32 %v17357_v39, 0.0  ;;  %v17358_v30 = vld [vmem:[#allocation23_spill] sm:$0xff]  ;;  %v17359_v14 = vld [vmem:[#allocation29_spill] sm:$0xff] }
 0xbfe   :  { %6727 = vst [vmem:[%s16598_s7 + $0xc8] sm:$0xff] %v6663_v16  ;;  %6728 = vst [vmem:[%s16598_s7 + $0xd0] sm:$0xff] %v6664_v18  ;;  %v6681_v32 = vmax.f32 %v17358_v30, 0.0  ;;  %v6682_v8 = vmax.f32 %v17359_v14, 0.0  ;;  %v17360_v63 = vld [vmem:[#allocation26_spill] sm:$0xff]  ;;  %v17361_v62 = vld [vmem:[#allocation28_spill] sm:$0xff] }
 0xbff   :  { %6729 = vst [vmem:[%s16598_s7 + $0xd8] sm:$0xff] %v6665_v29  ;;  %6730 = vst [vmem:[%s16598_s7 + $0xe0] sm:$0xff] %v6666_v10  ;;  %v6683_v34 = vmax.f32 %v17360_v63, 0.0  ;;  %v6684_v51 = vmax.f32 %v17361_v62, 0.0  ;;  %v17362_v20 = vld [vmem:[#allocation24_spill] sm:$0xff]  ;;  %v6686_v27 = vmax.f32 %v16288_v11, 0.0 }
 0xc00   :  { %6731 = vst [vmem:[%s16598_s7 + $0xe8] sm:$0xff] %v6667_v33  ;;  %6732 = vst [vmem:[%s16598_s7 + $0xf0] sm:$0xff] %v6668_v15  ;;  %v6685_v6 = vmax.f32 %v17362_v20, 0.0  ;;  %v6687_v58 = vmax.f32 %v16291_v19, 0.0  ;;  %v6688_v22 = vmax.f32 %v16294_v47, 0.0  ;;  %v6689_v40 = vmax.f32 %v16297_v35, 0.0 }
 0xc01   :  { %6733 = vst [vmem:[%s16598_s7 + $0xf8] sm:$0xff] %v6669_v59  ;;  %6734 = vst [vmem:[%s16598_s7 + $0x100] sm:$0xff] %v6670_v57  ;;  %v6690_v11 = vmax.f32 %v16300_v13, 0.0  ;;  %v6691_v35 = vmax.f32 %v16303_v2, 0.0  ;;  %v6692_v19 = vmax.f32 %v16306_v55, 0.0  ;;  %v6693_v47 = vmax.f32 %v16309_v9, 0.0 }
 0xc02   :  { %6735 = vst [vmem:[%s16598_s7 + $0x108] sm:$0xff] %v6671_v54  ;;  %6736 = vst [vmem:[%s16598_s7 + $0x110] sm:$0xff] %v6672_v48  ;;  %v6694_v55 = vmax.f32 %v16312_v26, 0.0  ;;  %v6695_v2 = vmax.f32 %v16315_v7, 0.0  ;;  %v6696_v13 = vmax.f32 %v16318_v36, 0.0  ;;  %v6697_v9 = vmax.f32 %v16321_v31, 0.0 }
 0xc03   :  { %6737 = vst [vmem:[%s16598_s7 + $0x118] sm:$0xff] %v6673_v44  ;;  %6738 = vst [vmem:[%s16598_s7 + $0x120] sm:$0xff] %v6674_v21  ;;  %v6698_v26 = vmax.f32 %v16324_v28, 0.0  ;;  %v6699_v7 = vmax.f32 %v16327_v52, 0.0  ;;  %v6700_v36 = vmax.f32 %v16330_v61, 0.0  ;;  %v6701_v31 = vmax.f32 %v16333_v49, 0.0 }
 0xc04   :  { %6739 = vst [vmem:[%s16598_s7 + $0x128] sm:$0xff] %v6675_v5  ;;  %6740 = vst [vmem:[%s16598_s7 + $0x130] sm:$0xff] %v6676_v46 }
 0xc05   :  { %6741 = vst [vmem:[%s16598_s7 + $0x138] sm:$0xff] %v6677_v41  ;;  %6742 = vst [vmem:[%s16598_s7 + $0x140] sm:$0xff] %v6678_v0 }
 0xc06   :  { %6743 = vst [vmem:[%s16598_s7 + $0x148] sm:$0xff] %v6679_v12  ;;  %6744 = vst [vmem:[%s16598_s7 + $0x150] sm:$0xff] %v6680_v60 }
 0xc07   :  { %6745 = vst [vmem:[%s16598_s7 + $0x158] sm:$0xff] %v6681_v32  ;;  %6746 = vst [vmem:[%s16598_s7 + $0x160] sm:$0xff] %v6682_v8 }
 0xc08   :  { %6747 = vst [vmem:[%s16598_s7 + $0x168] sm:$0xff] %v6683_v34  ;;  %6748 = vst [vmem:[%s16598_s7 + $0x170] sm:$0xff] %v6684_v51 }
 0xc09   :  { %6749 = vst [vmem:[%s16598_s7 + $0x178] sm:$0xff] %v6685_v6  ;;  %6750 = vst [vmem:[%s16598_s7 + $0x180] sm:$0xff] %v6686_v27 }
 0xc0a   :  { %6751 = vst [vmem:[%s16598_s7 + $0x188] sm:$0xff] %v6687_v58  ;;  %6752 = vst [vmem:[%s16598_s7 + $0x190] sm:$0xff] %v6688_v22 }
 0xc0b   :  { %6753 = vst [vmem:[%s16598_s7 + $0x198] sm:$0xff] %v6689_v40  ;;  %6754 = vst [vmem:[%s16598_s7 + $0x1a0] sm:$0xff] %v6690_v11 }
 0xc0c   :  { %6755 = vst [vmem:[%s16598_s7 + $0x1a8] sm:$0xff] %v6691_v35  ;;  %6756 = vst [vmem:[%s16598_s7 + $0x1b0] sm:$0xff] %v6692_v19 }
 0xc0d   :  { %6757 = vst [vmem:[%s16598_s7 + $0x1b8] sm:$0xff] %v6693_v47  ;;  %6758 = vst [vmem:[%s16598_s7 + $0x1c0] sm:$0xff] %v6694_v55 }
 0xc0e   :  { %6759 = vst [vmem:[%s16598_s7 + $0x1c8] sm:$0xff] %v6695_v2  ;;  %6760 = vst [vmem:[%s16598_s7 + $0x1d0] sm:$0xff] %v6696_v13 }
 0xc0f   :  { %6761 = vst [vmem:[%s16598_s7 + $0x1d8] sm:$0xff] %v6697_v9  ;;  %6762 = vst [vmem:[%s16598_s7 + $0x1e0] sm:$0xff] %v6698_v26 }
 0xc10   :  { %6763 = vst [vmem:[%s16598_s7 + $0x1e8] sm:$0xff] %v6699_v7  ;;  %6764 = vst [vmem:[%s16598_s7 + $0x1f0] sm:$0xff] %v6700_v36 }
 0xc11   :  { %6765 = vst [vmem:[%s16598_s7 + $0x1f8] sm:$0xff] %v6701_v31 }

</bundles_post_ra>
